<compile_context>
chip_gen: v7x
topology: tpu7x:2x2x1
jax: 0.10.0
libtpu: 0.0.40
codegen_flags: <defaults>
</compile_context>

<pallas_src>
import jax
import jax.numpy as jnp
from jax import lax
from jax.experimental import pallas as pl
from jax.experimental.pallas import tpu as pltpu


# ----------------------------------------------------------------------------
# Fused kernel: conv1 -> ReLU -> conv2 -> ReLU -> global-avg-pool -> linear
# One batch *tile* (TB images) per grid step; everything stays in VMEM.
# ----------------------------------------------------------------------------
def block_kernel(x_ref, w1_ref, b1_ref, w2_ref, b2_ref, wl_ref, bl_ref,
                 o_ref, pad1_ref, pad2_ref):
    # x_ref : (TB, H, W, Cin)
    # w1_ref: (9*Cin, C1)   weight-normed conv1 weight, im2col-reshaped
    # w2_ref: (9*C1,  C2)
    # wl_ref: (C2, NC)      linear head weight (C, num_classes)
    # b*_ref: (1, C)
    # o_ref : (TB, 1, NC)
    # pad1_ref / pad2_ref : VMEM scratch (TB, H+2, W+2, Cin) / (TB, H+2, W+2, C1)
    TB, H, W, _ = x_ref.shape
    C1 = w1_ref.shape[1]
    C2 = w2_ref.shape[1]

    def conv3x3_relu(pad_ref, w_r, b_r):
        C = pad_ref.shape[-1]
        # im2col: 9 shifted views of the zero-padded tile concatenated along
        # the channel (lane) axis -> one K = 9*C MXU contraction.
        taps = [pad_ref[:, dy:dy + H, dx:dx + W, :]
                for dy in range(3) for dx in range(3)]
        patches = jnp.concatenate(taps, axis=-1).reshape(TB * H * W, 9 * C)
        acc = jnp.dot(patches, w_r[...], preferred_element_type=jnp.float32)
        return jnp.maximum(acc + b_r[...], 0.0)          # bias + ReLU

    # ---- conv1: stage input into zero-padded VMEM scratch -------------------
    pad1_ref[...] = jnp.zeros_like(pad1_ref)
    pad1_ref[:, 1:H + 1, 1:W + 1, :] = x_ref[...]
    h1 = conv3x3_relu(pad1_ref, w1_ref, b1_ref)          # (TB*H*W, C1)
    # Dropout2d: identity in eval mode.

    # ---- conv2 ---------------------------------------------------------------
    pad2_ref[...] = jnp.zeros_like(pad2_ref)
    pad2_ref[:, 1:H + 1, 1:W + 1, :] = h1.reshape(TB, H, W, C1)
    h2 = conv3x3_relu(pad2_ref, w2_ref, b2_ref)          # (TB*H*W, C2)

    # ---- AdaptiveAvgPool2d(1) -> flatten -> Linear (fused epilogue) ----------
    pooled = jnp.mean(h2.reshape(TB, H * W, C2), axis=1)  # (TB, C2)
    logits = jnp.dot(pooled, wl_ref[...],
                     preferred_element_type=jnp.float32) + bl_ref[...]
    o_ref[...] = logits.reshape(o_ref.shape).astype(o_ref.dtype)


def _pick_batch_tile(B, H, W, Cin, C1, C2, budget_bytes=24 << 20):
    """Largest batch tile (divisor of B) whose live VMEM footprint stays small."""
    per_img = 4 * ((H * W) * (9 * Cin + 9 * C1 + 2 * C1 + 2 * C2)
                   + (H + 2) * (W + 2) * (Cin + C1))
    max_tb = max(1, min(B, budget_bytes // max(per_img, 1)))
    for cand in range(int(max_tb), 0, -1):
        if B % cand == 0:
            return cand
    return 1


def block_forward_pallas(x_nhwc, w1, b1, w2, b2, wl, bl):
    B, H, W, Cin = x_nhwc.shape
    C1 = w1.shape[1]
    C2 = w2.shape[1]
    NC = wl.shape[1]
    TB = _pick_batch_tile(B, H, W, Cin, C1, C2)
    nb = B // TB

    out = pl.pallas_call(
        block_kernel,
        out_shape=jax.ShapeDtypeStruct((B, 1, NC), jnp.float32),
        grid_spec=pltpu.PrefetchScalarGridSpec(
            num_scalar_prefetch=0,
            grid=(nb,),
            in_specs=[
                pl.BlockSpec((TB, H, W, Cin), lambda b: (b, 0, 0, 0)),
                pl.BlockSpec((9 * Cin, C1), lambda b: (0, 0)),
                pl.BlockSpec((1, C1), lambda b: (0, 0)),
                pl.BlockSpec((9 * C1, C2), lambda b: (0, 0)),
                pl.BlockSpec((1, C2), lambda b: (0, 0)),
                pl.BlockSpec((C2, NC), lambda b: (0, 0)),
                pl.BlockSpec((1, NC), lambda b: (0, 0)),
            ],
            out_specs=pl.BlockSpec((TB, 1, NC), lambda b: (b, 0, 0)),
            scratch_shapes=[
                pltpu.VMEM((TB, H + 2, W + 2, Cin), jnp.float32),
                pltpu.VMEM((TB, H + 2, W + 2, C1), jnp.float32),
            ],
        ),
        compiler_params=pltpu.CompilerParams(
            # batch tiles shard across TensorCores on v7x
            dimension_semantics=("parallel",)),
    )(x_nhwc, w1, b1, w2, b2, wl, bl)
    return out.reshape(B, NC)


# ----------------------------------------------------------------------------
# Parameter construction / weight prep (hoisted out of the forward path)
# ----------------------------------------------------------------------------
def weight_norm_effective(v, g):
    """PyTorch weight_norm (dim=0): w = g * v / ||v|| per output channel.
    v: (Cout, Cin, kh, kw), g: (Cout,).  (No eps, matching PyTorch.)"""
    norm = jnp.sqrt(jnp.sum(v * v, axis=(1, 2, 3), keepdims=True))
    return g.reshape(-1, 1, 1, 1) * v / norm


def prepare_weights(params):
    """Constant-per-model prep: weight_norm + OIHW->HWIO + im2col reshape."""
    convs = []
    for (v, g, b) in params["convs"]:
        w = weight_norm_effective(v, g)                  # (Cout, Cin, 3, 3)
        w_hwio = jnp.transpose(w, (2, 3, 1, 0))          # (3, 3, Cin, Cout)
        cout = w_hwio.shape[-1]
        w_k = w_hwio.reshape(-1, cout)                   # (9*Cin, Cout): (dy,dx,cin)
        convs.append((w_k, b.reshape(1, cout)))
    wl = jnp.transpose(params["lin_w"], (1, 0))          # (C, num_classes)
    bl = params["lin_b"].reshape(1, -1)
    return convs, wl, bl


@jax.jit
def block_forward(x_nchw, prepped):
    """Pallas implementation of Block.forward (two-conv default config).
    x: (B, C, H, W) -> logits (B, num_classes)."""
    convs, wl, bl = prepped
    (w1, b1), (w2, b2) = convs
    x = jnp.transpose(x_nchw, (0, 2, 3, 1))              # NCHW -> NHWC
    return block_forward_pallas(x, w1, b1, w2, b2, wl, bl)


def make_params(key, num_classes, in_channels, hidden_layers, kernel_size):
    params = {"convs": []}
    cin = in_channels
    for h in hidden_layers:
        key, kv = jax.random.split(key)
        v = jax.random.normal(kv, (h, cin, kernel_size, kernel_size),
                              jnp.float32) * 0.1
        g = jnp.sqrt(jnp.sum(v * v, axis=(1, 2, 3)))     # weight_norm default init
        key, kb = jax.random.split(key)
        b = jax.random.normal(kb, (h,), jnp.float32) * 0.1
        params["convs"].append((v, g, b))
        cin = h
    key, kw = jax.random.split(key)
    params["lin_w"] = jax.random.normal(
        kw, (num_classes, hidden_layers[-1]), jnp.float32) * 0.1
    key, kb = jax.random.split(key)
    params["lin_b"] = jax.random.normal(kb, (num_classes,), jnp.float32) * 0.1
    return params


# ----------------------------------------------------------------------------
# Pure-JAX reference (for correctness check)
# ----------------------------------------------------------------------------
def block_forward_ref(x_nchw, params):
    x = x_nchw
    for (v, g, b) in params["convs"]:
        w = weight_norm_effective(v, g)
        x = lax.conv_general_dilated(
            x, w, window_strides=(1, 1), padding=((1, 1), (1, 1)),
            dimension_numbers=("NCHW", "OIHW", "NCHW"))
        x = jnp.maximum(x + b[None, :, None, None], 0.0)
    pooled = jnp.mean(x, axis=(2, 3))                    # (B, C)
    return pooled @ params["lin_w"].T + params["lin_b"]


if __name__ == "__main__":
    num_classes = 10
    in_channels = 3
    hidden_layers = (32, 64)
    kernel_size = 3

    key = jax.random.PRNGKey(0)
    key, kx = jax.random.split(key)
    x = jax.random.normal(kx, (2, in_channels, 16, 16), jnp.float32)

    params = make_params(key, num_classes, in_channels, hidden_layers,
                         kernel_size)
    prepped = prepare_weights(params)        # hoisted: constant per model

    out = jax.block_until_ready(block_forward(x, prepped))
    ref = jax.block_until_ready(block_forward_ref(x, params))

    assert out.shape == (2, num_classes)
    assert jnp.allclose(out, ref, rtol=1e-4, atol=1e-4), (
        f"mismatch: max abs err {jnp.max(jnp.abs(out - ref))}")

    print("KERNEL_OK")
</pallas_src>

<mosaic_0001>
module attributes {stable_mosaic.version = 11 : i64} {
  func.func @block_kernel(%arg0: i32, %arg1: memref<2x16x16x3xf32, #tpu.memory_space<vmem>>, %arg2: memref<27x32xf32, #tpu.memory_space<vmem>>, %arg3: memref<1x32xf32, #tpu.memory_space<vmem>>, %arg4: memref<288x64xf32, #tpu.memory_space<vmem>>, %arg5: memref<1x64xf32, #tpu.memory_space<vmem>>, %arg6: memref<64x10xf32, #tpu.memory_space<vmem>>, %arg7: memref<1x10xf32, #tpu.memory_space<vmem>>, %arg8: memref<2x1x10xf32, #tpu.memory_space<vmem>>, %arg9: memref<2x18x18x3xf32, #tpu.memory_space<vmem>>, %arg10: memref<2x18x18x32xf32, #tpu.memory_space<vmem>>) attributes {dimension_semantics = [#tpu.dimension_semantics<parallel>], iteration_bounds = array<i64: 1>, scalar_prefetch = 0 : i64, scratch_operands = 2 : i64, tpu.core_type = #tpu.core_type<tc>, window_params = [{transform_indices = @transform_0, window_bounds = array<i64: 2, 16, 16, 3>}, {pipeline_mode = #tpu.pipeline_mode<synchronous>, transform_indices = @transform_1, window_bounds = array<i64: 27, 32>}, {pipeline_mode = #tpu.pipeline_mode<synchronous>, transform_indices = @transform_2, window_bounds = array<i64: 1, 32>}, {pipeline_mode = #tpu.pipeline_mode<synchronous>, transform_indices = @transform_3, window_bounds = array<i64: 288, 64>}, {pipeline_mode = #tpu.pipeline_mode<synchronous>, transform_indices = @transform_4, window_bounds = array<i64: 1, 64>}, {pipeline_mode = #tpu.pipeline_mode<synchronous>, transform_indices = @transform_5, window_bounds = array<i64: 64, 10>}, {pipeline_mode = #tpu.pipeline_mode<synchronous>, transform_indices = @transform_6, window_bounds = array<i64: 1, 10>}, {transform_indices = @transform_7, window_bounds = array<i64: 2, 1, 10>}]} {
    %cst = arith.constant 0.000000e+00 : f32
    %0 = vector.broadcast %cst : f32 to vector<2x18x18x3xf32>
    %c0 = arith.constant 0 : index
    %c0_0 = arith.constant 0 : index
    %c0_1 = arith.constant 0 : index
    %c0_2 = arith.constant 0 : index
    %1 = vector.load %arg9[%c0, %c0_0, %c0_1, %c0_2] : memref<2x18x18x3xf32, #tpu.memory_space<vmem>>, vector<2x18x18x3xf32>
    tpu.vector_store %arg9[%c0, %c0_0, %c0_1, %c0_2], %0 {strides = array<i32>} : memref<2x18x18x3xf32, #tpu.memory_space<vmem>>, vector<2x18x18x3xf32>,
    %c0_3 = arith.constant 0 : index
    %c0_4 = arith.constant 0 : index
    %c0_5 = arith.constant 0 : index
    %c0_6 = arith.constant 0 : index
    %2 = vector.load %arg1[%c0_3, %c0_4, %c0_5, %c0_6] : memref<2x16x16x3xf32, #tpu.memory_space<vmem>>, vector<2x16x16x3xf32>
    %c0_7 = arith.constant 0 : index
    %c1 = arith.constant 1 : index
    %c1_8 = arith.constant 1 : index
    %c0_9 = arith.constant 0 : index
    %3 = vector.load %arg9[%c0_7, %c1, %c1_8, %c0_9] : memref<2x18x18x3xf32, #tpu.memory_space<vmem>>, vector<2x16x16x3xf32>
    tpu.vector_store %arg9[%c0_7, %c1, %c1_8, %c0_9], %2 {strides = array<i32>} : memref<2x18x18x3xf32, #tpu.memory_space<vmem>>, vector<2x16x16x3xf32>,
    %c0_10 = arith.constant 0 : index
    %c0_11 = arith.constant 0 : index
    %c0_12 = arith.constant 0 : index
    %c0_13 = arith.constant 0 : index
    %4 = vector.load %arg9[%c0_10, %c0_11, %c0_12, %c0_13] : memref<2x18x18x3xf32, #tpu.memory_space<vmem>>, vector<2x16x16x3xf32>
    %c0_14 = arith.constant 0 : index
    %c0_15 = arith.constant 0 : index
    %c1_16 = arith.constant 1 : index
    %c0_17 = arith.constant 0 : index
    %5 = vector.load %arg9[%c0_14, %c0_15, %c1_16, %c0_17] : memref<2x18x18x3xf32, #tpu.memory_space<vmem>>, vector<2x16x16x3xf32>
    %c0_18 = arith.constant 0 : index
    %c0_19 = arith.constant 0 : index
    %c2 = arith.constant 2 : index
    %c0_20 = arith.constant 0 : index
    %6 = vector.load %arg9[%c0_18, %c0_19, %c2, %c0_20] : memref<2x18x18x3xf32, #tpu.memory_space<vmem>>, vector<2x16x16x3xf32>
    %c0_21 = arith.constant 0 : index
    %c1_22 = arith.constant 1 : index
    %c0_23 = arith.constant 0 : index
    %c0_24 = arith.constant 0 : index
    %7 = vector.load %arg9[%c0_21, %c1_22, %c0_23, %c0_24] : memref<2x18x18x3xf32, #tpu.memory_space<vmem>>, vector<2x16x16x3xf32>
    %c0_25 = arith.constant 0 : index
    %c1_26 = arith.constant 1 : index
    %c1_27 = arith.constant 1 : index
    %c0_28 = arith.constant 0 : index
    %8 = vector.load %arg9[%c0_25, %c1_26, %c1_27, %c0_28] : memref<2x18x18x3xf32, #tpu.memory_space<vmem>>, vector<2x16x16x3xf32>
    %c0_29 = arith.constant 0 : index
    %c1_30 = arith.constant 1 : index
    %c2_31 = arith.constant 2 : index
    %c0_32 = arith.constant 0 : index
    %9 = vector.load %arg9[%c0_29, %c1_30, %c2_31, %c0_32] : memref<2x18x18x3xf32, #tpu.memory_space<vmem>>, vector<2x16x16x3xf32>
    %c0_33 = arith.constant 0 : index
    %c2_34 = arith.constant 2 : index
    %c0_35 = arith.constant 0 : index
    %c0_36 = arith.constant 0 : index
    %10 = vector.load %arg9[%c0_33, %c2_34, %c0_35, %c0_36] : memref<2x18x18x3xf32, #tpu.memory_space<vmem>>, vector<2x16x16x3xf32>
    %c0_37 = arith.constant 0 : index
    %c2_38 = arith.constant 2 : index
    %c1_39 = arith.constant 1 : index
    %c0_40 = arith.constant 0 : index
    %11 = vector.load %arg9[%c0_37, %c2_38, %c1_39, %c0_40] : memref<2x18x18x3xf32, #tpu.memory_space<vmem>>, vector<2x16x16x3xf32>
    %c0_41 = arith.constant 0 : index
    %c2_42 = arith.constant 2 : index
    %c2_43 = arith.constant 2 : index
    %c0_44 = arith.constant 0 : index
    %12 = vector.load %arg9[%c0_41, %c2_42, %c2_43, %c0_44] : memref<2x18x18x3xf32, #tpu.memory_space<vmem>>, vector<2x16x16x3xf32>
    %13 = tpu.concatenate %4, %5, %6, %7, %8, %9, %10, %11, %12 in 3 : vector<2x16x16x3xf32>, vector<2x16x16x3xf32>, vector<2x16x16x3xf32>, vector<2x16x16x3xf32>, vector<2x16x16x3xf32>, vector<2x16x16x3xf32>, vector<2x16x16x3xf32>, vector<2x16x16x3xf32>, vector<2x16x16x3xf32> -> vector<2x16x16x27xf32>
    %14 = vector.shape_cast %13 : vector<2x16x16x27xf32> to vector<512x27xf32>
    %c0_45 = arith.constant 0 : index
    %c0_46 = arith.constant 0 : index
    %15 = vector.load %arg2[%c0_45, %c0_46] : memref<27x32xf32, #tpu.memory_space<vmem>>, vector<27x32xf32>
    %cst_47 = arith.constant dense<0.000000e+00> : vector<512x32xf32>
    %16 = tpu.matmul %14, %15, %cst_47 {dimension_numbers = #tpu.dot_dimension_numbers<[1], [0], [0], [1], [0, 0, 1, 1], [], []>} : vector<512x27xf32>, vector<27x32xf32>, vector<512x32xf32> -> vector<512x32xf32>
    %c0_48 = arith.constant 0 : index
    %c0_49 = arith.constant 0 : index
    %17 = vector.load %arg3[%c0_48, %c0_49] : memref<1x32xf32, #tpu.memory_space<vmem>>, vector<1x32xf32>
    %18 = vector.broadcast %17 : vector<1x32xf32> to vector<512x32xf32>
    %19 = arith.addf %16, %18 : vector<512x32xf32>
    %cst_50 = arith.constant 0.000000e+00 : f32
    %20 = vector.broadcast %cst_50 : f32 to vector<512x32xf32>
    %21 = arith.maximumf %19, %20 : vector<512x32xf32>
    %cst_51 = arith.constant 0.000000e+00 : f32
    %22 = vector.broadcast %cst_51 : f32 to vector<2x18x18x32xf32>
    %c0_52 = arith.constant 0 : index
    %c0_53 = arith.constant 0 : index
    %c0_54 = arith.constant 0 : index
    %c0_55 = arith.constant 0 : index
    %23 = vector.load %arg10[%c0_52, %c0_53, %c0_54, %c0_55] : memref<2x18x18x32xf32, #tpu.memory_space<vmem>>, vector<2x18x18x32xf32>
    tpu.vector_store %arg10[%c0_52, %c0_53, %c0_54, %c0_55], %22 {strides = array<i32>} : memref<2x18x18x32xf32, #tpu.memory_space<vmem>>, vector<2x18x18x32xf32>,
    %24 = vector.shape_cast %21 : vector<512x32xf32> to vector<2x16x16x32xf32>
    %c0_56 = arith.constant 0 : index
    %c1_57 = arith.constant 1 : index
    %c1_58 = arith.constant 1 : index
    %c0_59 = arith.constant 0 : index
    %25 = vector.load %arg10[%c0_56, %c1_57, %c1_58, %c0_59] : memref<2x18x18x32xf32, #tpu.memory_space<vmem>>, vector<2x16x16x32xf32>
    tpu.vector_store %arg10[%c0_56, %c1_57, %c1_58, %c0_59], %24 {strides = array<i32>} : memref<2x18x18x32xf32, #tpu.memory_space<vmem>>, vector<2x16x16x32xf32>,
    %c0_60 = arith.constant 0 : index
    %c0_61 = arith.constant 0 : index
    %c0_62 = arith.constant 0 : index
    %c0_63 = arith.constant 0 : index
    %26 = vector.load %arg10[%c0_60, %c0_61, %c0_62, %c0_63] : memref<2x18x18x32xf32, #tpu.memory_space<vmem>>, vector<2x16x16x32xf32>
    %c0_64 = arith.constant 0 : index
    %c0_65 = arith.constant 0 : index
    %c1_66 = arith.constant 1 : index
    %c0_67 = arith.constant 0 : index
    %27 = vector.load %arg10[%c0_64, %c0_65, %c1_66, %c0_67] : memref<2x18x18x32xf32, #tpu.memory_space<vmem>>, vector<2x16x16x32xf32>
    %c0_68 = arith.constant 0 : index
    %c0_69 = arith.constant 0 : index
    %c2_70 = arith.constant 2 : index
    %c0_71 = arith.constant 0 : index
    %28 = vector.load %arg10[%c0_68, %c0_69, %c2_70, %c0_71] : memref<2x18x18x32xf32, #tpu.memory_space<vmem>>, vector<2x16x16x32xf32>
    %c0_72 = arith.constant 0 : index
    %c1_73 = arith.constant 1 : index
    %c0_74 = arith.constant 0 : index
    %c0_75 = arith.constant 0 : index
    %29 = vector.load %arg10[%c0_72, %c1_73, %c0_74, %c0_75] : memref<2x18x18x32xf32, #tpu.memory_space<vmem>>, vector<2x16x16x32xf32>
    %c0_76 = arith.constant 0 : index
    %c1_77 = arith.constant 1 : index
    %c1_78 = arith.constant 1 : index
    %c0_79 = arith.constant 0 : index
    %30 = vector.load %arg10[%c0_76, %c1_77, %c1_78, %c0_79] : memref<2x18x18x32xf32, #tpu.memory_space<vmem>>, vector<2x16x16x32xf32>
    %c0_80 = arith.constant 0 : index
    %c1_81 = arith.constant 1 : index
    %c2_82 = arith.constant 2 : index
    %c0_83 = arith.constant 0 : index
    %31 = vector.load %arg10[%c0_80, %c1_81, %c2_82, %c0_83] : memref<2x18x18x32xf32, #tpu.memory_space<vmem>>, vector<2x16x16x32xf32>
    %c0_84 = arith.constant 0 : index
    %c2_85 = arith.constant 2 : index
    %c0_86 = arith.constant 0 : index
    %c0_87 = arith.constant 0 : index
    %32 = vector.load %arg10[%c0_84, %c2_85, %c0_86, %c0_87] : memref<2x18x18x32xf32, #tpu.memory_space<vmem>>, vector<2x16x16x32xf32>
    %c0_88 = arith.constant 0 : index
    %c2_89 = arith.constant 2 : index
    %c1_90 = arith.constant 1 : index
    %c0_91 = arith.constant 0 : index
    %33 = vector.load %arg10[%c0_88, %c2_89, %c1_90, %c0_91] : memref<2x18x18x32xf32, #tpu.memory_space<vmem>>, vector<2x16x16x32xf32>
    %c0_92 = arith.constant 0 : index
    %c2_93 = arith.constant 2 : index
    %c2_94 = arith.constant 2 : index
    %c0_95 = arith.constant 0 : index
    %34 = vector.load %arg10[%c0_92, %c2_93, %c2_94, %c0_95] : memref<2x18x18x32xf32, #tpu.memory_space<vmem>>, vector<2x16x16x32xf32>
    %35 = tpu.concatenate %26, %27, %28, %29, %30, %31, %32, %33, %34 in 3 : vector<2x16x16x32xf32>, vector<2x16x16x32xf32>, vector<2x16x16x32xf32>, vector<2x16x16x32xf32>, vector<2x16x16x32xf32>, vector<2x16x16x32xf32>, vector<2x16x16x32xf32>, vector<2x16x16x32xf32>, vector<2x16x16x32xf32> -> vector<2x16x16x288xf32>
    %36 = vector.shape_cast %35 : vector<2x16x16x288xf32> to vector<512x288xf32>
    %c0_96 = arith.constant 0 : index
    %c0_97 = arith.constant 0 : index
    %37 = vector.load %arg4[%c0_96, %c0_97] : memref<288x64xf32, #tpu.memory_space<vmem>>, vector<288x64xf32>
    %cst_98 = arith.constant dense<0.000000e+00> : vector<512x64xf32>
    %38 = tpu.matmul %36, %37, %cst_98 {dimension_numbers = #tpu.dot_dimension_numbers<[1], [0], [0], [1], [0, 0, 1, 1], [], []>} : vector<512x288xf32>, vector<288x64xf32>, vector<512x64xf32> -> vector<512x64xf32>
    %c0_99 = arith.constant 0 : index
    %c0_100 = arith.constant 0 : index
    %39 = vector.load %arg5[%c0_99, %c0_100] : memref<1x64xf32, #tpu.memory_space<vmem>>, vector<1x64xf32>
    %40 = vector.broadcast %39 : vector<1x64xf32> to vector<512x64xf32>
    %41 = arith.addf %38, %40 : vector<512x64xf32>
    %cst_101 = arith.constant 0.000000e+00 : f32
    %42 = vector.broadcast %cst_101 : f32 to vector<512x64xf32>
    %43 = arith.maximumf %41, %42 : vector<512x64xf32>
    %44 = vector.shape_cast %43 : vector<512x64xf32> to vector<2x256x64xf32>
    %cst_102 = arith.constant dense<0.000000e+00> : vector<2x64xf32>
    %45 = vector.multi_reduction <add>, %44, %cst_102 [1] : vector<2x256x64xf32> to vector<2x64xf32>
    %cst_103 = arith.constant 2.560000e+02 : f32
    %46 = vector.broadcast %cst_103 : f32 to vector<2x64xf32>
    %47 = arith.divf %45, %46 : vector<2x64xf32>
    %c0_104 = arith.constant 0 : index
    %c0_105 = arith.constant 0 : index
    %48 = vector.load %arg6[%c0_104, %c0_105] : memref<64x10xf32, #tpu.memory_space<vmem>>, vector<64x10xf32>
    %cst_106 = arith.constant dense<0.000000e+00> : vector<2x10xf32>
    %49 = tpu.matmul %47, %48, %cst_106 {dimension_numbers = #tpu.dot_dimension_numbers<[1], [0], [0], [1], [0, 0, 1, 1], [], []>} : vector<2x64xf32>, vector<64x10xf32>, vector<2x10xf32> -> vector<2x10xf32>
    %c0_107 = arith.constant 0 : index
    %c0_108 = arith.constant 0 : index
    %50 = vector.load %arg7[%c0_107, %c0_108] : memref<1x10xf32, #tpu.memory_space<vmem>>, vector<1x10xf32>
    %51 = vector.broadcast %50 : vector<1x10xf32> to vector<2x10xf32>
    %52 = arith.addf %49, %51 : vector<2x10xf32>
    %53 = vector.shape_cast %52 : vector<2x10xf32> to vector<2x1x10xf32>
    %c0_109 = arith.constant 0 : index
    %c0_110 = arith.constant 0 : index
    %c0_111 = arith.constant 0 : index
    %54 = vector.load %arg8[%c0_109, %c0_110, %c0_111] : memref<2x1x10xf32, #tpu.memory_space<vmem>>, vector<2x1x10xf32>
    tpu.vector_store %arg8[%c0_109, %c0_110, %c0_111], %53 {strides = array<i32>} : memref<2x1x10xf32, #tpu.memory_space<vmem>>, vector<2x1x10xf32>,
    return
  }
  func.func @transform_0(%arg0: i32) -> (i32, i32, i32, i32) {
    %c0_i32 = arith.constant 0 : i32
    %c0_i32_0 = arith.constant 0 : i32
    %c0_i32_1 = arith.constant 0 : i32
    %c0_i32_2 = arith.constant 0 : i32
    return %arg0, %c0_i32, %c0_i32_0, %c0_i32_1 : i32, i32, i32, i32
  }
  func.func @transform_1(%arg0: i32) -> (i32, i32) {
    %c0_i32 = arith.constant 0 : i32
    %c0_i32_0 = arith.constant 0 : i32
    %c0_i32_1 = arith.constant 0 : i32
    return %c0_i32, %c0_i32_0 : i32, i32
  }
  func.func @transform_2(%arg0: i32) -> (i32, i32) {
    %c0_i32 = arith.constant 0 : i32
    %c0_i32_0 = arith.constant 0 : i32
    %c0_i32_1 = arith.constant 0 : i32
    return %c0_i32, %c0_i32_0 : i32, i32
  }
  func.func @transform_3(%arg0: i32) -> (i32, i32) {
    %c0_i32 = arith.constant 0 : i32
    %c0_i32_0 = arith.constant 0 : i32
    %c0_i32_1 = arith.constant 0 : i32
    return %c0_i32, %c0_i32_0 : i32, i32
  }
  func.func @transform_4(%arg0: i32) -> (i32, i32) {
    %c0_i32 = arith.constant 0 : i32
    %c0_i32_0 = arith.constant 0 : i32
    %c0_i32_1 = arith.constant 0 : i32
    return %c0_i32, %c0_i32_0 : i32, i32
  }
  func.func @transform_5(%arg0: i32) -> (i32, i32) {
    %c0_i32 = arith.constant 0 : i32
    %c0_i32_0 = arith.constant 0 : i32
    %c0_i32_1 = arith.constant 0 : i32
    return %c0_i32, %c0_i32_0 : i32, i32
  }
  func.func @transform_6(%arg0: i32) -> (i32, i32) {
    %c0_i32 = arith.constant 0 : i32
    %c0_i32_0 = arith.constant 0 : i32
    %c0_i32_1 = arith.constant 0 : i32
    return %c0_i32, %c0_i32_0 : i32, i32
  }
  func.func @transform_7(%arg0: i32) -> (i32, i32, i32) {
    %c0_i32 = arith.constant 0 : i32
    %c0_i32_0 = arith.constant 0 : i32
    %c0_i32_1 = arith.constant 0 : i32
    return %arg0, %c0_i32, %c0_i32_0 : i32, i32, i32
  }
}

</mosaic_0001>

<bundles_post_ra>
// kernel: block_forward.1
= control target key start
LH: loop header
LB: loop body
LE: loop exit
PB: predicated region body
PF: predicated region fallthrough
CT: control target
= control target key end

     0   :  { %vm27_vm0 = vcmask 23552   ;;  %vm30_vm1 = vcmask 17408   ;;  %v14610_v2 = vmov 0.0   ;;  %s9767_s26 = smov 3   ;;  %s14602_s0 = inlined_call_operand.vmem [shape: f32[2,16,16,3], index: 0, kind: input, shape index: {}]   ;;  %s14603_s1 = inlined_call_operand.vmem [shape: f32[27,32], index: 1, kind: input, shape index: {}]   ;;  %s14604_s2 = inlined_call_operand.vmem [shape: f32[1,32], index: 2, kind: input, shape index: {}]   ;;  %s14605_s3 = inlined_call_operand.vmem [shape: f32[288,64], index: 3, kind: input, shape index: {}]   ;;  %s14606_s4 = inlined_call_operand.vmem [shape: f32[1,64], index: 4, kind: input, shape index: {}]   ;;  %s14607_s5 = inlined_call_operand.vmem [shape: f32[64,10], index: 5, kind: input, shape index: {}]   ;;  %s14608_s6 = inlined_call_operand.vmem [shape: f32[1,10], index: 6, kind: input, shape index: {}]   ;;  %s14609_s7 = inlined_call_operand.hbm [shape: f32[2,1,10], index: 7, kind: output, shape index: {}]  }
   0x1   :  { %v9828_v0 = vld [vmem:[%s14602_s0] sm:$0xff]  ;;  %v9833_v1 = vld [vmem:[%s14602_s0 + $0x8] sm:$0xff]  ;;  %28 = vst.msk [vmem:[#allocation2] sm:$0xff] %vm27_vm0, %v14610_v2  ;;  %29 = vst.msk [vmem:[#allocation2 + $0x8] sm:$0xff] %vm27_vm0, %v14610_v2 }
   0x2   :  { %32 = vst.msk [vmem:[#allocation2 + $0x18] sm:$0xff] %vm27_vm0, %v14610_v2  ;;  %33 = vst.msk [vmem:[#allocation2 + $0x20] sm:$0xff] %vm27_vm0, %v14610_v2  ;;  %v139_v3 = vld [vmem:[%s14602_s0 + $0x10] sm:$0xff]  ;;  %v140_v4 = vld [vmem:[%s14602_s0 + $0x18] sm:$0xff] }
   0x3   :  { %35 = vst.msk [vmem:[#allocation2 + $0x30] sm:$0xff] %vm27_vm0, %v14610_v2  ;;  %36 = vst.msk [vmem:[#allocation2 + $0x38] sm:$0xff] %vm27_vm0, %v14610_v2  ;;  %v141_v5 = vld [vmem:[%s14602_s0 + $0x20] sm:$0xff]  ;;  %v142_v6 = vld [vmem:[%s14602_s0 + $0x28] sm:$0xff] }
   0x4   :  { %38 = vst.msk [vmem:[#allocation2 + $0x48] sm:$0xff] %vm27_vm0, %v14610_v2  ;;  %39 = vst.msk [vmem:[#allocation2 + $0x50] sm:$0xff] %vm27_vm0, %v14610_v2  ;;  %v143_v7 = vld [vmem:[%s14602_s0 + $0x30] sm:$0xff]  ;;  %v144_v8 = vld [vmem:[%s14602_s0 + $0x38] sm:$0xff] }
   0x5   :  { %41 = vst.msk [vmem:[#allocation2 + $0x60] sm:$0xff] %vm27_vm0, %v14610_v2  ;;  %42 = vst.msk [vmem:[#allocation2 + $0x68] sm:$0xff] %vm27_vm0, %v14610_v2  ;;  %v145_v9 = vld [vmem:[%s14602_s0 + $0x40] sm:$0xff]  ;;  %v146_v10 = vld [vmem:[%s14602_s0 + $0x48] sm:$0xff] }
   0x6   :  { %44 = vst.msk [vmem:[#allocation2 + $0x78] sm:$0xff] %vm27_vm0, %v14610_v2  ;;  %45 = vst.msk [vmem:[#allocation2 + $0x80] sm:$0xff] %vm27_vm0, %v14610_v2  ;;  %v147_v11 = vld [vmem:[%s14602_s0 + $0x50] sm:$0xff]  ;;  %v148_v12 = vld [vmem:[%s14602_s0 + $0x58] sm:$0xff] }
   0x7   :  { %47 = vst.msk [vmem:[#allocation2 + $0x90] sm:$0xff] %vm27_vm0, %v14610_v2  ;;  %48 = vst.msk [vmem:[#allocation2 + $0x98] sm:$0xff] %vm27_vm0, %v14610_v2  ;;  %v149_v13 = vld [vmem:[%s14602_s0 + $0x60] sm:$0xff]  ;;  %v150_v14 = vld [vmem:[%s14602_s0 + $0x68] sm:$0xff] }
   0x8   :  { %50 = vst.msk [vmem:[#allocation2 + $0xa8] sm:$0xff] %vm27_vm0, %v14610_v2  ;;  %51 = vst.msk [vmem:[#allocation2 + $0xb0] sm:$0xff] %vm27_vm0, %v14610_v2  ;;  %v151_v15 = vld [vmem:[%s14602_s0 + $0x70] sm:$0xff]  ;;  %v152_v16 = vld [vmem:[%s14602_s0 + $0x78] sm:$0xff] }
   0x9   :  { %53 = vst.msk [vmem:[#allocation2 + $0xc0] sm:$0xff] %vm27_vm0, %v14610_v2  ;;  %54 = vst.msk [vmem:[#allocation2 + $0xc8] sm:$0xff] %vm27_vm0, %v14610_v2  ;;  %v153_v17 = vld [vmem:[%s14602_s0 + $0x80] sm:$0xff]  ;;  %v154_v18 = vld [vmem:[%s14602_s0 + $0x88] sm:$0xff] }
   0xa   :  { %56 = vst.msk [vmem:[#allocation2 + $0xd8] sm:$0xff] %vm27_vm0, %v14610_v2  ;;  %57 = vst.msk [vmem:[#allocation2 + $0xe0] sm:$0xff] %vm27_vm0, %v14610_v2  ;;  %v155_v19 = vld [vmem:[%s14602_s0 + $0x90] sm:$0xff]  ;;  %v156_v20 = vld [vmem:[%s14602_s0 + $0x98] sm:$0xff] }
   0xb   :  { %59 = vst.msk [vmem:[#allocation2 + $0xf0] sm:$0xff] %vm27_vm0, %v14610_v2  ;;  %60 = vst.msk [vmem:[#allocation2 + $0xf8] sm:$0xff] %vm27_vm0, %v14610_v2  ;;  %v157_v21 = vld [vmem:[%s14602_s0 + $0xa0] sm:$0xff]  ;;  %v158_v22 = vld [vmem:[%s14602_s0 + $0xa8] sm:$0xff] }
   0xc   :  { %62 = vst.msk [vmem:[#allocation2 + $0x108] sm:$0xff] %vm27_vm0, %v14610_v2  ;;  %63 = vst.msk [vmem:[#allocation2 + $0x110] sm:$0xff] %vm27_vm0, %v14610_v2  ;;  %v159_v23 = vld [vmem:[%s14602_s0 + $0xb0] sm:$0xff]  ;;  %v330_v24 = vld [vmem:[#allocation2 + $0x1] sm:$0xff] }
   0xd   :  { %65 = vst.msk [vmem:[#allocation2 + $0x120] sm:$0xff] %vm27_vm0, %v14610_v2  ;;  %66 = vst.msk [vmem:[#allocation2 + $0x128] sm:$0xff] %vm27_vm0, %v14610_v2  ;;  %v160_v25 = vld [vmem:[%s14602_s0 + $0xb8] sm:$0xff]  ;;  %907 = vrot.lane.b32.xlu0 %v330_v24, %s9767_s26  ;;  %v161_v32 = vld [vmem:[%s14602_s0 + $0xc0] sm:$0xff] }
   0xe   :  { %68 = vst.msk [vmem:[#allocation2 + $0x138] sm:$0xff] %vm27_vm0, %v14610_v2  ;;  %69 = vst.msk [vmem:[#allocation2 + $0x140] sm:$0xff] %vm27_vm0, %v14610_v2  ;;  %v162_v33 = vld [vmem:[%s14602_s0 + $0xc8] sm:$0xff]  ;;  %v163_v34 = vld [vmem:[%s14602_s0 + $0xd0] sm:$0xff] }
   0xf   :  { %71 = vst.msk [vmem:[#allocation2 + $0x150] sm:$0xff] %vm27_vm0, %v14610_v2  ;;  %72 = vst.msk [vmem:[#allocation2 + $0x158] sm:$0xff] %vm27_vm0, %v14610_v2  ;;  %v164_v35 = vld [vmem:[%s14602_s0 + $0xd8] sm:$0xff]  ;;  %v165_v36 = vld [vmem:[%s14602_s0 + $0xe0] sm:$0xff] }
  0x10   :  { %74 = vst.msk [vmem:[#allocation2 + $0x168] sm:$0xff] %vm27_vm0, %v14610_v2  ;;  %75 = vst.msk [vmem:[#allocation2 + $0x170] sm:$0xff] %vm27_vm0, %v14610_v2  ;;  %v166_v37 = vld [vmem:[%s14602_s0 + $0xe8] sm:$0xff]  ;;  %v169_v39 = vld [vmem:[%s14602_s0 + $0x100] sm:$0xff] }
  0x11   :  { %77 = vst.msk [vmem:[#allocation2 + $0x180] sm:$0xff] %vm27_vm0, %v14610_v2  ;;  %78 = vst.msk [vmem:[#allocation2 + $0x188] sm:$0xff] %vm27_vm0, %v14610_v2  ;;  %v170_v41 = vld [vmem:[%s14602_s0 + $0x108] sm:$0xff]  ;;  %v171_v42 = vld [vmem:[%s14602_s0 + $0x110] sm:$0xff] }
  0x12   :  { %80 = vst.msk [vmem:[#allocation2 + $0x198] sm:$0xff] %vm27_vm0, %v14610_v2  ;;  %81 = vst.msk [vmem:[#allocation2 + $0x1a0] sm:$0xff] %vm27_vm0, %v14610_v2  ;;  %v172_v43 = vld [vmem:[%s14602_s0 + $0x118] sm:$0xff]  ;;  %v173_v45 = vld [vmem:[%s14602_s0 + $0x120] sm:$0xff] }
  0x13   :  { %83 = vst.msk [vmem:[#allocation2 + $0x1b0] sm:$0xff] %vm27_vm0, %v14610_v2  ;;  %84 = vst.msk [vmem:[#allocation2 + $0x1b8] sm:$0xff] %vm27_vm0, %v14610_v2  ;;  %v174_v46 = vld [vmem:[%s14602_s0 + $0x128] sm:$0xff]  ;;  %v175_v47 = vld [vmem:[%s14602_s0 + $0x130] sm:$0xff] }
  0x14   :  { %86 = vst.msk [vmem:[#allocation2 + $0x1c8] sm:$0xff] %vm27_vm0, %v14610_v2  ;;  %87 = vst.msk [vmem:[#allocation2 + $0x1d0] sm:$0xff] %vm27_vm0, %v14610_v2  ;;  %v176_v48 = vld [vmem:[%s14602_s0 + $0x138] sm:$0xff]  ;;  %v177_v49 = vld [vmem:[%s14602_s0 + $0x140] sm:$0xff] }
  0x15   :  { %89 = vst.msk [vmem:[#allocation2 + $0x1e0] sm:$0xff] %vm27_vm0, %v14610_v2  ;;  %90 = vst.msk [vmem:[#allocation2 + $0x1e8] sm:$0xff] %vm27_vm0, %v14610_v2  ;;  %v178_v50 = vld [vmem:[%s14602_s0 + $0x148] sm:$0xff]  ;;  %v179_v51 = vld [vmem:[%s14602_s0 + $0x150] sm:$0xff] }
  0x16   :  { %92 = vst.msk [vmem:[#allocation2 + $0x1f8] sm:$0xff] %vm27_vm0, %v14610_v2  ;;  %93 = vst.msk [vmem:[#allocation2 + $0x200] sm:$0xff] %vm27_vm0, %v14610_v2  ;;  %v180_v52 = vld [vmem:[%s14602_s0 + $0x158] sm:$0xff]  ;;  %v181_v53 = vld [vmem:[%s14602_s0 + $0x160] sm:$0xff] }
  0x17   :  { %95 = vst.msk [vmem:[#allocation2 + $0x210] sm:$0xff] %vm27_vm0, %v14610_v2  ;;  %96 = vst.msk [vmem:[#allocation2 + $0x218] sm:$0xff] %vm27_vm0, %v14610_v2  ;;  %v182_v54 = vld [vmem:[%s14602_s0 + $0x168] sm:$0xff]  ;;  %v183_v55 = vld [vmem:[%s14602_s0 + $0x170] sm:$0xff] }
  0x18   :  { %98 = vst.msk [vmem:[#allocation2 + $0x228] sm:$0xff] %vm27_vm0, %v14610_v2  ;;  %99 = vst.msk [vmem:[#allocation2 + $0x230] sm:$0xff] %vm27_vm0, %v14610_v2  ;;  %v184_v56 = vld [vmem:[%s14602_s0 + $0x178] sm:$0xff]  ;;  %v185_v59 = vld [vmem:[%s14602_s0 + $0x180] sm:$0xff] }
  0x19   :  { %101 = vst.msk [vmem:[#allocation2 + $0x240] sm:$0xff] %vm27_vm0, %v14610_v2  ;;  %102 = vst.msk [vmem:[#allocation2 + $0x248] sm:$0xff] %vm27_vm0, %v14610_v2  ;;  %v186_v60 = vld [vmem:[%s14602_s0 + $0x188] sm:$0xff] }
  0x1a   :  { %104 = vst.msk [vmem:[#allocation2 + $0x258] sm:$0xff] %vm27_vm0, %v14610_v2  ;;  %105 = vst.msk [vmem:[#allocation2 + $0x260] sm:$0xff] %vm27_vm0, %v14610_v2 }
  0x1b   :  { %107 = vst.msk [vmem:[#allocation2 + $0x270] sm:$0xff] %vm27_vm0, %v14610_v2  ;;  %108 = vst.msk [vmem:[#allocation2 + $0x278] sm:$0xff] %vm27_vm0, %v14610_v2 }
  0x1c   :  { %110 = vst.msk [vmem:[#allocation2 + $0x288] sm:$0xff] %vm27_vm0, %v14610_v2  ;;  %111 = vst.msk [vmem:[#allocation2 + $0x290] sm:$0xff] %vm27_vm0, %v14610_v2 }
  0x1d   :  { %113 = vst.msk [vmem:[#allocation2 + $0x2a0] sm:$0xff] %vm27_vm0, %v14610_v2  ;;  %114 = vst.msk [vmem:[#allocation2 + $0x2a8] sm:$0xff] %vm27_vm0, %v14610_v2 }
  0x1e   :  { %116 = vst.msk [vmem:[#allocation2 + $0x2b8] sm:$0xff] %vm27_vm0, %v14610_v2  ;;  %117 = vst.msk [vmem:[#allocation2 + $0x2c0] sm:$0xff] %vm27_vm0, %v14610_v2 }
  0x1f   :  { %119 = vst.msk [vmem:[#allocation2 + $0x2d0] sm:$0xff] %vm27_vm0, %v14610_v2  ;;  %120 = vst.msk [vmem:[#allocation2 + $0x2d8] sm:$0xff] %vm27_vm0, %v14610_v2 }
  0x20   :  { %122 = vst.msk [vmem:[#allocation2 + $0x2e8] sm:$0xff] %vm27_vm0, %v14610_v2  ;;  %123 = vst.msk [vmem:[#allocation2 + $0x2f0] sm:$0xff] %vm27_vm0, %v14610_v2 }
  0x21   :  { %125 = vst.msk [vmem:[#allocation2 + $0x300] sm:$0xff] %vm27_vm0, %v14610_v2  ;;  %126 = vst.msk [vmem:[#allocation2 + $0x308] sm:$0xff] %vm27_vm0, %v14610_v2 }
  0x22   :  { %128 = vst.msk [vmem:[#allocation2 + $0x318] sm:$0xff] %vm27_vm0, %v14610_v2  ;;  %129 = vst.msk [vmem:[#allocation2 + $0x320] sm:$0xff] %vm27_vm0, %v14610_v2 }
  0x23   :  { %131 = vst.msk [vmem:[#allocation2 + $0x330] sm:$0xff] %vm27_vm0, %v14610_v2  ;;  %132 = vst.msk [vmem:[#allocation2 + $0x338] sm:$0xff] %vm27_vm0, %v14610_v2 }
  0x24   :  { %134 = vst.msk [vmem:[#allocation2 + $0x348] sm:$0xff] %vm27_vm0, %v14610_v2  ;;  %135 = vst.msk [vmem:[#allocation2 + $0x350] sm:$0xff] %vm27_vm0, %v14610_v2 }
  0x25   :  { %31 = vst.msk [vmem:[#allocation2 + $0x10] sm:$0x3] %vm30_vm1, %v14610_v2  ;;  %34 = vst.msk [vmem:[#allocation2 + $0x28] sm:$0x3] %vm30_vm1, %v14610_v2 }
  0x26   :  { %37 = vst.msk [vmem:[#allocation2 + $0x40] sm:$0x3] %vm30_vm1, %v14610_v2  ;;  %40 = vst.msk [vmem:[#allocation2 + $0x58] sm:$0x3] %vm30_vm1, %v14610_v2 }
  0x27   :  { %43 = vst.msk [vmem:[#allocation2 + $0x70] sm:$0x3] %vm30_vm1, %v14610_v2  ;;  %46 = vst.msk [vmem:[#allocation2 + $0x88] sm:$0x3] %vm30_vm1, %v14610_v2 }
  0x28   :  { %49 = vst.msk [vmem:[#allocation2 + $0xa0] sm:$0x3] %vm30_vm1, %v14610_v2  ;;  %52 = vst.msk [vmem:[#allocation2 + $0xb8] sm:$0x3] %vm30_vm1, %v14610_v2 }
  0x29   :  { %55 = vst.msk [vmem:[#allocation2 + $0xd0] sm:$0x3] %vm30_vm1, %v14610_v2  ;;  %58 = vst.msk [vmem:[#allocation2 + $0xe8] sm:$0x3] %vm30_vm1, %v14610_v2 }
  0x2a   :  { %61 = vst.msk [vmem:[#allocation2 + $0x100] sm:$0x3] %vm30_vm1, %v14610_v2  ;;  %64 = vst.msk [vmem:[#allocation2 + $0x118] sm:$0x3] %vm30_vm1, %v14610_v2 }
  0x2b   :  { %67 = vst.msk [vmem:[#allocation2 + $0x130] sm:$0x3] %vm30_vm1, %v14610_v2  ;;  %70 = vst.msk [vmem:[#allocation2 + $0x148] sm:$0x3] %vm30_vm1, %v14610_v2 }
  0x2c   :  { %73 = vst.msk [vmem:[#allocation2 + $0x160] sm:$0x3] %vm30_vm1, %v14610_v2  ;;  %76 = vst.msk [vmem:[#allocation2 + $0x178] sm:$0x3] %vm30_vm1, %v14610_v2  ;;  %v331_v27 = vld [vmem:[#allocation2 + $0x9] sm:$0xff] }
  0x2d   :  { %79 = vst.msk [vmem:[#allocation2 + $0x190] sm:$0x3] %vm30_vm1, %v14610_v2  ;;  %82 = vst.msk [vmem:[#allocation2 + $0x1a8] sm:$0x3] %vm30_vm1, %v14610_v2  ;;  %909 = vrot.lane.b32.xlu0 %v331_v27, %s9767_s26 }
  0x2e   :  { %85 = vst.msk [vmem:[#allocation2 + $0x1c0] sm:$0x3] %vm30_vm1, %v14610_v2  ;;  %88 = vst.msk [vmem:[#allocation2 + $0x1d8] sm:$0x3] %vm30_vm1, %v14610_v2 }
  0x2f   :  { %91 = vst.msk [vmem:[#allocation2 + $0x1f0] sm:$0x3] %vm30_vm1, %v14610_v2  ;;  %94 = vst.msk [vmem:[#allocation2 + $0x208] sm:$0x3] %vm30_vm1, %v14610_v2 }
  0x30   :  { %97 = vst.msk [vmem:[#allocation2 + $0x220] sm:$0x3] %vm30_vm1, %v14610_v2  ;;  %100 = vst.msk [vmem:[#allocation2 + $0x238] sm:$0x3] %vm30_vm1, %v14610_v2 }
  0x31   :  { %103 = vst.msk [vmem:[#allocation2 + $0x250] sm:$0x3] %vm30_vm1, %v14610_v2  ;;  %106 = vst.msk [vmem:[#allocation2 + $0x268] sm:$0x3] %vm30_vm1, %v14610_v2 }
  0x32   :  { %109 = vst.msk [vmem:[#allocation2 + $0x280] sm:$0x3] %vm30_vm1, %v14610_v2  ;;  %112 = vst.msk [vmem:[#allocation2 + $0x298] sm:$0x3] %vm30_vm1, %v14610_v2 }
  0x33   :  { %115 = vst.msk [vmem:[#allocation2 + $0x2b0] sm:$0x3] %vm30_vm1, %v14610_v2  ;;  %118 = vst.msk [vmem:[#allocation2 + $0x2c8] sm:$0x3] %vm30_vm1, %v14610_v2 }
  0x34   :  { %121 = vst.msk [vmem:[#allocation2 + $0x2e0] sm:$0x3] %vm30_vm1, %v14610_v2  ;;  %124 = vst.msk [vmem:[#allocation2 + $0x2f8] sm:$0x3] %vm30_vm1, %v14610_v2 }
  0x35   :  { %127 = vst.msk [vmem:[#allocation2 + $0x310] sm:$0x3] %vm30_vm1, %v14610_v2  ;;  %130 = vst.msk [vmem:[#allocation2 + $0x328] sm:$0x3] %vm30_vm1, %v14610_v2 }
  0x36   :  { %133 = vst.msk [vmem:[#allocation2 + $0x340] sm:$0x3] %vm30_vm1, %v14610_v2  ;;  %136 = vst.msk [vmem:[#allocation2 + $0x358] sm:$0x3] %vm30_vm1, %v14610_v2 }
  0x37   :  { %202 = vst.msk [vmem:[#allocation2 + $0x19] sm:$0xff] %vm27_vm0, %v9828_v0  ;;  %203 = vst.msk [vmem:[#allocation2 + $0x21] sm:$0xff] %vm27_vm0, %v9833_v1  ;;  %v187_v0 = vld [vmem:[%s14602_s0 + $0x190] sm:$0xff]  ;;  %v188_v1 = vld [vmem:[%s14602_s0 + $0x198] sm:$0xff] }
  0x38   :  { %204 = vst.msk [vmem:[#allocation2 + $0x31] sm:$0xff] %vm27_vm0, %v139_v3  ;;  %205 = vst.msk [vmem:[#allocation2 + $0x39] sm:$0xff] %vm27_vm0, %v140_v4  ;;  %v189_v3 = vld [vmem:[%s14602_s0 + $0x1a0] sm:$0xff]  ;;  %v190_v4 = vld [vmem:[%s14602_s0 + $0x1a8] sm:$0xff] }
  0x39   :  { %206 = vst.msk [vmem:[#allocation2 + $0x49] sm:$0xff] %vm27_vm0, %v141_v5  ;;  %207 = vst.msk [vmem:[#allocation2 + $0x51] sm:$0xff] %vm27_vm0, %v142_v6  ;;  %v191_v5 = vld [vmem:[%s14602_s0 + $0x1b0] sm:$0xff]  ;;  %v192_v6 = vld [vmem:[%s14602_s0 + $0x1b8] sm:$0xff] }
  0x3a   :  { %208 = vst.msk [vmem:[#allocation2 + $0x61] sm:$0xff] %vm27_vm0, %v143_v7  ;;  %209 = vst.msk [vmem:[#allocation2 + $0x69] sm:$0xff] %vm27_vm0, %v144_v8  ;;  %v193_v8 = vld [vmem:[%s14602_s0 + $0x1c0] sm:$0xff] }
  0x3b   :  { %210 = vst.msk [vmem:[#allocation2 + $0x79] sm:$0xff] %vm27_vm0, %v145_v9  ;;  %211 = vst.msk [vmem:[#allocation2 + $0x81] sm:$0xff] %vm27_vm0, %v146_v10  ;;  %v194_v9 = vld [vmem:[%s14602_s0 + $0x1c8] sm:$0xff]  ;;  %v195_v10 = vld [vmem:[%s14602_s0 + $0x1d0] sm:$0xff] }
  0x3c   :  { %212 = vst.msk [vmem:[#allocation2 + $0x91] sm:$0xff] %vm27_vm0, %v147_v11  ;;  %213 = vst.msk [vmem:[#allocation2 + $0x99] sm:$0xff] %vm27_vm0, %v148_v12  ;;  %v196_v12 = vld [vmem:[%s14602_s0 + $0x1d8] sm:$0xff] }
  0x3d   :  { %214 = vst.msk [vmem:[#allocation2 + $0xa9] sm:$0xff] %vm27_vm0, %v149_v13  ;;  %215 = vst.msk [vmem:[#allocation2 + $0xb1] sm:$0xff] %vm27_vm0, %v150_v14  ;;  %v197_v14 = vld [vmem:[%s14602_s0 + $0x1e0] sm:$0xff] }
  0x3e   :  { %216 = vst.msk [vmem:[#allocation2 + $0xc1] sm:$0xff] %vm27_vm0, %v151_v15  ;;  %217 = vst.msk [vmem:[#allocation2 + $0xc9] sm:$0xff] %vm27_vm0, %v152_v16  ;;  %v332_v26 = vld [vmem:[#allocation2 + $0x19] sm:$0xff]  ;;  %v333_v28 = vld [vmem:[#allocation2 + $0x21] sm:$0xff] }
  0x3f   :  { %218 = vst.msk [vmem:[#allocation2 + $0xd9] sm:$0xff] %vm27_vm0, %v153_v17  ;;  %219 = vst.msk [vmem:[#allocation2 + $0xe1] sm:$0xff] %vm27_vm0, %v154_v18  ;;  %911 = vrot.lane.b32.xlu1 %v332_v26, %s9767_s26  ;;  %v334_v29 = vld [vmem:[#allocation2 + $0x31] sm:$0xff]  ;;  %v335_v30 = vld [vmem:[#allocation2 + $0x39] sm:$0xff] }
  0x40   :  { %220 = vst.msk [vmem:[#allocation2 + $0xf1] sm:$0xff] %vm27_vm0, %v155_v19  ;;  %221 = vst.msk [vmem:[#allocation2 + $0xf9] sm:$0xff] %vm27_vm0, %v156_v20  ;;  %v336_v31 = vld [vmem:[#allocation2 + $0x49] sm:$0xff]  ;;  %915 = vrot.lane.b32.xlu0 %v334_v29, %s9767_s26  ;;  %v337_v38 = vld [vmem:[#allocation2 + $0x51] sm:$0xff] }
  0x41   :  { %222 = vst.msk [vmem:[#allocation2 + $0x109] sm:$0xff] %vm27_vm0, %v157_v21  ;;  %223 = vst.msk [vmem:[#allocation2 + $0x111] sm:$0xff] %vm27_vm0, %v158_v22  ;;  %v338_v40 = vld [vmem:[#allocation2 + $0x61] sm:$0xff]  ;;  %v339_v44 = vld [vmem:[#allocation2 + $0x69] sm:$0xff] }
  0x42   :  { %224 = vst.msk [vmem:[#allocation2 + $0x121] sm:$0xff] %vm27_vm0, %v159_v23  ;;  %225 = vst.msk [vmem:[#allocation2 + $0x129] sm:$0xff] %vm27_vm0, %v160_v25  ;;  %v340_v57 = vld [vmem:[#allocation2 + $0x79] sm:$0xff]  ;;  %v341_v58 = vld [vmem:[#allocation2 + $0x81] sm:$0xff] }
  0x43   :  { %913 = vrot.lane.b32.xlu1 %v333_v28, %s9767_s26  ;;  %226 = vst.msk [vmem:[#allocation2 + $0x139] sm:$0xff] %vm27_vm0, %v161_v32  ;;  %227 = vst.msk [vmem:[#allocation2 + $0x141] sm:$0xff] %vm27_vm0, %v162_v33  ;;  %v342_v61 = vld [vmem:[#allocation2 + $0x91] sm:$0xff]  ;;  %v343_v62 = vld [vmem:[#allocation2 + $0x99] sm:$0xff] }
  0x44   :  { %228 = vst.msk [vmem:[#allocation2 + $0x151] sm:$0xff] %vm27_vm0, %v163_v34  ;;  %229 = vst.msk [vmem:[#allocation2 + $0x159] sm:$0xff] %vm27_vm0, %v164_v35  ;;  %919 = vrot.lane.b32.xlu0 %v336_v31, %s9767_s26  ;;  %v344_v63 = vld [vmem:[#allocation2 + $0xa9] sm:$0xff]  ;;  %v345_v7 = vld [vmem:[#allocation2 + $0xb1] sm:$0xff] }
  0x45   :  { %230 = vst.msk [vmem:[#allocation2 + $0x169] sm:$0xff] %vm27_vm0, %v165_v36  ;;  %231 = vst.msk [vmem:[#allocation2 + $0x171] sm:$0xff] %vm27_vm0, %v166_v37  ;;  %v346_v11 = vld [vmem:[#allocation2 + $0xc1] sm:$0xff]  ;;  %v347_v13 = vld [vmem:[#allocation2 + $0xc9] sm:$0xff] }
  0x46   :  { %234 = vst.msk [vmem:[#allocation2 + $0x1c9] sm:$0xff] %vm27_vm0, %v169_v39  ;;  %235 = vst.msk [vmem:[#allocation2 + $0x1d1] sm:$0xff] %vm27_vm0, %v170_v41  ;;  %v198_v15 = vld [vmem:[%s14602_s0 + $0x1e8] sm:$0xff]  ;;  %v348_v16 = vld [vmem:[#allocation2 + $0xd9] sm:$0xff] }
  0x47   :  { %917 = vrot.lane.b32.xlu1 %v335_v30, %s9767_s26  ;;  %236 = vst.msk [vmem:[#allocation2 + $0x1e1] sm:$0xff] %vm27_vm0, %v171_v42  ;;  %237 = vst.msk [vmem:[#allocation2 + $0x1e9] sm:$0xff] %vm27_vm0, %v172_v43  ;;  %v349_v17 = vld [vmem:[#allocation2 + $0xe1] sm:$0xff]  ;;  %v350_v18 = vld [vmem:[#allocation2 + $0xf1] sm:$0xff] }
  0x48   :  { %238 = vst.msk [vmem:[#allocation2 + $0x1f9] sm:$0xff] %vm27_vm0, %v173_v45  ;;  %239 = vst.msk [vmem:[#allocation2 + $0x201] sm:$0xff] %vm27_vm0, %v174_v46  ;;  %923 = vrot.lane.b32.xlu0 %v338_v40, %s9767_s26  ;;  %v351_v19 = vld [vmem:[#allocation2 + $0xf9] sm:$0xff]  ;;  %v352_v20 = vld [vmem:[#allocation2 + $0x109] sm:$0xff] }
  0x49   :  { %240 = vst.msk [vmem:[#allocation2 + $0x211] sm:$0xff] %vm27_vm0, %v175_v47  ;;  %241 = vst.msk [vmem:[#allocation2 + $0x219] sm:$0xff] %vm27_vm0, %v176_v48  ;;  %v353_v21 = vld [vmem:[#allocation2 + $0x111] sm:$0xff]  ;;  %v354_v22 = vld [vmem:[#allocation2 + $0x121] sm:$0xff] }
  0x4a   :  { %242 = vst.msk [vmem:[#allocation2 + $0x229] sm:$0xff] %vm27_vm0, %v177_v49  ;;  %243 = vst.msk [vmem:[#allocation2 + $0x231] sm:$0xff] %vm27_vm0, %v178_v50  ;;  %v355_v23 = vld [vmem:[#allocation2 + $0x129] sm:$0xff]  ;;  %v356_v24 = vld [vmem:[#allocation2 + $0x139] sm:$0xff] }
  0x4b   :  { %921 = vrot.lane.b32.xlu1 %v337_v38, %s9767_s26  ;;  %244 = vst.msk [vmem:[#allocation2 + $0x241] sm:$0xff] %vm27_vm0, %v179_v51  ;;  %245 = vst.msk [vmem:[#allocation2 + $0x249] sm:$0xff] %vm27_vm0, %v180_v52  ;;  %v357_v25 = vld [vmem:[#allocation2 + $0x141] sm:$0xff]  ;;  %v358_v26 = vld [vmem:[#allocation2 + $0x151] sm:$0xff] }
  0x4c   :  { %246 = vst.msk [vmem:[#allocation2 + $0x259] sm:$0xff] %vm27_vm0, %v181_v53  ;;  %247 = vst.msk [vmem:[#allocation2 + $0x261] sm:$0xff] %vm27_vm0, %v182_v54  ;;  %927 = vrot.lane.b32.xlu0 %v340_v57, %s9767_s26 }
  0x4d   :  { %248 = vst.msk [vmem:[#allocation2 + $0x271] sm:$0xff] %vm27_vm0, %v183_v55  ;;  %249 = vst.msk [vmem:[#allocation2 + $0x279] sm:$0xff] %vm27_vm0, %v184_v56 }
  0x4e   :  { %250 = vst.msk [vmem:[#allocation2 + $0x289] sm:$0xff] %vm27_vm0, %v185_v59  ;;  %251 = vst.msk [vmem:[#allocation2 + $0x291] sm:$0xff] %vm27_vm0, %v186_v60 }
  0x4f   :  { %925 = vrot.lane.b32.xlu1 %v339_v44, %s9767_s26  ;;  %252 = vst.msk [vmem:[#allocation2 + $0x2a1] sm:$0xff] %vm27_vm0, %v187_v0  ;;  %253 = vst.msk [vmem:[#allocation2 + $0x2a9] sm:$0xff] %vm27_vm0, %v188_v1 }
  0x50   :  { %931 = vrot.lane.b32.xlu0 %v342_v61, %s9767_s26  ;;  %254 = vst.msk [vmem:[#allocation2 + $0x2b9] sm:$0xff] %vm27_vm0, %v189_v3  ;;  %255 = vst.msk [vmem:[#allocation2 + $0x2c1] sm:$0xff] %vm27_vm0, %v190_v4 }
  0x51   :  { %256 = vst.msk [vmem:[#allocation2 + $0x2d1] sm:$0xff] %vm27_vm0, %v191_v5  ;;  %257 = vst.msk [vmem:[#allocation2 + $0x2d9] sm:$0xff] %vm27_vm0, %v192_v6 }
  0x52   :  { %258 = vst.msk [vmem:[#allocation2 + $0x2e9] sm:$0xff] %vm27_vm0, %v193_v8  ;;  %259 = vst.msk [vmem:[#allocation2 + $0x2f1] sm:$0xff] %vm27_vm0, %v194_v9 }
  0x53   :  { %929 = vrot.lane.b32.xlu1 %v341_v58, %s9767_s26  ;;  %260 = vst.msk [vmem:[#allocation2 + $0x301] sm:$0xff] %vm27_vm0, %v195_v10  ;;  %261 = vst.msk [vmem:[#allocation2 + $0x309] sm:$0xff] %vm27_vm0, %v196_v12 }
  0x54   :  { %935 = vrot.lane.b32.xlu0 %v344_v63, %s9767_s26  ;;  %262 = vst.msk [vmem:[#allocation2 + $0x319] sm:$0xff] %vm27_vm0, %v197_v14  ;;  %263 = vst.msk [vmem:[#allocation2 + $0x321] sm:$0xff] %vm27_vm0, %v198_v15 }
  0x57   :  { %933 = vrot.lane.b32.xlu1 %v343_v62, %s9767_s26 }
  0x58   :  { %939 = vrot.lane.b32.xlu0 %v346_v11, %s9767_s26 }
  0x5b   :  { %937 = vrot.lane.b32.xlu1 %v345_v7, %s9767_s26 }
  0x5c   :  { %943 = vrot.lane.b32.xlu0 %v348_v16, %s9767_s26 }
  0x5f   :  { %941 = vrot.lane.b32.xlu1 %v347_v13, %s9767_s26 }
  0x60   :  { %947 = vrot.lane.b32.xlu0 %v350_v18, %s9767_s26 }
  0x63   :  { %945 = vrot.lane.b32.xlu1 %v349_v17, %s9767_s26 }
  0x64   :  { %951 = vrot.lane.b32.xlu0 %v352_v20, %s9767_s26 }
  0x67   :  { %949 = vrot.lane.b32.xlu1 %v351_v19, %s9767_s26 }
  0x68   :  { %955 = vrot.lane.b32.xlu0 %v354_v22, %s9767_s26 }
  0x6b   :  { %953 = vrot.lane.b32.xlu1 %v353_v21, %s9767_s26 }
  0x6c   :  { %959 = vrot.lane.b32.xlu0 %v356_v24, %s9767_s26 }
  0x6f   :  { %957 = vrot.lane.b32.xlu1 %v355_v23, %s9767_s26 }
  0x73   :  { %961 = vrot.lane.b32.xlu1 %v357_v25, %s9767_s26 }
  0x74   :  { %12 = vsyncpa [#allocation5], 0  ;;  %v359_v27 = vld [vmem:[#allocation2 + $0x159] sm:$0xff]  ;;  %963 = vrot.lane.b32.xlu0 %v358_v26, %s9767_s26  ;;  %v360_v28 = vld [vmem:[#allocation2 + $0x169] sm:$0xff]  ;;  %s9768_s10 = smov 6   ;;  %s9770_s18 = smov 12  }
  0x75   :  { %v361_v29 = vld [vmem:[#allocation2 + $0x171] sm:$0xff]  ;;  %v363_v31 = vld [vmem:[#allocation2 + $0x1b9] sm:$0xff]  ;;  %v364_v32 = vld [vmem:[#allocation2 + $0x1c9] sm:$0xff]  ;;  %s9771_s19 = smov 15   ;;  %s9772_s20 = smov 18   ;;  %vm3614_vm2 = vcmask 1042432  }
  0x76   :  { %v362_v30 = vld [vmem:[#allocation2 + $0x1b1] sm:$0xff]  ;;  %v366_v34 = vld [vmem:[#allocation2 + $0x1e1] sm:$0xff]  ;;  %v367_v35 = vld [vmem:[#allocation2 + $0x1e9] sm:$0xff]  ;;  %vm9773_vm3 = vmmov 1   ;;  %s9775_s30 = smov 24   ;;  %vm2955_vm5 = vcmask 48128  }
  0x77   :  { %965 = vrot.lane.b32.xlu1 %v359_v27, %s9767_s26  ;;  %v365_v33 = vld [vmem:[#allocation2 + $0x1d1] sm:$0xff]  ;;  %v368_v36 = vld [vmem:[#allocation2 + $0x1f9] sm:$0xff]  ;;  %v369_v37 = vld [vmem:[#allocation2 + $0x201] sm:$0xff]  ;;  %vm3020_vm6 = vcmask 72704   ;;  %vm3085_vm7 = vcmask 97280   ;;  %vm3150_vm8 = vcmask 121856  }
  0x78   :  { %967 = vrot.lane.b32.xlu0 %v360_v28, %s9767_s26  ;;  %v370_v38 = vld [vmem:[#allocation2 + $0x211] sm:$0xff]  ;;  %v371_v39 = vld [vmem:[#allocation2 + $0x219] sm:$0xff]  ;;  %v372_v40 = vld [vmem:[#allocation2 + $0x229] sm:$0xff]  ;;  %vm3215_vm9 = vcmask 146432   ;;  %vm3280_vm10 = vcmask 171008   ;;  %vm3345_vm11 = vcmask 195584  }
  0x79   :  { %v373_v41 = vld [vmem:[#allocation2 + $0x231] sm:$0xff]  ;;  %v374_v42 = vld [vmem:[#allocation2 + $0x241] sm:$0xff]  ;;  %v375_v43 = vld [vmem:[#allocation2 + $0x249] sm:$0xff]  ;;  %vm3421_vm12 = vcmask 220160   ;;  %vm4067_vm13 = vcmask 261120   ;;  %vm4070_vm14 = vcmask 254976  }
  0x7a   :  { %v376_v44 = vld [vmem:[#allocation2 + $0x259] sm:$0xff]  ;;  %v377_v45 = vld [vmem:[#allocation2 + $0x261] sm:$0xff]  ;;  %v378_v46 = vld [vmem:[#allocation2 + $0x271] sm:$0xff]  ;;  %s9776_s8 = smov 32   ;;  %s9778_s25 = smov 64   ;;  %vm6419_vm15 = vcmask 523264  }
  0x7b   :  { %969 = vrot.lane.b32.xlu1 %v361_v29, %s9767_s26  ;;  %v379_v47 = vld [vmem:[#allocation2 + $0x279] sm:$0xff]  ;;  %v380_v48 = vld [vmem:[#allocation2 + $0x289] sm:$0xff]  ;;  %v381_v49 = vld [vmem:[#allocation2 + $0x291] sm:$0xff]  ;;  %s9779_s27 = smov 96   ;;  %vm9780_vm1 = vmmov 0  }
  0x7c   :  { %971 = vrot.lane.b32.xlu0 %v362_v30, %s9767_s26  ;;  %v382_v50 = vld [vmem:[#allocation2 + $0x2a1] sm:$0xff]  ;;  %v383_v51 = vld [vmem:[#allocation2 + $0x2a9] sm:$0xff]  ;;  %v384_v52 = vld [vmem:[#allocation2 + $0x2b9] sm:$0xff] }
  0x7d   :  { %v385_v53 = vld [vmem:[#allocation2 + $0x2c1] sm:$0xff]  ;;  %v386_v54 = vld [vmem:[#allocation2 + $0x2d1] sm:$0xff]  ;;  %v387_v55 = vld [vmem:[#allocation2 + $0x2d9] sm:$0xff] }
  0x7e   :  { %v388_v56 = vld [vmem:[#allocation2 + $0x2e9] sm:$0xff]  ;;  %v389_v58 = vld [vmem:[#allocation2 + $0x2f1] sm:$0xff]  ;;  %v390_v60 = vld [vmem:[#allocation2 + $0x301] sm:$0xff] }
  0x7f   :  { %973 = vrot.lane.b32.xlu1 %v363_v31, %s9767_s26  ;;  %v10345_v57 = vpop.permute.xlu0 %907  ;;  %v391_v62 = vld [vmem:[#allocation2 + $0x309] sm:$0xff]  ;;  %v392_v0 = vld [vmem:[#allocation2 + $0x319] sm:$0xff]  ;;  %v393_v3 = vld [vmem:[#allocation2 + $0x321] sm:$0xff] }
  0x80   :  { %975 = vrot.lane.b32.xlu0 %v364_v32, %s9767_s26  ;;  %v394_v5 = vld [vmem:[#allocation2 + $0x2] sm:$0xff]  ;;  %v395_v7 = vld [vmem:[#allocation2 + $0xa] sm:$0xff]  ;;  %v396_v9 = vld [vmem:[#allocation2 + $0x1a] sm:$0xff] }
  0x81   :  { %v397_v11 = vld [vmem:[#allocation2 + $0x22] sm:$0xff]  ;;  %v398_v13 = vld [vmem:[#allocation2 + $0x32] sm:$0xff]  ;;  %v399_v15 = vld [vmem:[#allocation2 + $0x3a] sm:$0xff] }
  0x82   :  { %v400_v17 = vld [vmem:[#allocation2 + $0x4a] sm:$0xff]  ;;  %v401_v19 = vld [vmem:[#allocation2 + $0x52] sm:$0xff]  ;;  %v402_v21 = vld [vmem:[#allocation2 + $0x62] sm:$0xff] }
  0x83   :  { %977 = vrot.lane.b32.xlu1 %v365_v33, %s9767_s26  ;;  %v403_v23 = vld [vmem:[#allocation2 + $0x6a] sm:$0xff]  ;;  %v404_v25 = vld [vmem:[#allocation2 + $0x7a] sm:$0xff]  ;;  %v405_v27 = vld [vmem:[#allocation2 + $0x82] sm:$0xff] }
  0x84   :  { %979 = vrot.lane.b32.xlu0 %v366_v34, %s9767_s26  ;;  %v406_v29 = vld [vmem:[#allocation2 + $0x92] sm:$0xff]  ;;  %v407_v31 = vld [vmem:[#allocation2 + $0x9a] sm:$0xff]  ;;  %v408_v33 = vld [vmem:[#allocation2 + $0xaa] sm:$0xff] }
  0x85   :  { %vm8596_vm4 = vmpackc.low %vm3614_vm2, %vm9773_vm3  ;;  %vm7968_vm2 = vcmask 1041409   ;;  %vm8067_vm3 = vcmask 73728  }
  0x87   :  { %981 = vrot.lane.b32.xlu1 %v367_v35, %s9767_s26  ;;  %v409_v35 = vld [vmem:[#allocation2 + $0xb2] sm:$0xff] }
  0x88   :  { %983 = vrot.lane.b32.xlu0 %v368_v36, %s9767_s26 }
  0x8b   :  { %985 = vrot.lane.b32.xlu1 %v369_v37, %s9767_s26  ;;  %v410_v37 = vld [vmem:[#allocation2 + $0xc2] sm:$0xff] }
  0x8c   :  { %987 = vrot.lane.b32.xlu0 %v370_v38, %s9767_s26 }
  0x8f   :  { %989 = vrot.lane.b32.xlu1 %v371_v39, %s9767_s26  ;;  %v411_v39 = vld [vmem:[#allocation2 + $0xca] sm:$0xff] }
  0x90   :  { %991 = vrot.lane.b32.xlu0 %v372_v40, %s9767_s26 }
  0x93   :  { %993 = vrot.lane.b32.xlu1 %v373_v41, %s9767_s26  ;;  %v412_v41 = vld [vmem:[#allocation2 + $0xda] sm:$0xff] }
  0x94   :  { %995 = vrot.lane.b32.xlu0 %v374_v42, %s9767_s26 }
  0x97   :  { %997 = vrot.lane.b32.xlu1 %v375_v43, %s9767_s26  ;;  %v413_v43 = vld [vmem:[#allocation2 + $0xe2] sm:$0xff] }
  0x98   :  { %999 = vrot.lane.b32.xlu0 %v376_v44, %s9767_s26 }
  0x9b   :  { %1001 = vrot.lane.b32.xlu1 %v377_v45, %s9767_s26  ;;  %v414_v45 = vld [vmem:[#allocation2 + $0xf2] sm:$0xff] }
  0x9c   :  { %1003 = vrot.lane.b32.xlu0 %v378_v46, %s9767_s26 }
  0x9f   :  { %1005 = vrot.lane.b32.xlu1 %v379_v47, %s9767_s26  ;;  %v10351_v61 = vpop.permute.xlu0 %909  ;;  %v415_v47 = vld [vmem:[#allocation2 + $0xfa] sm:$0xff] }
  0xa0   :  { %1007 = vrot.lane.b32.xlu0 %v380_v48, %s9767_s26 }
  0xa3   :  { %1009 = vrot.lane.b32.xlu1 %v381_v49, %s9767_s26  ;;  %v416_v49 = vld [vmem:[#allocation2 + $0x10a] sm:$0xff] }
  0xa4   :  { %1011 = vrot.lane.b32.xlu0 %v382_v50, %s9767_s26 }
  0xa7   :  { %1013 = vrot.lane.b32.xlu1 %v383_v51, %s9767_s26  ;;  %v417_v51 = vld [vmem:[#allocation2 + $0x112] sm:$0xff] }
  0xa8   :  { %1015 = vrot.lane.b32.xlu0 %v384_v52, %s9767_s26 }
  0xab   :  { %1017 = vrot.lane.b32.xlu1 %v385_v53, %s9767_s26  ;;  %v418_v53 = vld [vmem:[#allocation2 + $0x122] sm:$0xff] }
  0xac   :  { %1019 = vrot.lane.b32.xlu0 %v386_v54, %s9767_s26 }
  0xaf   :  { %1021 = vrot.lane.b32.xlu1 %v387_v55, %s9767_s26  ;;  %v419_v55 = vld [vmem:[#allocation2 + $0x12a] sm:$0xff] }
  0xb0   :  { %1023 = vrot.lane.b32.xlu0 %v388_v56, %s9767_s26 }
  0xb1   :  { %v10347_v59 = vpop.permute.xlu1 %911 }
  0xb2   :  { %v10357_v1 = vpop.permute.xlu0 %915 }
  0xb3   :  { %1025 = vrot.lane.b32.xlu1 %v389_v58, %s9767_s26  ;;  %v420_v58 = vld [vmem:[#allocation2 + $0x13a] sm:$0xff] }
  0xb4   :  { %1027 = vrot.lane.b32.xlu0 %v390_v60, %s9767_s26 }
  0xb5   :  { %v10353_v63 = vpop.permute.xlu1 %913 }
  0xb6   :  { %v10363_v6 = vpop.permute.xlu0 %919 }
  0xb7   :  { %1029 = vrot.lane.b32.xlu1 %v391_v62, %s9767_s26  ;;  %v421_v62 = vld [vmem:[#allocation2 + $0x142] sm:$0xff] }
  0xb8   :  { %1031 = vrot.lane.b32.xlu0 %v392_v0, %s9767_s26 }
  0xb9   :  { %v10359_v4 = vpop.permute.xlu1 %917 }
  0xba   :  { %v10369_v10 = vpop.permute.xlu0 %923 }
  0xbb   :  { %1033 = vrot.lane.b32.xlu1 %v393_v3, %s9767_s26  ;;  %v167_v3 = vld [vmem:[%s14602_s0 + $0xf0] sm:$0xff] }
  0xbc   :  { %1163 = vrot.lane.b32.xlu0 %v394_v5, %s9768_s10  ;;  %232 = vst.msk [vmem:[#allocation2 + $0x181] sm:$0xff] %vm27_vm0, %v167_v3  ;;  %v168_v5 = vld [vmem:[%s14602_s0 + $0xf8] sm:$0xff] }
  0xbd   :  { %v10365_v8 = vpop.permute.xlu1 %921  ;;  %233 = vst.msk [vmem:[#allocation2 + $0x189] sm:$0xff] %vm27_vm0, %v168_v5  ;;  %v436_v5 = vld [vmem:[#allocation2 + $0x22a] sm:$0xff] }
  0xbe   :  { %v10375_v14 = vpop.permute.xlu0 %927 }
  0xbf   :  { %1165 = vrot.lane.b32.xlu1 %v395_v7, %s9768_s10  ;;  %14613 = vst [vmem:[#allocation8_spill] sm:$0xff] %v10375_v14  ;;  %v422_v7 = vld [vmem:[#allocation2 + $0x152] sm:$0xff] }
  0xc0   :  { %1167 = vrot.lane.b32.xlu0 %v396_v9, %s9768_s10 }
  0xc1   :  { %v10371_v12 = vpop.permute.xlu1 %925 }
  0xc2   :  { %14612 = vst [vmem:[#allocation7_spill] sm:$0xff] %v10371_v12  ;;  %v10381_v18 = vpop.permute.xlu0 %931 }
  0xc3   :  { %1169 = vrot.lane.b32.xlu1 %v397_v11, %s9768_s10  ;;  %14615 = vst [vmem:[#allocation10_spill] sm:$0xff] %v10381_v18  ;;  %v423_v11 = vld [vmem:[#allocation2 + $0x15a] sm:$0xff] }
  0xc4   :  { %1171 = vrot.lane.b32.xlu0 %v398_v13, %s9768_s10 }
  0xc5   :  { %v10377_v16 = vpop.permute.xlu1 %929 }
  0xc6   :  { %14614 = vst [vmem:[#allocation9_spill] sm:$0xff] %v10377_v16  ;;  %v10387_v22 = vpop.permute.xlu0 %935 }
  0xc7   :  { %1173 = vrot.lane.b32.xlu1 %v399_v15, %s9768_s10  ;;  %14617 = vst [vmem:[#allocation12_spill] sm:$0xff] %v10387_v22  ;;  %v424_v15 = vld [vmem:[#allocation2 + $0x16a] sm:$0xff] }
  0xc8   :  { %1175 = vrot.lane.b32.xlu0 %v400_v17, %s9768_s10 }
  0xc9   :  { %v10383_v20 = vpop.permute.xlu1 %933 }
  0xca   :  { %14616 = vst [vmem:[#allocation11_spill] sm:$0xff] %v10383_v20  ;;  %v10393_v26 = vpop.permute.xlu0 %939  ;;  %v11025_v20 = vld [vmem:[#allocation2 + $0xb2] sm:$0xff] }
  0xcb   :  { %1177 = vrot.lane.b32.xlu1 %v401_v19, %s9768_s10  ;;  %14619 = vst [vmem:[#allocation14_spill] sm:$0xff] %v10393_v26  ;;  %v425_v19 = vld [vmem:[#allocation2 + $0x172] sm:$0xff] }
  0xcc   :  { %1179 = vrot.lane.b32.xlu0 %v402_v21, %s9768_s10 }
  0xcd   :  { %v10389_v24 = vpop.permute.xlu1 %937 }
  0xce   :  { %14618 = vst [vmem:[#allocation13_spill] sm:$0xff] %v10389_v24  ;;  %v10399_v30 = vpop.permute.xlu0 %943  ;;  %v10997_v24 = vld [vmem:[#allocation2 + $0x7a] sm:$0xff] }
  0xcf   :  { %1181 = vrot.lane.b32.xlu1 %v403_v23, %s9768_s10  ;;  %14621 = vst [vmem:[#allocation16_spill] sm:$0xff] %v10399_v30  ;;  %v426_v23 = vld [vmem:[#allocation2 + $0x1b2] sm:$0xff] }
  0xd0   :  { %1183 = vrot.lane.b32.xlu0 %v404_v25, %s9768_s10 }
  0xd1   :  { %v10395_v28 = vpop.permute.xlu1 %941 }
  0xd2   :  { %14620 = vst [vmem:[#allocation15_spill] sm:$0xff] %v10395_v28  ;;  %v10405_v34 = vpop.permute.xlu0 %947  ;;  %v10965_v28 = vld [vmem:[#allocation2 + $0x3a] sm:$0xff] }
  0xd3   :  { %1185 = vrot.lane.b32.xlu1 %v405_v27, %s9768_s10  ;;  %14623 = vst [vmem:[#allocation18_spill] sm:$0xff] %v10405_v34  ;;  %v427_v27 = vld [vmem:[#allocation2 + $0x1ba] sm:$0xff] }
  0xd4   :  { %1187 = vrot.lane.b32.xlu0 %v406_v29, %s9768_s10 }
  0xd5   :  { %v10401_v32 = vpop.permute.xlu1 %945 }
  0xd6   :  { %14622 = vst [vmem:[#allocation17_spill] sm:$0xff] %v10401_v32  ;;  %v10411_v38 = vpop.permute.xlu0 %951  ;;  %v537_v32 = vld [vmem:[#allocation2 + $0xc9] sm:$0xff] }
  0xd7   :  { %1189 = vrot.lane.b32.xlu1 %v407_v31, %s9768_s10  ;;  %14625 = vst [vmem:[#allocation20_spill] sm:$0xff] %v10411_v38  ;;  %v428_v31 = vld [vmem:[#allocation2 + $0x1ca] sm:$0xff] }
  0xd8   :  { %1191 = vrot.lane.b32.xlu0 %v408_v33, %s9768_s10 }
  0xd9   :  { %v10407_v36 = vpop.permute.xlu1 %949 }
  0xda   :  { %14624 = vst [vmem:[#allocation19_spill] sm:$0xff] %v10407_v36  ;;  %v10417_v42 = vpop.permute.xlu0 %955  ;;  %v533_v36 = vld [vmem:[#allocation2 + $0x99] sm:$0xff] }
  0xdb   :  { %1193 = vrot.lane.b32.xlu1 %v409_v35, %s9768_s10  ;;  %14627 = vst [vmem:[#allocation22_spill] sm:$0xff] %v10417_v42  ;;  %v429_v35 = vld [vmem:[#allocation2 + $0x1d2] sm:$0xff] }
  0xdc   :  { %1195 = vrot.lane.b32.xlu0 %v410_v37, %s9768_s10 }
  0xdd   :  { %v10413_v40 = vpop.permute.xlu1 %953 }
  0xde   :  { %14626 = vst [vmem:[#allocation21_spill] sm:$0xff] %v10413_v40  ;;  %v10423_v46 = vpop.permute.xlu0 %959  ;;  %v529_v40 = vld [vmem:[#allocation2 + $0x69] sm:$0xff] }
  0xdf   :  { %1197 = vrot.lane.b32.xlu1 %v411_v39, %s9768_s10  ;;  %14629 = vst [vmem:[#allocation24_spill] sm:$0xff] %v10423_v46  ;;  %v430_v39 = vld [vmem:[#allocation2 + $0x1e2] sm:$0xff] }
  0xe0   :  { %1199 = vrot.lane.b32.xlu0 %v412_v41, %s9768_s10 }
  0xe1   :  { %v10419_v44 = vpop.permute.xlu1 %957 }
  0xe2   :  { %14628 = vst [vmem:[#allocation23_spill] sm:$0xff] %v10419_v44  ;;  %v525_v44 = vld [vmem:[#allocation2 + $0x39] sm:$0xff] }
  0xe3   :  { %1201 = vrot.lane.b32.xlu1 %v413_v43, %s9768_s10  ;;  %v431_v43 = vld [vmem:[#allocation2 + $0x1ea] sm:$0xff] }
  0xe4   :  { %1203 = vrot.lane.b32.xlu0 %v414_v45, %s9768_s10 }
  0xe5   :  { %v10425_v48 = vpop.permute.xlu1 %961 }
  0xe6   :  { %14630 = vst [vmem:[#allocation25_spill] sm:$0xff] %v10425_v48  ;;  %v10429_v50 = vpop.permute.xlu0 %963 }
  0xe7   :  { %1205 = vrot.lane.b32.xlu1 %v415_v47, %s9768_s10  ;;  %14631 = vst [vmem:[#allocation26_spill] sm:$0xff] %v10429_v50  ;;  %v432_v47 = vld [vmem:[#allocation2 + $0x1fa] sm:$0xff]  ;;  %v291_v50 = vld [vmem:[#allocation2 + $0x128] sm:$0xff] }
  0xe8   :  { %1207 = vrot.lane.b32.xlu0 %v416_v49, %s9768_s10 }
  0xe9   :  { %v10431_v52 = vpop.permute.xlu1 %965 }
  0xea   :  { %14632 = vst [vmem:[#allocation27_spill] sm:$0xff] %v10431_v52  ;;  %v10435_v54 = vpop.permute.xlu0 %967 }
  0xeb   :  { %1209 = vrot.lane.b32.xlu1 %v417_v51, %s9768_s10  ;;  %14633 = vst [vmem:[#allocation28_spill] sm:$0xff] %v10435_v54  ;;  %v433_v51 = vld [vmem:[#allocation2 + $0x202] sm:$0xff]  ;;  %v289_v54 = vld [vmem:[#allocation2 + $0x110] sm:$0xff] }
  0xec   :  { %1211 = vrot.lane.b32.xlu0 %v418_v53, %s9768_s10 }
  0xed   :  { %v10437_v56 = vpop.permute.xlu1 %969 }
  0xee   :  { %14634 = vst [vmem:[#allocation29_spill] sm:$0xff] %v10437_v56  ;;  %v10441_v60 = vpop.permute.xlu0 %971 }
  0xef   :  { %1213 = vrot.lane.b32.xlu1 %v419_v55, %s9768_s10  ;;  %14635 = vst [vmem:[#allocation30_spill] sm:$0xff] %v10441_v60  ;;  %v434_v55 = vld [vmem:[#allocation2 + $0x212] sm:$0xff] }
  0xf0   :  { %1215 = vrot.lane.b32.xlu0 %v420_v58, %s9768_s10  ;;  %v287_v60 = vld [vmem:[#allocation2 + $0xf8] sm:$0xff] }
  0xf1   :  { %v10443_v0 = vpop.permute.xlu1 %973 }
  0xf2   :  { %14636 = vst [vmem:[#allocation31_spill] sm:$0xff] %v10443_v0  ;;  %v10455_v9 = vpop.permute.xlu0 %975 }
  0xf3   :  { %1217 = vrot.lane.b32.xlu1 %v421_v62, %s9768_s10  ;;  %14637 = vst [vmem:[#allocation32_spill] sm:$0xff] %v10455_v9  ;;  %v435_v62 = vld [vmem:[#allocation2 + $0x21a] sm:$0xff] }
  0xf4   :  { %1219 = vrot.lane.b32.xlu0 %v422_v7, %s9768_s10  ;;  %v285_v9 = vld [vmem:[#allocation2 + $0xe0] sm:$0xff] }
  0xf5   :  { %v10457_v13 = vpop.permute.xlu1 %977 }
  0xf6   :  { %14638 = vst [vmem:[#allocation33_spill] sm:$0xff] %v10457_v13  ;;  %v10461_v17 = vpop.permute.xlu0 %979 }
  0xf7   :  { %1221 = vrot.lane.b32.xlu1 %v423_v11, %s9768_s10  ;;  %14639 = vst [vmem:[#allocation34_spill] sm:$0xff] %v10461_v17  ;;  %v437_v11 = vld [vmem:[#allocation2 + $0x232] sm:$0xff]  ;;  %v283_v17 = vld [vmem:[#allocation2 + $0xc8] sm:$0xff] }
  0xf8   :  { %1223 = vrot.lane.b32.xlu0 %v424_v15, %s9768_s10 }
  0xf9   :  { %v10463_v21 = vpop.permute.xlu1 %981 }
  0xfa   :  { %14640 = vst [vmem:[#allocation35_spill] sm:$0xff] %v10463_v21  ;;  %v10467_v25 = vpop.permute.xlu0 %983 }
  0xfb   :  { %1225 = vrot.lane.b32.xlu1 %v425_v19, %s9768_s10  ;;  %14641 = vst [vmem:[#allocation36_spill] sm:$0xff] %v10467_v25  ;;  %v438_v19 = vld [vmem:[#allocation2 + $0x242] sm:$0xff]  ;;  %v281_v25 = vld [vmem:[#allocation2 + $0xb0] sm:$0xff] }
  0xfc   :  { %1227 = vrot.lane.b32.xlu0 %v426_v23, %s9768_s10 }
  0xfd   :  { %v10469_v29 = vpop.permute.xlu1 %985 }
  0xfe   :  { %14642 = vst [vmem:[#allocation37_spill] sm:$0xff] %v10469_v29  ;;  %v10473_v33 = vpop.permute.xlu0 %987 }
  0xff   :  { %1229 = vrot.lane.b32.xlu1 %v427_v27, %s9768_s10  ;;  %14643 = vst [vmem:[#allocation38_spill] sm:$0xff] %v10473_v33  ;;  %v439_v27 = vld [vmem:[#allocation2 + $0x24a] sm:$0xff]  ;;  %v279_v33 = vld [vmem:[#allocation2 + $0x98] sm:$0xff] }
 0x100   :  { %1231 = vrot.lane.b32.xlu0 %v428_v31, %s9768_s10 }
 0x101   :  { %v10475_v37 = vpop.permute.xlu1 %989 }
 0x102   :  { %14644 = vst [vmem:[#allocation39_spill] sm:$0xff] %v10475_v37  ;;  %v10479_v41 = vpop.permute.xlu0 %991 }
 0x103   :  { %1233 = vrot.lane.b32.xlu1 %v429_v35, %s9768_s10  ;;  %14645 = vst [vmem:[#allocation40_spill] sm:$0xff] %v10479_v41  ;;  %v440_v35 = vld [vmem:[#allocation2 + $0x25a] sm:$0xff] }
 0x104   :  { %1235 = vrot.lane.b32.xlu0 %v430_v39, %s9768_s10  ;;  %v277_v41 = vld [vmem:[#allocation2 + $0x80] sm:$0xff] }
 0x105   :  { %v10481_v45 = vpop.permute.xlu1 %993 }
 0x106   :  { %14646 = vst [vmem:[#allocation41_spill] sm:$0xff] %v10481_v45  ;;  %v10485_v49 = vpop.permute.xlu0 %995 }
 0x107   :  { %1237 = vrot.lane.b32.xlu1 %v431_v43, %s9768_s10  ;;  %14647 = vst [vmem:[#allocation42_spill] sm:$0xff] %v10485_v49  ;;  %v441_v43 = vld [vmem:[#allocation2 + $0x262] sm:$0xff] }
 0x108   :  { %1239 = vrot.lane.b32.xlu0 %v432_v47, %s9768_s10  ;;  %v275_v49 = vld [vmem:[#allocation2 + $0x68] sm:$0xff] }
 0x109   :  { %v10487_v53 = vpop.permute.xlu1 %997 }
 0x10a   :  { %14648 = vst [vmem:[#allocation43_spill] sm:$0xff] %v10487_v53  ;;  %v10491_v58 = vpop.permute.xlu0 %999 }
 0x10b   :  { %1241 = vrot.lane.b32.xlu1 %v433_v51, %s9768_s10  ;;  %14649 = vst [vmem:[#allocation44_spill] sm:$0xff] %v10491_v58  ;;  %v442_v51 = vld [vmem:[#allocation2 + $0x272] sm:$0xff] }
 0x10c   :  { %1243 = vrot.lane.b32.xlu0 %v434_v55, %s9768_s10  ;;  %v273_v58 = vld [vmem:[#allocation2 + $0x50] sm:$0xff] }
 0x10d   :  { %v10493_v3 = vpop.permute.xlu1 %1001 }
 0x10e   :  { %14650 = vst [vmem:[#allocation45_spill] sm:$0xff] %v10493_v3  ;;  %v10497_v7 = vpop.permute.xlu0 %1003 }
 0x10f   :  { %1245 = vrot.lane.b32.xlu1 %v435_v62, %s9768_s10  ;;  %14651 = vst [vmem:[#allocation46_spill] sm:$0xff] %v10497_v7  ;;  %v443_v62 = vld [vmem:[#allocation2 + $0x27a] sm:$0xff] }
 0x110   :  { %1247 = vrot.lane.b32.xlu0 %v436_v5, %s9768_s10  ;;  %v271_v7 = vld [vmem:[#allocation2 + $0x38] sm:$0xff] }
 0x111   :  { %v10499_v15 = vpop.permute.xlu1 %1005 }
 0x112   :  { %14652 = vst [vmem:[#allocation47_spill] sm:$0xff] %v10499_v15  ;;  %v10503_v23 = vpop.permute.xlu0 %1007 }
 0x113   :  { %1249 = vrot.lane.b32.xlu1 %v437_v11, %s9768_s10  ;;  %14653 = vst [vmem:[#allocation48_spill] sm:$0xff] %v10503_v23  ;;  %v444_v11 = vld [vmem:[#allocation2 + $0x28a] sm:$0xff]  ;;  %v269_v23 = vld [vmem:[#allocation2 + $0x20] sm:$0xff] }
 0x114   :  { %1251 = vrot.lane.b32.xlu0 %v438_v19, %s9768_s10 }
 0x115   :  { %v10505_v31 = vpop.permute.xlu1 %1009 }
 0x116   :  { %14654 = vst [vmem:[#allocation49_spill] sm:$0xff] %v10505_v31  ;;  %v10509_v39 = vpop.permute.xlu0 %1011 }
 0x117   :  { %1253 = vrot.lane.b32.xlu1 %v439_v27, %s9768_s10  ;;  %14655 = vst [vmem:[#allocation50_spill] sm:$0xff] %v10509_v39  ;;  %v445_v27 = vld [vmem:[#allocation2 + $0x292] sm:$0xff] }
 0x118   :  { %1255 = vrot.lane.b32.xlu0 %v440_v35, %s9768_s10  ;;  %v446_v35 = vld [vmem:[#allocation2 + $0x2a2] sm:$0xff] }
 0x119   :  { %v10511_v47 = vpop.permute.xlu1 %1013 }
 0x11a   :  { %14656 = vst [vmem:[#allocation51_spill] sm:$0xff] %v10511_v47  ;;  %v10515_v55 = vpop.permute.xlu0 %1015 }
 0x11b   :  { %1257 = vrot.lane.b32.xlu1 %v441_v43, %s9768_s10  ;;  %14657 = vst [vmem:[#allocation52_spill] sm:$0xff] %v10515_v55  ;;  %v447_v55 = vld [vmem:[#allocation2 + $0x2aa] sm:$0xff] }
 0x11c   :  { %1259 = vrot.lane.b32.xlu0 %v442_v51, %s9768_s10  ;;  %v448_v51 = vld [vmem:[#allocation2 + $0x2ba] sm:$0xff] }
 0x11d   :  { %v10517_v5 = vpop.permute.xlu1 %1017 }
 0x11e   :  { %14658 = vst [vmem:[#allocation53_spill] sm:$0xff] %v10517_v5  ;;  %v10521_v19 = vpop.permute.xlu0 %1019 }
 0x11f   :  { %1261 = vrot.lane.b32.xlu1 %v443_v62, %s9768_s10  ;;  %14659 = vst [vmem:[#allocation54_spill] sm:$0xff] %v10521_v19  ;;  %v449_v19 = vld [vmem:[#allocation2 + $0x2c2] sm:$0xff] }
 0x120   :  { %1263 = vrot.lane.b32.xlu0 %v444_v11, %s9768_s10  ;;  %v450_v11 = vld [vmem:[#allocation2 + $0x2d2] sm:$0xff] }
 0x121   :  { %v10523_v2 = vpop.permute.xlu1 %1021 }
 0x122   :  { %14660 = vst [vmem:[#allocation55_spill] sm:$0xff] %v10523_v2  ;;  %v10527_v43 = vpop.permute.xlu0 %1023 }
 0x123   :  { %1265 = vrot.lane.b32.xlu1 %v445_v27, %s9768_s10  ;;  %14661 = vst [vmem:[#allocation56_spill] sm:$0xff] %v10527_v43  ;;  %v451_v43 = vld [vmem:[#allocation2 + $0x2da] sm:$0xff] }
 0x124   :  { %1267 = vrot.lane.b32.xlu0 %v446_v35, %s9768_s10 }
 0x125   :  { %v10529_v47 = vpop.permute.xlu1 %1025 }
 0x126   :  { %14662 = vst [vmem:[#allocation57_spill] sm:$0xff] %v10529_v47  ;;  %v10533_v62 = vpop.permute.xlu0 %1027 }
 0x127   :  { %1269 = vrot.lane.b32.xlu1 %v447_v55, %s9768_s10  ;;  %14663 = vst [vmem:[#allocation58_spill] sm:$0xff] %v10533_v62  ;;  %v452_v55 = vld [vmem:[#allocation2 + $0x2ea] sm:$0xff]  ;;  %v453_v62 = vld [vmem:[#allocation2 + $0x2f2] sm:$0xff] }
 0x128   :  { %1271 = vrot.lane.b32.xlu0 %v448_v51, %s9768_s10  ;;  %v200_v51 = vld [vmem:[%s14602_s0 + $0x1f8] sm:$0xff] }
 0x129   :  { %v10535_v5 = vpop.permute.xlu1 %1029  ;;  %265 = vst.msk [vmem:[#allocation2 + $0x339] sm:$0xff] %vm27_vm0, %v200_v51  ;;  %v268_v51 = vld [vmem:[#allocation2 + $0x18] sm:$0xff] }
 0x12a   :  { %14664 = vst [vmem:[#allocation59_spill] sm:$0xff] %v10535_v5  ;;  %v10539_v27 = vpop.permute.xlu0 %1031  ;;  %v457_v5 = vld [vmem:[#allocation2 + $0x322] sm:$0xff] }
 0x12b   :  { %1273 = vrot.lane.b32.xlu1 %v449_v19, %s9768_s10  ;;  %14665 = vst [vmem:[#allocation60_spill] sm:$0xff] %v10539_v27  ;;  %v199_v19 = vld [vmem:[%s14602_s0 + $0x1f0] sm:$0xff]  ;;  %s9769_s0 = smov 9  }
 0x12c   :  { %1275 = vrot.lane.b32.xlu0 %v450_v11, %s9768_s10  ;;  %264 = vst.msk [vmem:[#allocation2 + $0x331] sm:$0xff] %vm27_vm0, %v199_v19 }
 0x12d   :  { %v10541_v2 = vpop.permute.xlu1 %1033 }
 0x12e   :  { %14666 = vst [vmem:[#allocation61_spill] sm:$0xff] %v10541_v2  ;;  %v10545_v35 = vpop.permute.xlu0 %1163  ;;  %v455_v2 = vld [vmem:[#allocation2 + $0x30a] sm:$0xff] }
 0x12f   :  { %1277 = vrot.lane.b32.xlu1 %v451_v43, %s9768_s10  ;;  %v454_v43 = vld [vmem:[#allocation2 + $0x302] sm:$0xff] }
 0x130   :  { %1279 = vrot.lane.b32.xlu0 %v452_v55, %s9768_s10  ;;  %v456_v55 = vld [vmem:[#allocation2 + $0x31a] sm:$0xff] }
 0x131   :  { %v10547_v47 = vpop.permute.xlu1 %1165 }
 0x132   :  { %v10559_v11 = vpop.permute.xlu0 %1167 }
 0x133   :  { %1281 = vrot.lane.b32.xlu1 %v453_v62, %s9768_s10  ;;  %v521_v48 = vld [vmem:[#allocation2 + $0x338] sm:$0xff] }
 0x134   :  { %1283 = vrot.lane.b32.xlu0 %v454_v43, %s9768_s10  ;;  %v270_v43 = vld [vmem:[#allocation2 + $0x30] sm:$0xff] }
 0x135   :  { %v10561_v27 = vpop.permute.xlu1 %1169 }
 0x136   :  { %v10565_v19 = vpop.permute.xlu0 %1171 }
 0x137   :  { %1285 = vrot.lane.b32.xlu1 %v455_v2, %s9768_s10 }
 0x138   :  { %1287 = vrot.lane.b32.xlu0 %v456_v55, %s9768_s10  ;;  %v272_v55 = vld [vmem:[#allocation2 + $0x48] sm:$0xff] }
 0x139   :  { %v10567_v39 = vpop.permute.xlu1 %1173 }
 0x13a   :  { %v10571_v62 = vpop.permute.xlu0 %1175 }
 0x13b   :  { %1289 = vrot.lane.b32.xlu1 %v457_v5, %s9768_s10 }
 0x13c   :  { %1419 = vrot.lane.b32.xlu0 %v268_v51, %s9769_s0  ;;  %v274_v51 = vld [vmem:[#allocation2 + $0x60] sm:$0xff] }
 0x13d   :  { %v10573_v31 = vpop.permute.xlu1 %1177 }
 0x13e   :  { %v10577_v2 = vpop.permute.xlu0 %1179 }
 0x13f   :  { %1421 = vrot.lane.b32.xlu1 %v269_v23, %s9769_s0  ;;  %14667 = vst [vmem:[#allocation62_spill] sm:$0xff] %v10577_v2 }
 0x140   :  { %1423 = vrot.lane.b32.xlu0 %v270_v43, %s9769_s0  ;;  %v276_v43 = vld [vmem:[#allocation2 + $0x78] sm:$0xff] }
 0x141   :  { %v10579_v15 = vpop.permute.xlu1 %1181 }
 0x142   :  { %14668 = vst [vmem:[#allocation63_spill] sm:$0xff] %v10579_v15  ;;  %v10583_v5 = vpop.permute.xlu0 %1183  ;;  %v656_v15 = vld [vmem:[#allocation2 + $0x68] sm:$0xff] }
 0x143   :  { %1425 = vrot.lane.b32.xlu1 %v271_v7, %s9769_s0  ;;  %14669 = vst [vmem:[#allocation64_spill] sm:$0xff] %v10583_v5 }
 0x144   :  { %1427 = vrot.lane.b32.xlu0 %v272_v55, %s9769_s0  ;;  %v278_v55 = vld [vmem:[#allocation2 + $0x90] sm:$0xff] }
 0x145   :  { %v10585_v3 = vpop.permute.xlu1 %1185 }
 0x146   :  { %14670 = vst [vmem:[#allocation65_spill] sm:$0xff] %v10585_v3  ;;  %v10589_v23 = vpop.permute.xlu0 %1187  ;;  %v604_v3 = vld [vmem:[#allocation2 + $0xf2] sm:$0xff] }
 0x147   :  { %1429 = vrot.lane.b32.xlu1 %v273_v58, %s9769_s0  ;;  %14671 = vst [vmem:[#allocation66_spill] sm:$0xff] %v10589_v23 }
 0x148   :  { %1431 = vrot.lane.b32.xlu0 %v274_v51, %s9769_s0  ;;  %v280_v51 = vld [vmem:[#allocation2 + $0xa8] sm:$0xff] }
 0x149   :  { %v10591_v53 = vpop.permute.xlu1 %1189 }
 0x14a   :  { %14672 = vst [vmem:[#allocation67_spill] sm:$0xff] %v10591_v53  ;;  %v10595_v7 = vpop.permute.xlu0 %1191  ;;  %v11013_v53 = vld [vmem:[#allocation2 + $0x9a] sm:$0xff] }
 0x14b   :  { %1433 = vrot.lane.b32.xlu1 %v275_v49, %s9769_s0  ;;  %14673 = vst [vmem:[#allocation68_spill] sm:$0xff] %v10595_v7 }
 0x14c   :  { %1435 = vrot.lane.b32.xlu0 %v276_v43, %s9769_s0  ;;  %v282_v43 = vld [vmem:[#allocation2 + $0xc0] sm:$0xff] }
 0x14d   :  { %v10597_v45 = vpop.permute.xlu1 %1193 }
 0x14e   :  { %14674 = vst [vmem:[#allocation69_spill] sm:$0xff] %v10597_v45  ;;  %v10601_v58 = vpop.permute.xlu0 %1195  ;;  %v10989_v45 = vld [vmem:[#allocation2 + $0x6a] sm:$0xff] }
 0x14f   :  { %1437 = vrot.lane.b32.xlu1 %v277_v41, %s9769_s0  ;;  %14675 = vst [vmem:[#allocation70_spill] sm:$0xff] %v10601_v58 }
 0x150   :  { %1439 = vrot.lane.b32.xlu0 %v278_v55, %s9769_s0  ;;  %v284_v55 = vld [vmem:[#allocation2 + $0xd8] sm:$0xff] }
 0x151   :  { %v10603_v37 = vpop.permute.xlu1 %1197 }
 0x152   :  { %14676 = vst [vmem:[#allocation71_spill] sm:$0xff] %v10603_v37  ;;  %v10607_v49 = vpop.permute.xlu0 %1199  ;;  %v587_v37 = vld [vmem:[#allocation2 + $0x22] sm:$0xff] }
 0x153   :  { %1441 = vrot.lane.b32.xlu1 %v279_v33, %s9769_s0  ;;  %14677 = vst [vmem:[#allocation72_spill] sm:$0xff] %v10607_v49 }
 0x154   :  { %1443 = vrot.lane.b32.xlu0 %v280_v51, %s9769_s0  ;;  %v286_v51 = vld [vmem:[#allocation2 + $0xf0] sm:$0xff] }
 0x155   :  { %v10609_v29 = vpop.permute.xlu1 %1201 }
 0x156   :  { %14678 = vst [vmem:[#allocation73_spill] sm:$0xff] %v10609_v29  ;;  %v10613_v41 = vpop.permute.xlu0 %1203  ;;  %v535_v29 = vld [vmem:[#allocation2 + $0xb1] sm:$0xff] }
 0x157   :  { %1445 = vrot.lane.b32.xlu1 %v281_v25, %s9769_s0  ;;  %14679 = vst [vmem:[#allocation74_spill] sm:$0xff] %v10613_v41 }
 0x158   :  { %1447 = vrot.lane.b32.xlu0 %v282_v43, %s9769_s0  ;;  %v288_v43 = vld [vmem:[#allocation2 + $0x108] sm:$0xff] }
 0x159   :  { %v10615_v21 = vpop.permute.xlu1 %1205 }
 0x15a   :  { %14680 = vst [vmem:[#allocation75_spill] sm:$0xff] %v10615_v21  ;;  %v10619_v33 = vpop.permute.xlu0 %1207  ;;  %v531_v21 = vld [vmem:[#allocation2 + $0x81] sm:$0xff] }
 0x15b   :  { %1449 = vrot.lane.b32.xlu1 %v283_v17, %s9769_s0  ;;  %14681 = vst [vmem:[#allocation76_spill] sm:$0xff] %v10619_v33 }
 0x15c   :  { %1451 = vrot.lane.b32.xlu0 %v284_v55, %s9769_s0  ;;  %v290_v55 = vld [vmem:[#allocation2 + $0x120] sm:$0xff] }
 0x15d   :  { %v10621_v13 = vpop.permute.xlu1 %1209 }
 0x15e   :  { %14682 = vst [vmem:[#allocation77_spill] sm:$0xff] %v10621_v13  ;;  %v10625_v25 = vpop.permute.xlu0 %1211  ;;  %v527_v13 = vld [vmem:[#allocation2 + $0x51] sm:$0xff] }
 0x15f   :  { %1453 = vrot.lane.b32.xlu1 %v285_v9, %s9769_s0  ;;  %14683 = vst [vmem:[#allocation78_spill] sm:$0xff] %v10625_v25 }
 0x160   :  { %1455 = vrot.lane.b32.xlu0 %v286_v51, %s9769_s0  ;;  %v292_v51 = vld [vmem:[#allocation2 + $0x138] sm:$0xff] }
 0x161   :  { %v10627_v0 = vpop.permute.xlu1 %1213 }
 0x162   :  { %14684 = vst [vmem:[#allocation79_spill] sm:$0xff] %v10627_v0  ;;  %v10631_v17 = vpop.permute.xlu0 %1215  ;;  %v523_v0 = vld [vmem:[#allocation2 + $0x21] sm:$0xff] }
 0x163   :  { %1457 = vrot.lane.b32.xlu1 %v287_v60, %s9769_s0  ;;  %14685 = vst [vmem:[#allocation80_spill] sm:$0xff] %v10631_v17 }
 0x164   :  { %1459 = vrot.lane.b32.xlu0 %v288_v43, %s9769_s0  ;;  %v294_v43 = vld [vmem:[#allocation2 + $0x150] sm:$0xff] }
 0x165   :  { %v10633_v56 = vpop.permute.xlu1 %1217 }
 0x166   :  { %14686 = vst [vmem:[#allocation81_spill] sm:$0xff] %v10633_v56  ;;  %v10637_v9 = vpop.permute.xlu0 %1219  ;;  %v293_v56 = vld [vmem:[#allocation2 + $0x140] sm:$0xff] }
 0x167   :  { %1461 = vrot.lane.b32.xlu1 %v289_v54, %s9769_s0  ;;  %14687 = vst [vmem:[#allocation82_spill] sm:$0xff] %v10637_v9 }
 0x168   :  { %1463 = vrot.lane.b32.xlu0 %v290_v55, %s9769_s0  ;;  %v296_v55 = vld [vmem:[#allocation2 + $0x168] sm:$0xff] }
 0x169   :  { %v10639_v52 = vpop.permute.xlu1 %1221 }
 0x16a   :  { %14688 = vst [vmem:[#allocation83_spill] sm:$0xff] %v10639_v52  ;;  %v10643_v60 = vpop.permute.xlu0 %1223  ;;  %v295_v52 = vld [vmem:[#allocation2 + $0x158] sm:$0xff] }
 0x16b   :  { %1465 = vrot.lane.b32.xlu1 %v291_v50, %s9769_s0  ;;  %14689 = vst [vmem:[#allocation84_spill] sm:$0xff] %v10643_v60 }
 0x16c   :  { %1467 = vrot.lane.b32.xlu0 %v292_v51, %s9769_s0 }
 0x16d   :  { %v10645_v17 = vpop.permute.xlu1 %1225 }
 0x16e   :  { %14690 = vst [vmem:[#allocation85_spill] sm:$0xff] %v10645_v17  ;;  %v10649_v54 = vpop.permute.xlu0 %1227  ;;  %v297_v17 = vld [vmem:[#allocation2 + $0x170] sm:$0xff] }
 0x16f   :  { %1469 = vrot.lane.b32.xlu1 %v293_v56, %s9769_s0  ;;  %14691 = vst [vmem:[#allocation86_spill] sm:$0xff] %v10649_v54  ;;  %v488_v56 = vld [vmem:[#allocation2 + $0x180] sm:$0xff]  ;;  %v489_v54 = vld [vmem:[#allocation2 + $0x188] sm:$0xff] }
 0x170   :  { %1471 = vrot.lane.b32.xlu0 %v294_v43, %s9769_s0  ;;  %v300_v43 = vld [vmem:[#allocation2 + $0x1c8] sm:$0xff] }
 0x171   :  { %v10651_v9 = vpop.permute.xlu1 %1229 }
 0x172   :  { %14692 = vst [vmem:[#allocation87_spill] sm:$0xff] %v10651_v9  ;;  %v10655_v50 = vpop.permute.xlu0 %1231 }
 0x173   :  { %1473 = vrot.lane.b32.xlu1 %v295_v52, %s9769_s0  ;;  %14693 = vst [vmem:[#allocation88_spill] sm:$0xff] %v10655_v50 }
 0x174   :  { %1475 = vrot.lane.b32.xlu0 %v296_v55, %s9769_s0  ;;  %v302_v55 = vld [vmem:[#allocation2 + $0x1e0] sm:$0xff] }
 0x175   :  { %v10657_v60 = vpop.permute.xlu1 %1233 }
 0x176   :  { %14694 = vst [vmem:[#allocation89_spill] sm:$0xff] %v10657_v60  ;;  %v10661_v51 = vpop.permute.xlu0 %1235  ;;  %v301_v60 = vld [vmem:[#allocation2 + $0x1d0] sm:$0xff] }
 0x177   :  { %1477 = vrot.lane.b32.xlu1 %v297_v17, %s9769_s0  ;;  %14695 = vst [vmem:[#allocation90_spill] sm:$0xff] %v10661_v51 }
 0x178   :  { %1479 = vrot.lane.b32.xlu0 %v488_v56, %s9769_s0  ;;  %v304_v56 = vld [vmem:[#allocation2 + $0x1f8] sm:$0xff] }
 0x179   :  { %v10663_v9 = vpop.permute.xlu1 %1237 }
 0x17a   :  { %14696 = vst [vmem:[#allocation91_spill] sm:$0xff] %v10663_v9  ;;  %v10667_v52 = vpop.permute.xlu0 %1239  ;;  %v303_v9 = vld [vmem:[#allocation2 + $0x1e8] sm:$0xff] }
 0x17b   :  { %1481 = vrot.lane.b32.xlu1 %v489_v54, %s9769_s0  ;;  %14697 = vst [vmem:[#allocation92_spill] sm:$0xff] %v10667_v52 }
 0x17c   :  { %1483 = vrot.lane.b32.xlu0 %v300_v43, %s9769_s0  ;;  %v306_v43 = vld [vmem:[#allocation2 + $0x210] sm:$0xff] }
 0x17d   :  { %v10669_v50 = vpop.permute.xlu1 %1241 }
 0x17e   :  { %14698 = vst [vmem:[#allocation93_spill] sm:$0xff] %v10669_v50  ;;  %v10673_v17 = vpop.permute.xlu0 %1243  ;;  %v305_v50 = vld [vmem:[#allocation2 + $0x200] sm:$0xff] }
 0x17f   :  { %1485 = vrot.lane.b32.xlu1 %v301_v60, %s9769_s0  ;;  %14699 = vst [vmem:[#allocation94_spill] sm:$0xff] %v10673_v17 }
 0x180   :  { %1487 = vrot.lane.b32.xlu0 %v302_v55, %s9769_s0  ;;  %v308_v55 = vld [vmem:[#allocation2 + $0x228] sm:$0xff] }
 0x181   :  { %v10675_v51 = vpop.permute.xlu1 %1245 }
 0x182   :  { %14700 = vst [vmem:[#allocation95_spill] sm:$0xff] %v10675_v51  ;;  %v10679_v54 = vpop.permute.xlu0 %1247  ;;  %v307_v51 = vld [vmem:[#allocation2 + $0x218] sm:$0xff] }
 0x183   :  { %1489 = vrot.lane.b32.xlu1 %v303_v9, %s9769_s0  ;;  %14701 = vst [vmem:[#allocation96_spill] sm:$0xff] %v10679_v54 }
 0x184   :  { %1491 = vrot.lane.b32.xlu0 %v304_v56, %s9769_s0  ;;  %v310_v56 = vld [vmem:[#allocation2 + $0x240] sm:$0xff] }
 0x185   :  { %v10681_v52 = vpop.permute.xlu1 %1249 }
 0x186   :  { %14702 = vst [vmem:[#allocation97_spill] sm:$0xff] %v10681_v52  ;;  %v10685_v60 = vpop.permute.xlu0 %1251  ;;  %v309_v52 = vld [vmem:[#allocation2 + $0x230] sm:$0xff] }
 0x187   :  { %1493 = vrot.lane.b32.xlu1 %v305_v50, %s9769_s0  ;;  %14703 = vst [vmem:[#allocation98_spill] sm:$0xff] %v10685_v60 }
 0x188   :  { %1495 = vrot.lane.b32.xlu0 %v306_v43, %s9769_s0  ;;  %v312_v43 = vld [vmem:[#allocation2 + $0x258] sm:$0xff] }
 0x189   :  { %v10687_v17 = vpop.permute.xlu1 %1253 }
 0x18a   :  { %14704 = vst [vmem:[#allocation99_spill] sm:$0xff] %v10687_v17  ;;  %v10691_v9 = vpop.permute.xlu0 %1255  ;;  %v311_v17 = vld [vmem:[#allocation2 + $0x248] sm:$0xff] }
 0x18b   :  { %1497 = vrot.lane.b32.xlu1 %v307_v51, %s9769_s0  ;;  %14705 = vst [vmem:[#allocation100_spill] sm:$0xff] %v10691_v9 }
 0x18c   :  { %1499 = vrot.lane.b32.xlu0 %v308_v55, %s9769_s0  ;;  %v314_v55 = vld [vmem:[#allocation2 + $0x270] sm:$0xff] }
 0x18d   :  { %v10693_v54 = vpop.permute.xlu1 %1257 }
 0x18e   :  { %14706 = vst [vmem:[#allocation101_spill] sm:$0xff] %v10693_v54  ;;  %v10697_v50 = vpop.permute.xlu0 %1259  ;;  %v313_v54 = vld [vmem:[#allocation2 + $0x260] sm:$0xff] }
 0x18f   :  { %1501 = vrot.lane.b32.xlu1 %v309_v52, %s9769_s0  ;;  %14707 = vst [vmem:[#allocation102_spill] sm:$0xff] %v10697_v50 }
 0x190   :  { %1503 = vrot.lane.b32.xlu0 %v310_v56, %s9769_s0  ;;  %v316_v56 = vld [vmem:[#allocation2 + $0x288] sm:$0xff] }
 0x191   :  { %v10699_v60 = vpop.permute.xlu1 %1261 }
 0x192   :  { %14708 = vst [vmem:[#allocation103_spill] sm:$0xff] %v10699_v60  ;;  %v10703_v51 = vpop.permute.xlu0 %1263  ;;  %v315_v60 = vld [vmem:[#allocation2 + $0x278] sm:$0xff] }
 0x193   :  { %1505 = vrot.lane.b32.xlu1 %v311_v17, %s9769_s0  ;;  %14709 = vst [vmem:[#allocation104_spill] sm:$0xff] %v10703_v51 }
 0x194   :  { %1507 = vrot.lane.b32.xlu0 %v312_v43, %s9769_s0  ;;  %v318_v43 = vld [vmem:[#allocation2 + $0x2a0] sm:$0xff] }
 0x195   :  { %v10705_v9 = vpop.permute.xlu1 %1265 }
 0x196   :  { %14710 = vst [vmem:[#allocation105_spill] sm:$0xff] %v10705_v9  ;;  %v10709_v52 = vpop.permute.xlu0 %1267  ;;  %v317_v9 = vld [vmem:[#allocation2 + $0x290] sm:$0xff] }
 0x197   :  { %1509 = vrot.lane.b32.xlu1 %v313_v54, %s9769_s0  ;;  %14711 = vst [vmem:[#allocation106_spill] sm:$0xff] %v10709_v52 }
 0x198   :  { %1511 = vrot.lane.b32.xlu0 %v314_v55, %s9769_s0  ;;  %v320_v55 = vld [vmem:[#allocation2 + $0x2b8] sm:$0xff] }
 0x199   :  { %v10711_v50 = vpop.permute.xlu1 %1269 }
 0x19a   :  { %14712 = vst [vmem:[#allocation107_spill] sm:$0xff] %v10711_v50  ;;  %v10715_v17 = vpop.permute.xlu0 %1271  ;;  %v319_v50 = vld [vmem:[#allocation2 + $0x2a8] sm:$0xff] }
 0x19b   :  { %1513 = vrot.lane.b32.xlu1 %v315_v60, %s9769_s0  ;;  %14713 = vst [vmem:[#allocation108_spill] sm:$0xff] %v10715_v17 }
 0x19c   :  { %1515 = vrot.lane.b32.xlu0 %v316_v56, %s9769_s0  ;;  %v322_v56 = vld [vmem:[#allocation2 + $0x2d0] sm:$0xff] }
 0x19d   :  { %v10717_v51 = vpop.permute.xlu1 %1273 }
 0x19e   :  { %14714 = vst [vmem:[#allocation109_spill] sm:$0xff] %v10717_v51  ;;  %v10721_v54 = vpop.permute.xlu0 %1275  ;;  %v321_v51 = vld [vmem:[#allocation2 + $0x2c0] sm:$0xff] }
 0x19f   :  { %1517 = vrot.lane.b32.xlu1 %v317_v9, %s9769_s0  ;;  %14715 = vst [vmem:[#allocation110_spill] sm:$0xff] %v10721_v54 }
 0x1a0   :  { %1519 = vrot.lane.b32.xlu0 %v318_v43, %s9769_s0  ;;  %v324_v43 = vld [vmem:[#allocation2 + $0x2e8] sm:$0xff] }
 0x1a1   :  { %v10723_v52 = vpop.permute.xlu1 %1277 }
 0x1a2   :  { %14716 = vst [vmem:[#allocation111_spill] sm:$0xff] %v10723_v52  ;;  %v10727_v60 = vpop.permute.xlu0 %1279  ;;  %v323_v52 = vld [vmem:[#allocation2 + $0x2d8] sm:$0xff] }
 0x1a3   :  { %1521 = vrot.lane.b32.xlu1 %v319_v50, %s9769_s0  ;;  %14717 = vst [vmem:[#allocation112_spill] sm:$0xff] %v10727_v60 }
 0x1a4   :  { %1523 = vrot.lane.b32.xlu0 %v320_v55, %s9769_s0  ;;  %v326_v55 = vld [vmem:[#allocation2 + $0x300] sm:$0xff] }
 0x1a5   :  { %v10729_v17 = vpop.permute.xlu1 %1281 }
 0x1a6   :  { %14718 = vst [vmem:[#allocation113_spill] sm:$0xff] %v10729_v17  ;;  %v10733_v9 = vpop.permute.xlu0 %1283  ;;  %v325_v17 = vld [vmem:[#allocation2 + $0x2f0] sm:$0xff] }
 0x1a7   :  { %1525 = vrot.lane.b32.xlu1 %v321_v51, %s9769_s0  ;;  %14719 = vst [vmem:[#allocation114_spill] sm:$0xff] %v10733_v9 }
 0x1a8   :  { %1527 = vrot.lane.b32.xlu0 %v322_v56, %s9769_s0  ;;  %v328_v56 = vld [vmem:[#allocation2 + $0x318] sm:$0xff] }
 0x1a9   :  { %v10735_v54 = vpop.permute.xlu1 %1285 }
 0x1aa   :  { %14720 = vst [vmem:[#allocation115_spill] sm:$0xff] %v10735_v54  ;;  %v10739_v50 = vpop.permute.xlu0 %1287  ;;  %v327_v54 = vld [vmem:[#allocation2 + $0x308] sm:$0xff] }
 0x1ab   :  { %1529 = vrot.lane.b32.xlu1 %v323_v52, %s9769_s0  ;;  %14721 = vst [vmem:[#allocation116_spill] sm:$0xff] %v10739_v50 }
 0x1ac   :  { %1531 = vrot.lane.b32.xlu0 %v324_v43, %s9769_s0 }
 0x1ad   :  { %v10741_v60 = vpop.permute.xlu1 %1289 }
 0x1ae   :  { %14722 = vst [vmem:[#allocation117_spill] sm:$0xff] %v10741_v60  ;;  %v10745_v51 = vpop.permute.xlu0 %1419  ;;  %v329_v60 = vld [vmem:[#allocation2 + $0x320] sm:$0xff] }
 0x1af   :  { %1533 = vrot.lane.b32.xlu1 %v325_v17, %s9769_s0  ;;  %v520_v17 = vld [vmem:[#allocation2 + $0x330] sm:$0xff] }
 0x1b0   :  { %1535 = vrot.lane.b32.xlu0 %v326_v55, %s9769_s0 }
 0x1b1   :  { %v10747_v9 = vpop.permute.xlu1 %1421 }
 0x1b2   :  { %v10751_v52 = vpop.permute.xlu0 %1423 }
 0x1b3   :  { %1537 = vrot.lane.b32.xlu1 %v327_v54, %s9769_s0  ;;  %v522_v54 = vld [vmem:[#allocation2 + $0x19] sm:$0xff] }
 0x1b4   :  { %1539 = vrot.lane.b32.xlu0 %v328_v56, %s9769_s0 }
 0x1b5   :  { %v10753_v50 = vpop.permute.xlu1 %1425 }
 0x1b6   :  { %v10757_v43 = vpop.permute.xlu0 %1427 }
 0x1b7   :  { %1541 = vrot.lane.b32.xlu1 %v329_v60, %s9769_s0  ;;  %v524_v60 = vld [vmem:[#allocation2 + $0x31] sm:$0xff] }
 0x1b8   :  { %1543 = vrot.lane.b32.xlu0 %v520_v17, %s9769_s0 }
 0x1b9   :  { %v10759_v46 = vpop.permute.xlu1 %1429 }
 0x1ba   :  { %v10763_v55 = vpop.permute.xlu0 %1431 }
 0x1bb   :  { %1545 = vrot.lane.b32.xlu1 %v521_v48, %s9769_s0  ;;  %v526_v48 = vld [vmem:[#allocation2 + $0x49] sm:$0xff] }
 0x1bc   :  { %1675 = vrot.lane.b32.xlu0 %v522_v54, %s9770_s18 }
 0x1bd   :  { %v10765_v25 = vpop.permute.xlu1 %1433 }
 0x1be   :  { %v10769_v56 = vpop.permute.xlu0 %1435 }
 0x1bf   :  { %1677 = vrot.lane.b32.xlu1 %v523_v0, %s9770_s18  ;;  %14723 = vst [vmem:[#allocation118_spill] sm:$0xff] %v10769_v56  ;;  %v528_v0 = vld [vmem:[#allocation2 + $0x61] sm:$0xff] }
 0x1c0   :  { %1679 = vrot.lane.b32.xlu0 %v524_v60, %s9770_s18 }
 0x1c1   :  { %v10771_v42 = vpop.permute.xlu1 %1437 }
 0x1c2   :  { %14724 = vst [vmem:[#allocation119_spill] sm:$0xff] %v10771_v42  ;;  %v10775_v17 = vpop.permute.xlu0 %1439  ;;  %v654_v42 = vld [vmem:[#allocation2 + $0x50] sm:$0xff] }
 0x1c3   :  { %1681 = vrot.lane.b32.xlu1 %v525_v44, %s9770_s18  ;;  %14725 = vst [vmem:[#allocation120_spill] sm:$0xff] %v10775_v17  ;;  %v530_v44 = vld [vmem:[#allocation2 + $0x79] sm:$0xff] }
 0x1c4   :  { %1683 = vrot.lane.b32.xlu0 %v526_v48, %s9770_s18 }
 0x1c5   :  { %v10777_v33 = vpop.permute.xlu1 %1441 }
 0x1c6   :  { %14726 = vst [vmem:[#allocation121_spill] sm:$0xff] %v10777_v33  ;;  %v10781_v54 = vpop.permute.xlu0 %1443 }
 0x1c7   :  { %1685 = vrot.lane.b32.xlu1 %v527_v13, %s9770_s18  ;;  %14727 = vst [vmem:[#allocation122_spill] sm:$0xff] %v10781_v54  ;;  %v532_v13 = vld [vmem:[#allocation2 + $0x91] sm:$0xff] }
 0x1c8   :  { %1687 = vrot.lane.b32.xlu0 %v528_v0, %s9770_s18 }
 0x1c9   :  { %v10783_v38 = vpop.permute.xlu1 %1445 }
 0x1ca   :  { %14728 = vst [vmem:[#allocation123_spill] sm:$0xff] %v10783_v38  ;;  %v10787_v60 = vpop.permute.xlu0 %1447  ;;  %v11001_v38 = vld [vmem:[#allocation2 + $0x82] sm:$0xff] }
 0x1cb   :  { %1689 = vrot.lane.b32.xlu1 %v529_v40, %s9770_s18  ;;  %14729 = vst [vmem:[#allocation124_spill] sm:$0xff] %v10787_v60  ;;  %v534_v40 = vld [vmem:[#allocation2 + $0xa9] sm:$0xff] }
 0x1cc   :  { %1691 = vrot.lane.b32.xlu0 %v530_v44, %s9770_s18 }
 0x1cd   :  { %v10789_v41 = vpop.permute.xlu1 %1449 }
 0x1ce   :  { %14730 = vst [vmem:[#allocation125_spill] sm:$0xff] %v10789_v41  ;;  %v10793_v48 = vpop.permute.xlu0 %1451  ;;  %v10985_v41 = vld [vmem:[#allocation2 + $0x62] sm:$0xff] }
 0x1cf   :  { %1693 = vrot.lane.b32.xlu1 %v531_v21, %s9770_s18  ;;  %14731 = vst [vmem:[#allocation126_spill] sm:$0xff] %v10793_v48  ;;  %v536_v21 = vld [vmem:[#allocation2 + $0xc1] sm:$0xff] }
 0x1d0   :  { %1695 = vrot.lane.b32.xlu0 %v532_v13, %s9770_s18 }
 0x1d1   :  { %v10795_v34 = vpop.permute.xlu1 %1453 }
 0x1d2   :  { %14732 = vst [vmem:[#allocation127_spill] sm:$0xff] %v10795_v34  ;;  %v10799_v0 = vpop.permute.xlu0 %1455 }
 0x1d3   :  { %1697 = vrot.lane.b32.xlu1 %v533_v36, %s9770_s18  ;;  %14733 = vst [vmem:[#allocation128_spill] sm:$0xff] %v10799_v0  ;;  %v538_v36 = vld [vmem:[#allocation2 + $0xd9] sm:$0xff]  ;;  %v539_v0 = vld [vmem:[#allocation2 + $0xe1] sm:$0xff] }
 0x1d4   :  { %1699 = vrot.lane.b32.xlu0 %v534_v40, %s9770_s18 }
 0x1d5   :  { %v10801_v49 = vpop.permute.xlu1 %1457 }
 0x1d6   :  { %14734 = vst [vmem:[#allocation129_spill] sm:$0xff] %v10801_v49  ;;  %v10805_v44 = vpop.permute.xlu0 %1459 }
 0x1d7   :  { %1701 = vrot.lane.b32.xlu1 %v535_v29, %s9770_s18  ;;  %14735 = vst [vmem:[#allocation130_spill] sm:$0xff] %v10805_v44  ;;  %v540_v29 = vld [vmem:[#allocation2 + $0xf1] sm:$0xff]  ;;  %v541_v44 = vld [vmem:[#allocation2 + $0xf9] sm:$0xff] }
 0x1d8   :  { %1703 = vrot.lane.b32.xlu0 %v536_v21, %s9770_s18 }
 0x1d9   :  { %v10807_v30 = vpop.permute.xlu1 %1461 }
 0x1da   :  { %14736 = vst [vmem:[#allocation131_spill] sm:$0xff] %v10807_v30  ;;  %v10811_v13 = vpop.permute.xlu0 %1463 }
 0x1db   :  { %1705 = vrot.lane.b32.xlu1 %v537_v32, %s9770_s18  ;;  %14737 = vst [vmem:[#allocation132_spill] sm:$0xff] %v10811_v13  ;;  %v542_v32 = vld [vmem:[#allocation2 + $0x109] sm:$0xff]  ;;  %v543_v13 = vld [vmem:[#allocation2 + $0x111] sm:$0xff] }
 0x1dc   :  { %1707 = vrot.lane.b32.xlu0 %v538_v36, %s9770_s18 }
 0x1dd   :  { %v10813_v34 = vpop.permute.xlu1 %1465 }
 0x1de   :  { %14738 = vst [vmem:[#allocation133_spill] sm:$0xff] %v10813_v34  ;;  %v10817_v40 = vpop.permute.xlu0 %1467 }
 0x1df   :  { %1709 = vrot.lane.b32.xlu1 %v539_v0, %s9770_s18  ;;  %14739 = vst [vmem:[#allocation134_spill] sm:$0xff] %v10817_v40  ;;  %v544_v0 = vld [vmem:[#allocation2 + $0x121] sm:$0xff]  ;;  %v545_v40 = vld [vmem:[#allocation2 + $0x129] sm:$0xff] }
 0x1e0   :  { %1711 = vrot.lane.b32.xlu0 %v540_v29, %s9770_s18 }
 0x1e1   :  { %v10819_v49 = vpop.permute.xlu1 %1469 }
 0x1e2   :  { %14740 = vst [vmem:[#allocation135_spill] sm:$0xff] %v10819_v49  ;;  %v10823_v21 = vpop.permute.xlu0 %1471 }
 0x1e3   :  { %1713 = vrot.lane.b32.xlu1 %v541_v44, %s9770_s18  ;;  %14741 = vst [vmem:[#allocation136_spill] sm:$0xff] %v10823_v21  ;;  %v546_v44 = vld [vmem:[#allocation2 + $0x139] sm:$0xff]  ;;  %v547_v21 = vld [vmem:[#allocation2 + $0x141] sm:$0xff] }
 0x1e4   :  { %1715 = vrot.lane.b32.xlu0 %v542_v32, %s9770_s18 }
 0x1e5   :  { %v10825_v30 = vpop.permute.xlu1 %1473 }
 0x1e6   :  { %14742 = vst [vmem:[#allocation137_spill] sm:$0xff] %v10825_v30  ;;  %v10829_v36 = vpop.permute.xlu0 %1475 }
 0x1e7   :  { %1717 = vrot.lane.b32.xlu1 %v543_v13, %s9770_s18  ;;  %14743 = vst [vmem:[#allocation138_spill] sm:$0xff] %v10829_v36  ;;  %v548_v13 = vld [vmem:[#allocation2 + $0x151] sm:$0xff]  ;;  %v549_v36 = vld [vmem:[#allocation2 + $0x159] sm:$0xff] }
 0x1e8   :  { %1719 = vrot.lane.b32.xlu0 %v544_v0, %s9770_s18 }
 0x1e9   :  { %v10831_v34 = vpop.permute.xlu1 %1477 }
 0x1ea   :  { %14744 = vst [vmem:[#allocation139_spill] sm:$0xff] %v10831_v34  ;;  %v10835_v29 = vpop.permute.xlu0 %1479 }
 0x1eb   :  { %1721 = vrot.lane.b32.xlu1 %v545_v40, %s9770_s18  ;;  %14745 = vst [vmem:[#allocation140_spill] sm:$0xff] %v10835_v29  ;;  %v550_v40 = vld [vmem:[#allocation2 + $0x169] sm:$0xff]  ;;  %v551_v29 = vld [vmem:[#allocation2 + $0x171] sm:$0xff] }
 0x1ec   :  { %1723 = vrot.lane.b32.xlu0 %v546_v44, %s9770_s18 }
 0x1ed   :  { %v10837_v49 = vpop.permute.xlu1 %1481 }
 0x1ee   :  { %14746 = vst [vmem:[#allocation141_spill] sm:$0xff] %v10837_v49  ;;  %v10841_v32 = vpop.permute.xlu0 %1483 }
 0x1ef   :  { %1725 = vrot.lane.b32.xlu1 %v547_v21, %s9770_s18  ;;  %14747 = vst [vmem:[#allocation142_spill] sm:$0xff] %v10841_v32  ;;  %v552_v21 = vld [vmem:[#allocation2 + $0x181] sm:$0xff]  ;;  %v553_v32 = vld [vmem:[#allocation2 + $0x189] sm:$0xff] }
 0x1f0   :  { %1727 = vrot.lane.b32.xlu0 %v548_v13, %s9770_s18 }
 0x1f1   :  { %v10843_v30 = vpop.permute.xlu1 %1485 }
 0x1f2   :  { %14748 = vst [vmem:[#allocation143_spill] sm:$0xff] %v10843_v30  ;;  %v10847_v0 = vpop.permute.xlu0 %1487 }
 0x1f3   :  { %1729 = vrot.lane.b32.xlu1 %v549_v36, %s9770_s18  ;;  %14749 = vst [vmem:[#allocation144_spill] sm:$0xff] %v10847_v0  ;;  %v554_v36 = vld [vmem:[#allocation2 + $0x1c9] sm:$0xff]  ;;  %v555_v0 = vld [vmem:[#allocation2 + $0x1d1] sm:$0xff] }
 0x1f4   :  { %1731 = vrot.lane.b32.xlu0 %v550_v40, %s9770_s18 }
 0x1f5   :  { %v10849_v34 = vpop.permute.xlu1 %1489 }
 0x1f6   :  { %14750 = vst [vmem:[#allocation145_spill] sm:$0xff] %v10849_v34  ;;  %v10853_v44 = vpop.permute.xlu0 %1491 }
 0x1f7   :  { %1733 = vrot.lane.b32.xlu1 %v551_v29, %s9770_s18  ;;  %14751 = vst [vmem:[#allocation146_spill] sm:$0xff] %v10853_v44  ;;  %v556_v29 = vld [vmem:[#allocation2 + $0x1e1] sm:$0xff]  ;;  %v557_v44 = vld [vmem:[#allocation2 + $0x1e9] sm:$0xff] }
 0x1f8   :  { %1735 = vrot.lane.b32.xlu0 %v552_v21, %s9770_s18 }
 0x1f9   :  { %v10855_v49 = vpop.permute.xlu1 %1493 }
 0x1fa   :  { %14752 = vst [vmem:[#allocation147_spill] sm:$0xff] %v10855_v49  ;;  %v10859_v13 = vpop.permute.xlu0 %1495 }
 0x1fb   :  { %1737 = vrot.lane.b32.xlu1 %v553_v32, %s9770_s18  ;;  %14753 = vst [vmem:[#allocation148_spill] sm:$0xff] %v10859_v13  ;;  %v558_v32 = vld [vmem:[#allocation2 + $0x1f9] sm:$0xff]  ;;  %v559_v13 = vld [vmem:[#allocation2 + $0x201] sm:$0xff] }
 0x1fc   :  { %1739 = vrot.lane.b32.xlu0 %v554_v36, %s9770_s18 }
 0x1fd   :  { %v10861_v30 = vpop.permute.xlu1 %1497 }
 0x1fe   :  { %14754 = vst [vmem:[#allocation149_spill] sm:$0xff] %v10861_v30  ;;  %v10865_v40 = vpop.permute.xlu0 %1499 }
 0x1ff   :  { %1741 = vrot.lane.b32.xlu1 %v555_v0, %s9770_s18  ;;  %14755 = vst [vmem:[#allocation150_spill] sm:$0xff] %v10865_v40  ;;  %v560_v0 = vld [vmem:[#allocation2 + $0x211] sm:$0xff]  ;;  %v561_v40 = vld [vmem:[#allocation2 + $0x219] sm:$0xff] }
 0x200   :  { %1743 = vrot.lane.b32.xlu0 %v556_v29, %s9770_s18 }
 0x201   :  { %v10867_v34 = vpop.permute.xlu1 %1501 }
 0x202   :  { %14756 = vst [vmem:[#allocation151_spill] sm:$0xff] %v10867_v34  ;;  %v10871_v21 = vpop.permute.xlu0 %1503 }
 0x203   :  { %1745 = vrot.lane.b32.xlu1 %v557_v44, %s9770_s18  ;;  %14757 = vst [vmem:[#allocation152_spill] sm:$0xff] %v10871_v21  ;;  %v562_v44 = vld [vmem:[#allocation2 + $0x229] sm:$0xff]  ;;  %v563_v21 = vld [vmem:[#allocation2 + $0x231] sm:$0xff] }
 0x204   :  { %1747 = vrot.lane.b32.xlu0 %v558_v32, %s9770_s18 }
 0x205   :  { %v10873_v49 = vpop.permute.xlu1 %1505 }
 0x206   :  { %14758 = vst [vmem:[#allocation153_spill] sm:$0xff] %v10873_v49  ;;  %v10877_v36 = vpop.permute.xlu0 %1507 }
 0x207   :  { %1749 = vrot.lane.b32.xlu1 %v559_v13, %s9770_s18  ;;  %14759 = vst [vmem:[#allocation154_spill] sm:$0xff] %v10877_v36  ;;  %v564_v13 = vld [vmem:[#allocation2 + $0x241] sm:$0xff]  ;;  %v565_v36 = vld [vmem:[#allocation2 + $0x249] sm:$0xff] }
 0x208   :  { %1751 = vrot.lane.b32.xlu0 %v560_v0, %s9770_s18 }
 0x209   :  { %v10879_v30 = vpop.permute.xlu1 %1509 }
 0x20a   :  { %14760 = vst [vmem:[#allocation155_spill] sm:$0xff] %v10879_v30  ;;  %v10883_v29 = vpop.permute.xlu0 %1511 }
 0x20b   :  { %1753 = vrot.lane.b32.xlu1 %v561_v40, %s9770_s18  ;;  %14761 = vst [vmem:[#allocation156_spill] sm:$0xff] %v10883_v29  ;;  %v566_v40 = vld [vmem:[#allocation2 + $0x259] sm:$0xff]  ;;  %v567_v29 = vld [vmem:[#allocation2 + $0x261] sm:$0xff] }
 0x20c   :  { %1755 = vrot.lane.b32.xlu0 %v562_v44, %s9770_s18 }
 0x20d   :  { %v10885_v34 = vpop.permute.xlu1 %1513 }
 0x20e   :  { %14762 = vst [vmem:[#allocation157_spill] sm:$0xff] %v10885_v34  ;;  %v10889_v32 = vpop.permute.xlu0 %1515 }
 0x20f   :  { %1757 = vrot.lane.b32.xlu1 %v563_v21, %s9770_s18  ;;  %14763 = vst [vmem:[#allocation158_spill] sm:$0xff] %v10889_v32  ;;  %v568_v21 = vld [vmem:[#allocation2 + $0x271] sm:$0xff]  ;;  %v569_v32 = vld [vmem:[#allocation2 + $0x279] sm:$0xff] }
 0x210   :  { %1759 = vrot.lane.b32.xlu0 %v564_v13, %s9770_s18 }
 0x211   :  { %v10891_v49 = vpop.permute.xlu1 %1517 }
 0x212   :  { %14764 = vst [vmem:[#allocation159_spill] sm:$0xff] %v10891_v49  ;;  %v10895_v0 = vpop.permute.xlu0 %1519 }
 0x213   :  { %1761 = vrot.lane.b32.xlu1 %v565_v36, %s9770_s18  ;;  %14765 = vst [vmem:[#allocation160_spill] sm:$0xff] %v10895_v0  ;;  %v570_v36 = vld [vmem:[#allocation2 + $0x289] sm:$0xff]  ;;  %v571_v0 = vld [vmem:[#allocation2 + $0x291] sm:$0xff] }
 0x214   :  { %1763 = vrot.lane.b32.xlu0 %v566_v40, %s9770_s18 }
 0x215   :  { %v10897_v30 = vpop.permute.xlu1 %1521 }
 0x216   :  { %14766 = vst [vmem:[#allocation161_spill] sm:$0xff] %v10897_v30  ;;  %v10901_v44 = vpop.permute.xlu0 %1523 }
 0x217   :  { %1765 = vrot.lane.b32.xlu1 %v567_v29, %s9770_s18  ;;  %14767 = vst [vmem:[#allocation162_spill] sm:$0xff] %v10901_v44  ;;  %v572_v29 = vld [vmem:[#allocation2 + $0x2a1] sm:$0xff]  ;;  %v573_v44 = vld [vmem:[#allocation2 + $0x2a9] sm:$0xff] }
 0x218   :  { %1767 = vrot.lane.b32.xlu0 %v568_v21, %s9770_s18 }
 0x219   :  { %v10903_v34 = vpop.permute.xlu1 %1525 }
 0x21a   :  { %14768 = vst [vmem:[#allocation163_spill] sm:$0xff] %v10903_v34  ;;  %v10907_v13 = vpop.permute.xlu0 %1527 }
 0x21b   :  { %1769 = vrot.lane.b32.xlu1 %v569_v32, %s9770_s18  ;;  %14769 = vst [vmem:[#allocation164_spill] sm:$0xff] %v10907_v13  ;;  %v574_v32 = vld [vmem:[#allocation2 + $0x2b9] sm:$0xff]  ;;  %v575_v13 = vld [vmem:[#allocation2 + $0x2c1] sm:$0xff] }
 0x21c   :  { %1771 = vrot.lane.b32.xlu0 %v570_v36, %s9770_s18 }
 0x21d   :  { %v10909_v49 = vpop.permute.xlu1 %1529 }
 0x21e   :  { %14770 = vst [vmem:[#allocation165_spill] sm:$0xff] %v10909_v49  ;;  %v10913_v40 = vpop.permute.xlu0 %1531 }
 0x21f   :  { %1773 = vrot.lane.b32.xlu1 %v571_v0, %s9770_s18  ;;  %14771 = vst [vmem:[#allocation166_spill] sm:$0xff] %v10913_v40  ;;  %v576_v0 = vld [vmem:[#allocation2 + $0x2d1] sm:$0xff]  ;;  %v577_v40 = vld [vmem:[#allocation2 + $0x2d9] sm:$0xff] }
 0x220   :  { %1775 = vrot.lane.b32.xlu0 %v572_v29, %s9770_s18 }
 0x221   :  { %v10915_v30 = vpop.permute.xlu1 %1533 }
 0x222   :  { %14772 = vst [vmem:[#allocation167_spill] sm:$0xff] %v10915_v30  ;;  %v10919_v21 = vpop.permute.xlu0 %1535 }
 0x223   :  { %1777 = vrot.lane.b32.xlu1 %v573_v44, %s9770_s18  ;;  %14773 = vst [vmem:[#allocation168_spill] sm:$0xff] %v10919_v21  ;;  %v578_v44 = vld [vmem:[#allocation2 + $0x2e9] sm:$0xff]  ;;  %v579_v21 = vld [vmem:[#allocation2 + $0x2f1] sm:$0xff] }
 0x224   :  { %1779 = vrot.lane.b32.xlu0 %v574_v32, %s9770_s18 }
 0x225   :  { %v10921_v34 = vpop.permute.xlu1 %1537 }
 0x226   :  { %14774 = vst [vmem:[#allocation169_spill] sm:$0xff] %v10921_v34  ;;  %v10925_v36 = vpop.permute.xlu0 %1539 }
 0x227   :  { %1781 = vrot.lane.b32.xlu1 %v575_v13, %s9770_s18  ;;  %14775 = vst [vmem:[#allocation170_spill] sm:$0xff] %v10925_v36  ;;  %v580_v13 = vld [vmem:[#allocation2 + $0x301] sm:$0xff]  ;;  %v581_v36 = vld [vmem:[#allocation2 + $0x309] sm:$0xff] }
 0x228   :  { %1783 = vrot.lane.b32.xlu0 %v576_v0, %s9770_s18 }
 0x229   :  { %v10927_v49 = vpop.permute.xlu1 %1541 }
 0x22a   :  { %14776 = vst [vmem:[#allocation171_spill] sm:$0xff] %v10927_v49  ;;  %v10931_v29 = vpop.permute.xlu0 %1543 }
 0x22b   :  { %1785 = vrot.lane.b32.xlu1 %v577_v40, %s9770_s18  ;;  %14777 = vst [vmem:[#allocation172_spill] sm:$0xff] %v10931_v29  ;;  %v582_v40 = vld [vmem:[#allocation2 + $0x319] sm:$0xff]  ;;  %v583_v29 = vld [vmem:[#allocation2 + $0x321] sm:$0xff] }
 0x22c   :  { %1787 = vrot.lane.b32.xlu0 %v578_v44, %s9770_s18 }
 0x22d   :  { %v10933_v30 = vpop.permute.xlu1 %1545 }
 0x22e   :  { %14778 = vst [vmem:[#allocation173_spill] sm:$0xff] %v10933_v30  ;;  %v10937_v32 = vpop.permute.xlu0 %1675  ;;  %v585_v30 = vld [vmem:[#allocation2 + $0x339] sm:$0xff] }
 0x22f   :  { %1789 = vrot.lane.b32.xlu1 %v579_v21, %s9770_s18  ;;  %v584_v21 = vld [vmem:[#allocation2 + $0x331] sm:$0xff] }
 0x230   :  { %1791 = vrot.lane.b32.xlu0 %v580_v13, %s9770_s18 }
 0x231   :  { %v10939_v34 = vpop.permute.xlu1 %1677 }
 0x232   :  { %v10943_v0 = vpop.permute.xlu0 %1679 }
 0x233   :  { %1793 = vrot.lane.b32.xlu1 %v581_v36, %s9770_s18  ;;  %v586_v36 = vld [vmem:[#allocation2 + $0x1a] sm:$0xff] }
 0x234   :  { %1795 = vrot.lane.b32.xlu0 %v582_v40, %s9770_s18 }
 0x235   :  { %v10945_v49 = vpop.permute.xlu1 %1681 }
 0x236   :  { %v10949_v44 = vpop.permute.xlu0 %1683 }
 0x237   :  { %1797 = vrot.lane.b32.xlu1 %v583_v29, %s9770_s18  ;;  %v10961_v29 = vld [vmem:[#allocation2 + $0x32] sm:$0xff] }
 0x238   :  { %1799 = vrot.lane.b32.xlu0 %v584_v21, %s9770_s18 }
 0x239   :  { %v10951_v48 = vpop.permute.xlu1 %1685 }
 0x23a   :  { %v10955_v13 = vpop.permute.xlu0 %1687 }
 0x23b   :  { %1801 = vrot.lane.b32.xlu1 %v585_v30, %s9770_s18  ;;  %v10973_v30 = vld [vmem:[#allocation2 + $0x4a] sm:$0xff] }
 0x23c   :  { %1931 = vrot.lane.b32.xlu0 %v586_v36, %s9771_s19  ;;  %v10977_v36 = vld [vmem:[#allocation2 + $0x52] sm:$0xff] }
 0x23d   :  { %v10957_v58 = vpop.permute.xlu1 %1689 }
 0x23e   :  { %v10963_v40 = vpop.permute.xlu0 %1691 }
 0x23f   :  { %1933 = vrot.lane.b32.xlu1 %v587_v37, %s9771_s19  ;;  %14779 = vst [vmem:[#allocation174_spill] sm:$0xff] %v10963_v40 }
 0x240   :  { %1935 = vrot.lane.b32.xlu0 %v10961_v29, %s9771_s19 }
 0x241   :  { %v10967_v21 = vpop.permute.xlu1 %1693 }
 0x242   :  { %14780 = vst [vmem:[#allocation175_spill] sm:$0xff] %v10967_v21  ;;  %v10975_v26 = vpop.permute.xlu0 %1695  ;;  %v652_v21 = vld [vmem:[#allocation2 + $0x38] sm:$0xff] }
 0x243   :  { %1937 = vrot.lane.b32.xlu1 %v10965_v28, %s9771_s19  ;;  %14781 = vst [vmem:[#allocation176_spill] sm:$0xff] %v10975_v26 }
 0x244   :  { %1939 = vrot.lane.b32.xlu0 %v10973_v30, %s9771_s19 }
 0x245   :  { %v10979_v37 = vpop.permute.xlu1 %1697 }
 0x246   :  { %14782 = vst [vmem:[#allocation177_spill] sm:$0xff] %v10979_v37  ;;  %v10987_v60 = vpop.permute.xlu0 %1699  ;;  %v601_v37 = vld [vmem:[#allocation2 + $0xca] sm:$0xff] }
 0x247   :  { %1941 = vrot.lane.b32.xlu1 %v10977_v36, %s9771_s19  ;;  %14783 = vst [vmem:[#allocation178_spill] sm:$0xff] %v10987_v60 }
 0x248   :  { %1943 = vrot.lane.b32.xlu0 %v10985_v41, %s9771_s19 }
 0x249   :  { %v10991_v7 = vpop.permute.xlu1 %1701 }
 0x24a   :  { %14784 = vst [vmem:[#allocation179_spill] sm:$0xff] %v10991_v7  ;;  %v10999_v22 = vpop.permute.xlu0 %1703  ;;  %v11009_v7 = vld [vmem:[#allocation2 + $0x92] sm:$0xff] }
 0x24b   :  { %1945 = vrot.lane.b32.xlu1 %v10989_v45, %s9771_s19  ;;  %14785 = vst [vmem:[#allocation180_spill] sm:$0xff] %v10999_v22 }
 0x24c   :  { %1947 = vrot.lane.b32.xlu0 %v10997_v24, %s9771_s19 }
 0x24d   :  { %v11003_v54 = vpop.permute.xlu1 %1705 }
 0x24e   :  { %14786 = vst [vmem:[#allocation181_spill] sm:$0xff] %v11003_v54  ;;  %v11011_v60 = vpop.permute.xlu0 %1707  ;;  %v11021_v54 = vld [vmem:[#allocation2 + $0xaa] sm:$0xff] }
 0x24f   :  { %1949 = vrot.lane.b32.xlu1 %v11001_v38, %s9771_s19  ;;  %14787 = vst [vmem:[#allocation182_spill] sm:$0xff] %v11011_v60 }
 0x250   :  { %1951 = vrot.lane.b32.xlu0 %v11009_v7, %s9771_s19 }
 0x251   :  { %v11015_v23 = vpop.permute.xlu1 %1709 }
 0x252   :  { %14788 = vst [vmem:[#allocation183_spill] sm:$0xff] %v11015_v23  ;;  %v11023_v22 = vpop.permute.xlu0 %1711  ;;  %v600_v23 = vld [vmem:[#allocation2 + $0xc2] sm:$0xff] }
 0x253   :  { %1953 = vrot.lane.b32.xlu1 %v11013_v53, %s9771_s19  ;;  %14789 = vst [vmem:[#allocation184_spill] sm:$0xff] %v11023_v22  ;;  %v602_v22 = vld [vmem:[#allocation2 + $0xda] sm:$0xff] }
 0x254   :  { %1955 = vrot.lane.b32.xlu0 %v11021_v54, %s9771_s19 }
 0x255   :  { %v11027_v18 = vpop.permute.xlu1 %1713 }
 0x256   :  { %14790 = vst [vmem:[#allocation185_spill] sm:$0xff] %v11027_v18  ;;  %v11033_v60 = vpop.permute.xlu0 %1715  ;;  %v603_v18 = vld [vmem:[#allocation2 + $0xe2] sm:$0xff] }
 0x257   :  { %1957 = vrot.lane.b32.xlu1 %v11025_v20, %s9771_s19  ;;  %14791 = vst [vmem:[#allocation186_spill] sm:$0xff] %v11033_v60  ;;  %v605_v60 = vld [vmem:[#allocation2 + $0xfa] sm:$0xff] }
 0x258   :  { %1959 = vrot.lane.b32.xlu0 %v600_v23, %s9771_s19  ;;  %v606_v23 = vld [vmem:[#allocation2 + $0x10a] sm:$0xff] }
 0x259   :  { %v11035_v26 = vpop.permute.xlu1 %1717 }
 0x25a   :  { %14792 = vst [vmem:[#allocation187_spill] sm:$0xff] %v11035_v26  ;;  %v11039_v33 = vpop.permute.xlu0 %1719 }
 0x25b   :  { %1961 = vrot.lane.b32.xlu1 %v601_v37, %s9771_s19  ;;  %14793 = vst [vmem:[#allocation188_spill] sm:$0xff] %v11039_v33  ;;  %v607_v33 = vld [vmem:[#allocation2 + $0x112] sm:$0xff] }
 0x25c   :  { %1963 = vrot.lane.b32.xlu0 %v602_v22, %s9771_s19 }
 0x25d   :  { %v11041_v17 = vpop.permute.xlu1 %1721 }
 0x25e   :  { %14794 = vst [vmem:[#allocation189_spill] sm:$0xff] %v11041_v17  ;;  %v11045_v5 = vpop.permute.xlu0 %1723 }
 0x25f   :  { %1965 = vrot.lane.b32.xlu1 %v603_v18, %s9771_s19  ;;  %14795 = vst [vmem:[#allocation190_spill] sm:$0xff] %v11045_v5  ;;  %v608_v18 = vld [vmem:[#allocation2 + $0x122] sm:$0xff]  ;;  %v609_v5 = vld [vmem:[#allocation2 + $0x12a] sm:$0xff] }
 0x260   :  { %1967 = vrot.lane.b32.xlu0 %v604_v3, %s9771_s19  ;;  %v610_v3 = vld [vmem:[#allocation2 + $0x13a] sm:$0xff] }
 0x261   :  { %v11047_v16 = vpop.permute.xlu1 %1725 }
 0x262   :  { %14796 = vst [vmem:[#allocation191_spill] sm:$0xff] %v11047_v16  ;;  %v11051_v37 = vpop.permute.xlu0 %1727 }
 0x263   :  { %1969 = vrot.lane.b32.xlu1 %v605_v60, %s9771_s19  ;;  %14797 = vst [vmem:[#allocation192_spill] sm:$0xff] %v11051_v37  ;;  %v611_v37 = vld [vmem:[#allocation2 + $0x142] sm:$0xff] }
 0x264   :  { %1971 = vrot.lane.b32.xlu0 %v606_v23, %s9771_s19 }
 0x265   :  { %v11053_v26 = vpop.permute.xlu1 %1729 }
 0x266   :  { %14798 = vst [vmem:[#allocation193_spill] sm:$0xff] %v11053_v26  ;;  %v11057_v22 = vpop.permute.xlu0 %1731 }
 0x267   :  { %1973 = vrot.lane.b32.xlu1 %v607_v33, %s9771_s19  ;;  %14799 = vst [vmem:[#allocation194_spill] sm:$0xff] %v11057_v22  ;;  %v612_v33 = vld [vmem:[#allocation2 + $0x152] sm:$0xff]  ;;  %v613_v22 = vld [vmem:[#allocation2 + $0x15a] sm:$0xff] }
 0x268   :  { %1975 = vrot.lane.b32.xlu0 %v608_v18, %s9771_s19 }
 0x269   :  { %v11059_v17 = vpop.permute.xlu1 %1733 }
 0x26a   :  { %14800 = vst [vmem:[#allocation195_spill] sm:$0xff] %v11059_v17  ;;  %v11063_v60 = vpop.permute.xlu0 %1735 }
 0x26b   :  { %1977 = vrot.lane.b32.xlu1 %v609_v5, %s9771_s19  ;;  %14801 = vst [vmem:[#allocation196_spill] sm:$0xff] %v11063_v60  ;;  %v614_v5 = vld [vmem:[#allocation2 + $0x16a] sm:$0xff]  ;;  %v615_v60 = vld [vmem:[#allocation2 + $0x172] sm:$0xff] }
 0x26c   :  { %1979 = vrot.lane.b32.xlu0 %v610_v3, %s9771_s19 }
 0x26d   :  { %v11065_v16 = vpop.permute.xlu1 %1737 }
 0x26e   :  { %14802 = vst [vmem:[#allocation197_spill] sm:$0xff] %v11065_v16  ;;  %v11069_v23 = vpop.permute.xlu0 %1739 }
 0x26f   :  { %1981 = vrot.lane.b32.xlu1 %v611_v37, %s9771_s19  ;;  %14803 = vst [vmem:[#allocation198_spill] sm:$0xff] %v11069_v23  ;;  %v616_v37 = vld [vmem:[#allocation2 + $0x182] sm:$0xff]  ;;  %v617_v23 = vld [vmem:[#allocation2 + $0x18a] sm:$0xff] }
 0x270   :  { %1983 = vrot.lane.b32.xlu0 %v612_v33, %s9771_s19 }
 0x271   :  { %v11071_v26 = vpop.permute.xlu1 %1741 }
 0x272   :  { %14804 = vst [vmem:[#allocation199_spill] sm:$0xff] %v11071_v26  ;;  %v11075_v18 = vpop.permute.xlu0 %1743 }
 0x273   :  { %1985 = vrot.lane.b32.xlu1 %v613_v22, %s9771_s19  ;;  %14805 = vst [vmem:[#allocation200_spill] sm:$0xff] %v11075_v18  ;;  %v618_v22 = vld [vmem:[#allocation2 + $0x1ca] sm:$0xff]  ;;  %v619_v18 = vld [vmem:[#allocation2 + $0x1d2] sm:$0xff] }
 0x274   :  { %1987 = vrot.lane.b32.xlu0 %v614_v5, %s9771_s19 }
 0x275   :  { %v11077_v17 = vpop.permute.xlu1 %1745 }
 0x276   :  { %14806 = vst [vmem:[#allocation201_spill] sm:$0xff] %v11077_v17  ;;  %v11081_v3 = vpop.permute.xlu0 %1747 }
 0x277   :  { %1989 = vrot.lane.b32.xlu1 %v615_v60, %s9771_s19  ;;  %14807 = vst [vmem:[#allocation202_spill] sm:$0xff] %v11081_v3  ;;  %v620_v60 = vld [vmem:[#allocation2 + $0x1e2] sm:$0xff]  ;;  %v621_v3 = vld [vmem:[#allocation2 + $0x1ea] sm:$0xff] }
 0x278   :  { %1991 = vrot.lane.b32.xlu0 %v616_v37, %s9771_s19 }
 0x279   :  { %v11083_v16 = vpop.permute.xlu1 %1749 }
 0x27a   :  { %14808 = vst [vmem:[#allocation203_spill] sm:$0xff] %v11083_v16  ;;  %v11087_v33 = vpop.permute.xlu0 %1751 }
 0x27b   :  { %1993 = vrot.lane.b32.xlu1 %v617_v23, %s9771_s19  ;;  %14809 = vst [vmem:[#allocation204_spill] sm:$0xff] %v11087_v33  ;;  %v622_v23 = vld [vmem:[#allocation2 + $0x1fa] sm:$0xff]  ;;  %v623_v33 = vld [vmem:[#allocation2 + $0x202] sm:$0xff] }
 0x27c   :  { %1995 = vrot.lane.b32.xlu0 %v618_v22, %s9771_s19 }
 0x27d   :  { %v11089_v26 = vpop.permute.xlu1 %1753 }
 0x27e   :  { %14810 = vst [vmem:[#allocation205_spill] sm:$0xff] %v11089_v26  ;;  %v11093_v5 = vpop.permute.xlu0 %1755 }
 0x27f   :  { %1997 = vrot.lane.b32.xlu1 %v619_v18, %s9771_s19  ;;  %14811 = vst [vmem:[#allocation206_spill] sm:$0xff] %v11093_v5  ;;  %v624_v18 = vld [vmem:[#allocation2 + $0x212] sm:$0xff]  ;;  %v625_v5 = vld [vmem:[#allocation2 + $0x21a] sm:$0xff] }
 0x280   :  { %1999 = vrot.lane.b32.xlu0 %v620_v60, %s9771_s19 }
 0x281   :  { %v11095_v17 = vpop.permute.xlu1 %1757 }
 0x282   :  { %14812 = vst [vmem:[#allocation207_spill] sm:$0xff] %v11095_v17  ;;  %v11099_v37 = vpop.permute.xlu0 %1759 }
 0x283   :  { %2001 = vrot.lane.b32.xlu1 %v621_v3, %s9771_s19  ;;  %14813 = vst [vmem:[#allocation208_spill] sm:$0xff] %v11099_v37  ;;  %v626_v3 = vld [vmem:[#allocation2 + $0x22a] sm:$0xff]  ;;  %v627_v37 = vld [vmem:[#allocation2 + $0x232] sm:$0xff] }
 0x284   :  { %2003 = vrot.lane.b32.xlu0 %v622_v23, %s9771_s19 }
 0x285   :  { %v11101_v16 = vpop.permute.xlu1 %1761 }
 0x286   :  { %14814 = vst [vmem:[#allocation209_spill] sm:$0xff] %v11101_v16  ;;  %v11105_v22 = vpop.permute.xlu0 %1763 }
 0x287   :  { %2005 = vrot.lane.b32.xlu1 %v623_v33, %s9771_s19  ;;  %14815 = vst [vmem:[#allocation210_spill] sm:$0xff] %v11105_v22  ;;  %v628_v33 = vld [vmem:[#allocation2 + $0x242] sm:$0xff]  ;;  %v629_v22 = vld [vmem:[#allocation2 + $0x24a] sm:$0xff] }
 0x288   :  { %2007 = vrot.lane.b32.xlu0 %v624_v18, %s9771_s19 }
 0x289   :  { %v11107_v26 = vpop.permute.xlu1 %1765 }
 0x28a   :  { %14816 = vst [vmem:[#allocation211_spill] sm:$0xff] %v11107_v26  ;;  %v11111_v60 = vpop.permute.xlu0 %1767 }
 0x28b   :  { %2009 = vrot.lane.b32.xlu1 %v625_v5, %s9771_s19  ;;  %14817 = vst [vmem:[#allocation212_spill] sm:$0xff] %v11111_v60  ;;  %v630_v5 = vld [vmem:[#allocation2 + $0x25a] sm:$0xff]  ;;  %v631_v60 = vld [vmem:[#allocation2 + $0x262] sm:$0xff] }
 0x28c   :  { %2011 = vrot.lane.b32.xlu0 %v626_v3, %s9771_s19 }
 0x28d   :  { %v11113_v17 = vpop.permute.xlu1 %1769 }
 0x28e   :  { %14818 = vst [vmem:[#allocation213_spill] sm:$0xff] %v11113_v17  ;;  %v11117_v23 = vpop.permute.xlu0 %1771 }
 0x28f   :  { %2013 = vrot.lane.b32.xlu1 %v627_v37, %s9771_s19  ;;  %14819 = vst [vmem:[#allocation214_spill] sm:$0xff] %v11117_v23  ;;  %v632_v37 = vld [vmem:[#allocation2 + $0x272] sm:$0xff]  ;;  %v633_v23 = vld [vmem:[#allocation2 + $0x27a] sm:$0xff] }
 0x290   :  { %2015 = vrot.lane.b32.xlu0 %v628_v33, %s9771_s19 }
 0x291   :  { %v11119_v16 = vpop.permute.xlu1 %1773 }
 0x292   :  { %14820 = vst [vmem:[#allocation215_spill] sm:$0xff] %v11119_v16  ;;  %v11123_v18 = vpop.permute.xlu0 %1775 }
 0x293   :  { %2017 = vrot.lane.b32.xlu1 %v629_v22, %s9771_s19  ;;  %14821 = vst [vmem:[#allocation216_spill] sm:$0xff] %v11123_v18  ;;  %v634_v22 = vld [vmem:[#allocation2 + $0x28a] sm:$0xff]  ;;  %v635_v18 = vld [vmem:[#allocation2 + $0x292] sm:$0xff] }
 0x294   :  { %2019 = vrot.lane.b32.xlu0 %v630_v5, %s9771_s19 }
 0x295   :  { %v11125_v26 = vpop.permute.xlu1 %1777 }
 0x296   :  { %14822 = vst [vmem:[#allocation217_spill] sm:$0xff] %v11125_v26  ;;  %v11129_v3 = vpop.permute.xlu0 %1779 }
 0x297   :  { %2021 = vrot.lane.b32.xlu1 %v631_v60, %s9771_s19  ;;  %14823 = vst [vmem:[#allocation218_spill] sm:$0xff] %v11129_v3  ;;  %v636_v60 = vld [vmem:[#allocation2 + $0x2a2] sm:$0xff]  ;;  %v637_v3 = vld [vmem:[#allocation2 + $0x2aa] sm:$0xff] }
 0x298   :  { %2023 = vrot.lane.b32.xlu0 %v632_v37, %s9771_s19 }
 0x299   :  { %v11131_v17 = vpop.permute.xlu1 %1781 }
 0x29a   :  { %14824 = vst [vmem:[#allocation219_spill] sm:$0xff] %v11131_v17  ;;  %v11135_v33 = vpop.permute.xlu0 %1783 }
 0x29b   :  { %2025 = vrot.lane.b32.xlu1 %v633_v23, %s9771_s19  ;;  %14825 = vst [vmem:[#allocation220_spill] sm:$0xff] %v11135_v33  ;;  %v638_v23 = vld [vmem:[#allocation2 + $0x2ba] sm:$0xff]  ;;  %v639_v33 = vld [vmem:[#allocation2 + $0x2c2] sm:$0xff] }
 0x29c   :  { %2027 = vrot.lane.b32.xlu0 %v634_v22, %s9771_s19 }
 0x29d   :  { %v11137_v16 = vpop.permute.xlu1 %1785 }
 0x29e   :  { %14826 = vst [vmem:[#allocation221_spill] sm:$0xff] %v11137_v16  ;;  %v11141_v5 = vpop.permute.xlu0 %1787 }
 0x29f   :  { %2029 = vrot.lane.b32.xlu1 %v635_v18, %s9771_s19  ;;  %14827 = vst [vmem:[#allocation222_spill] sm:$0xff] %v11141_v5  ;;  %v640_v18 = vld [vmem:[#allocation2 + $0x2d2] sm:$0xff]  ;;  %v641_v5 = vld [vmem:[#allocation2 + $0x2da] sm:$0xff] }
 0x2a0   :  { %2031 = vrot.lane.b32.xlu0 %v636_v60, %s9771_s19 }
 0x2a1   :  { %v11143_v26 = vpop.permute.xlu1 %1789 }
 0x2a2   :  { %14828 = vst [vmem:[#allocation223_spill] sm:$0xff] %v11143_v26  ;;  %v11147_v37 = vpop.permute.xlu0 %1791 }
 0x2a3   :  { %2033 = vrot.lane.b32.xlu1 %v637_v3, %s9771_s19  ;;  %14829 = vst [vmem:[#allocation224_spill] sm:$0xff] %v11147_v37  ;;  %v642_v3 = vld [vmem:[#allocation2 + $0x2ea] sm:$0xff]  ;;  %v643_v37 = vld [vmem:[#allocation2 + $0x2f2] sm:$0xff] }
 0x2a4   :  { %2035 = vrot.lane.b32.xlu0 %v638_v23, %s9771_s19 }
 0x2a5   :  { %v11149_v17 = vpop.permute.xlu1 %1793 }
 0x2a6   :  { %14830 = vst [vmem:[#allocation225_spill] sm:$0xff] %v11149_v17  ;;  %v11153_v22 = vpop.permute.xlu0 %1795 }
 0x2a7   :  { %2037 = vrot.lane.b32.xlu1 %v639_v33, %s9771_s19  ;;  %14831 = vst [vmem:[#allocation226_spill] sm:$0xff] %v11153_v22  ;;  %v644_v33 = vld [vmem:[#allocation2 + $0x302] sm:$0xff]  ;;  %v645_v22 = vld [vmem:[#allocation2 + $0x30a] sm:$0xff] }
 0x2a8   :  { %2039 = vrot.lane.b32.xlu0 %v640_v18, %s9771_s19 }
 0x2a9   :  { %v11155_v16 = vpop.permute.xlu1 %1797 }
 0x2aa   :  { %14832 = vst [vmem:[#allocation227_spill] sm:$0xff] %v11155_v16  ;;  %v11159_v60 = vpop.permute.xlu0 %1799 }
 0x2ab   :  { %2041 = vrot.lane.b32.xlu1 %v641_v5, %s9771_s19  ;;  %14833 = vst [vmem:[#allocation228_spill] sm:$0xff] %v11159_v60  ;;  %v646_v5 = vld [vmem:[#allocation2 + $0x31a] sm:$0xff]  ;;  %v647_v60 = vld [vmem:[#allocation2 + $0x322] sm:$0xff] }
 0x2ac   :  { %2043 = vrot.lane.b32.xlu0 %v642_v3, %s9771_s19 }
 0x2ad   :  { %v11161_v26 = vpop.permute.xlu1 %1801 }
 0x2ae   :  { %14834 = vst [vmem:[#allocation229_spill] sm:$0xff] %v11161_v26  ;;  %v11165_v23 = vpop.permute.xlu0 %1931  ;;  %v649_v26 = vld [vmem:[#allocation2 + $0x33a] sm:$0xff] }
 0x2af   :  { %2045 = vrot.lane.b32.xlu1 %v643_v37, %s9771_s19  ;;  %v648_v37 = vld [vmem:[#allocation2 + $0x332] sm:$0xff] }
 0x2b0   :  { %2047 = vrot.lane.b32.xlu0 %v644_v33, %s9771_s19 }
 0x2b1   :  { %v11167_v17 = vpop.permute.xlu1 %1933 }
 0x2b2   :  { %v11171_v18 = vpop.permute.xlu0 %1935 }
 0x2b3   :  { %2049 = vrot.lane.b32.xlu1 %v645_v22, %s9771_s19  ;;  %v651_v22 = vld [vmem:[#allocation2 + $0x30] sm:$0xff] }
 0x2b4   :  { %2051 = vrot.lane.b32.xlu0 %v646_v5, %s9771_s19 }
 0x2b5   :  { %v11173_v16 = vpop.permute.xlu1 %1937 }
 0x2b6   :  { %v11177_v3 = vpop.permute.xlu0 %1939 }
 0x2b7   :  { %2053 = vrot.lane.b32.xlu1 %v647_v60, %s9771_s19  ;;  %v653_v60 = vld [vmem:[#allocation2 + $0x48] sm:$0xff] }
 0x2b8   :  { %2055 = vrot.lane.b32.xlu0 %v648_v37, %s9771_s19 }
 0x2b9   :  { %v11179_v14 = vpop.permute.xlu1 %1941 }
 0x2ba   :  { %v11183_v33 = vpop.permute.xlu0 %1943 }
 0x2bb   :  { %2057 = vrot.lane.b32.xlu1 %v649_v26, %s9771_s19  ;;  %v655_v26 = vld [vmem:[#allocation2 + $0x60] sm:$0xff] }
 0x2bc   :  { %2187 = vrot.lane.b32.xlu0 %v651_v22, %s9772_s20 }
 0x2bd   :  { %v11185_v40 = vpop.permute.xlu1 %1945 }
 0x2be   :  { %v11189_v5 = vpop.permute.xlu0 %1947 }
 0x2bf   :  { %2189 = vrot.lane.b32.xlu1 %v652_v21, %s9772_s20  ;;  %14835 = vst [vmem:[#allocation230_spill] sm:$0xff] %v11189_v5  ;;  %v657_v21 = vld [vmem:[#allocation2 + $0x78] sm:$0xff]  ;;  %v658_v5 = vld [vmem:[#allocation2 + $0x80] sm:$0xff] }
 0x2c0   :  { %2191 = vrot.lane.b32.xlu0 %v653_v60, %s9772_s20 }
 0x2c1   :  { %v11191_v56 = vpop.permute.xlu1 %1949 }
 0x2c2   :  { %14836 = vst [vmem:[#allocation231_spill] sm:$0xff] %v11191_v56  ;;  %v11195_v37 = vpop.permute.xlu0 %1951 }
 0x2c3   :  { %2193 = vrot.lane.b32.xlu1 %v654_v42, %s9772_s20  ;;  %14837 = vst [vmem:[#allocation232_spill] sm:$0xff] %v11195_v37  ;;  %v659_v42 = vld [vmem:[#allocation2 + $0x90] sm:$0xff]  ;;  %v660_v37 = vld [vmem:[#allocation2 + $0x98] sm:$0xff] }
 0x2c4   :  { %2195 = vrot.lane.b32.xlu0 %v655_v26, %s9772_s20 }
 0x2c5   :  { %v11197_v2 = vpop.permute.xlu1 %1953 }
 0x2c6   :  { %14838 = vst [vmem:[#allocation233_spill] sm:$0xff] %v11197_v2  ;;  %v11201_v22 = vpop.permute.xlu0 %1955 }
 0x2c7   :  { %2197 = vrot.lane.b32.xlu1 %v656_v15, %s9772_s20  ;;  %14839 = vst [vmem:[#allocation234_spill] sm:$0xff] %v11201_v22  ;;  %v661_v15 = vld [vmem:[#allocation2 + $0xa8] sm:$0xff]  ;;  %v662_v22 = vld [vmem:[#allocation2 + $0xb0] sm:$0xff] }
 0x2c8   :  { %2199 = vrot.lane.b32.xlu0 %v657_v21, %s9772_s20 }
 0x2c9   :  { %v11203_v12 = vpop.permute.xlu1 %1957 }
 0x2ca   :  { %14840 = vst [vmem:[#allocation235_spill] sm:$0xff] %v11203_v12  ;;  %v11207_v60 = vpop.permute.xlu0 %1959 }
 0x2cb   :  { %2201 = vrot.lane.b32.xlu1 %v658_v5, %s9772_s20  ;;  %14841 = vst [vmem:[#allocation236_spill] sm:$0xff] %v11207_v60  ;;  %v663_v5 = vld [vmem:[#allocation2 + $0xc0] sm:$0xff]  ;;  %v664_v60 = vld [vmem:[#allocation2 + $0xc8] sm:$0xff] }
 0x2cc   :  { %2203 = vrot.lane.b32.xlu0 %v659_v42, %s9772_s20 }
 0x2cd   :  { %v11209_v56 = vpop.permute.xlu1 %1961 }
 0x2ce   :  { %14842 = vst [vmem:[#allocation237_spill] sm:$0xff] %v11209_v56  ;;  %v11213_v26 = vpop.permute.xlu0 %1963 }
 0x2cf   :  { %2205 = vrot.lane.b32.xlu1 %v660_v37, %s9772_s20  ;;  %14843 = vst [vmem:[#allocation238_spill] sm:$0xff] %v11213_v26  ;;  %v665_v37 = vld [vmem:[#allocation2 + $0xd8] sm:$0xff]  ;;  %v666_v26 = vld [vmem:[#allocation2 + $0xe0] sm:$0xff] }
 0x2d0   :  { %2207 = vrot.lane.b32.xlu0 %v661_v15, %s9772_s20 }
 0x2d1   :  { %v11215_v2 = vpop.permute.xlu1 %1965 }
 0x2d2   :  { %14844 = vst [vmem:[#allocation239_spill] sm:$0xff] %v11215_v2  ;;  %v11219_v21 = vpop.permute.xlu0 %1967 }
 0x2d3   :  { %2209 = vrot.lane.b32.xlu1 %v662_v22, %s9772_s20  ;;  %14845 = vst [vmem:[#allocation240_spill] sm:$0xff] %v11219_v21  ;;  %v667_v22 = vld [vmem:[#allocation2 + $0xf0] sm:$0xff]  ;;  %v668_v21 = vld [vmem:[#allocation2 + $0xf8] sm:$0xff] }
 0x2d4   :  { %2211 = vrot.lane.b32.xlu0 %v663_v5, %s9772_s20 }
 0x2d5   :  { %v11221_v12 = vpop.permute.xlu1 %1969 }
 0x2d6   :  { %14846 = vst [vmem:[#allocation241_spill] sm:$0xff] %v11221_v12  ;;  %v11225_v42 = vpop.permute.xlu0 %1971 }
 0x2d7   :  { %2213 = vrot.lane.b32.xlu1 %v664_v60, %s9772_s20  ;;  %14847 = vst [vmem:[#allocation242_spill] sm:$0xff] %v11225_v42  ;;  %v669_v60 = vld [vmem:[#allocation2 + $0x108] sm:$0xff]  ;;  %v670_v42 = vld [vmem:[#allocation2 + $0x110] sm:$0xff] }
 0x2d8   :  { %2215 = vrot.lane.b32.xlu0 %v665_v37, %s9772_s20 }
 0x2d9   :  { %v11227_v56 = vpop.permute.xlu1 %1973 }
 0x2da   :  { %14848 = vst [vmem:[#allocation243_spill] sm:$0xff] %v11227_v56  ;;  %v11231_v15 = vpop.permute.xlu0 %1975 }
 0x2db   :  { %2217 = vrot.lane.b32.xlu1 %v666_v26, %s9772_s20  ;;  %14849 = vst [vmem:[#allocation244_spill] sm:$0xff] %v11231_v15  ;;  %v671_v26 = vld [vmem:[#allocation2 + $0x120] sm:$0xff]  ;;  %v672_v15 = vld [vmem:[#allocation2 + $0x128] sm:$0xff] }
 0x2dc   :  { %2219 = vrot.lane.b32.xlu0 %v667_v22, %s9772_s20 }
 0x2dd   :  { %v11233_v2 = vpop.permute.xlu1 %1977 }
 0x2de   :  { %14850 = vst [vmem:[#allocation245_spill] sm:$0xff] %v11233_v2  ;;  %v11237_v5 = vpop.permute.xlu0 %1979 }
 0x2df   :  { %2221 = vrot.lane.b32.xlu1 %v668_v21, %s9772_s20  ;;  %14851 = vst [vmem:[#allocation246_spill] sm:$0xff] %v11237_v5  ;;  %v673_v21 = vld [vmem:[#allocation2 + $0x138] sm:$0xff]  ;;  %v674_v5 = vld [vmem:[#allocation2 + $0x140] sm:$0xff] }
 0x2e0   :  { %2223 = vrot.lane.b32.xlu0 %v669_v60, %s9772_s20 }
 0x2e1   :  { %v11239_v12 = vpop.permute.xlu1 %1981 }
 0x2e2   :  { %14852 = vst [vmem:[#allocation247_spill] sm:$0xff] %v11239_v12  ;;  %v11243_v37 = vpop.permute.xlu0 %1983 }
 0x2e3   :  { %2225 = vrot.lane.b32.xlu1 %v670_v42, %s9772_s20  ;;  %14853 = vst [vmem:[#allocation248_spill] sm:$0xff] %v11243_v37  ;;  %v675_v42 = vld [vmem:[#allocation2 + $0x150] sm:$0xff]  ;;  %v676_v37 = vld [vmem:[#allocation2 + $0x158] sm:$0xff] }
 0x2e4   :  { %2227 = vrot.lane.b32.xlu0 %v671_v26, %s9772_s20 }
 0x2e5   :  { %v11245_v56 = vpop.permute.xlu1 %1985 }
 0x2e6   :  { %14854 = vst [vmem:[#allocation249_spill] sm:$0xff] %v11245_v56  ;;  %v11249_v22 = vpop.permute.xlu0 %1987 }
 0x2e7   :  { %2229 = vrot.lane.b32.xlu1 %v672_v15, %s9772_s20  ;;  %14855 = vst [vmem:[#allocation250_spill] sm:$0xff] %v11249_v22  ;;  %v677_v15 = vld [vmem:[#allocation2 + $0x168] sm:$0xff]  ;;  %v678_v22 = vld [vmem:[#allocation2 + $0x170] sm:$0xff] }
 0x2e8   :  { %2231 = vrot.lane.b32.xlu0 %v673_v21, %s9772_s20 }
 0x2e9   :  { %v11251_v2 = vpop.permute.xlu1 %1989 }
 0x2ea   :  { %14856 = vst [vmem:[#allocation251_spill] sm:$0xff] %v11251_v2  ;;  %v11255_v60 = vpop.permute.xlu0 %1991 }
 0x2eb   :  { %2233 = vrot.lane.b32.xlu1 %v674_v5, %s9772_s20  ;;  %14857 = vst [vmem:[#allocation252_spill] sm:$0xff] %v11255_v60  ;;  %v679_v5 = vld [vmem:[#allocation2 + $0x180] sm:$0xff]  ;;  %v680_v60 = vld [vmem:[#allocation2 + $0x188] sm:$0xff] }
 0x2ec   :  { %2235 = vrot.lane.b32.xlu0 %v675_v42, %s9772_s20 }
 0x2ed   :  { %v11257_v12 = vpop.permute.xlu1 %1993 }
 0x2ee   :  { %14858 = vst [vmem:[#allocation253_spill] sm:$0xff] %v11257_v12  ;;  %v11261_v26 = vpop.permute.xlu0 %1995 }
 0x2ef   :  { %2237 = vrot.lane.b32.xlu1 %v676_v37, %s9772_s20  ;;  %14859 = vst [vmem:[#allocation254_spill] sm:$0xff] %v11261_v26  ;;  %v681_v37 = vld [vmem:[#allocation2 + $0x198] sm:$0xff]  ;;  %v682_v26 = vld [vmem:[#allocation2 + $0x1a0] sm:$0xff] }
 0x2f0   :  { %2239 = vrot.lane.b32.xlu0 %v677_v15, %s9772_s20 }
 0x2f1   :  { %v11263_v56 = vpop.permute.xlu1 %1997 }
 0x2f2   :  { %14860 = vst [vmem:[#allocation255_spill] sm:$0xff] %v11263_v56  ;;  %v11267_v21 = vpop.permute.xlu0 %1999 }
 0x2f3   :  { %2241 = vrot.lane.b32.xlu1 %v678_v22, %s9772_s20  ;;  %14861 = vst [vmem:[#allocation256_spill] sm:$0xff] %v11267_v21  ;;  %v683_v22 = vld [vmem:[#allocation2 + $0x1e0] sm:$0xff]  ;;  %v684_v21 = vld [vmem:[#allocation2 + $0x1e8] sm:$0xff] }
 0x2f4   :  { %2243 = vrot.lane.b32.xlu0 %v679_v5, %s9772_s20 }
 0x2f5   :  { %v11269_v2 = vpop.permute.xlu1 %2001 }
 0x2f6   :  { %14862 = vst [vmem:[#allocation257_spill] sm:$0xff] %v11269_v2  ;;  %v11273_v42 = vpop.permute.xlu0 %2003 }
 0x2f7   :  { %2245 = vrot.lane.b32.xlu1 %v680_v60, %s9772_s20  ;;  %14863 = vst [vmem:[#allocation258_spill] sm:$0xff] %v11273_v42  ;;  %v685_v60 = vld [vmem:[#allocation2 + $0x1f8] sm:$0xff]  ;;  %v686_v42 = vld [vmem:[#allocation2 + $0x200] sm:$0xff] }
 0x2f8   :  { %2247 = vrot.lane.b32.xlu0 %v681_v37, %s9772_s20 }
 0x2f9   :  { %v11275_v12 = vpop.permute.xlu1 %2005 }
 0x2fa   :  { %14864 = vst [vmem:[#allocation259_spill] sm:$0xff] %v11275_v12  ;;  %v11279_v15 = vpop.permute.xlu0 %2007 }
 0x2fb   :  { %2249 = vrot.lane.b32.xlu1 %v682_v26, %s9772_s20  ;;  %14865 = vst [vmem:[#allocation260_spill] sm:$0xff] %v11279_v15  ;;  %v687_v26 = vld [vmem:[#allocation2 + $0x210] sm:$0xff]  ;;  %v688_v15 = vld [vmem:[#allocation2 + $0x218] sm:$0xff] }
 0x2fc   :  { %2251 = vrot.lane.b32.xlu0 %v683_v22, %s9772_s20 }
 0x2fd   :  { %v11281_v56 = vpop.permute.xlu1 %2009 }
 0x2fe   :  { %14866 = vst [vmem:[#allocation261_spill] sm:$0xff] %v11281_v56  ;;  %v11285_v5 = vpop.permute.xlu0 %2011 }
 0x2ff   :  { %2253 = vrot.lane.b32.xlu1 %v684_v21, %s9772_s20  ;;  %14867 = vst [vmem:[#allocation262_spill] sm:$0xff] %v11285_v5  ;;  %v689_v21 = vld [vmem:[#allocation2 + $0x228] sm:$0xff]  ;;  %v690_v5 = vld [vmem:[#allocation2 + $0x230] sm:$0xff] }
 0x300   :  { %2255 = vrot.lane.b32.xlu0 %v685_v60, %s9772_s20 }
 0x301   :  { %v11287_v2 = vpop.permute.xlu1 %2013 }
 0x302   :  { %14868 = vst [vmem:[#allocation263_spill] sm:$0xff] %v11287_v2  ;;  %v11291_v37 = vpop.permute.xlu0 %2015 }
 0x303   :  { %2257 = vrot.lane.b32.xlu1 %v686_v42, %s9772_s20  ;;  %14869 = vst [vmem:[#allocation264_spill] sm:$0xff] %v11291_v37  ;;  %v691_v42 = vld [vmem:[#allocation2 + $0x240] sm:$0xff]  ;;  %v692_v37 = vld [vmem:[#allocation2 + $0x248] sm:$0xff] }
 0x304   :  { %2259 = vrot.lane.b32.xlu0 %v687_v26, %s9772_s20 }
 0x305   :  { %v11293_v12 = vpop.permute.xlu1 %2017 }
 0x306   :  { %14870 = vst [vmem:[#allocation265_spill] sm:$0xff] %v11293_v12  ;;  %v11297_v22 = vpop.permute.xlu0 %2019 }
 0x307   :  { %2261 = vrot.lane.b32.xlu1 %v688_v15, %s9772_s20  ;;  %14871 = vst [vmem:[#allocation266_spill] sm:$0xff] %v11297_v22  ;;  %v693_v15 = vld [vmem:[#allocation2 + $0x258] sm:$0xff]  ;;  %v694_v22 = vld [vmem:[#allocation2 + $0x260] sm:$0xff] }
 0x308   :  { %2263 = vrot.lane.b32.xlu0 %v689_v21, %s9772_s20 }
 0x309   :  { %v11299_v56 = vpop.permute.xlu1 %2021 }
 0x30a   :  { %14872 = vst [vmem:[#allocation267_spill] sm:$0xff] %v11299_v56  ;;  %v11303_v60 = vpop.permute.xlu0 %2023  ;;  %v3413_v56 = vld [vmem:[%s14603_s1 + $0x18] sm:$0x7] }
 0x30b   :  { %2265 = vrot.lane.b32.xlu1 %v690_v5, %s9772_s20  ;;  %14873 = vst [vmem:[#allocation268_spill] sm:$0xff] %v11303_v60  ;;  %v695_v5 = vld [vmem:[#allocation2 + $0x270] sm:$0xff]  ;;  %v696_v60 = vld [vmem:[#allocation2 + $0x278] sm:$0xff] }
 0x30c   :  { %2267 = vrot.lane.b32.xlu0 %v691_v42, %s9772_s20  ;;  %v3410_v42 = vld [vmem:[%s14603_s1] sm:$0xff] }
 0x30d   :  { %v11305_v2 = vpop.permute.xlu1 %2025 }
 0x30e   :  { %14874 = vst [vmem:[#allocation269_spill] sm:$0xff] %v11305_v2  ;;  %v11309_v26 = vpop.permute.xlu0 %2027 }
 0x30f   :  { %2269 = vrot.lane.b32.xlu1 %v692_v37, %s9772_s20  ;;  %14875 = vst [vmem:[#allocation270_spill] sm:$0xff] %v11309_v26  ;;  %v3411_v37 = vld [vmem:[%s14603_s1 + $0x8] sm:$0xff] }
 0x310   :  { %2271 = vrot.lane.b32.xlu0 %v693_v15, %s9772_s20  ;;  %v8591_v2 = vpack.c.bf16 %v3411_v37, %v3410_v42  ;;  %v700_v42 = vld [vmem:[#allocation2 + $0x2a8] sm:$0xff] }
 0x311   :  { %v11311_v12 = vpop.permute.xlu1 %2029 }
 0x312   :  { %14876 = vst [vmem:[#allocation271_spill] sm:$0xff] %v11311_v12  ;;  %v11315_v21 = vpop.permute.xlu0 %2031  ;;  %8592 = vmatprep.subr.bf16.mxu0 %v8591_v2  ;;  %v3412_v12 = vld [vmem:[%s14603_s1 + $0x10] sm:$0xff]  ;;  %s9774_s1 = smov 21  }
 0x313   :  { %2273 = vrot.lane.b32.xlu1 %v694_v22, %s9772_s20  ;;  %14877 = vst [vmem:[#allocation272_spill] sm:$0xff] %v11315_v21  ;;  %v697_v22 = vld [vmem:[#allocation2 + $0x288] sm:$0xff]  ;;  %v698_v21 = vld [vmem:[#allocation2 + $0x290] sm:$0xff]  ;;  %8594 = vmatpush3.bf16.msra.mxu0 %v8591_v2 }
 0x314   :  { %2275 = vrot.lane.b32.xlu0 %v695_v5, %s9772_s20  ;;  %v8595_v5 = vpack.c.bf16 %v3413_v56, %v3412_v12  ;;  %v702_v56 = vld [vmem:[#allocation2 + $0x2c0] sm:$0xff] }
 0x315   :  { %v11323_v26 = vpop.permute.xlu1 %2033 }
 0x316   :  { %14878 = vst [vmem:[#allocation273_spill] sm:$0xff] %v11323_v26  ;;  %v11327_v15 = vpop.permute.xlu0 %2035  ;;  %8597 = vmatprep.subr.msk.bf16.mxu0 %vm8596_vm4, %v8595_v5 }
 0x317   :  { %2277 = vrot.lane.b32.xlu1 %v696_v60, %s9772_s20  ;;  %14879 = vst [vmem:[#allocation274_spill] sm:$0xff] %v11327_v15  ;;  %v699_v60 = vld [vmem:[#allocation2 + $0x2a0] sm:$0xff]  ;;  %8600 = vmatpush3.bf16.msk.msra.mxu0 %vm8596_vm4, %v8595_v5 }
 0x318   :  { %2279 = vrot.lane.b32.xlu0 %v697_v22, %s9772_s20  ;;  %v716_v5 = vld [vmem:[#allocation2 + $0x39] sm:$0xff] }
 0x319   :  { %v11335_v26 = vpop.permute.xlu1 %2037 }
 0x31a   :  { %14880 = vst [vmem:[#allocation275_spill] sm:$0xff] %v11335_v26  ;;  %v11339_v2 = vpop.permute.xlu0 %2039  ;;  %v701_v26 = vld [vmem:[#allocation2 + $0x2b8] sm:$0xff] }
 0x31b   :  { %2281 = vrot.lane.b32.xlu1 %v698_v21, %s9772_s20  ;;  %14881 = vst [vmem:[#allocation276_spill] sm:$0xff] %v11339_v2  ;;  %v715_v21 = vld [vmem:[#allocation2 + $0x31] sm:$0xff] }
 0x31c   :  { %2283 = vrot.lane.b32.xlu0 %v699_v60, %s9772_s20 }
 0x31d   :  { %v11341_v37 = vpop.permute.xlu1 %2041 }
 0x31e   :  { %14882 = vst [vmem:[#allocation277_spill] sm:$0xff] %v11341_v37  ;;  %v11345_v12 = vpop.permute.xlu0 %2043  ;;  %v726_v37 = vld [vmem:[#allocation2 + $0xb1] sm:$0xff] }
 0x31f   :  { %2285 = vrot.lane.b32.xlu1 %v700_v42, %s9772_s20  ;;  %14883 = vst [vmem:[#allocation278_spill] sm:$0xff] %v11345_v12 }
 0x320   :  { %2287 = vrot.lane.b32.xlu0 %v701_v26, %s9772_s20  ;;  %v717_v26 = vld [vmem:[#allocation2 + $0x49] sm:$0xff] }
 0x321   :  { %v11347_v22 = vpop.permute.xlu1 %2045 }
 0x322   :  { %14884 = vst [vmem:[#allocation279_spill] sm:$0xff] %v11347_v22  ;;  %v11351_v2 = vpop.permute.xlu0 %2047  ;;  %v724_v22 = vld [vmem:[#allocation2 + $0x99] sm:$0xff] }
 0x323   :  { %2289 = vrot.lane.b32.xlu1 %v702_v56, %s9772_s20  ;;  %14885 = vst [vmem:[#allocation280_spill] sm:$0xff] %v11351_v2 }
 0x324   :  { %2443 = vrot.lane.b32.xlu0 %v715_v21, %s9774_s1 }
 0x325   :  { %v11353_v15 = vpop.permute.xlu1 %2049 }
 0x326   :  { %14886 = vst [vmem:[#allocation281_spill] sm:$0xff] %v11353_v15  ;;  %v11357_v60 = vpop.permute.xlu0 %2051  ;;  %v718_v15 = vld [vmem:[#allocation2 + $0x51] sm:$0xff] }
 0x327   :  { %2445 = vrot.lane.b32.xlu1 %v716_v5, %s9774_s1  ;;  %14887 = vst [vmem:[#allocation282_spill] sm:$0xff] %v11357_v60 }
 0x328   :  { %2699 = vrot.lane.b32.xlu0 %v10961_v29, %s9775_s30 }
 0x329   :  { %v11359_v42 = vpop.permute.xlu1 %2053 }
 0x32a   :  { %14888 = vst [vmem:[#allocation283_spill] sm:$0xff] %v11359_v42  ;;  %v11365_v56 = vpop.permute.xlu0 %2055 }
 0x32b   :  { %2701 = vrot.lane.b32.xlu1 %v10965_v28, %s9775_s30  ;;  %14889 = vst [vmem:[#allocation284_spill] sm:$0xff] %v11365_v56  ;;  %v719_v28 = vld [vmem:[#allocation2 + $0x61] sm:$0xff]  ;;  %v720_v56 = vld [vmem:[#allocation2 + $0x69] sm:$0xff] }
 0x32c   :  { %2447 = vrot.lane.b32.xlu0 %v717_v26, %s9774_s1 }
 0x32d   :  { %v11367_v2 = vpop.permute.xlu1 %2057 }
 0x32e   :  { %14890 = vst [vmem:[#allocation285_spill] sm:$0xff] %v11367_v2  ;;  %v11371_v21 = vpop.permute.xlu0 %2187  ;;  %v722_v2 = vld [vmem:[#allocation2 + $0x81] sm:$0xff] }
 0x32f   :  { %2449 = vrot.lane.b32.xlu1 %v718_v15, %s9774_s1 }
 0x330   :  { %2703 = vrot.lane.b32.xlu0 %v10973_v30, %s9775_s30  ;;  %v721_v30 = vld [vmem:[#allocation2 + $0x79] sm:$0xff] }
 0x331   :  { %v11373_v5 = vpop.permute.xlu1 %2189 }
 0x332   :  { %v11379_v29 = vpop.permute.xlu0 %2191 }
 0x333   :  { %2705 = vrot.lane.b32.xlu1 %v10977_v36, %s9775_s30 }
 0x334   :  { %2451 = vrot.lane.b32.xlu0 %v719_v28, %s9774_s1 }
 0x335   :  { %v11381_v42 = vpop.permute.xlu1 %2193 }
 0x336   :  { %v11385_v15 = vpop.permute.xlu0 %2195 }
 0x337   :  { %2453 = vrot.lane.b32.xlu1 %v720_v56, %s9774_s1 }
 0x338   :  { %2707 = vrot.lane.b32.xlu0 %v10985_v41, %s9775_s30 }
 0x339   :  { %v11387_v26 = vpop.permute.xlu1 %2197 }
 0x33a   :  { %v11393_v36 = vpop.permute.xlu0 %2199 }
 0x33b   :  { %2709 = vrot.lane.b32.xlu1 %v10989_v45, %s9775_s30  ;;  %v723_v45 = vld [vmem:[#allocation2 + $0x91] sm:$0xff] }
 0x33c   :  { %2455 = vrot.lane.b32.xlu0 %v721_v30, %s9774_s1 }
 0x33d   :  { %v11395_v60 = vpop.permute.xlu1 %2201 }
 0x33e   :  { %v11399_v56 = vpop.permute.xlu0 %2203 }
 0x33f   :  { %2457 = vrot.lane.b32.xlu1 %v722_v2, %s9774_s1 }
 0x340   :  { %2711 = vrot.lane.b32.xlu0 %v10997_v24, %s9775_s30  ;;  %v725_v24 = vld [vmem:[#allocation2 + $0xa9] sm:$0xff] }
 0x341   :  { %v11401_v28 = vpop.permute.xlu1 %2205 }
 0x342   :  { %v11407_v41 = vpop.permute.xlu0 %2207 }
 0x343   :  { %2713 = vrot.lane.b32.xlu1 %v11001_v38, %s9775_s30  ;;  %14891 = vst [vmem:[#allocation286_spill] sm:$0xff] %v11407_v41 }
 0x344   :  { %2459 = vrot.lane.b32.xlu0 %v723_v45, %s9774_s1 }
 0x345   :  { %v11409_v12 = vpop.permute.xlu1 %2209 }
 0x346   :  { %v11413_v2 = vpop.permute.xlu0 %2211 }
 0x347   :  { %2461 = vrot.lane.b32.xlu1 %v724_v22, %s9774_s1 }
 0x348   :  { %2715 = vrot.lane.b32.xlu0 %v11009_v7, %s9775_s30 }
 0x349   :  { %v11415_v30 = vpop.permute.xlu1 %2213 }
 0x34a   :  { %14892 = vst [vmem:[#allocation287_spill] sm:$0xff] %v11415_v30  ;;  %v11421_v38 = vpop.permute.xlu0 %2215 }
 0x34b   :  { %2717 = vrot.lane.b32.xlu1 %v11013_v53, %s9775_s30  ;;  %14893 = vst [vmem:[#allocation288_spill] sm:$0xff] %v11421_v38  ;;  %v727_v53 = vld [vmem:[#allocation2 + $0xc1] sm:$0xff]  ;;  %v728_v38 = vld [vmem:[#allocation2 + $0xc9] sm:$0xff] }
 0x34c   :  { %2463 = vrot.lane.b32.xlu0 %v725_v24, %s9774_s1 }
 0x34d   :  { %v11423_v41 = vpop.permute.xlu1 %2217 }
 0x34e   :  { %14894 = vst [vmem:[#allocation289_spill] sm:$0xff] %v11423_v41  ;;  %v11427_v22 = vpop.permute.xlu0 %2219 }
 0x34f   :  { %2465 = vrot.lane.b32.xlu1 %v726_v37, %s9774_s1  ;;  %14895 = vst [vmem:[#allocation290_spill] sm:$0xff] %v11427_v22  ;;  %v791_v37 = vld [vmem:[#allocation2 + $0xc2] sm:$0xff] }
 0x350   :  { %2719 = vrot.lane.b32.xlu0 %v11021_v54, %s9775_s30 }
 0x351   :  { %v11429_v45 = vpop.permute.xlu1 %2221 }
 0x352   :  { %14896 = vst [vmem:[#allocation291_spill] sm:$0xff] %v11429_v45  ;;  %v11435_v7 = vpop.permute.xlu0 %2223  ;;  %v792_v45 = vld [vmem:[#allocation2 + $0xca] sm:$0xff] }
 0x353   :  { %2721 = vrot.lane.b32.xlu1 %v11025_v20, %s9775_s30  ;;  %14897 = vst [vmem:[#allocation292_spill] sm:$0xff] %v11435_v7  ;;  %v729_v20 = vld [vmem:[#allocation2 + $0xd9] sm:$0xff]  ;;  %v730_v7 = vld [vmem:[#allocation2 + $0xe1] sm:$0xff] }
 0x354   :  { %2467 = vrot.lane.b32.xlu0 %v727_v53, %s9774_s1 }
 0x355   :  { %v11437_v30 = vpop.permute.xlu1 %2225 }
 0x356   :  { %14898 = vst [vmem:[#allocation293_spill] sm:$0xff] %v11437_v30  ;;  %v11441_v24 = vpop.permute.xlu0 %2227 }
 0x357   :  { %2469 = vrot.lane.b32.xlu1 %v728_v38, %s9774_s1  ;;  %14899 = vst [vmem:[#allocation294_spill] sm:$0xff] %v11441_v24  ;;  %v793_v38 = vld [vmem:[#allocation2 + $0xda] sm:$0xff]  ;;  %v794_v24 = vld [vmem:[#allocation2 + $0xe2] sm:$0xff] }
 0x358   :  { %2723 = vrot.lane.b32.xlu0 %v791_v37, %s9775_s30 }
 0x359   :  { %v11443_v22 = vpop.permute.xlu1 %2229 }
 0x35a   :  { %14900 = vst [vmem:[#allocation295_spill] sm:$0xff] %v11443_v22  ;;  %v11447_v54 = vpop.permute.xlu0 %2231 }
 0x35b   :  { %2725 = vrot.lane.b32.xlu1 %v792_v45, %s9775_s30  ;;  %14901 = vst [vmem:[#allocation296_spill] sm:$0xff] %v11447_v54  ;;  %v731_v45 = vld [vmem:[#allocation2 + $0xf1] sm:$0xff]  ;;  %v732_v54 = vld [vmem:[#allocation2 + $0xf9] sm:$0xff] }
 0x35c   :  { %2471 = vrot.lane.b32.xlu0 %v729_v20, %s9774_s1 }
 0x35d   :  { %v11449_v41 = vpop.permute.xlu1 %2233 }
 0x35e   :  { %14902 = vst [vmem:[#allocation297_spill] sm:$0xff] %v11449_v41  ;;  %v11453_v53 = vpop.permute.xlu0 %2235 }
 0x35f   :  { %2473 = vrot.lane.b32.xlu1 %v730_v7, %s9774_s1  ;;  %14903 = vst [vmem:[#allocation298_spill] sm:$0xff] %v11453_v53  ;;  %v795_v7 = vld [vmem:[#allocation2 + $0xf2] sm:$0xff]  ;;  %v796_v53 = vld [vmem:[#allocation2 + $0xfa] sm:$0xff] }
 0x360   :  { %2727 = vrot.lane.b32.xlu0 %v793_v38, %s9775_s30 }
 0x361   :  { %v11455_v30 = vpop.permute.xlu1 %2237 }
 0x362   :  { %14904 = vst [vmem:[#allocation299_spill] sm:$0xff] %v11455_v30  ;;  %v11459_v37 = vpop.permute.xlu0 %2239 }
 0x363   :  { %2729 = vrot.lane.b32.xlu1 %v794_v24, %s9775_s30  ;;  %14905 = vst [vmem:[#allocation300_spill] sm:$0xff] %v11459_v37  ;;  %v733_v24 = vld [vmem:[#allocation2 + $0x109] sm:$0xff]  ;;  %v734_v37 = vld [vmem:[#allocation2 + $0x111] sm:$0xff] }
 0x364   :  { %2475 = vrot.lane.b32.xlu0 %v731_v45, %s9774_s1 }
 0x365   :  { %v11461_v22 = vpop.permute.xlu1 %2241 }
 0x366   :  { %14906 = vst [vmem:[#allocation301_spill] sm:$0xff] %v11461_v22  ;;  %v11465_v20 = vpop.permute.xlu0 %2243 }
 0x367   :  { %2477 = vrot.lane.b32.xlu1 %v732_v54, %s9774_s1  ;;  %14907 = vst [vmem:[#allocation302_spill] sm:$0xff] %v11465_v20  ;;  %v797_v54 = vld [vmem:[#allocation2 + $0x10a] sm:$0xff]  ;;  %v798_v20 = vld [vmem:[#allocation2 + $0x112] sm:$0xff] }
 0x368   :  { %2731 = vrot.lane.b32.xlu0 %v795_v7, %s9775_s30 }
 0x369   :  { %v11467_v41 = vpop.permute.xlu1 %2245 }
 0x36a   :  { %14908 = vst [vmem:[#allocation303_spill] sm:$0xff] %v11467_v41  ;;  %v11471_v38 = vpop.permute.xlu0 %2247 }
 0x36b   :  { %2733 = vrot.lane.b32.xlu1 %v796_v53, %s9775_s30  ;;  %14909 = vst [vmem:[#allocation304_spill] sm:$0xff] %v11471_v38  ;;  %v735_v53 = vld [vmem:[#allocation2 + $0x121] sm:$0xff]  ;;  %v736_v38 = vld [vmem:[#allocation2 + $0x129] sm:$0xff] }
 0x36c   :  { %2479 = vrot.lane.b32.xlu0 %v733_v24, %s9774_s1 }
 0x36d   :  { %v11473_v30 = vpop.permute.xlu1 %2249 }
 0x36e   :  { %14910 = vst [vmem:[#allocation305_spill] sm:$0xff] %v11473_v30  ;;  %v11477_v45 = vpop.permute.xlu0 %2251 }
 0x36f   :  { %2481 = vrot.lane.b32.xlu1 %v734_v37, %s9774_s1  ;;  %14911 = vst [vmem:[#allocation306_spill] sm:$0xff] %v11477_v45  ;;  %v799_v37 = vld [vmem:[#allocation2 + $0x122] sm:$0xff]  ;;  %v800_v45 = vld [vmem:[#allocation2 + $0x12a] sm:$0xff] }
 0x370   :  { %2735 = vrot.lane.b32.xlu0 %v797_v54, %s9775_s30 }
 0x371   :  { %v11479_v22 = vpop.permute.xlu1 %2253 }
 0x372   :  { %14912 = vst [vmem:[#allocation307_spill] sm:$0xff] %v11479_v22  ;;  %v11483_v7 = vpop.permute.xlu0 %2255 }
 0x373   :  { %2737 = vrot.lane.b32.xlu1 %v798_v20, %s9775_s30  ;;  %14913 = vst [vmem:[#allocation308_spill] sm:$0xff] %v11483_v7  ;;  %v737_v20 = vld [vmem:[#allocation2 + $0x139] sm:$0xff]  ;;  %v738_v7 = vld [vmem:[#allocation2 + $0x141] sm:$0xff] }
 0x374   :  { %2483 = vrot.lane.b32.xlu0 %v735_v53, %s9774_s1 }
 0x375   :  { %v11485_v41 = vpop.permute.xlu1 %2257 }
 0x376   :  { %14914 = vst [vmem:[#allocation309_spill] sm:$0xff] %v11485_v41  ;;  %v11489_v24 = vpop.permute.xlu0 %2259 }
 0x377   :  { %2485 = vrot.lane.b32.xlu1 %v736_v38, %s9774_s1  ;;  %14915 = vst [vmem:[#allocation310_spill] sm:$0xff] %v11489_v24  ;;  %v801_v38 = vld [vmem:[#allocation2 + $0x13a] sm:$0xff]  ;;  %v802_v24 = vld [vmem:[#allocation2 + $0x142] sm:$0xff] }
 0x378   :  { %2739 = vrot.lane.b32.xlu0 %v799_v37, %s9775_s30 }
 0x379   :  { %v11491_v30 = vpop.permute.xlu1 %2261 }
 0x37a   :  { %14916 = vst [vmem:[#allocation311_spill] sm:$0xff] %v11491_v30  ;;  %v11495_v54 = vpop.permute.xlu0 %2263 }
 0x37b   :  { %2741 = vrot.lane.b32.xlu1 %v800_v45, %s9775_s30  ;;  %14917 = vst [vmem:[#allocation312_spill] sm:$0xff] %v11495_v54  ;;  %v739_v45 = vld [vmem:[#allocation2 + $0x151] sm:$0xff]  ;;  %v740_v54 = vld [vmem:[#allocation2 + $0x159] sm:$0xff] }
 0x37c   :  { %2487 = vrot.lane.b32.xlu0 %v737_v20, %s9774_s1 }
 0x37d   :  { %v11497_v22 = vpop.permute.xlu1 %2265 }
 0x37e   :  { %14918 = vst [vmem:[#allocation313_spill] sm:$0xff] %v11497_v22  ;;  %v11501_v53 = vpop.permute.xlu0 %2267 }
 0x37f   :  { %2489 = vrot.lane.b32.xlu1 %v738_v7, %s9774_s1  ;;  %14919 = vst [vmem:[#allocation314_spill] sm:$0xff] %v11501_v53  ;;  %v803_v7 = vld [vmem:[#allocation2 + $0x152] sm:$0xff]  ;;  %v804_v53 = vld [vmem:[#allocation2 + $0x15a] sm:$0xff] }
 0x380   :  { %2743 = vrot.lane.b32.xlu0 %v801_v38, %s9775_s30 }
 0x381   :  { %v11503_v41 = vpop.permute.xlu1 %2269 }
 0x382   :  { %14920 = vst [vmem:[#allocation315_spill] sm:$0xff] %v11503_v41  ;;  %v11507_v37 = vpop.permute.xlu0 %2271 }
 0x383   :  { %2745 = vrot.lane.b32.xlu1 %v802_v24, %s9775_s30  ;;  %14921 = vst [vmem:[#allocation316_spill] sm:$0xff] %v11507_v37  ;;  %v741_v24 = vld [vmem:[#allocation2 + $0x169] sm:$0xff]  ;;  %v742_v37 = vld [vmem:[#allocation2 + $0x171] sm:$0xff] }
 0x384   :  { %2491 = vrot.lane.b32.xlu0 %v739_v45, %s9774_s1 }
 0x385   :  { %v11509_v30 = vpop.permute.xlu1 %2273 }
 0x386   :  { %14922 = vst [vmem:[#allocation317_spill] sm:$0xff] %v11509_v30  ;;  %v11513_v20 = vpop.permute.xlu0 %2275 }
 0x387   :  { %2493 = vrot.lane.b32.xlu1 %v740_v54, %s9774_s1  ;;  %14923 = vst [vmem:[#allocation318_spill] sm:$0xff] %v11513_v20  ;;  %v805_v54 = vld [vmem:[#allocation2 + $0x16a] sm:$0xff]  ;;  %v806_v20 = vld [vmem:[#allocation2 + $0x172] sm:$0xff] }
 0x388   :  { %2747 = vrot.lane.b32.xlu0 %v803_v7, %s9775_s30  ;;  %v266_v7 = vld [vmem:[#allocation2] sm:$0xff] }
 0x389   :  { %v11515_v22 = vpop.permute.xlu1 %2277 }
 0x38a   :  { %14924 = vst [vmem:[#allocation319_spill] sm:$0xff] %v11515_v22  ;;  %v11519_v38 = vpop.permute.xlu0 %2279 }
 0x38b   :  { %2749 = vrot.lane.b32.xlu1 %v804_v53, %s9775_s30  ;;  %14925 = vst [vmem:[#allocation320_spill] sm:$0xff] %v11519_v38  ;;  %v743_v53 = vld [vmem:[#allocation2 + $0x181] sm:$0xff] }
 0x38c   :  { %2495 = vrot.lane.b32.xlu0 %v741_v24, %s9774_s1  ;;  %v267_v38 = vld [vmem:[#allocation2 + $0x8] sm:$0xff] }
 0x38d   :  { %v11521_v41 = vpop.permute.xlu1 %2281 }
 0x38e   :  { %14926 = vst [vmem:[#allocation321_spill] sm:$0xff] %v11521_v41  ;;  %v11525_v45 = vpop.permute.xlu0 %2283  ;;  %v744_v41 = vld [vmem:[#allocation2 + $0x189] sm:$0xff] }
 0x38f   :  { %2497 = vrot.lane.b32.xlu1 %v742_v37, %s9774_s1  ;;  %v2891_v37 = vsel %vm27_vm0, %v266_v7, %v10345_v57  ;;  %v808_v7 = vld [vmem:[#allocation2 + $0x18a] sm:$0xff] }
 0x390   :  { %2751 = vrot.lane.b32.xlu0 %v805_v54, %s9775_s30  ;;  %v2892_v54 = vsel %vm27_vm0, %v267_v38, %v10351_v61 }
 0x391   :  { %v11527_v30 = vpop.permute.xlu1 %2285 }
 0x392   :  { %14927 = vst [vmem:[#allocation322_spill] sm:$0xff] %v11527_v30  ;;  %v11531_v22 = vpop.permute.xlu0 %2287  ;;  %v2957_v30 = vsel %vm2955_vm5, %v2892_v54, %v10547_v47 }
 0x393   :  { %2753 = vrot.lane.b32.xlu1 %v806_v20, %s9775_s30  ;;  %14928 = vst [vmem:[#allocation323_spill] sm:$0xff] %v11531_v22  ;;  %v2956_v20 = vsel %vm2955_vm5, %v2891_v37, %v10545_v35  ;;  %v807_v22 = vld [vmem:[#allocation2 + $0x182] sm:$0xff] }
 0x394   :  { %2499 = vrot.lane.b32.xlu0 %v743_v53, %s9774_s1  ;;  %v3022_v53 = vsel %vm3020_vm6, %v2957_v30, %v10747_v9 }
 0x395   :  { %v11533_v24 = vpop.permute.xlu1 %2289 }
 0x396   :  { %14929 = vst [vmem:[#allocation324_spill] sm:$0xff] %v11533_v24  ;;  %v3021_v24 = vsel %vm3020_vm6, %v2956_v20, %v10745_v51  ;;  %v2444_v57 = vpop.permute.xlu0 %2443 }
 0x397   :  { %2501 = vrot.lane.b32.xlu1 %v744_v41, %s9774_s1  ;;  %v3086_v61 = vsel %vm3085_vm7, %v3021_v24, %v10937_v32  ;;  %v3087_v41 = vsel %vm3085_vm7, %v3022_v53, %v10939_v34  ;;  %v745_v32 = vld [vmem:[#allocation2 + $0x199] sm:$0xff] }
 0x398   :  { %v3151_v47 = vsel %vm3150_vm8, %v3086_v61, %v11165_v23  ;;  %2755 = vrot.lane.b32.xlu0 %v807_v22, %s9775_s30  ;;  %v3152_v51 = vsel %vm3150_vm8, %v3087_v41, %v11167_v17  ;;  %v746_v23 = vld [vmem:[#allocation2 + $0x1a1] sm:$0xff]  ;;  %v9680_v17 = vld [vmem:[#allocation2 + $0x18] sm:$0xff] }
 0x399   :  { %v2446_v35 = vpop.permute.xlu1 %2445  ;;  %v3216_v9 = vsel %vm3215_vm9, %v3151_v47, %v11371_v21  ;;  %v3217_v30 = vsel %vm3215_vm9, %v3152_v51, %v11373_v5  ;;  %v2893_v21 = vsel %vm27_vm0, %v9680_v17, %v10347_v59  ;;  %v9681_v5 = vld [vmem:[#allocation2 + $0x20] sm:$0xff] }
 0x39a   :  { %v3281_v34 = vsel %vm3280_vm10, %v3216_v9, %v2444_v57  ;;  %v2700_v38 = vpop.permute.xlu0 %2699  ;;  %v3282_v22 = vsel %vm3280_vm10, %v3217_v30, %v2446_v35  ;;  %v2894_v20 = vsel %vm27_vm0, %v9681_v5, %v10353_v63  ;;  %v2958_v57 = vsel %vm2955_vm5, %v2893_v21, %v10559_v11  ;;  %v810_v35 = vld [vmem:[#allocation2 + $0x1a2] sm:$0xff]  ;;  %v812_v21 = vld [vmem:[#allocation2 + $0x1ea] sm:$0xff] }
 0x39b   :  { %2757 = vrot.lane.b32.xlu1 %v808_v7, %s9775_s30  ;;  %v3346_v37 = vsel %vm3345_vm11, %v3281_v34, %v2700_v38  ;;  %v809_v7 = vld [vmem:[#allocation2 + $0x19a] sm:$0xff]  ;;  %v2959_v59 = vsel %vm2955_vm5, %v2894_v20, %v10561_v27  ;;  %v3023_v53 = vsel %vm3020_vm6, %v2958_v57, %v10751_v52  ;;  %v9682_v38 = vld [vmem:[#allocation2 + $0x30] sm:$0xff] }
 0x39c   :  { %2503 = vrot.lane.b32.xlu0 %v745_v32, %s9774_s1  ;;  %8372 = vmatprep.mubr.msk.f32.mxu0 %vm3421_vm12, %v3346_v37  ;;  %v3024_v41 = vsel %vm3020_vm6, %v2959_v59, %v10753_v50  ;;  %v3088_v63 = vsel %vm3085_vm7, %v3023_v53, %v10943_v0  ;;  %v747_v50 = vld [vmem:[#allocation2 + $0x1e1] sm:$0xff]  ;;  %v748_v32 = vld [vmem:[#allocation2 + $0x1e9] sm:$0xff] }
 0x39d   :  { %v2702_v24 = vpop.permute.xlu1 %2701  ;;  %v3089_v47 = vsel %vm3085_vm7, %v3024_v41, %v10945_v49  ;;  %v3153_v51 = vsel %vm3150_vm8, %v3088_v63, %v11171_v18  ;;  %v813_v63 = vld [vmem:[#allocation2 + $0x1fa] sm:$0xff] }
 0x39e   :  { %v3347_v54 = vsel %vm3345_vm11, %v3282_v22, %v2702_v24  ;;  %v2448_v61 = vpop.permute.xlu0 %2447  ;;  %v3154_v27 = vsel %vm3150_vm8, %v3089_v47, %v11173_v16  ;;  %v3218_v52 = vsel %vm3215_vm9, %v3153_v51, %v11379_v29  ;;  %v2895_v16 = vsel %vm27_vm0, %v9682_v38, %v10357_v1  ;;  %v811_v24 = vld [vmem:[#allocation2 + $0x1e2] sm:$0xff]  ;;  %v14931_v38 = vld [vmem:[#allocation62_spill] sm:$0xff] }
 0x39f   :  { %2505 = vrot.lane.b32.xlu1 %v746_v23, %s9774_s1  ;;  %8373 = vmatmul.mubr.msk.f32.vlgmr.msra.gmra.mrb[0].mxu0 %vm3421_vm12, %v3347_v54  ;;  %v3219_v0 = vsel %vm3215_vm9, %v3154_v27, %v11381_v42  ;;  %v3283_v9 = vsel %vm3280_vm10, %v3218_v52, %v2448_v61  ;;  %v9683_v42 = vld [vmem:[#allocation2 + $0x38] sm:$0xff]  ;;  %v2960_v22 = vsel %vm2955_vm5, %v2895_v16, %v10565_v19  ;;  %v9684_v61 = vld [vmem:[#allocation2 + $0x48] sm:$0xff] }
 0x3a0   :  { %2759 = vrot.lane.b32.xlu0 %v809_v7, %s9775_s30  ;;  %v2896_v23 = vsel %vm27_vm0, %v9683_v42, %v10359_v4  ;;  %v3025_v37 = vsel %vm3020_vm6, %v2960_v22, %v10757_v43  ;;  %v750_v7 = vld [vmem:[#allocation2 + $0x201] sm:$0xff] }
 0x3a1   :  { %v2450_v11 = vpop.permute.xlu1 %2449  ;;  %v2961_v1 = vsel %vm2955_vm5, %v2896_v23, %v10567_v39  ;;  %v3090_v4 = vsel %vm3085_vm7, %v3025_v37, %v10949_v44  ;;  %v814_v51 = vld [vmem:[#allocation2 + $0x202] sm:$0xff]  ;;  %v14933_v23 = vld [vmem:[#allocation118_spill] sm:$0xff] }
 0x3a2   :  { %v2704_v49 = vpop.permute.xlu0 %2703  ;;  %v3284_v18 = vsel %vm3280_vm10, %v3219_v0, %v2450_v11  ;;  %v3026_v54 = vsel %vm3020_vm6, %v2961_v1, %v10759_v46  ;;  %v3155_v20 = vsel %vm3150_vm8, %v3090_v4, %v11177_v3  ;;  %v749_v46 = vld [vmem:[#allocation2 + $0x1f9] sm:$0xff]  ;;  %v14932_v42 = vld [vmem:[#allocation63_spill] sm:$0xff] }
 0x3a3   :  { %2761 = vrot.lane.b32.xlu1 %v810_v35, %s9775_s30  ;;  %v3348_v30 = vsel %vm3345_vm11, %v3283_v9, %v2704_v49  ;;  %v3091_v5 = vsel %vm3085_vm7, %v3026_v54, %v10951_v48  ;;  %v3220_v43 = vsel %vm3215_vm9, %v3155_v20, %v11385_v15  ;;  %v752_v9 = vld [vmem:[#allocation2 + $0x219] sm:$0xff]  ;;  %v14934_v37 = vld [vmem:[#allocation119_spill] sm:$0xff] }
 0x3a4   :  { %2507 = vrot.lane.b32.xlu0 %v747_v50, %s9774_s1  ;;  %8375 = vmatprep.mubr.msk.f32.mxu0 %vm3421_vm12, %v3348_v30  ;;  %v3156_v39 = vsel %vm3150_vm8, %v3091_v5, %v11179_v14  ;;  %v2897_v14 = vsel %vm27_vm0, %v9684_v61, %v10363_v6  ;;  %v14930_v30 = vld [vmem:[#allocation7_spill] sm:$0xff]  ;;  %v816_v1 = vld [vmem:[#allocation2 + $0x21a] sm:$0xff] }
 0x3a5   :  { %v2706_v34 = vpop.permute.xlu1 %2705  ;;  %v3221_v44 = vsel %vm3215_vm9, %v3156_v39, %v11387_v26  ;;  %v9685_v26 = vld [vmem:[#allocation2 + $0x50] sm:$0xff]  ;;  %v2962_v41 = vsel %vm2955_vm5, %v2897_v14, %v10571_v62  ;;  %v14937_v20 = vld [vmem:[#allocation230_spill] sm:$0xff] }
 0x3a6   :  { %v3349_v29 = vsel %vm3345_vm11, %v3284_v18, %v2706_v34  ;;  %v2452_v17 = vpop.permute.xlu0 %2451  ;;  %v2898_v35 = vsel %vm27_vm0, %v9685_v26, %v10365_v8  ;;  %v3027_v11 = vsel %vm3020_vm6, %v2962_v41, %v10763_v55  ;;  %v9686_v18 = vld [vmem:[#allocation2 + $0x60] sm:$0xff]  ;;  %v14939_v26 = vld [vmem:[#allocation8_spill] sm:$0xff]  ;;  %v14940_v41 = vld [vmem:[#allocation9_spill] sm:$0xff] }
 0x3a7   :  { %2509 = vrot.lane.b32.xlu1 %v748_v32, %s9774_s1  ;;  %8376 = vmatmul.mubr.msk.f32.gmra.mrb[2].mxu0 %vm3421_vm12, %v3349_v29  ;;  %v3285_v57 = vsel %vm3280_vm10, %v3220_v43, %v2452_v17  ;;  %v2963_v6 = vsel %vm2955_vm5, %v2898_v35, %v10573_v31  ;;  %v3092_v8 = vsel %vm3085_vm7, %v3027_v11, %v10955_v13  ;;  %v815_v29 = vld [vmem:[#allocation2 + $0x212] sm:$0xff]  ;;  %v14938_v43 = vld [vmem:[#allocation231_spill] sm:$0xff] }
 0x3a8   :  { %2763 = vrot.lane.b32.xlu0 %v811_v24, %s9775_s30  ;;  %v3028_v27 = vsel %vm3020_vm6, %v2963_v6, %v10765_v25  ;;  %v3157_v50 = vsel %vm3150_vm8, %v3092_v8, %v11183_v33  ;;  %v751_v25 = vld [vmem:[#allocation2 + $0x211] sm:$0xff] }
 0x3a9   :  { %v2454_v19 = vpop.permute.xlu1 %2453  ;;  %v3093_v52 = vsel %vm3085_vm7, %v3028_v27, %v10957_v58  ;;  %v3222_v55 = vsel %vm3215_vm9, %v3157_v50, %v11393_v36  ;;  %v14941_v6 = vld [vmem:[#allocation64_spill] sm:$0xff]  ;;  %v818_v50 = vld [vmem:[#allocation2 + $0x232] sm:$0xff] }
 0x3aa   :  { %v2708_v48 = vpop.permute.xlu0 %2707  ;;  %v3286_v3 = vsel %vm3280_vm10, %v3221_v44, %v2454_v19  ;;  %v3158_v31 = vsel %vm3150_vm8, %v3093_v52, %v11185_v40  ;;  %v2899_v40 = vsel %vm27_vm0, %v9686_v18, %v10369_v10  ;;  %v14936_v19 = vld [vmem:[#allocation175_spill] sm:$0xff]  ;;  %v14943_v8 = vld [vmem:[#allocation120_spill] sm:$0xff] }
 0x3ab   :  { %2765 = vrot.lane.b32.xlu1 %v812_v21, %s9775_s30  ;;  %v3350_v59 = vsel %vm3345_vm11, %v3285_v57, %v2708_v48  ;;  %v3223_v13 = vsel %vm3215_vm9, %v3158_v31, %v11395_v60  ;;  %v9687_v60 = vld [vmem:[#allocation2 + $0x68] sm:$0xff]  ;;  %v2964_v16 = vsel %vm2955_vm5, %v2899_v40, %v14931_v38  ;;  %v14935_v21 = vld [vmem:[#allocation174_spill] sm:$0xff]  ;;  %v14944_v31 = vld [vmem:[#allocation121_spill] sm:$0xff] }
 0x3ac   :  { %2511 = vrot.lane.b32.xlu0 %v749_v46, %s9774_s1  ;;  %8378 = vmatprep.mubr.msk.f32.mxu0 %vm3421_vm12, %v3350_v59  ;;  %v2900_v34 = vsel %vm27_vm0, %v9687_v60, %v14930_v30  ;;  %v3029_v22 = vsel %vm3020_vm6, %v2964_v16, %v14933_v23  ;;  %v753_v57 = vld [vmem:[#allocation2 + $0x229] sm:$0xff]  ;;  %v754_v59 = vld [vmem:[#allocation2 + $0x231] sm:$0xff]  ;;  %v14949_v40 = vld [vmem:[#allocation286_spill] sm:$0xff] }
 0x3ad   :  { %v2710_v53 = vpop.permute.xlu1 %2709  ;;  %v2965_v10 = vsel %vm2955_vm5, %v2900_v34, %v14932_v42  ;;  %v3094_v54 = vsel %vm3085_vm7, %v3029_v22, %v14935_v21  ;;  %v755_v60 = vld [vmem:[#allocation2 + $0x241] sm:$0xff]  ;;  %v756_v16 = vld [vmem:[#allocation2 + $0x249] sm:$0xff] }
 0x3ae   :  { %v3351_v15 = vsel %vm3345_vm11, %v3286_v3, %v2710_v53  ;;  %v2456_v47 = vpop.permute.xlu0 %2455  ;;  %v3030_v17 = vsel %vm3020_vm6, %v2965_v10, %v14934_v37  ;;  %v3159_v39 = vsel %vm3150_vm8, %v3094_v54, %v14937_v20  ;;  %v9690_v23 = vld [vmem:[#allocation2 + $0x90] sm:$0xff]  ;;  %v14950_v22 = vld [vmem:[#allocation10_spill] sm:$0xff]  ;;  %v14951_v37 = vld [vmem:[#allocation11_spill] sm:$0xff] }
 0x3af   :  { %2513 = vrot.lane.b32.xlu1 %v750_v7, %s9774_s1  ;;  %8379 = vmatmul.mubr.msk.f32.gmra.mrb[4].mxu0 %vm3421_vm12, %v3351_v15  ;;  %v3287_v0 = vsel %vm3280_vm10, %v3222_v55, %v2456_v47  ;;  %v3095_v5 = vsel %vm3085_vm7, %v3030_v17, %v14936_v19  ;;  %v3224_v44 = vsel %vm3215_vm9, %v3159_v39, %v11399_v56  ;;  %v9688_v15 = vld [vmem:[#allocation2 + $0x78] sm:$0xff]  ;;  %v817_v47 = vld [vmem:[#allocation2 + $0x22a] sm:$0xff]  ;;  %v14953_v19 = vld [vmem:[#allocation67_spill] sm:$0xff] }
 0x3b0   :  { %2767 = vrot.lane.b32.xlu0 %v813_v63, %s9775_s30  ;;  %v3160_v46 = vsel %vm3150_vm8, %v3095_v5, %v14938_v43  ;;  %v2901_v35 = vsel %vm27_vm0, %v9688_v15, %v14939_v26  ;;  %v14952_v21 = vld [vmem:[#allocation66_spill] sm:$0xff]  ;;  %v14959_v15 = vld [vmem:[#allocation235_spill] sm:$0xff] }
 0x3b1   :  { %v2458_v62 = vpop.permute.xlu1 %2457  ;;  %v3225_v48 = vsel %vm3215_vm9, %v3160_v46, %v11401_v28  ;;  %v9689_v28 = vld [vmem:[#allocation2 + $0x80] sm:$0xff]  ;;  %v2966_v11 = vsel %vm2955_vm5, %v2901_v35, %v14941_v6  ;;  %v820_v46 = vld [vmem:[#allocation2 + $0x24a] sm:$0xff] }
 0x3b2   :  { %v2712_v58 = vpop.permute.xlu0 %2711  ;;  %v3288_v33 = vsel %vm3280_vm10, %v3223_v13, %v2458_v62  ;;  %v2902_v63 = vsel %vm27_vm0, %v9689_v28, %v14940_v41  ;;  %v3031_v62 = vsel %vm3020_vm6, %v2966_v11, %v14943_v8  ;;  %v14954_v20 = vld [vmem:[#allocation122_spill] sm:$0xff]  ;;  %v14960_v28 = vld [vmem:[#allocation287_spill] sm:$0xff] }
 0x3b3   :  { %2769 = vrot.lane.b32.xlu1 %v814_v51, %s9775_s30  ;;  %v3352_v49 = vsel %vm3345_vm11, %v3287_v0, %v2712_v58  ;;  %v14942_v51 = vld [vmem:[#allocation65_spill] sm:$0xff]  ;;  %v758_v11 = vld [vmem:[#allocation2 + $0x261] sm:$0xff] }
 0x3b4   :  { %2515 = vrot.lane.b32.xlu0 %v751_v25, %s9774_s1  ;;  %8381 = vmatprep.mubr.msk.f32.mxu0 %vm3421_vm12, %v3352_v49  ;;  %v2967_v27 = vsel %vm2955_vm5, %v2902_v63, %v14942_v51  ;;  %v14945_v25 = vld [vmem:[#allocation176_spill] sm:$0xff]  ;;  %v14946_v58 = vld [vmem:[#allocation177_spill] sm:$0xff] }
 0x3b5   :  { %v2714_v32 = vpop.permute.xlu1 %2713  ;;  %v3032_v55 = vsel %vm3020_vm6, %v2967_v27, %v14944_v31  ;;  %v3096_v13 = vsel %vm3085_vm7, %v3031_v62, %v14945_v25  ;;  %v9692_v8 = vld [vmem:[#allocation2 + $0xa8] sm:$0xff]  ;;  %v14962_v31 = vld [vmem:[#allocation13_spill] sm:$0xff] }
 0x3b6   :  { %v3353_v36 = vsel %vm3345_vm11, %v3288_v33, %v2714_v32  ;;  %v2460_v24 = vpop.permute.xlu0 %2459  ;;  %v14947_v33 = vld [vmem:[#allocation232_spill] sm:$0xff]  ;;  %v14948_v32 = vld [vmem:[#allocation233_spill] sm:$0xff] }
 0x3b7   :  { %2517 = vrot.lane.b32.xlu1 %v752_v9, %s9774_s1  ;;  %8382 = vmatmul.mubr.msk.f32.gmra.mrb[6].mxu0 %vm3421_vm12, %v3353_v36  ;;  %v3289_v7 = vsel %vm3280_vm10, %v3224_v44, %v2460_v24  ;;  %v3097_v9 = vsel %vm3085_vm7, %v3032_v55, %v14946_v58  ;;  %v3161_v49 = vsel %vm3150_vm8, %v3096_v13, %v14947_v33  ;;  %v14955_v44 = vld [vmem:[#allocation123_spill] sm:$0xff]  ;;  %v14961_v62 = vld [vmem:[#allocation12_spill] sm:$0xff]  ;;  %v14964_v58 = vld [vmem:[#allocation69_spill] sm:$0xff] }
 0x3b8   :  { %2771 = vrot.lane.b32.xlu0 %v815_v29, %s9775_s30  ;;  %v3162_v18 = vsel %vm3150_vm8, %v3097_v9, %v14948_v32  ;;  %v3226_v36 = vsel %vm3215_vm9, %v3161_v49, %v14949_v40  ;;  %v2903_v24 = vsel %vm27_vm0, %v9690_v23, %v14950_v22  ;;  %v14963_v25 = vld [vmem:[#allocation68_spill] sm:$0xff]  ;;  %v14966_v40 = vld [vmem:[#allocation125_spill] sm:$0xff] }
 0x3b9   :  { %v2462_v4 = vpop.permute.xlu1 %2461  ;;  %v3227_v30 = vsel %vm3215_vm9, %v3162_v18, %v11409_v12  ;;  %v9691_v12 = vld [vmem:[#allocation2 + $0x98] sm:$0xff]  ;;  %v2968_v54 = vsel %vm2955_vm5, %v2903_v24, %v14952_v21  ;;  %v14965_v33 = vld [vmem:[#allocation124_spill] sm:$0xff]  ;;  %v822_v18 = vld [vmem:[#allocation2 + $0x262] sm:$0xff] }
 0x3ba   :  { %v2716_v3 = vpop.permute.xlu0 %2715  ;;  %v3290_v53 = vsel %vm3280_vm10, %v3225_v48, %v2462_v4  ;;  %v2904_v17 = vsel %vm27_vm0, %v9691_v12, %v14951_v37  ;;  %v819_v4 = vld [vmem:[#allocation2 + $0x242] sm:$0xff]  ;;  %v3033_v39 = vsel %vm3020_vm6, %v2968_v54, %v14954_v20  ;;  %v14956_v48 = vld [vmem:[#allocation178_spill] sm:$0xff]  ;;  %v14971_v22 = vld [vmem:[#allocation288_spill] sm:$0xff] }
 0x3bb   :  { %2773 = vrot.lane.b32.xlu1 %v816_v1, %s9775_s30  ;;  %v3354_v61 = vsel %vm3345_vm11, %v3289_v7, %v2716_v3  ;;  %v2969_v5 = vsel %vm2955_vm5, %v2904_v17, %v14953_v19  ;;  %v3098_v7 = vsel %vm3085_vm7, %v3033_v39, %v14956_v48  ;;  %v14972_v12 = vld [vmem:[#allocation289_spill] sm:$0xff]  ;;  %v9694_v20 = vld [vmem:[#allocation2 + $0xc0] sm:$0xff] }
 0x3bc   :  { %2519 = vrot.lane.b32.xlu0 %v753_v57, %s9774_s1  ;;  %8384 = vmatprep.mubr.msk.f32.mxu0 %vm3421_vm12, %v3354_v61  ;;  %v3034_v57 = vsel %vm3020_vm6, %v2969_v5, %v14955_v44  ;;  %v14958_v61 = vld [vmem:[#allocation234_spill] sm:$0xff]  ;;  %v9695_v44 = vld [vmem:[#allocation2 + $0xc8] sm:$0xff] }
 0x3bd   :  { %v2718_v14 = vpop.permute.xlu1 %2717  ;;  %v760_v54 = vld [vmem:[#allocation2 + $0x279] sm:$0xff] }
 0x3be   :  { %v3355_v56 = vsel %vm3345_vm11, %v3290_v53, %v2718_v14  ;;  %v2464_v52 = vpop.permute.xlu0 %2463  ;;  %v3163_v14 = vsel %vm3150_vm8, %v3098_v7, %v14958_v61  ;;  %v14973_v39 = vld [vmem:[#allocation14_spill] sm:$0xff] }
 0x3bf   :  { %2521 = vrot.lane.b32.xlu1 %v754_v59, %s9774_s1  ;;  %8385 = vmatmul.mubr.msk.f32.gmra.mrb[8].mxu0 %vm3421_vm12, %v3355_v56  ;;  %v3291_v34 = vsel %vm3280_vm10, %v3226_v36, %v2464_v52  ;;  %v14957_v59 = vld [vmem:[#allocation179_spill] sm:$0xff]  ;;  %v3228_v35 = vsel %vm3215_vm9, %v3163_v14, %v11413_v2  ;;  %v757_v56 = vld [vmem:[#allocation2 + $0x259] sm:$0xff]  ;;  %v2905_v52 = vsel %vm27_vm0, %v9692_v8, %v14961_v62 }
 0x3c0   :  { %2775 = vrot.lane.b32.xlu0 %v817_v47, %s9775_s30  ;;  %v3099_v53 = vsel %vm3085_vm7, %v3034_v57, %v14957_v59  ;;  %v2970_v13 = vsel %vm2955_vm5, %v2905_v52, %v14963_v25  ;;  %v14974_v57 = vld [vmem:[#allocation15_spill] sm:$0xff]  ;;  %v14975_v7 = vld [vmem:[#allocation70_spill] sm:$0xff]  ;;  %v823_v59 = vld [vmem:[#allocation2 + $0x272] sm:$0xff] }
 0x3c1   :  { %v2466_v0 = vpop.permute.xlu1 %2465  ;;  %v3164_v26 = vsel %vm3150_vm8, %v3099_v53, %v14959_v15  ;;  %v3035_v49 = vsel %vm3020_vm6, %v2970_v13, %v14965_v33  ;;  %v2908_v48 = vsel %vm27_vm0, %v9695_v44, %v14974_v57  ;;  %v14976_v53 = vld [vmem:[#allocation71_spill] sm:$0xff]  ;;  %v14977_v14 = vld [vmem:[#allocation126_spill] sm:$0xff]  ;;  %v14996_v57 = vld [vmem:[#allocation293_spill] sm:$0xff] }
 0x3c2   :  { %v2720_v38 = vpop.permute.xlu0 %2719  ;;  %v3292_v29 = vsel %vm3280_vm10, %v3227_v30, %v2466_v0  ;;  %v3229_v41 = vsel %vm3215_vm9, %v3164_v26, %v14960_v28  ;;  %v821_v0 = vld [vmem:[#allocation2 + $0x25a] sm:$0xff]  ;;  %v2973_v61 = vsel %vm2955_vm5, %v2908_v48, %v14976_v53  ;;  %v14982_v8 = vld [vmem:[#allocation239_spill] sm:$0xff] }
 0x3c3   :  { %2777 = vrot.lane.b32.xlu1 %v818_v50, %s9775_s30  ;;  %v3356_v42 = vsel %vm3345_vm11, %v3291_v34, %v2720_v38  ;;  %v9693_v50 = vld [vmem:[#allocation2 + $0xb0] sm:$0xff]  ;;  %v14983_v52 = vld [vmem:[#allocation290_spill] sm:$0xff] }
 0x3c4   :  { %2523 = vrot.lane.b32.xlu0 %v755_v60, %s9774_s1  ;;  %8387 = vmatprep.mubr.msk.f32.mxu0 %vm3421_vm12, %v3356_v42  ;;  %v2906_v55 = vsel %vm27_vm0, %v9693_v50, %v14962_v31  ;;  %v14967_v60 = vld [vmem:[#allocation180_spill] sm:$0xff]  ;;  %v14968_v38 = vld [vmem:[#allocation181_spill] sm:$0xff]  ;;  %v14984_v31 = vld [vmem:[#allocation291_spill] sm:$0xff] }
 0x3c5   :  { %v2722_v10 = vpop.permute.xlu1 %2721  ;;  %v2971_v9 = vsel %vm2955_vm5, %v2906_v55, %v14964_v58  ;;  %v3100_v30 = vsel %vm3085_vm7, %v3035_v49, %v14967_v60  ;;  %v761_v50 = vld [vmem:[#allocation2 + $0x289] sm:$0xff]  ;;  %v9696_v49 = vld [vmem:[#allocation2 + $0xd8] sm:$0xff]  ;;  %v763_v44 = vld [vmem:[#allocation2 + $0x2a1] sm:$0xff] }
 0x3c6   :  { %v3357_v1 = vsel %vm3345_vm11, %v3292_v29, %v2722_v10  ;;  %v2468_v43 = vpop.permute.xlu0 %2467  ;;  %v3036_v36 = vsel %vm3020_vm6, %v2971_v9, %v14966_v40  ;;  %v14969_v29 = vld [vmem:[#allocation236_spill] sm:$0xff]  ;;  %v14970_v10 = vld [vmem:[#allocation237_spill] sm:$0xff] }
 0x3c7   :  { %2525 = vrot.lane.b32.xlu1 %v756_v16, %s9774_s1  ;;  %8388 = vmatmul.mubr.msk.f32.gmra.mrb[10].mxu0 %vm3421_vm12, %v3357_v1  ;;  %v3293_v63 = vsel %vm3280_vm10, %v3228_v35, %v2468_v43  ;;  %v3101_v16 = vsel %vm3085_vm7, %v3036_v36, %v14968_v38  ;;  %v3165_v42 = vsel %vm3150_vm8, %v3100_v30, %v14969_v29  ;;  %v759_v1 = vld [vmem:[#allocation2 + $0x271] sm:$0xff]  ;;  %v824_v35 = vld [vmem:[#allocation2 + $0x27a] sm:$0xff] }
 0x3c8   :  { %2779 = vrot.lane.b32.xlu0 %v819_v4, %s9775_s30  ;;  %v3166_v23 = vsel %vm3150_vm8, %v3101_v16, %v14970_v10  ;;  %v3230_v24 = vsel %vm3215_vm9, %v3165_v42, %v14971_v22  ;;  %v2907_v43 = vsel %vm27_vm0, %v9694_v20, %v14973_v39  ;;  %v9697_v36 = vld [vmem:[#allocation2 + $0xe0] sm:$0xff]  ;;  %v14986_v60 = vld [vmem:[#allocation17_spill] sm:$0xff]  ;;  %v825_v16 = vld [vmem:[#allocation2 + $0x28a] sm:$0xff] }
 0x3c9   :  { %v2470_v3 = vpop.permute.xlu1 %2469  ;;  %v3231_v37 = vsel %vm3215_vm9, %v3166_v23, %v14972_v12  ;;  %v2910_v30 = vsel %vm27_vm0, %v9697_v36, %v14986_v60  ;;  %v14988_v29 = vld [vmem:[#allocation73_spill] sm:$0xff]  ;;  %v14989_v10 = vld [vmem:[#allocation128_spill] sm:$0xff]  ;;  %v15008_v60 = vld [vmem:[#allocation295_spill] sm:$0xff] }
 0x3ca   :  { %v2724_v6 = vpop.permute.xlu0 %2723  ;;  %v3294_v47 = vsel %vm3280_vm10, %v3229_v41, %v2470_v3  ;;  %v2972_v3 = vsel %vm2955_vm5, %v2907_v43, %v14975_v7  ;;  %v14979_v41 = vld [vmem:[#allocation182_spill] sm:$0xff]  ;;  %v2975_v42 = vsel %vm2955_vm5, %v2910_v30, %v14988_v29  ;;  %v14994_v20 = vld [vmem:[#allocation241_spill] sm:$0xff]  ;;  %v14995_v43 = vld [vmem:[#allocation292_spill] sm:$0xff] }
 0x3cb   :  { %2781 = vrot.lane.b32.xlu1 %v820_v46, %s9775_s30  ;;  %v3358_v51 = vsel %vm3345_vm11, %v3293_v63, %v2724_v6  ;;  %v3037_v15 = vsel %vm3020_vm6, %v2972_v3, %v14977_v14  ;;  %v765_v36 = vld [vmem:[#allocation2 + $0x2b9] sm:$0xff] }
 0x3cc   :  { %2527 = vrot.lane.b32.xlu0 %v757_v56, %s9774_s1  ;;  %8390 = vmatprep.mubr.msk.f32.mxu0 %vm3421_vm12, %v3358_v51  ;;  %v14978_v56 = vld [vmem:[#allocation127_spill] sm:$0xff]  ;;  %v3102_v63 = vsel %vm3085_vm7, %v3037_v15, %v14979_v41  ;;  %v14981_v51 = vld [vmem:[#allocation238_spill] sm:$0xff]  ;;  %v9698_v15 = vld [vmem:[#allocation2 + $0xf0] sm:$0xff] }
 0x3cd   :  { %v2726_v27 = vpop.permute.xlu1 %2725  ;;  %v3038_v28 = vsel %vm3020_vm6, %v2973_v61, %v14978_v56  ;;  %v14998_v41 = vld [vmem:[#allocation19_spill] sm:$0xff] }
 0x3ce   :  { %v3359_v2 = vsel %vm3345_vm11, %v3294_v47, %v2726_v27  ;;  %v2472_v32 = vpop.permute.xlu0 %2471  ;;  %v3167_v27 = vsel %vm3150_vm8, %v3102_v63, %v14981_v51  ;;  %v15000_v51 = vld [vmem:[#allocation75_spill] sm:$0xff] }
 0x3cf   :  { %2529 = vrot.lane.b32.xlu1 %v758_v11, %s9774_s1  ;;  %8391 = vmatmul.mubr.msk.f32.gmra.mrb[12].mxu0 %vm3421_vm12, %v3359_v2  ;;  %v3295_v17 = vsel %vm3280_vm10, %v3230_v24, %v2472_v32  ;;  %v14980_v11 = vld [vmem:[#allocation183_spill] sm:$0xff]  ;;  %v3232_v2 = vsel %vm3215_vm9, %v3167_v27, %v14983_v52  ;;  %v14985_v32 = vld [vmem:[#allocation16_spill] sm:$0xff]  ;;  %v826_v24 = vld [vmem:[#allocation2 + $0x292] sm:$0xff] }
 0x3d0   :  { %2783 = vrot.lane.b32.xlu0 %v821_v0, %s9775_s30  ;;  %v3103_v47 = vsel %vm3085_vm7, %v3038_v28, %v14980_v11  ;;  %v762_v0 = vld [vmem:[#allocation2 + $0x291] sm:$0xff] }
 0x3d1   :  { %v2474_v34 = vpop.permute.xlu1 %2473  ;;  %v3168_v62 = vsel %vm3150_vm8, %v3103_v47, %v14982_v8  ;;  %v9699_v28 = vld [vmem:[#allocation2 + $0xf8] sm:$0xff]  ;;  %v827_v47 = vld [vmem:[#allocation2 + $0x2a2] sm:$0xff] }
 0x3d2   :  { %v2728_v21 = vpop.permute.xlu0 %2727  ;;  %v3296_v4 = vsel %vm3280_vm10, %v3231_v37, %v2474_v34  ;;  %v3233_v55 = vsel %vm3215_vm9, %v3168_v62, %v14984_v31  ;;  %v14987_v34 = vld [vmem:[#allocation72_spill] sm:$0xff]  ;;  %v2912_v63 = vsel %vm27_vm0, %v9699_v28, %v14998_v41  ;;  %v15001_v8 = vld [vmem:[#allocation130_spill] sm:$0xff]  ;;  %v15020_v41 = vld [vmem:[#allocation297_spill] sm:$0xff] }
 0x3d3   :  { %2785 = vrot.lane.b32.xlu1 %v822_v18, %s9775_s30  ;;  %v3360_v19 = vsel %vm3345_vm11, %v3295_v17, %v2728_v21  ;;  %v2909_v18 = vsel %vm27_vm0, %v9696_v49, %v14985_v32  ;;  %v14991_v37 = vld [vmem:[#allocation184_spill] sm:$0xff]  ;;  %v2977_v27 = vsel %vm2955_vm5, %v2912_v63, %v15000_v51  ;;  %v15006_v49 = vld [vmem:[#allocation243_spill] sm:$0xff] }
 0x3d4   :  { %2531 = vrot.lane.b32.xlu0 %v759_v1, %s9774_s1  ;;  %8393 = vmatprep.mubr.msk.f32.mxu0 %vm3421_vm12, %v3360_v19  ;;  %v2974_v38 = vsel %vm2955_vm5, %v2909_v18, %v14987_v34  ;;  %v14990_v1 = vld [vmem:[#allocation129_spill] sm:$0xff]  ;;  %v14993_v19 = vld [vmem:[#allocation240_spill] sm:$0xff]  ;;  %v15007_v18 = vld [vmem:[#allocation294_spill] sm:$0xff] }
 0x3d5   :  { %v2730_v5 = vpop.permute.xlu1 %2729  ;;  %v3039_v23 = vsel %vm3020_vm6, %v2974_v38, %v14989_v10  ;;  %v3040_v12 = vsel %vm3020_vm6, %v2975_v42, %v14990_v1  ;;  %v703_v28 = vld [vmem:[#allocation2 + $0x2d0] sm:$0xff] }
 0x3d6   :  { %v3361_v46 = vsel %vm3345_vm11, %v3296_v4, %v2730_v5  ;;  %v2476_v26 = vpop.permute.xlu0 %2475  ;;  %v3104_v17 = vsel %vm3085_vm7, %v3039_v23, %v14991_v37  ;;  %v9700_v23 = vld [vmem:[#allocation2 + $0x108] sm:$0xff]  ;;  %v15010_v37 = vld [vmem:[#allocation21_spill] sm:$0xff] }
 0x3d7   :  { %2533 = vrot.lane.b32.xlu1 %v760_v54, %s9774_s1  ;;  %8394 = vmatmul.mubr.msk.f32.gmra.mrb[14].mxu0 %vm3421_vm12, %v3361_v46  ;;  %v3297_v25 = vsel %vm3280_vm10, %v3232_v2, %v2476_v26  ;;  %v14992_v54 = vld [vmem:[#allocation185_spill] sm:$0xff]  ;;  %v3169_v5 = vsel %vm3150_vm8, %v3104_v17, %v14993_v19  ;;  %v14997_v26 = vld [vmem:[#allocation18_spill] sm:$0xff]  ;;  %v828_v2 = vld [vmem:[#allocation2 + $0x2aa] sm:$0xff] }
 0x3d8   :  { %2787 = vrot.lane.b32.xlu0 %v823_v59, %s9775_s30  ;;  %v3105_v4 = vsel %vm3085_vm7, %v3040_v12, %v14992_v54  ;;  %v3234_v46 = vsel %vm3215_vm9, %v3169_v5, %v14995_v43  ;;  %v764_v59 = vld [vmem:[#allocation2 + $0x2a9] sm:$0xff]  ;;  %v15012_v19 = vld [vmem:[#allocation77_spill] sm:$0xff] }
 0x3d9   :  { %v2478_v6 = vpop.permute.xlu1 %2477  ;;  %v3170_v39 = vsel %vm3150_vm8, %v3105_v4, %v14994_v20  ;;  %v9701_v12 = vld [vmem:[#allocation2 + $0x110] sm:$0xff]  ;;  %v829_v4 = vld [vmem:[#allocation2 + $0x2ba] sm:$0xff] }
 0x3da   :  { %v2732_v13 = vpop.permute.xlu0 %2731  ;;  %v3298_v58 = vsel %vm3280_vm10, %v3233_v55, %v2478_v6  ;;  %v3235_v48 = vsel %vm3215_vm9, %v3170_v39, %v14996_v57  ;;  %v14999_v6 = vld [vmem:[#allocation74_spill] sm:$0xff]  ;;  %v2914_v17 = vsel %vm27_vm0, %v9701_v12, %v15010_v37  ;;  %v15013_v20 = vld [vmem:[#allocation132_spill] sm:$0xff]  ;;  %v831_v37 = vld [vmem:[#allocation2 + $0x2d2] sm:$0xff] }
 0x3db   :  { %2789 = vrot.lane.b32.xlu1 %v824_v35, %s9775_s30  ;;  %v3362_v9 = vsel %vm3345_vm11, %v3297_v25, %v2732_v13  ;;  %v2911_v35 = vsel %vm27_vm0, %v9698_v15, %v14997_v26  ;;  %v15003_v55 = vld [vmem:[#allocation186_spill] sm:$0xff]  ;;  %v2979_v5 = vsel %vm2955_vm5, %v2914_v17, %v15012_v19  ;;  %v15018_v15 = vld [vmem:[#allocation245_spill] sm:$0xff]  ;;  %v15033_v17 = vld [vmem:[#allocation299_spill] sm:$0xff] }
 0x3dc   :  { %2535 = vrot.lane.b32.xlu0 %v761_v50, %s9774_s1  ;;  %8396 = vmatprep.mubr.msk.f32.mxu0 %vm3421_vm12, %v3362_v9  ;;  %v2976_v11 = vsel %vm2955_vm5, %v2911_v35, %v14999_v6  ;;  %v15002_v50 = vld [vmem:[#allocation131_spill] sm:$0xff]  ;;  %v15005_v9 = vld [vmem:[#allocation242_spill] sm:$0xff]  ;;  %v15019_v35 = vld [vmem:[#allocation296_spill] sm:$0xff] }
 0x3dd   :  { %v2734_v33 = vpop.permute.xlu1 %2733  ;;  %v3041_v62 = vsel %vm3020_vm6, %v2976_v11, %v15001_v8  ;;  %v3042_v31 = vsel %vm3020_vm6, %v2977_v27, %v15002_v50  ;;  %v832_v19 = vld [vmem:[#allocation2 + $0x2da] sm:$0xff] }
 0x3de   :  { %v3363_v40 = vsel %vm3345_vm11, %v3298_v58, %v2734_v33  ;;  %v2480_v22 = vpop.permute.xlu0 %2479  ;;  %v3106_v25 = vsel %vm3085_vm7, %v3041_v62, %v15003_v55  ;;  %v9702_v62 = vld [vmem:[#allocation2 + $0x120] sm:$0xff]  ;;  %v9703_v55 = vld [vmem:[#allocation2 + $0x128] sm:$0xff] }
 0x3df   :  { %2537 = vrot.lane.b32.xlu1 %v762_v0, %s9774_s1  ;;  %8397 = vmatmul.mubr.msk.f32.gmra.mrb[16].mxu0 %vm3421_vm12, %v3363_v40  ;;  %v3299_v7 = vsel %vm3280_vm10, %v3234_v46, %v2480_v22  ;;  %v15004_v0 = vld [vmem:[#allocation187_spill] sm:$0xff]  ;;  %v3171_v33 = vsel %vm3150_vm8, %v3106_v25, %v15005_v9  ;;  %v15009_v22 = vld [vmem:[#allocation20_spill] sm:$0xff] }
 0x3e0   :  { %2791 = vrot.lane.b32.xlu0 %v825_v16, %s9775_s30  ;;  %v3107_v58 = vsel %vm3085_vm7, %v3042_v31, %v15004_v0  ;;  %v3236_v40 = vsel %vm3215_vm9, %v3171_v33, %v15007_v18  ;;  %v766_v16 = vld [vmem:[#allocation2 + $0x2c1] sm:$0xff]  ;;  %v15022_v31 = vmov 0.0   ;;  %v767_v9 = vld [vmem:[#allocation2 + $0x2d1] sm:$0xff] }
 0x3e1   :  { %v2482_v21 = vpop.permute.xlu1 %2481  ;;  %v3172_v32 = vsel %vm3150_vm8, %v3107_v58, %v15006_v49  ;;  %v830_v46 = vld [vmem:[#allocation2 + $0x2c2] sm:$0xff]  ;;  %4073 = vst.msk [vmem:[#allocation3 + $0x20] sm:$0xff] %vm4067_vm13, %v15022_v31  ;;  %4068 = vst.msk [vmem:[#allocation3] sm:$0xff] %vm4067_vm13, %v15022_v31  ;;  %v15024_v0 = vld [vmem:[#allocation78_spill] sm:$0xff] }
 0x3e2   :  { %v2736_v3 = vpop.permute.xlu0 %2735  ;;  %v3300_v53 = vsel %vm3280_vm10, %v3235_v48, %v2482_v21  ;;  %v3237_v30 = vsel %vm3215_vm9, %v3172_v32, %v15008_v60  ;;  %v15011_v21 = vld [vmem:[#allocation76_spill] sm:$0xff]  ;;  %4074 = vst.msk [vmem:[#allocation3 + $0x28] sm:$0x3] %vm4070_vm14, %v15022_v31  ;;  %4071 = vst.msk [vmem:[#allocation3 + $0x10] sm:$0x3] %vm4070_vm14, %v15022_v31  ;;  %v15023_v25 = vld [vmem:[#allocation23_spill] sm:$0xff] }
 0x3e3   :  { %2793 = vrot.lane.b32.xlu1 %v826_v24, %s9775_s30  ;;  %v3364_v61 = vsel %vm3345_vm11, %v3299_v7, %v2736_v3  ;;  %v2913_v24 = vsel %vm27_vm0, %v9700_v23, %v15009_v22  ;;  %v15015_v48 = vld [vmem:[#allocation188_spill] sm:$0xff]  ;;  %4069 = vst.msk [vmem:[#allocation3 + $0x8] sm:$0xff] %vm4067_vm13, %v15022_v31  ;;  %4072 = vst.msk [vmem:[#allocation3 + $0x18] sm:$0xff] %vm4067_vm13, %v15022_v31  ;;  %v15025_v33 = vld [vmem:[#allocation79_spill] sm:$0xff] }
 0x3e4   :  { %2539 = vrot.lane.b32.xlu0 %v763_v44, %s9774_s1  ;;  %8399 = vmatprep.mubr.msk.f32.mxu0 %vm3421_vm12, %v3364_v61  ;;  %v2978_v54 = vsel %vm2955_vm5, %v2913_v24, %v15011_v21  ;;  %v15014_v44 = vld [vmem:[#allocation133_spill] sm:$0xff]  ;;  %v15017_v61 = vld [vmem:[#allocation244_spill] sm:$0xff]  ;;  %4075 = vst.msk [vmem:[#allocation3 + $0x30] sm:$0xff] %vm4067_vm13, %v15022_v31  ;;  %4076 = vst.msk [vmem:[#allocation3 + $0x38] sm:$0xff] %vm4067_vm13, %v15022_v31 }
 0x3e5   :  { %v2738_v14 = vpop.permute.xlu1 %2737  ;;  %v3043_v39 = vsel %vm3020_vm6, %v2978_v54, %v15013_v20  ;;  %v3044_v57 = vsel %vm3020_vm6, %v2979_v5, %v15014_v44  ;;  %4077 = vst.msk [vmem:[#allocation3 + $0x40] sm:$0x3] %vm4070_vm14, %v15022_v31  ;;  %4080 = vst.msk [vmem:[#allocation3 + $0x58] sm:$0x3] %vm4070_vm14, %v15022_v31  ;;  %v15026_v32 = vld [vmem:[#allocation134_spill] sm:$0xff]  ;;  %v15027_v60 = vld [vmem:[#allocation135_spill] sm:$0xff] }
 0x3e6   :  { %v3365_v56 = vsel %vm3345_vm11, %v3300_v53, %v2738_v14  ;;  %v2484_v52 = vpop.permute.xlu0 %2483  ;;  %v3108_v7 = vsel %vm3085_vm7, %v3043_v39, %v15015_v48  ;;  %4078 = vst.msk [vmem:[#allocation3 + $0x48] sm:$0xff] %vm4067_vm13, %v15022_v31  ;;  %4079 = vst.msk [vmem:[#allocation3 + $0x50] sm:$0xff] %vm4067_vm13, %v15022_v31  ;;  %v15031_v22 = vld [vmem:[#allocation247_spill] sm:$0xff] }
 0x3e7   :  { %2541 = vrot.lane.b32.xlu1 %v764_v59, %s9774_s1  ;;  %8400 = vmatmul.mubr.msk.f32.gmra.mrb[18].mxu0 %vm3421_vm12, %v3365_v56  ;;  %v3301_v34 = vsel %vm3280_vm10, %v3236_v40, %v2484_v52  ;;  %v15016_v59 = vld [vmem:[#allocation189_spill] sm:$0xff]  ;;  %v3173_v14 = vsel %vm3150_vm8, %v3108_v7, %v15017_v61  ;;  %v15021_v52 = vld [vmem:[#allocation22_spill] sm:$0xff]  ;;  %4081 = vst.msk [vmem:[#allocation3 + $0x60] sm:$0xff] %vm4067_vm13, %v15022_v31  ;;  %4082 = vst.msk [vmem:[#allocation3 + $0x68] sm:$0xff] %vm4067_vm13, %v15022_v31 }
 0x3e8   :  { %2795 = vrot.lane.b32.xlu0 %v827_v47, %s9775_s30  ;;  %v3109_v53 = vsel %vm3085_vm7, %v3044_v57, %v15016_v59  ;;  %v3238_v56 = vsel %vm3215_vm9, %v3173_v14, %v15019_v35  ;;  %v11938_v47 = vld [vmem:[#allocation2 + $0x2d8] sm:$0xff]  ;;  %4083 = vst.msk [vmem:[#allocation3 + $0x70] sm:$0x3] %vm4070_vm14, %v15022_v31  ;;  %4086 = vst.msk [vmem:[#allocation3 + $0x88] sm:$0x3] %vm4070_vm14, %v15022_v31  ;;  %v9705_v48 = vld [vmem:[#allocation2 + $0x140] sm:$0xff] }
 0x3e9   :  { %v2486_v13 = vpop.permute.xlu1 %2485  ;;  %v3174_v26 = vsel %vm3150_vm8, %v3109_v53, %v15018_v15  ;;  %4084 = vst.msk [vmem:[#allocation3 + $0x78] sm:$0xff] %vm4067_vm13, %v15022_v31  ;;  %4085 = vst.msk [vmem:[#allocation3 + $0x80] sm:$0xff] %vm4067_vm13, %v15022_v31  ;;  %v15035_v7 = vld [vmem:[#allocation25_spill] sm:$0xff]  ;;  %v15036_v59 = vld [vmem:[#allocation80_spill] sm:$0xff] }
 0x3ea   :  { %v2740_v38 = vpop.permute.xlu0 %2739  ;;  %v3302_v29 = vsel %vm3280_vm10, %v3237_v30, %v2486_v13  ;;  %v3239_v63 = vsel %vm3215_vm9, %v3174_v26, %v15020_v41  ;;  %4087 = vst.msk [vmem:[#allocation3 + $0x90] sm:$0xff] %vm4067_vm13, %v15022_v31  ;;  %4088 = vst.msk [vmem:[#allocation3 + $0x98] sm:$0xff] %vm4067_vm13, %v15022_v31  ;;  %v2916_v13 = vsel %vm27_vm0, %v9703_v55, %v15023_v25  ;;  %v705_v61 = vld [vmem:[#allocation2 + $0x2e8] sm:$0xff]  ;;  %v15037_v14 = vld [vmem:[#allocation81_spill] sm:$0xff] }
 0x3eb   :  { %2797 = vrot.lane.b32.xlu1 %v828_v2, %s9775_s30  ;;  %v3366_v42 = vsel %vm3345_vm11, %v3301_v34, %v2740_v38  ;;  %v11944_v2 = vsel %vm27_vm0, %v9702_v62, %v15021_v52  ;;  %4089 = vst.msk [vmem:[#allocation3 + $0xa0] sm:$0x3] %vm4070_vm14, %v15022_v31  ;;  %4092 = vst.msk [vmem:[#allocation3 + $0xb8] sm:$0x3] %vm4070_vm14, %v15022_v31  ;;  %v2981_v49 = vsel %vm2955_vm5, %v2916_v13, %v15025_v33  ;;  %v15028_v34 = vld [vmem:[#allocation190_spill] sm:$0xff]  ;;  %v15038_v26 = vld [vmem:[#allocation136_spill] sm:$0xff] }
 0x3ec   :  { %2543 = vrot.lane.b32.xlu0 %v765_v36, %s9774_s1  ;;  %8402 = vmatprep.mubr.msk.f32.mxu0 %vm3421_vm12, %v3366_v42  ;;  %4090 = vst.msk [vmem:[#allocation3 + $0xa8] sm:$0xff] %vm4067_vm13, %v15022_v31  ;;  %4091 = vst.msk [vmem:[#allocation3 + $0xb0] sm:$0xff] %vm4067_vm13, %v15022_v31  ;;  %v2980_v58 = vsel %vm2955_vm5, %v11944_v2, %v15024_v0  ;;  %v768_v36 = vld [vmem:[#allocation2 + $0x2d9] sm:$0xff]  ;;  %v3046_v30 = vsel %vm3020_vm6, %v2981_v49, %v15027_v60  ;;  %v769_v25 = vld [vmem:[#allocation2 + $0x2e9] sm:$0xff] }
 0x3ed   :  { %v2742_v10 = vpop.permute.xlu1 %2741  ;;  %4093 = vst.msk [vmem:[#allocation3 + $0xc0] sm:$0xff] %vm4067_vm13, %v15022_v31  ;;  %4094 = vst.msk [vmem:[#allocation3 + $0xc8] sm:$0xff] %vm4067_vm13, %v15022_v31  ;;  %v3045_v18 = vsel %vm3020_vm6, %v2980_v58, %v15026_v32  ;;  %v15039_v41 = vld [vmem:[#allocation137_spill] sm:$0xff] }
 0x3ee   :  { %v3367_v1 = vsel %vm3345_vm11, %v3302_v29, %v2742_v10  ;;  %v2488_v43 = vpop.permute.xlu0 %2487  ;;  %4095 = vst.msk [vmem:[#allocation3 + $0xd0] sm:$0x3] %vm4070_vm14, %v15022_v31  ;;  %4098 = vst.msk [vmem:[#allocation3 + $0xe8] sm:$0x3] %vm4070_vm14, %v15022_v31  ;;  %v3110_v38 = vsel %vm3085_vm7, %v3045_v18, %v15028_v34  ;;  %v15029_v29 = vld [vmem:[#allocation191_spill] sm:$0xff]  ;;  %v15030_v10 = vld [vmem:[#allocation246_spill] sm:$0xff] }
 0x3ef   :  { %2545 = vrot.lane.b32.xlu1 %v766_v16, %s9774_s1  ;;  %8403 = vmatmul.mubr.msk.f32.gmra.mrb[20].mxu0 %vm3421_vm12, %v3367_v1  ;;  %v3303_v6 = vsel %vm3280_vm10, %v3238_v56, %v2488_v43  ;;  %4096 = vst.msk [vmem:[#allocation3 + $0xd8] sm:$0xff] %vm4067_vm13, %v15022_v31  ;;  %4097 = vst.msk [vmem:[#allocation3 + $0xe0] sm:$0xff] %vm4067_vm13, %v15022_v31  ;;  %v3111_v42 = vsel %vm3085_vm7, %v3046_v30, %v15029_v29  ;;  %v15032_v1 = vld [vmem:[#allocation298_spill] sm:$0xff]  ;;  %v15043_v52 = vld [vmem:[#allocation249_spill] sm:$0xff] }
 0x3f0   :  { %2799 = vrot.lane.b32.xlu0 %v829_v4, %s9775_s30  ;;  %4099 = vst.msk [vmem:[#allocation3 + $0xf0] sm:$0xff] %vm4067_vm13, %v15022_v31  ;;  %4100 = vst.msk [vmem:[#allocation3 + $0xf8] sm:$0xff] %vm4067_vm13, %v15022_v31  ;;  %v3175_v23 = vsel %vm3150_vm8, %v3110_v38, %v15030_v10  ;;  %v3176_v24 = vsel %vm3150_vm8, %v3111_v42, %v15031_v22  ;;  %v9704_v43 = vld [vmem:[#allocation2 + $0x138] sm:$0xff]  ;;  %v15047_v38 = vld [vmem:[#allocation27_spill] sm:$0xff] }
 0x3f1   :  { %v2490_v3 = vpop.permute.xlu1 %2489  ;;  %4101 = vst.msk [vmem:[#allocation3 + $0x100] sm:$0x3] %vm4070_vm14, %v15022_v31  ;;  %4104 = vst.msk [vmem:[#allocation3 + $0x118] sm:$0x3] %vm4070_vm14, %v15022_v31  ;;  %v3240_v12 = vsel %vm3215_vm9, %v3175_v23, %v15032_v1  ;;  %v3241_v21 = vsel %vm3215_vm9, %v3176_v24, %v15033_v17  ;;  %v15045_v13 = vld [vmem:[#allocation301_spill] sm:$0xff]  ;;  %v15048_v29 = vld [vmem:[#allocation82_spill] sm:$0xff] }
 0x3f2   :  { %v2744_v11 = vpop.permute.xlu0 %2743  ;;  %v3304_v51 = vsel %vm3280_vm10, %v3239_v63, %v2490_v3  ;;  %4102 = vst.msk [vmem:[#allocation3 + $0x108] sm:$0xff] %vm4067_vm13, %v15022_v31  ;;  %4103 = vst.msk [vmem:[#allocation3 + $0x110] sm:$0xff] %vm4067_vm13, %v15022_v31  ;;  %v2918_v3 = vsel %vm27_vm0, %v9705_v48, %v15035_v7  ;;  %v770_v33 = vld [vmem:[#allocation2 + $0x2f1] sm:$0xff]  ;;  %v15049_v23 = vld [vmem:[#allocation83_spill] sm:$0xff] }
 0x3f3   :  { %2801 = vrot.lane.b32.xlu1 %v830_v46, %s9775_s30  ;;  %v3368_v27 = vsel %vm3345_vm11, %v3303_v6, %v2744_v11  ;;  %4105 = vst.msk [vmem:[#allocation3 + $0x120] sm:$0xff] %vm4067_vm13, %v15022_v31  ;;  %4106 = vst.msk [vmem:[#allocation3 + $0x128] sm:$0xff] %vm4067_vm13, %v15022_v31  ;;  %v15034_v46 = vld [vmem:[#allocation24_spill] sm:$0xff]  ;;  %v2983_v15 = vsel %vm2955_vm5, %v2918_v3, %v15037_v14  ;;  %v9707_v34 = vld [vmem:[#allocation2 + $0x158] sm:$0xff] }
 0x3f4   :  { %2291 = vrot.lane.b32.xlu0 %v703_v28, %s9772_s20  ;;  %8405 = vmatprep.mubr.msk.f32.mxu0 %vm3421_vm12, %v3368_v27  ;;  %4107 = vst.msk [vmem:[#allocation3 + $0x130] sm:$0x3] %vm4070_vm14, %v15022_v31  ;;  %4110 = vst.msk [vmem:[#allocation3 + $0x148] sm:$0x3] %vm4070_vm14, %v15022_v31  ;;  %v2917_v44 = vsel %vm27_vm0, %v9704_v43, %v15034_v46  ;;  %v706_v28 = vld [vmem:[#allocation2 + $0x2f0] sm:$0xff]  ;;  %v3048_v63 = vsel %vm3020_vm6, %v2983_v15, %v15039_v41  ;;  %v15050_v24 = vld [vmem:[#allocation138_spill] sm:$0xff] }
 0x3f5   :  { %v2746_v8 = vpop.permute.xlu1 %2745  ;;  %4108 = vst.msk [vmem:[#allocation3 + $0x138] sm:$0xff] %vm4067_vm13, %v15022_v31  ;;  %4109 = vst.msk [vmem:[#allocation3 + $0x140] sm:$0xff] %vm4067_vm13, %v15022_v31  ;;  %v2982_v53 = vsel %vm2955_vm5, %v2917_v44, %v15036_v59  ;;  %v15040_v6 = vld [vmem:[#allocation192_spill] sm:$0xff]  ;;  %v15051_v17 = vld [vmem:[#allocation139_spill] sm:$0xff] }
 0x3f6   :  { %v11947_v50 = vsel %vm3345_vm11, %v3304_v51, %v2746_v8  ;;  %4111 = vst.msk [vmem:[#allocation3 + $0x150] sm:$0xff] %vm4067_vm13, %v15022_v31  ;;  %4112 = vst.msk [vmem:[#allocation3 + $0x158] sm:$0xff] %vm4067_vm13, %v15022_v31  ;;  %v2492_v40 = vpop.permute.xlu0 %2491  ;;  %v3047_v35 = vsel %vm3020_vm6, %v2982_v53, %v15038_v26  ;;  %v15041_v51 = vld [vmem:[#allocation193_spill] sm:$0xff]  ;;  %v15042_v8 = vld [vmem:[#allocation248_spill] sm:$0xff] }
 0x3f7   :  { %4113 = vst.msk [vmem:[#allocation3 + $0x160] sm:$0x3] %vm4070_vm14, %v15022_v31  ;;  %4116 = vst.msk [vmem:[#allocation3 + $0x178] sm:$0x3] %vm4070_vm14, %v15022_v31  ;;  %2293 = vrot.lane.b32.xlu1 %v11938_v47, %s9772_s20  ;;  %8406 = vmatmul.mubr.msk.f32.gmra.mrb[22].mxu0 %vm3421_vm12, %v11947_v50  ;;  %v3305_v54 = vsel %vm3280_vm10, %v3240_v12, %v2492_v40  ;;  %v3112_v11 = vsel %vm3085_vm7, %v3047_v35, %v15040_v6  ;;  %v15044_v50 = vld [vmem:[#allocation300_spill] sm:$0xff]  ;;  %v15055_v46 = vld [vmem:[#allocation251_spill] sm:$0xff] }
 0x3f8   :  { %4114 = vst.msk [vmem:[#allocation3 + $0x168] sm:$0xff] %vm4067_vm13, %v15022_v31  ;;  %4115 = vst.msk [vmem:[#allocation3 + $0x170] sm:$0xff] %vm4067_vm13, %v15022_v31  ;;  %2547 = vrot.lane.b32.xlu0 %v767_v9, %s9774_s1  ;;  %v3113_v27 = vsel %vm3085_vm7, %v3048_v63, %v15041_v51  ;;  %v3177_v62 = vsel %vm3150_vm8, %v3112_v11, %v15042_v8  ;;  %v9706_v40 = vld [vmem:[#allocation2 + $0x150] sm:$0xff]  ;;  %v707_v7 = vld [vmem:[#allocation2 + $0x300] sm:$0xff] }
 0x3f9   :  { %4117 = vst.msk [vmem:[#allocation3 + $0x180] sm:$0xff] %vm4067_vm13, %v15022_v31  ;;  %4118 = vst.msk [vmem:[#allocation3 + $0x188] sm:$0xff] %vm4067_vm13, %v15022_v31  ;;  %v2494_v16 = vpop.permute.xlu1 %2493  ;;  %v3178_v2 = vsel %vm3150_vm8, %v3113_v27, %v15043_v52  ;;  %v3242_v55 = vsel %vm3215_vm9, %v3177_v62, %v15044_v50  ;;  %v833_v10 = vld [vmem:[#allocation2 + $0x2ea] sm:$0xff]  ;;  %v15057_v3 = vld [vmem:[#allocation303_spill] sm:$0xff] }
 0x3fa   :  { %4119 = vst.msk [vmem:[#allocation3 + $0x190] sm:$0x3] %vm4070_vm14, %v15022_v31  ;;  %4122 = vst.msk [vmem:[#allocation3 + $0x1a8] sm:$0x3] %vm4070_vm14, %v15022_v31  ;;  %v2748_v4 = vpop.permute.xlu0 %2747  ;;  %v3306_v5 = vsel %vm3280_vm10, %v3241_v21, %v2494_v16  ;;  %v3243_v0 = vsel %vm3215_vm9, %v3178_v2, %v15045_v13  ;;  %v2920_v16 = vsel %vm27_vm0, %v9707_v34, %v15047_v38  ;;  %v708_v14 = vld [vmem:[#allocation2 + $0x308] sm:$0xff]  ;;  %v9709_v6 = vld [vmem:[#allocation2 + $0x170] sm:$0xff] }
 0x3fb   :  { %4120 = vst.msk [vmem:[#allocation3 + $0x198] sm:$0xff] %vm4067_vm13, %v15022_v31  ;;  %4121 = vst.msk [vmem:[#allocation3 + $0x1a0] sm:$0xff] %vm4067_vm13, %v15022_v31  ;;  %2549 = vrot.lane.b32.xlu1 %v768_v36, %s9774_s1  ;;  %v3370_v20 = vsel %vm3345_vm11, %v3305_v54, %v2748_v4  ;;  %v15046_v36 = vld [vmem:[#allocation26_spill] sm:$0xff]  ;;  %v2985_v22 = vsel %vm2955_vm5, %v2920_v16, %v15049_v23  ;;  %v15059_v11 = vld [vmem:[#allocation29_spill] sm:$0xff] }
 0x3fc   :  { %4123 = vst.msk [vmem:[#allocation3 + $0x1b0] sm:$0xff] %vm4067_vm13, %v15022_v31  ;;  %4124 = vst.msk [vmem:[#allocation3 + $0x1b8] sm:$0xff] %vm4067_vm13, %v15022_v31  ;;  %2803 = vrot.lane.b32.xlu0 %v831_v37, %s9775_s30  ;;  %8408 = vmatprep.mubr.msk.f32.mxu0 %vm3421_vm12, %v3370_v20  ;;  %v2919_v60 = vsel %vm27_vm0, %v9706_v40, %v15046_v36  ;;  %v834_v37 = vld [vmem:[#allocation2 + $0x2f2] sm:$0xff]  ;;  %v3050_v21 = vsel %vm3020_vm6, %v2985_v22, %v15051_v17  ;;  %v15052_v54 = vld [vmem:[#allocation194_spill] sm:$0xff] }
 0x3fd   :  { %4125 = vst.msk [vmem:[#allocation3 + $0x1c0] sm:$0x3] %vm4070_vm14, %v15022_v31  ;;  %4128 = vst.msk [vmem:[#allocation3 + $0x1d8] sm:$0x3] %vm4070_vm14, %v15022_v31  ;;  %v2750_v39 = vpop.permute.xlu1 %2749  ;;  %v2984_v42 = vsel %vm2955_vm5, %v2919_v60, %v15048_v29  ;;  %v15060_v51 = vld [vmem:[#allocation84_spill] sm:$0xff]  ;;  %v771_v8 = vld [vmem:[#allocation2 + $0x301] sm:$0xff] }
 0x3fe   :  { %4126 = vst.msk [vmem:[#allocation3 + $0x1c8] sm:$0xff] %vm4067_vm13, %v15022_v31  ;;  %4127 = vst.msk [vmem:[#allocation3 + $0x1d0] sm:$0xff] %vm4067_vm13, %v15022_v31  ;;  %v3371_v57 = vsel %vm3345_vm11, %v3306_v5, %v2750_v39  ;;  %v2496_v56 = vpop.permute.xlu0 %2495  ;;  %v3049_v1 = vsel %vm3020_vm6, %v2984_v42, %v15050_v24  ;;  %v15053_v5 = vld [vmem:[#allocation195_spill] sm:$0xff]  ;;  %v15054_v39 = vld [vmem:[#allocation250_spill] sm:$0xff] }
 0x3ff   :  { %4129 = vst.msk [vmem:[#allocation3 + $0x1e0] sm:$0xff] %vm4067_vm13, %v15022_v31  ;;  %4130 = vst.msk [vmem:[#allocation3 + $0x1e8] sm:$0xff] %vm4067_vm13, %v15022_v31  ;;  %2805 = vrot.lane.b32.xlu1 %v832_v19, %s9775_s30  ;;  %8409 = vmatmul.mubr.msk.f32.gmra.mrb[24].mxu0 %vm3421_vm12, %v3371_v57  ;;  %v3307_v58 = vsel %vm3280_vm10, %v3242_v55, %v2496_v56  ;;  %v3114_v4 = vsel %vm3085_vm7, %v3049_v1, %v15052_v54  ;;  %v15056_v57 = vld [vmem:[#allocation302_spill] sm:$0xff]  ;;  %v9708_v56 = vld [vmem:[#allocation2 + $0x168] sm:$0xff] }
 0x400   :  { %4131 = vst.msk [vmem:[#allocation3 + $0x1f0] sm:$0x3] %vm4070_vm14, %v15022_v31  ;;  %4134 = vst.msk [vmem:[#allocation3 + $0x208] sm:$0x3] %vm4070_vm14, %v15022_v31  ;;  %2295 = vrot.lane.b32.xlu0 %v705_v61, %s9772_s20  ;;  %v3115_v20 = vsel %vm3085_vm7, %v3050_v21, %v15053_v5  ;;  %v3179_v43 = vsel %vm3150_vm8, %v3114_v4, %v15054_v39  ;;  %v15061_v62 = vld [vmem:[#allocation85_spill] sm:$0xff]  ;;  %v15062_v2 = vld [vmem:[#allocation140_spill] sm:$0xff] }
 0x401   :  { %4132 = vst.msk [vmem:[#allocation3 + $0x1f8] sm:$0xff] %vm4067_vm13, %v15022_v31  ;;  %4133 = vst.msk [vmem:[#allocation3 + $0x200] sm:$0xff] %vm4067_vm13, %v15022_v31  ;;  %v2498_v47 = vpop.permute.xlu1 %2497  ;;  %v3180_v44 = vsel %vm3150_vm8, %v3115_v20, %v15055_v46  ;;  %v3244_v48 = vsel %vm3215_vm9, %v3179_v43, %v15056_v57  ;;  %v15063_v13 = vld [vmem:[#allocation141_spill] sm:$0xff]  ;;  %v15068_v34 = vld [vmem:[#allocation304_spill] sm:$0xff] }
 0x402   :  { %4135 = vst.msk [vmem:[#allocation3 + $0x210] sm:$0xff] %vm4067_vm13, %v15022_v31  ;;  %4136 = vst.msk [vmem:[#allocation3 + $0x218] sm:$0xff] %vm4067_vm13, %v15022_v31  ;;  %v2752_v9 = vpop.permute.xlu0 %2751  ;;  %v3308_v49 = vsel %vm3280_vm10, %v3243_v0, %v2498_v47  ;;  %v3245_v59 = vsel %vm3215_vm9, %v3180_v44, %v15057_v3  ;;  %v2922_v47 = vsel %vm27_vm0, %v9709_v6, %v15059_v11  ;;  %v298_v36 = vld [vmem:[#allocation2 + $0x1b0] sm:$0xff]  ;;  %v835_v16 = vld [vmem:[#allocation2 + $0x302] sm:$0xff] }
 0x403   :  { %4137 = vst.msk [vmem:[#allocation3 + $0x220] sm:$0x3] %vm4070_vm14, %v15022_v31  ;;  %4140 = vst.msk [vmem:[#allocation3 + $0x238] sm:$0x3] %vm4070_vm14, %v15022_v31  ;;  %2297 = vrot.lane.b32.xlu1 %v706_v28, %s9772_s20  ;;  %v3372_v32 = vsel %vm3345_vm11, %v3307_v58, %v2752_v9  ;;  %v15058_v28 = vld [vmem:[#allocation28_spill] sm:$0xff]  ;;  %v2987_v52 = vsel %vm2955_vm5, %v2922_v47, %v15061_v62  ;;  %v15067_v60 = vld [vmem:[#allocation253_spill] sm:$0xff] }
 0x404   :  { %4138 = vst.msk [vmem:[#allocation3 + $0x228] sm:$0xff] %vm4067_vm13, %v15022_v31  ;;  %4139 = vst.msk [vmem:[#allocation3 + $0x230] sm:$0xff] %vm4067_vm13, %v15022_v31  ;;  %2551 = vrot.lane.b32.xlu0 %v769_v25, %s9774_s1  ;;  %8411 = vmatprep.mubr.msk.f32.mxu0 %vm3421_vm12, %v3372_v32  ;;  %v2921_v41 = vsel %vm27_vm0, %v9708_v56, %v15058_v28  ;;  %v772_v25 = vld [vmem:[#allocation2 + $0x309] sm:$0xff]  ;;  %v3052_v0 = vsel %vm3020_vm6, %v2987_v52, %v15063_v13  ;;  %v299_v29 = vld [vmem:[#allocation2 + $0x1b8] sm:$0xff] }
 0x405   :  { %4141 = vst.msk [vmem:[#allocation3 + $0x240] sm:$0xff] %vm4067_vm13, %v15022_v31  ;;  %4142 = vst.msk [vmem:[#allocation3 + $0x248] sm:$0xff] %vm4067_vm13, %v15022_v31  ;;  %v2754_v18 = vpop.permute.xlu1 %2753  ;;  %v2986_v27 = vsel %vm2955_vm5, %v2921_v41, %v15060_v51  ;;  %v15064_v58 = vld [vmem:[#allocation196_spill] sm:$0xff]  ;;  %v15069_v42 = vld [vmem:[#allocation305_spill] sm:$0xff] }
 0x406   :  { %4143 = vst.msk [vmem:[#allocation3 + $0x250] sm:$0x3] %vm4070_vm14, %v15022_v31  ;;  %4146 = vst.msk [vmem:[#allocation3 + $0x268] sm:$0x3] %vm4070_vm14, %v15022_v31  ;;  %v3373_v30 = vsel %vm3345_vm11, %v3308_v49, %v2754_v18  ;;  %v2500_v12 = vpop.permute.xlu0 %2499  ;;  %v3051_v50 = vsel %vm3020_vm6, %v2986_v27, %v15062_v2  ;;  %v15065_v49 = vld [vmem:[#allocation197_spill] sm:$0xff]  ;;  %v15066_v18 = vld [vmem:[#allocation252_spill] sm:$0xff] }
 0x407   :  { %4144 = vst.msk [vmem:[#allocation3 + $0x258] sm:$0xff] %vm4067_vm13, %v15022_v31  ;;  %4145 = vst.msk [vmem:[#allocation3 + $0x260] sm:$0xff] %vm4067_vm13, %v15022_v31  ;;  %2553 = vrot.lane.b32.xlu1 %v770_v33, %s9774_s1  ;;  %8412 = vmatmul.mubr.msk.f32.gmra.mrb[26].mxu0 %vm3421_vm12, %v3373_v30  ;;  %v3309_v53 = vsel %vm3280_vm10, %v3244_v48, %v2500_v12  ;;  %v3116_v9 = vsel %vm3085_vm7, %v3051_v50, %v15064_v58  ;;  %v836_v24 = vld [vmem:[#allocation2 + $0x30a] sm:$0xff]  ;;  %v15070_v17 = vld [vmem:[#allocation30_spill] sm:$0xff] }
 0x408   :  { %4147 = vst.msk [vmem:[#allocation3 + $0x270] sm:$0xff] %vm4067_vm13, %v15022_v31  ;;  %4148 = vst.msk [vmem:[#allocation3 + $0x278] sm:$0xff] %vm4067_vm13, %v15022_v31  ;;  %2807 = vrot.lane.b32.xlu0 %v833_v10, %s9775_s30  ;;  %v3117_v32 = vsel %vm3085_vm7, %v3052_v0, %v15065_v49  ;;  %v3181_v40 = vsel %vm3150_vm8, %v3116_v9, %v15066_v18  ;;  %v2923_v21 = vsel %vm27_vm0, %v298_v36, %v15070_v17  ;;  %v15071_v4 = vld [vmem:[#allocation31_spill] sm:$0xff]  ;;  %v15072_v5 = vld [vmem:[#allocation86_spill] sm:$0xff] }
 0x409   :  { %4149 = vst.msk [vmem:[#allocation3 + $0x280] sm:$0x3] %vm4070_vm14, %v15022_v31  ;;  %4152 = vst.msk [vmem:[#allocation3 + $0x298] sm:$0x3] %vm4070_vm14, %v15022_v31  ;;  %v2502_v19 = vpop.permute.xlu1 %2501  ;;  %v3182_v30 = vsel %vm3150_vm8, %v3117_v32, %v15067_v60  ;;  %v3246_v38 = vsel %vm3215_vm9, %v3181_v40, %v15068_v34  ;;  %v2988_v20 = vsel %vm2955_vm5, %v2923_v21, %v15072_v5  ;;  %v709_v39 = vld [vmem:[#allocation2 + $0x318] sm:$0xff]  ;;  %v15073_v43 = vld [vmem:[#allocation87_spill] sm:$0xff] }
 0x40a   :  { %4150 = vst.msk [vmem:[#allocation3 + $0x288] sm:$0xff] %vm4067_vm13, %v15022_v31  ;;  %4151 = vst.msk [vmem:[#allocation3 + $0x290] sm:$0xff] %vm4067_vm13, %v15022_v31  ;;  %v2756_v61 = vpop.permute.xlu0 %2755  ;;  %v3310_v15 = vsel %vm3280_vm10, %v3245_v59, %v2502_v19  ;;  %v3247_v10 = vsel %vm3215_vm9, %v3182_v30, %v15069_v42  ;;  %v2924_v19 = vsel %vm27_vm0, %v299_v29, %v15071_v4  ;;  %v15074_v44 = vld [vmem:[#allocation142_spill] sm:$0xff]  ;;  %v15075_v3 = vld [vmem:[#allocation143_spill] sm:$0xff] }
 0x40b   :  { %4153 = vst.msk [vmem:[#allocation3 + $0x2a0] sm:$0xff] %vm4067_vm13, %v15022_v31  ;;  %4154 = vst.msk [vmem:[#allocation3 + $0x2a8] sm:$0xff] %vm4067_vm13, %v15022_v31  ;;  %2809 = vrot.lane.b32.xlu1 %v834_v37, %s9775_s30  ;;  %v3374_v26 = vsel %vm3345_vm11, %v3309_v53, %v2756_v61  ;;  %v2989_v46 = vsel %vm2955_vm5, %v2924_v19, %v15073_v43  ;;  %v3053_v57 = vsel %vm3020_vm6, %v2988_v20, %v15074_v44  ;;  %v15076_v53 = vld [vmem:[#allocation198_spill] sm:$0xff]  ;;  %v15079_v28 = vld [vmem:[#allocation255_spill] sm:$0xff] }
 0x40c   :  { %4155 = vst.msk [vmem:[#allocation3 + $0x2b0] sm:$0x3] %vm4070_vm14, %v15022_v31  ;;  %4158 = vst.msk [vmem:[#allocation3 + $0x2c8] sm:$0x3] %vm4070_vm14, %v15022_v31  ;;  %2299 = vrot.lane.b32.xlu0 %v707_v7, %s9772_s20  ;;  %8414 = vmatprep.mubr.msk.f32.mxu0 %vm3421_vm12, %v3374_v26  ;;  %v710_v7 = vld [vmem:[#allocation2 + $0x320] sm:$0xff]  ;;  %v3054_v59 = vsel %vm3020_vm6, %v2989_v46, %v15075_v3  ;;  %v3118_v61 = vsel %vm3085_vm7, %v3053_v57, %v15076_v53  ;;  %v9711_v58 = vld [vmem:[#allocation2 + $0x1d0] sm:$0xff] }
 0x40d   :  { %4156 = vst.msk [vmem:[#allocation3 + $0x2b8] sm:$0xff] %vm4067_vm13, %v15022_v31  ;;  %4157 = vst.msk [vmem:[#allocation3 + $0x2c0] sm:$0xff] %vm4067_vm13, %v15022_v31  ;;  %v2758_v35 = vpop.permute.xlu1 %2757  ;;  %v773_v11 = vld [vmem:[#allocation2 + $0x319] sm:$0xff]  ;;  %v15081_v47 = vld [vmem:[#allocation307_spill] sm:$0xff] }
 0x40e   :  { %4159 = vst.msk [vmem:[#allocation3 + $0x2d0] sm:$0xff] %vm4067_vm13, %v15022_v31  ;;  %4160 = vst.msk [vmem:[#allocation3 + $0x2d8] sm:$0xff] %vm4067_vm13, %v15022_v31  ;;  %v3375_v63 = vsel %vm3345_vm11, %v3310_v15, %v2758_v35  ;;  %v2504_v55 = vpop.permute.xlu0 %2503  ;;  %v15077_v15 = vld [vmem:[#allocation199_spill] sm:$0xff]  ;;  %v15078_v35 = vld [vmem:[#allocation254_spill] sm:$0xff] }
 0x40f   :  { %4161 = vst.msk [vmem:[#allocation3 + $0x2e0] sm:$0x3] %vm4070_vm14, %v15022_v31  ;;  %4164 = vst.msk [vmem:[#allocation3 + $0x2f8] sm:$0x3] %vm4070_vm14, %v15022_v31  ;;  %2301 = vrot.lane.b32.xlu1 %v708_v14, %s9772_s20  ;;  %8415 = vmatmul.mubr.msk.f32.gmra.mrb[28].mxu0 %vm3421_vm12, %v3375_v63  ;;  %v3311_v23 = vsel %vm3280_vm10, %v3246_v38, %v2504_v55  ;;  %v3119_v26 = vsel %vm3085_vm7, %v3054_v59, %v15077_v15  ;;  %v15080_v63 = vld [vmem:[#allocation306_spill] sm:$0xff]  ;;  %v9710_v55 = vld [vmem:[#allocation2 + $0x1c8] sm:$0xff] }
 0x410   :  { %4162 = vst.msk [vmem:[#allocation3 + $0x2e8] sm:$0xff] %vm4067_vm13, %v15022_v31  ;;  %4163 = vst.msk [vmem:[#allocation3 + $0x2f0] sm:$0xff] %vm4067_vm13, %v15022_v31  ;;  %2555 = vrot.lane.b32.xlu0 %v771_v8, %s9774_s1  ;;  %v3183_v56 = vsel %vm3150_vm8, %v3118_v61, %v15078_v35  ;;  %v3184_v41 = vsel %vm3150_vm8, %v3119_v26, %v15079_v28  ;;  %v774_v62 = vld [vmem:[#allocation2 + $0x321] sm:$0xff]  ;;  %v15083_v9 = vld [vmem:[#allocation33_spill] sm:$0xff] }
 0x411   :  { %4165 = vst.msk [vmem:[#allocation3 + $0x300] sm:$0xff] %vm4067_vm13, %v15022_v31  ;;  %4166 = vst.msk [vmem:[#allocation3 + $0x308] sm:$0xff] %vm4067_vm13, %v15022_v31  ;;  %v2506_v33 = vpop.permute.xlu1 %2505  ;;  %v3248_v6 = vsel %vm3215_vm9, %v3183_v56, %v15080_v63  ;;  %v3249_v51 = vsel %vm3215_vm9, %v3184_v41, %v15081_v47  ;;  %v15084_v49 = vld [vmem:[#allocation88_spill] sm:$0xff]  ;;  %v837_v18 = vld [vmem:[#allocation2 + $0x31a] sm:$0xff] }
 0x412   :  { %4167 = vst.msk [vmem:[#allocation3 + $0x310] sm:$0x3] %vm4070_vm14, %v15022_v31  ;;  %4170 = vst.msk [vmem:[#allocation3 + $0x328] sm:$0x3] %vm4070_vm14, %v15022_v31  ;;  %v2760_v22 = vpop.permute.xlu0 %2759  ;;  %v3312_v1 = vsel %vm3280_vm10, %v3247_v10, %v2506_v33  ;;  %v2926_v33 = vsel %vm27_vm0, %v9711_v58, %v15083_v9  ;;  %v15085_v40 = vld [vmem:[#allocation89_spill] sm:$0xff]  ;;  %v15086_v60 = vld [vmem:[#allocation144_spill] sm:$0xff] }
 0x413   :  { %4168 = vst.msk [vmem:[#allocation3 + $0x318] sm:$0xff] %vm4067_vm13, %v15022_v31  ;;  %4169 = vst.msk [vmem:[#allocation3 + $0x320] sm:$0xff] %vm4067_vm13, %v15022_v31  ;;  %2557 = vrot.lane.b32.xlu1 %v772_v25, %s9774_s1  ;;  %v3376_v12 = vsel %vm3345_vm11, %v3311_v23, %v2760_v22  ;;  %v15082_v25 = vld [vmem:[#allocation32_spill] sm:$0xff]  ;;  %v2991_v36 = vsel %vm2955_vm5, %v2926_v33, %v15085_v40  ;;  %v838_v38 = vld [vmem:[#allocation2 + $0x322] sm:$0xff] }
 0x414   :  { %4171 = vst.msk [vmem:[#allocation3 + $0x330] sm:$0xff] %vm4067_vm13, %v15022_v31  ;;  %4172 = vst.msk [vmem:[#allocation3 + $0x338] sm:$0xff] %vm4067_vm13, %v15022_v31  ;;  %2811 = vrot.lane.b32.xlu0 %v835_v16, %s9775_s30  ;;  %8417 = vmatprep.mubr.msk.f32.mxu0 %vm3421_vm12, %v3376_v12  ;;  %v2925_v13 = vsel %vm27_vm0, %v9710_v55, %v15082_v25  ;;  %v15087_v16 = vld [vmem:[#allocation145_spill] sm:$0xff]  ;;  %v15088_v42 = vld [vmem:[#allocation200_spill] sm:$0xff] }
 0x415   :  { %4173 = vst.msk [vmem:[#allocation3 + $0x340] sm:$0x3] %vm4070_vm14, %v15022_v31  ;;  %4176 = vst.msk [vmem:[#allocation3 + $0x358] sm:$0x3] %vm4070_vm14, %v15022_v31  ;;  %v2762_v37 = vpop.permute.xlu1 %2761  ;;  %v2990_v32 = vsel %vm2955_vm5, %v2925_v13, %v15084_v49  ;;  %v3056_v29 = vsel %vm3020_vm6, %v2991_v36, %v15087_v16  ;;  %v15089_v22 = vld [vmem:[#allocation201_spill] sm:$0xff]  ;;  %v15092_v21 = vld [vmem:[#allocation308_spill] sm:$0xff] }
 0x416   :  { %4174 = vst.msk [vmem:[#allocation3 + $0x348] sm:$0xff] %vm4067_vm13, %v15022_v31  ;;  %4175 = vst.msk [vmem:[#allocation3 + $0x350] sm:$0xff] %vm4067_vm13, %v15022_v31  ;;  %v3377_v54 = vsel %vm3345_vm11, %v3312_v1, %v2762_v37  ;;  %v2508_v48 = vpop.permute.xlu0 %2507  ;;  %v3055_v30 = vsel %vm3020_vm6, %v2990_v32, %v15086_v60  ;;  %v15090_v1 = vld [vmem:[#allocation256_spill] sm:$0xff]  ;;  %v15091_v37 = vld [vmem:[#allocation257_spill] sm:$0xff] }
 0x417   :  { %2813 = vrot.lane.b32.xlu1 %v836_v24, %s9775_s30  ;;  %8418 = vmatmul.mubr.msk.f32.gmra.mrb[30].mxu0 %vm3421_vm12, %v3377_v54  ;;  %v3313_v27 = vsel %vm3280_vm10, %v3248_v6, %v2508_v48  ;;  %v3120_v10 = vsel %vm3085_vm7, %v3055_v30, %v15088_v42  ;;  %v3121_v24 = vsel %vm3085_vm7, %v3056_v29, %v15089_v22  ;;  %v711_v4 = vld [vmem:[#allocation2 + $0x330] sm:$0xff]  ;;  %v712_v43 = vld [vmem:[#allocation2 + $0x338] sm:$0xff]  ;;  %v9712_v48 = vld [vmem:[#allocation2 + $0x1e0] sm:$0xff] }
 0x418   :  { %2303 = vrot.lane.b32.xlu0 %v709_v39, %s9772_s20  ;;  %v3185_v12 = vsel %vm3150_vm8, %v3120_v10, %v15090_v1  ;;  %v3186_v17 = vsel %vm3150_vm8, %v3121_v24, %v15091_v37  ;;  %v15093_v19 = vld [vmem:[#allocation309_spill] sm:$0xff]  ;;  %v9713_v53 = vld [vmem:[#allocation2 + $0x1e8] sm:$0xff]  ;;  %v15096_v15 = vld [vmem:[#allocation90_spill] sm:$0xff] }
 0x419   :  { %v2510_v14 = vpop.permute.xlu1 %2509  ;;  %v3250_v54 = vsel %vm3215_vm9, %v3185_v12, %v15092_v21  ;;  %v3251_v5 = vsel %vm3215_vm9, %v3186_v17, %v15093_v19  ;;  %v15095_v61 = vld [vmem:[#allocation35_spill] sm:$0xff]  ;;  %v775_v35 = vld [vmem:[#allocation2 + $0x331] sm:$0xff]  ;;  %v15098_v41 = vld [vmem:[#allocation146_spill] sm:$0xff] }
 0x41a   :  { %v2764_v8 = vpop.permute.xlu0 %2763  ;;  %v3314_v52 = vsel %vm3280_vm10, %v3249_v51, %v2510_v14  ;;  %v2928_v14 = vsel %vm27_vm0, %v9713_v53, %v15095_v61  ;;  %v15097_v56 = vld [vmem:[#allocation91_spill] sm:$0xff]  ;;  %v839_v9 = vld [vmem:[#allocation2 + $0x332] sm:$0xff]  ;;  %v840_v40 = vld [vmem:[#allocation2 + $0x33a] sm:$0xff] }
 0x41b   :  { %2305 = vrot.lane.b32.xlu1 %v710_v7, %s9772_s20  ;;  %v3378_v2 = vsel %vm3345_vm11, %v3313_v27, %v2764_v8  ;;  %v15094_v7 = vld [vmem:[#allocation34_spill] sm:$0xff]  ;;  %v2993_v28 = vsel %vm2955_vm5, %v2928_v14, %v15097_v56  ;;  %v15099_v47 = vld [vmem:[#allocation147_spill] sm:$0xff]  ;;  %v15107_v10 = vld [vmem:[#allocation37_spill] sm:$0xff] }
 0x41c   :  { %2559 = vrot.lane.b32.xlu0 %v773_v11, %s9774_s1  ;;  %8420 = vmatprep.mubr.msk.f32.mxu0 %vm3421_vm12, %v3378_v2  ;;  %v2927_v3 = vsel %vm27_vm0, %v9712_v48, %v15094_v7  ;;  %v776_v11 = vld [vmem:[#allocation2 + $0x339] sm:$0xff]  ;;  %v3058_v51 = vsel %vm3020_vm6, %v2993_v28, %v15099_v47  ;;  %v15103_v25 = vld [vmem:[#allocation259_spill] sm:$0xff]  ;;  %v15108_v22 = vld [vmem:[#allocation92_spill] sm:$0xff] }
 0x41d   :  { %v2766_v50 = vpop.permute.xlu1 %2765  ;;  %v2992_v26 = vsel %vm2955_vm5, %v2927_v3, %v15096_v15  ;;  %v15100_v27 = vld [vmem:[#allocation202_spill] sm:$0xff]  ;;  %v15105_v33 = vld [vmem:[#allocation311_spill] sm:$0xff]  ;;  %v15109_v12 = vld [vmem:[#allocation93_spill] sm:$0xff] }
 0x41e   :  { %v3379_v0 = vsel %vm3345_vm11, %v3314_v52, %v2766_v50  ;;  %v2512_v34 = vpop.permute.xlu0 %2511  ;;  %v3057_v63 = vsel %vm3020_vm6, %v2992_v26, %v15098_v41  ;;  %v15101_v52 = vld [vmem:[#allocation203_spill] sm:$0xff]  ;;  %v15102_v50 = vld [vmem:[#allocation258_spill] sm:$0xff]  ;;  %v15110_v17 = vld [vmem:[#allocation148_spill] sm:$0xff] }
 0x41f   :  { %2561 = vrot.lane.b32.xlu1 %v774_v62, %s9774_s1  ;;  %8421 = vmatmul.mubr.msk.f32.gmra.mrb[32].mxu0 %vm3421_vm12, %v3379_v0  ;;  %v3315_v20 = vsel %vm3280_vm10, %v3250_v54, %v2512_v34  ;;  %v3122_v8 = vsel %vm3085_vm7, %v3057_v63, %v15100_v27  ;;  %v3123_v2 = vsel %vm3085_vm7, %v3058_v51, %v15101_v52  ;;  %v15104_v0 = vld [vmem:[#allocation310_spill] sm:$0xff]  ;;  %v713_v1 = vld [vmem:[#allocation2 + $0x348] sm:$0xff]  ;;  %v15111_v19 = vld [vmem:[#allocation149_spill] sm:$0xff] }
 0x420   :  { %2815 = vrot.lane.b32.xlu0 %v837_v18, %s9775_s30  ;;  %v3187_v55 = vsel %vm3150_vm8, %v3122_v8, %v15102_v50  ;;  %v3188_v13 = vsel %vm3150_vm8, %v3123_v2, %v15103_v25  ;;  %v9714_v34 = vld [vmem:[#allocation2 + $0x1f8] sm:$0xff]  ;;  %v9715_v42 = vld [vmem:[#allocation2 + $0x200] sm:$0xff]  ;;  %v777_v61 = vld [vmem:[#allocation2 + $0x349] sm:$0xff] }
 0x421   :  { %v2514_v23 = vpop.permute.xlu1 %2513  ;;  %v3252_v58 = vsel %vm3215_vm9, %v3187_v55, %v15104_v0  ;;  %v3253_v49 = vsel %vm3215_vm9, %v3188_v13, %v15105_v33  ;;  %v15115_v7 = vld [vmem:[#allocation261_spill] sm:$0xff]  ;;  %v15119_v8 = vld [vmem:[#allocation39_spill] sm:$0xff]  ;;  %v15120_v52 = vld [vmem:[#allocation94_spill] sm:$0xff] }
 0x422   :  { %v2768_v39 = vpop.permute.xlu0 %2767  ;;  %v3316_v46 = vsel %vm3280_vm10, %v3251_v5, %v2514_v23  ;;  %v2930_v23 = vsel %vm27_vm0, %v9715_v42, %v15107_v10  ;;  %v15117_v14 = vld [vmem:[#allocation313_spill] sm:$0xff]  ;;  %v841_v50 = vld [vmem:[#allocation2 + $0x34a] sm:$0xff]  ;;  %v4306_v55 = vld [vmem:[#allocation3 + $0x1] sm:$0xff] }
 0x423   :  { %2817 = vrot.lane.b32.xlu1 %v838_v38, %s9775_s30  ;;  %v3380_v44 = vsel %vm3345_vm11, %v3315_v20, %v2768_v39  ;;  %v15106_v38 = vld [vmem:[#allocation36_spill] sm:$0xff]  ;;  %v2995_v37 = vsel %vm2955_vm5, %v2930_v23, %v15109_v12  ;;  %v9717_v27 = vld [vmem:[#allocation2 + $0x218] sm:$0xff]  ;;  %v15121_v13 = vld [vmem:[#allocation95_spill] sm:$0xff] }
 0x424   :  { %2307 = vrot.lane.b32.xlu0 %v711_v4, %s9772_s20  ;;  %8423 = vmatprep.mubr.msk.f32.mxu0 %vm3421_vm12, %v3380_v44  ;;  %v2929_v16 = vsel %vm27_vm0, %v9714_v34, %v15106_v38  ;;  %v714_v4 = vld [vmem:[#allocation2 + $0x350] sm:$0xff]  ;;  %v3060_v5 = vsel %vm3020_vm6, %v2995_v37, %v15111_v19  ;;  %v15126_v38 = vld [vmem:[#allocation262_spill] sm:$0xff]  ;;  %v15127_v42 = vld [vmem:[#allocation263_spill] sm:$0xff] }
 0x425   :  { %v2770_v57 = vpop.permute.xlu1 %2769  ;;  %v2994_v24 = vsel %vm2955_vm5, %v2929_v16, %v15108_v22  ;;  %v15112_v20 = vld [vmem:[#allocation204_spill] sm:$0xff]  ;;  %v15128_v23 = vld [vmem:[#allocation314_spill] sm:$0xff] }
 0x426   :  { %v3381_v59 = vsel %vm3345_vm11, %v3316_v46, %v2770_v57  ;;  %v2516_v6 = vpop.permute.xlu0 %2515  ;;  %v3059_v21 = vsel %vm3020_vm6, %v2994_v24, %v15110_v17  ;;  %v15113_v46 = vld [vmem:[#allocation205_spill] sm:$0xff]  ;;  %v15114_v57 = vld [vmem:[#allocation260_spill] sm:$0xff]  ;;  %v15129_v24 = vld [vmem:[#allocation315_spill] sm:$0xff] }
 0x427   :  { %2309 = vrot.lane.b32.xlu1 %v712_v43, %s9772_s20  ;;  %8424 = vmatmul.mubr.msk.f32.gmra.mrb[34].mxu0 %vm3421_vm12, %v3381_v59  ;;  %v3317_v32 = vsel %vm3280_vm10, %v3252_v58, %v2516_v6  ;;  %v3124_v39 = vsel %vm3085_vm7, %v3059_v21, %v15112_v20  ;;  %v3125_v44 = vsel %vm3085_vm7, %v3060_v5, %v15113_v46  ;;  %v15116_v59 = vld [vmem:[#allocation312_spill] sm:$0xff]  ;;  %v15122_v58 = vld [vmem:[#allocation150_spill] sm:$0xff] }
 0x428   :  { %2563 = vrot.lane.b32.xlu0 %v775_v35, %s9774_s1  ;;  %v3189_v48 = vsel %vm3150_vm8, %v3124_v39, %v15114_v57  ;;  %v3190_v3 = vsel %vm3150_vm8, %v3125_v44, %v15115_v7  ;;  %v778_v56 = vld [vmem:[#allocation2 + $0x351] sm:$0xff]  ;;  %v4307_v25 = vld [vmem:[#allocation3 + $0x9] sm:$0xff] }
 0x429   :  { %v2518_v62 = vpop.permute.xlu1 %2517  ;;  %v3254_v53 = vsel %vm3215_vm9, %v3189_v48, %v15116_v59  ;;  %v3255_v15 = vsel %vm3215_vm9, %v3190_v3, %v15117_v14  ;;  %v9716_v6 = vld [vmem:[#allocation2 + $0x210] sm:$0xff] }
 0x42a   :  { %v2772_v18 = vpop.permute.xlu0 %2771  ;;  %v3318_v36 = vsel %vm3280_vm10, %v3253_v49, %v2518_v62  ;;  %v2932_v62 = vsel %vm27_vm0, %v9717_v27, %v15119_v8  ;;  %v842_v49 = vld [vmem:[#allocation2 + $0x352] sm:$0xff]  ;;  %v15130_v19 = vld [vmem:[#allocation40_spill] sm:$0xff] }
 0x42b   :  { %2565 = vrot.lane.b32.xlu1 %v776_v11, %s9774_s1  ;;  %v3382_v60 = vsel %vm3345_vm11, %v3317_v32, %v2772_v18  ;;  %v15118_v11 = vld [vmem:[#allocation38_spill] sm:$0xff]  ;;  %v2997_v0 = vsel %vm2955_vm5, %v2932_v62, %v15121_v13  ;;  %v15123_v32 = vld [vmem:[#allocation151_spill] sm:$0xff]  ;;  %v9719_v39 = vld [vmem:[#allocation2 + $0x230] sm:$0xff] }
 0x42c   :  { %2819 = vrot.lane.b32.xlu0 %v839_v9, %s9775_s30  ;;  %8426 = vmatprep.mubr.msk.f32.mxu0 %vm3421_vm12, %v3382_v60  ;;  %v2931_v47 = vsel %vm27_vm0, %v9716_v6, %v15118_v11  ;;  %v3062_v18 = vsel %vm3020_vm6, %v2997_v0, %v15123_v32  ;;  %v15132_v44 = vld [vmem:[#allocation96_spill] sm:$0xff]  ;;  %v15133_v48 = vld [vmem:[#allocation97_spill] sm:$0xff]  ;;  %v15142_v13 = vld [vmem:[#allocation42_spill] sm:$0xff] }
 0x42d   :  { %v2774_v30 = vpop.permute.xlu1 %2773  ;;  %v2996_v2 = vsel %vm2955_vm5, %v2931_v47, %v15120_v52  ;;  %v15134_v3 = vld [vmem:[#allocation152_spill] sm:$0xff]  ;;  %v15139_v6 = vld [vmem:[#allocation265_spill] sm:$0xff]  ;;  %v15144_v32 = vld [vmem:[#allocation98_spill] sm:$0xff] }
 0x42e   :  { %v3383_v29 = vsel %vm3345_vm11, %v3318_v36, %v2774_v30  ;;  %v2520_v54 = vpop.permute.xlu0 %2519  ;;  %v3061_v9 = vsel %vm3020_vm6, %v2996_v2, %v15122_v58  ;;  %v15125_v30 = vld [vmem:[#allocation207_spill] sm:$0xff]  ;;  %v15140_v47 = vld [vmem:[#allocation316_spill] sm:$0xff]  ;;  %v15141_v27 = vld [vmem:[#allocation317_spill] sm:$0xff] }
 0x42f   :  { %2821 = vrot.lane.b32.xlu1 %v840_v40, %s9775_s30  ;;  %8427 = vmatmul.mubr.msk.f32.gmra.mrb[36].mxu0 %vm3421_vm12, %v3383_v29  ;;  %v3319_v26 = vsel %vm3280_vm10, %v3254_v53, %v2520_v54  ;;  %v15124_v40 = vld [vmem:[#allocation206_spill] sm:$0xff]  ;;  %v3127_v34 = vsel %vm3085_vm7, %v3062_v18, %v15125_v30  ;;  %v8720_v29 = vpack.i.bf16 %v4307_v25, %v4306_v55 }
 0x430   :  { %2311 = vrot.lane.b32.xlu0 %v713_v1, %s9772_s20  ;;  %v3126_v36 = vsel %vm3085_vm7, %v3061_v9, %v15124_v40  ;;  %v3192_v10 = vsel %vm3150_vm8, %v3127_v34, %v15127_v42  ;;  %v9720_v25 = vld [vmem:[#allocation2 + $0x240] sm:$0xff]  ;;  %v9721_v9 = vld [vmem:[#allocation2 + $0x248] sm:$0xff] }
 0x431   :  { %v2522_v43 = vpop.permute.xlu1 %2521  ;;  %v3191_v16 = vsel %vm3150_vm8, %v3126_v36, %v15126_v38  ;;  %v3257_v1 = vsel %vm3215_vm9, %v3192_v10, %v15129_v24  ;;  %v2935_v0 = vsel %vm27_vm0, %v9720_v25, %v15142_v13  ;;  %v15145_v40 = vld [vmem:[#allocation99_spill] sm:$0xff]  ;;  %v15150_v24 = vld [vmem:[#allocation266_spill] sm:$0xff] }
 0x432   :  { %v2776_v35 = vpop.permute.xlu0 %2775  ;;  %v3320_v28 = vsel %vm3280_vm10, %v3255_v15, %v2522_v43  ;;  %v3256_v22 = vsel %vm3215_vm9, %v3191_v16, %v15128_v23  ;;  %v15131_v43 = vld [vmem:[#allocation41_spill] sm:$0xff]  ;;  %v15136_v15 = vld [vmem:[#allocation208_spill] sm:$0xff]  ;;  %v3000_v18 = vsel %vm2955_vm5, %v2935_v0, %v15144_v32  ;;  %v15147_v38 = vld [vmem:[#allocation155_spill] sm:$0xff] }
 0x433   :  { %2313 = vrot.lane.b32.xlu1 %v714_v4, %s9772_s20  ;;  %v3384_v41 = vsel %vm3345_vm11, %v3319_v26, %v2776_v35  ;;  %v9718_v4 = vld [vmem:[#allocation2 + $0x228] sm:$0xff]  ;;  %v2934_v46 = vsel %vm27_vm0, %v9719_v39, %v15131_v43  ;;  %v15166_v32 = vld [vmem:[#allocation46_spill] sm:$0xff] }
 0x434   :  { %2567 = vrot.lane.b32.xlu0 %v777_v61, %s9774_s1  ;;  %8429 = vmatprep.mubr.msk.f32.mxu0 %vm3421_vm12, %v3384_v41  ;;  %v2933_v5 = vsel %vm27_vm0, %v9718_v4, %v15130_v19  ;;  %v2999_v7 = vsel %vm2955_vm5, %v2934_v46, %v15133_v48  ;;  %v15135_v61 = vld [vmem:[#allocation153_spill] sm:$0xff]  ;;  %v15138_v41 = vld [vmem:[#allocation264_spill] sm:$0xff]  ;;  %v15149_v23 = vld [vmem:[#allocation211_spill] sm:$0xff] }
 0x435   :  { %v2778_v63 = vpop.permute.xlu1 %2777  ;;  %v2998_v57 = vsel %vm2955_vm5, %v2933_v5, %v15132_v44  ;;  %v3064_v14 = vsel %vm3020_vm6, %v2999_v7, %v15135_v61  ;;  %v9722_v46 = vld [vmem:[#allocation2 + $0x258] sm:$0xff]  ;;  %v15154_v44 = vld [vmem:[#allocation44_spill] sm:$0xff]  ;;  %v9723_v7 = vld [vmem:[#allocation2 + $0x260] sm:$0xff] }
 0x436   :  { %v3385_v51 = vsel %vm3345_vm11, %v3320_v28, %v2778_v63  ;;  %v2524_v33 = vpop.permute.xlu0 %2523  ;;  %v3063_v59 = vsel %vm3020_vm6, %v2998_v57, %v15134_v3  ;;  %v2937_v57 = vsel %vm27_vm0, %v9722_v46, %v15154_v44  ;;  %v15155_v3 = vld [vmem:[#allocation45_spill] sm:$0xff] }
 0x437   :  { %2569 = vrot.lane.b32.xlu1 %v778_v56, %s9774_s1  ;;  %8430 = vmatmul.mubr.msk.f32.gmra.mrb[38].mxu0 %vm3421_vm12, %v3385_v51  ;;  %v3321_v12 = vsel %vm3280_vm10, %v3256_v22, %v2524_v33  ;;  %v3128_v26 = vsel %vm3085_vm7, %v3063_v59, %v15136_v15  ;;  %v15137_v56 = vld [vmem:[#allocation209_spill] sm:$0xff]  ;;  %v15143_v33 = vld [vmem:[#allocation43_spill] sm:$0xff]  ;;  %v2938_v59 = vsel %vm27_vm0, %v9723_v7, %v15155_v3 }
 0x438   :  { %2823 = vrot.lane.b32.xlu0 %v841_v50, %s9775_s30  ;;  %v3129_v28 = vsel %vm3085_vm7, %v3064_v14, %v15137_v56  ;;  %v3193_v63 = vsel %vm3150_vm8, %v3128_v26, %v15138_v41  ;;  %v15157_v14 = vld [vmem:[#allocation101_spill] sm:$0xff]  ;;  %v15158_v26 = vld [vmem:[#allocation156_spill] sm:$0xff] }
 0x439   :  { %v2526_v60 = vpop.permute.xlu1 %2525  ;;  %v3194_v11 = vsel %vm3150_vm8, %v3129_v28, %v15139_v6  ;;  %v3258_v51 = vsel %vm3215_vm9, %v3193_v63, %v15140_v47  ;;  %v3003_v15 = vsel %vm2955_vm5, %v2938_v59, %v15157_v14  ;;  %v15159_v28 = vld [vmem:[#allocation157_spill] sm:$0xff]  ;;  %v15160_v63 = vld [vmem:[#allocation212_spill] sm:$0xff] }
 0x43a   :  { %v2780_v37 = vpop.permute.xlu0 %2779  ;;  %v3322_v17 = vsel %vm3280_vm10, %v3257_v1, %v2526_v60  ;;  %v3259_v8 = vsel %vm3215_vm9, %v3194_v11, %v15141_v27  ;;  %v15146_v60 = vld [vmem:[#allocation154_spill] sm:$0xff]  ;;  %v3068_v41 = vsel %vm3020_vm6, %v3003_v15, %v15159_v28  ;;  %v15161_v47 = vld [vmem:[#allocation213_spill] sm:$0xff]  ;;  %v15162_v27 = vld [vmem:[#allocation268_spill] sm:$0xff] }
 0x43b   :  { %2825 = vrot.lane.b32.xlu1 %v842_v49, %s9775_s30  ;;  %v3386_v21 = vsel %vm3345_vm11, %v3321_v12, %v2780_v37  ;;  %v2936_v49 = vsel %vm27_vm0, %v9721_v9, %v15143_v33  ;;  %v3065_v30 = vsel %vm3020_vm6, %v3000_v18, %v15146_v60  ;;  %v15151_v12 = vld [vmem:[#allocation267_spill] sm:$0xff]  ;;  %s9782_s30 = smov [#allocation4]  }
 0x43c   :  { %8432 = vmatprep.mubr.msk.f32.mxu0 %vm3421_vm12, %v3386_v21  ;;  %8721 = vrot.lane.b32.xlu0 %v8720_v29, %s9776_s8  ;;  %v3001_v36 = vsel %vm2955_vm5, %v2936_v49, %v15145_v40  ;;  %v15148_v29 = vld [vmem:[#allocation210_spill] sm:$0xff]  ;;  %v9724_v49 = vld [vmem:[#allocation2 + $0x270] sm:$0xff]  ;;  %v15167_v60 = vld [vmem:[#allocation47_spill] sm:$0xff]  ;;  %s8075_s9 = sshll.u32 %s9782_s30, 4  ;;  %s8076_s9 = int_to_ptr.vmem [resolvable:$true] %s8075_s9 }
 0x43d   :  { %v2782_v54 = vpop.permute.xlu1 %2781  ;;  %v3066_v16 = vsel %vm3020_vm6, %v3001_v36, %v15147_v38  ;;  %v3130_v42 = vsel %vm3085_vm7, %v3065_v30, %v15148_v29  ;;  %v2939_v18 = vsel %vm27_vm0, %v9724_v49, %v15166_v32  ;;  %v9725_v36 = vld [vmem:[#allocation2 + $0x278] sm:$0xff]  ;;  %s9742_s10 = scalar_lea.vmem %s8076_s9, 32  ;;  %p9747_p1 = scmp.lt.s32.totalorder %s8076_s9, %s8076_s9 }
 0x43e   :  { %v3387_v20 = vsel %vm3345_vm11, %v3322_v17, %v2782_v54  ;;  %v2528_v53 = vpop.permute.xlu0 %2527  ;;  %v3131_v22 = vsel %vm3085_vm7, %v3066_v16, %v15149_v23  ;;  %v3195_v1 = vsel %vm3150_vm8, %v3130_v42, %v15150_v24  ;;  %v15152_v17 = vld [vmem:[#allocation318_spill] sm:$0xff]  ;;  %v15153_v54 = vld [vmem:[#allocation319_spill] sm:$0xff]  ;;  %v2940_v30 = vsel %vm27_vm0, %v9725_v36, %v15167_v60  ;;  %v15186_v49 = vld [vmem:[#allocation273_spill] sm:$0xff]  ;;  %p9743_p0 = scmp.ne.s32.totalorder %s8076_s9, %s9742_s10  ;;  %p9748_p2 = scmp.lt.s32.totalorder %s9742_s10, %s9742_s10 }
 0x43f   :  { %8433 = vmatmul.mubr.msk.f32.gmra.mrb[40].mxu0 %vm3421_vm12, %v3387_v20  ;;  %v3323_v62 = vsel %vm3280_vm10, %v3258_v51, %v2528_v53  ;;  %v3196_v37 = vsel %vm3150_vm8, %v3131_v22, %v15151_v12  ;;  %v3260_v21 = vsel %vm3215_vm9, %v3195_v1, %v15152_v17  ;;  %v15156_v53 = vld [vmem:[#allocation100_spill] sm:$0xff]  ;;  %v3133_v51 = vsel %vm3085_vm7, %v3068_v41, %v15161_v47  ;;  %v15169_v16 = vld [vmem:[#allocation103_spill] sm:$0xff]  ;;  %v15170_v42 = vld [vmem:[#allocation158_spill] sm:$0xff] }
 0x440   :  { %v3261_v4 = vsel %vm3215_vm9, %v3196_v37, %v15153_v54  ;;  %v3002_v61 = vsel %vm2955_vm5, %v2937_v57, %v15156_v53  ;;  %v3005_v29 = vsel %vm2955_vm5, %v2940_v30, %v15169_v16  ;;  %v15171_v22 = vld [vmem:[#allocation159_spill] sm:$0xff]  ;;  %v15172_v1 = vld [vmem:[#allocation214_spill] sm:$0xff]  ;;  %v15179_v41 = vld [vmem:[#allocation104_spill] sm:$0xff]  ;;  %p9749_p3 = por %p9748_p2, %p9747_p1 }
 0x441   :  { %v2530_v35 = vpop.permute.xlu1 %2529  ;;  %v3070_v24 = vsel %vm3020_vm6, %v3005_v29, %v15171_v22  ;;  %v15173_v17 = vld [vmem:[#allocation215_spill] sm:$0xff]  ;;  %v15174_v54 = vld [vmem:[#allocation270_spill] sm:$0xff]  ;;  %v15181_v47 = vld [vmem:[#allocation160_spill] sm:$0xff] }
 0x442   :  { %v2784_v52 = vpop.permute.xlu0 %2783  ;;  %v3324_v2 = vsel %vm3280_vm10, %v3259_v8, %v2530_v35  ;;  %v3067_v35 = vsel %vm3020_vm6, %v3002_v61, %v15158_v26  ;;  %v6741_v57 = vld [vmem:[%s14605_s3] sm:$0xff]  ;;  %v9726_v53 = vld [vmem:[#allocation2 + $0x288] sm:$0xff]  ;;  %v9777_v26 = vmov 0.0|0.0   ;;  %p9750_p4 = pnand %p9749_p3, %p9743_p0 }
 0x443   :  { %v3388_v50 = vsel %vm3345_vm11, %v3323_v62, %v2784_v52  ;;  %v3132_v6 = vsel %vm3085_vm7, %v3067_v35, %v15160_v63  ;;  %v15163_v62 = vld [vmem:[#allocation269_spill] sm:$0xff]  ;;  %v15177_v61 = vld [vmem:[#allocation48_spill] sm:$0xff]  ;;  %8669 = vmatprep.subr.bf16.mxu1 %v9777_v26  ;;  %8601 = vmatprep.subr.bf16.mxu0 %v9777_v26 }
 0x444   :  { %8435 = vmatprep.mubr.msk.f32.mxu0 %vm3421_vm12, %v3388_v50  ;;  %v3197_v8 = vsel %vm3150_vm8, %v3132_v6, %v15162_v27  ;;  %v3198_v52 = vsel %vm3150_vm8, %v3133_v51, %v15163_v62  ;;  %v2941_v14 = vsel %vm27_vm0, %v9726_v53, %v15177_v61  ;;  %v9727_v35 = vld [vmem:[#allocation2 + $0x290] sm:$0xff]  ;;  %v6744_v62 = vld [vmem:[%s14605_s3 + $0x18] sm:$0xff]  ;;  %v6746_v16 = vld [vmem:[%s14605_s3 + $0x28] sm:$0xff] }
 0x445   :  { %v2786_v55 = vpop.permute.xlu1 %2785  ;;  %v3006_v63 = vsel %vm2955_vm5, %v2941_v14, %v15179_v41  ;;  %v15180_v6 = vld [vmem:[#allocation105_spill] sm:$0xff]  ;;  %v15188_v36 = vld [vmem:[#allocation324_spill] sm:$0xff]  ;;  %v15195_v61 = vld [vmem:[#allocation218_spill] sm:$0xff] }
 0x446   :  { %v3389_v58 = vsel %vm3345_vm11, %v3324_v2, %v2786_v55  ;;  %v2532_v34 = vpop.permute.xlu0 %2531  ;;  %v15164_v2 = vld [vmem:[#allocation320_spill] sm:$0xff]  ;;  %v15165_v55 = vld [vmem:[#allocation321_spill] sm:$0xff]  ;;  %v3071_v51 = vsel %vm3020_vm6, %v3006_v63, %v15181_v47  ;;  %v15197_v41 = vld [vmem:[#allocation274_spill] sm:$0xff] }
 0x447   :  { %8436 = vmatmul.mubr.msk.f32.gmra.mrb[42].mxu0 %vm3421_vm12, %v3389_v58  ;;  %v3325_v19 = vsel %vm3280_vm10, %v3260_v21, %v2532_v34  ;;  %v3262_v50 = vsel %vm3215_vm9, %v3197_v8, %v15164_v2  ;;  %v3263_v25 = vsel %vm3215_vm9, %v3198_v52, %v15165_v55  ;;  %v15168_v34 = vld [vmem:[#allocation102_spill] sm:$0xff]  ;;  %v3135_v21 = vsel %vm3085_vm7, %v3070_v24, %v15173_v17  ;;  %v6743_v8 = vld [vmem:[%s14605_s3 + $0x10] sm:$0xff] }
 0x448   :  { %v3004_v38 = vsel %vm2955_vm5, %v2939_v18, %v15168_v34  ;;  %v15182_v52 = vld [vmem:[#allocation161_spill] sm:$0xff]  ;;  %v15187_v18 = vld [vmem:[#allocation323_spill] sm:$0xff] }
 0x449   :  { %v2534_v10 = vpop.permute.xlu1 %2533 }
 0x44a   :  { %v2788_v5 = vpop.permute.xlu0 %2787  ;;  %v3326_v20 = vsel %vm3280_vm10, %v3261_v4, %v2534_v10  ;;  %v3069_v10 = vsel %vm3020_vm6, %v3004_v38, %v15170_v42  ;;  %v6745_v38 = vld [vmem:[%s14605_s3 + $0x20] sm:$0xff] }
 0x44b   :  { %v3390_v39 = vsel %vm3345_vm11, %v3325_v19, %v2788_v5  ;;  %v3134_v12 = vsel %vm3085_vm7, %v3069_v10, %v15172_v1  ;;  %v15175_v19 = vld [vmem:[#allocation271_spill] sm:$0xff]  ;;  %v6747_v1 = vld [vmem:[%s14605_s3 + $0x30] sm:$0xff] }
 0x44c   :  { %8438 = vmatprep.mubr.msk.f32.mxu0 %vm3421_vm12, %v3390_v39  ;;  %v3199_v4 = vsel %vm3150_vm8, %v3134_v12, %v15174_v54  ;;  %v3200_v5 = vsel %vm3150_vm8, %v3135_v21, %v15175_v19  ;;  %v15176_v39 = vld [vmem:[#allocation322_spill] sm:$0xff]  ;;  %v9729_v19 = vld [vmem:[#allocation2 + $0x2a8] sm:$0xff] }
 0x44d   :  { %v2790_v43 = vpop.permute.xlu1 %2789  ;;  %v6748_v12 = vld [vmem:[%s14605_s3 + $0x38] sm:$0xff]  ;;  %v9728_v21 = vld [vmem:[#allocation2 + $0x2a0] sm:$0xff] }
 0x44e   :  { %v3391_v48 = vsel %vm3345_vm11, %v3326_v20, %v2790_v43  ;;  %v2536_v56 = vpop.permute.xlu0 %2535  ;;  %v3264_v20 = vsel %vm3215_vm9, %v3199_v4, %v11525_v45  ;;  %v3265_v43 = vsel %vm3215_vm9, %v3200_v5, %v15176_v39  ;;  %v8611_v17 = vpack.c.bf16 %v6748_v12, %v6747_v1  ;;  %v15189_v54 = vld [vmem:[#allocation50_spill] sm:$0xff]  ;;  %v15190_v5 = vld [vmem:[#allocation51_spill] sm:$0xff]  ;;  %v15202_v1 = vld [vmem:[#allocation109_spill] sm:$0xff] }
 0x44f   :  { %8439 = vmatmul.mubr.msk.f32.gmra.mrb[44].mxu0 %vm3421_vm12, %v3391_v48  ;;  %v3327_v13 = vsel %vm3280_vm10, %v3262_v50, %v2536_v56  ;;  %v6742_v48 = vld [vmem:[%s14605_s3 + $0x8] sm:$0xff]  ;;  %v15178_v56 = vld [vmem:[#allocation49_spill] sm:$0xff]  ;;  %v2943_v4 = vsel %vm27_vm0, %v9728_v21, %v15189_v54  ;;  %v15191_v39 = vld [vmem:[#allocation106_spill] sm:$0xff] }
 0x450   :  { %v8602_v45 = vpack.c.bf16 %v6742_v48, %v6741_v57  ;;  %v2942_v28 = vsel %vm27_vm0, %v9727_v35, %v15178_v56  ;;  %v15183_v50 = vld [vmem:[#allocation216_spill] sm:$0xff]  ;;  %v15193_v57 = vld [vmem:[#allocation162_spill] sm:$0xff]  ;;  %v15196_v56 = vld [vmem:[#allocation219_spill] sm:$0xff] }
 0x451   :  { %v2538_v11 = vpop.permute.xlu1 %2537  ;;  %v3136_v55 = vsel %vm3085_vm7, %v3071_v51, %v15183_v50  ;;  %v6755_v54 = vld [vmem:[%s14605_s3 + $0x70] sm:$0xff] }
 0x452   :  { %v2792_v0 = vpop.permute.xlu0 %2791  ;;  %v3328_v58 = vsel %vm3280_vm10, %v3263_v25, %v2538_v11  ;;  %8685 = vmatpush1.bf16.msra.mxu1 %v8602_v45  ;;  %v3007_v11 = vsel %vm2955_vm5, %v2942_v28, %v15180_v6  ;;  %8603 = vmatpush1.bf16.msra.mxu0 %v8602_v45  ;;  %v15194_v45 = vld [vmem:[#allocation163_spill] sm:$0xff] }
 0x453   :  { %v3392_v9 = vsel %vm3345_vm11, %v3327_v13, %v2792_v0  ;;  %8670 = vmatprep.subr.bf16.mxu1 %v9777_v26  ;;  %v3072_v2 = vsel %vm3020_vm6, %v3007_v11, %v15182_v52  ;;  %v8605_v13 = vpack.c.bf16 %v6744_v62, %v6743_v8  ;;  %v15184_v0 = vld [vmem:[#allocation217_spill] sm:$0xff]  ;;  %8604 = vmatprep.subr.bf16.mxu0 %v9777_v26  ;;  %v15198_v6 = vld [vmem:[#allocation275_spill] sm:$0xff]  ;;  %v12691_v62 = vld [vmem:[%s14604_s2] ss:$0 sm:$0xff] }
 0x454   :  { %8441 = vmatprep.mubr.msk.f32.mxu0 %vm3421_vm12, %v3392_v9  ;;  %v15185_v9 = vld [vmem:[#allocation272_spill] sm:$0xff] }
 0x455   :  { %v2794_v33 = vpop.permute.xlu1 %2793  ;;  %v6751_v52 = vld [vmem:[%s14605_s3 + $0x50] sm:$0xff] }
 0x456   :  { %v3393_v40 = vsel %vm3345_vm11, %v3328_v58, %v2794_v33  ;;  %v2540_v23 = vpop.permute.xlu0 %2539  ;;  %v3137_v58 = vsel %vm3085_vm7, %v3072_v2, %v15184_v0  ;;  %v3201_v33 = vsel %vm3150_vm8, %v3136_v55, %v15185_v9  ;;  %8686 = vmatpush1.bf16.msra.mxu1 %v8605_v13  ;;  %8606 = vmatpush1.bf16.msra.mxu0 %v8605_v13  ;;  %v6752_v2 = vld [vmem:[%s14605_s3 + $0x58] sm:$0xff] }
 0x457   :  { %8442 = vmatmul.mubr.msk.f32.gmra.mrb[46].mxu0 %vm3421_vm12, %v3393_v40  ;;  %v3329_v46 = vsel %vm3280_vm10, %v3264_v20, %v2540_v23  ;;  %v3202_v32 = vsel %vm3150_vm8, %v3137_v58, %v15186_v49  ;;  %v3266_v40 = vsel %vm3215_vm9, %v3201_v33, %v15187_v18  ;;  %8671 = vmatprep.subr.bf16.mxu1 %v9777_v26  ;;  %v6753_v18 = vld [vmem:[%s14605_s3 + $0x60] sm:$0xff] }
 0x458   :  { %v3267_v60 = vsel %vm3215_vm9, %v3202_v32, %v15188_v36  ;;  %v8608_v23 = vpack.c.bf16 %v6746_v16, %v6745_v38  ;;  %8607 = vmatprep.subr.bf16.mxu0 %v9777_v26  ;;  %v2944_v20 = vsel %vm27_vm0, %v9729_v19, %v15190_v5  ;;  %v8617_v13 = vpack.c.bf16 %v6752_v2, %v6751_v52  ;;  %v15199_v38 = vld [vmem:[#allocation52_spill] sm:$0xff]  ;;  %v15204_v19 = vld [vmem:[#allocation165_spill] sm:$0xff] }
 0x459   :  { %v2542_v37 = vpop.permute.xlu1 %2541 }
 0x45a   :  { %v2796_v44 = vpop.permute.xlu0 %2795  ;;  %v3330_v7 = vsel %vm3280_vm10, %v3265_v43, %v2542_v37  ;;  %8687 = vmatpush1.bf16.msra.mxu1 %v8608_v23  ;;  %8609 = vmatpush1.bf16.msra.mxu0 %v8608_v23  ;;  %v3008_v43 = vsel %vm2955_vm5, %v2943_v4, %v15191_v39  ;;  %v6756_v4 = vld [vmem:[%s14605_s3 + $0x78] sm:$0xff] }
 0x45b   :  { %v3394_v3 = vsel %vm3345_vm11, %v3329_v46, %v2796_v44  ;;  %8672 = vmatprep.subr.bf16.mxu1 %v9777_v26  ;;  %8610 = vmatprep.subr.bf16.mxu0 %v9777_v26  ;;  %v15192_v46 = vld [vmem:[#allocation107_spill] sm:$0xff]  ;;  %v3073_v48 = vsel %vm3020_vm6, %v3008_v43, %v15193_v57 }
 0x45c   :  { %8444 = vmatprep.mubr.msk.f32.mxu0 %vm3421_vm12, %v3394_v3  ;;  %v3009_v44 = vsel %vm2955_vm5, %v2944_v20, %v15192_v46  ;;  %v6749_v3 = vld [vmem:[%s14605_s3 + $0x40] sm:$0xff]  ;;  %v3138_v14 = vsel %vm3085_vm7, %v3073_v48, %v15195_v61  ;;  %v15205_v20 = vld [vmem:[#allocation220_spill] sm:$0xff]  ;;  %v8623_v46 = vpack.c.bf16 %v6756_v4, %v6755_v54 }
 0x45d   :  { %v2798_v59 = vpop.permute.xlu1 %2797  ;;  %v3074_v53 = vsel %vm3020_vm6, %v3009_v44, %v15194_v45  ;;  %v3203_v63 = vsel %vm3150_vm8, %v3138_v14, %v15197_v41  ;;  %v15206_v44 = vld [vmem:[#allocation221_spill] sm:$0xff]  ;;  %v15207_v48 = vld [vmem:[#allocation276_spill] sm:$0xff]  ;;  %v6757_v41 = vld [vmem:[%s14605_s3 + $0x80] sm:$0xff] }
 0x45e   :  { %v3395_v15 = vsel %vm3345_vm11, %v3330_v7, %v2798_v59  ;;  %v2544_v27 = vpop.permute.xlu0 %2543  ;;  %8688 = vmatpush1.bf16.msra.mxu1 %v8611_v17  ;;  %v6750_v59 = vld [vmem:[%s14605_s3 + $0x48] sm:$0xff]  ;;  %8612 = vmatpush1.bf16.msra.mxu0 %v8611_v17  ;;  %v3139_v28 = vsel %vm3085_vm7, %v3074_v53, %v15196_v56 }
 0x45f   :  { %8445 = vmatmul.mubr.msk.f32.gmra.mrb[48].mxu0 %vm3421_vm12, %v3395_v15  ;;  %v3331_v30 = vsel %vm3280_vm10, %v3266_v40, %v2544_v27  ;;  %8673 = vmatprep.subr.bf16.mxu1 %v9777_v26  ;;  %v8614_v35 = vpack.c.bf16 %v6750_v59, %v6749_v3  ;;  %v3204_v11 = vsel %vm3150_vm8, %v3139_v28, %v15198_v6  ;;  %v6754_v40 = vld [vmem:[%s14605_s3 + $0x68] sm:$0xff]  ;;  %v15208_v59 = vld [vmem:[#allocation277_spill] sm:$0xff] }
 0x460   :  { %8613 = vmatprep.subr.bf16.mxu0 %v9777_v26 }
 0x461   :  { %v2546_v25 = vpop.permute.xlu1 %2545 }
 0x462   :  { %v2800_v34 = vpop.permute.xlu0 %2799  ;;  %v3332_v29 = vsel %vm3280_vm10, %v3267_v60, %v2546_v25  ;;  %8689 = vmatpush1.bf16.msra.mxu1 %v8614_v35  ;;  %8615 = vmatpush1.bf16.msra.mxu0 %v8614_v35 }
 0x463   :  { %v3396_v42 = vsel %vm3345_vm11, %v3331_v30, %v2800_v34  ;;  %8674 = vmatprep.subr.bf16.mxu1 %v9777_v26  ;;  %8616 = vmatprep.subr.bf16.mxu0 %v9777_v26  ;;  %v8620_v30 = vpack.c.bf16 %v6754_v40, %v6753_v18  ;;  %v9730_v34 = vld [vmem:[#allocation2 + $0x2b8] sm:$0xff] }
 0x464   :  { %8447 = vmatprep.mubr.msk.f32.mxu0 %vm3421_vm12, %v3396_v42  ;;  %v2945_v16 = vsel %vm27_vm0, %v9730_v34, %v15199_v38  ;;  %v9731_v42 = vld [vmem:[#allocation2 + $0x2c0] sm:$0xff]  ;;  %v9733_v40 = vld [vmem:[#allocation2 + $0x2d8] sm:$0xff] }
 0x465   :  { %v2802_v10 = vpop.permute.xlu1 %2801 }
 0x466   :  { %v3397_v22 = vsel %vm3345_vm11, %v3332_v29, %v2802_v10  ;;  %v2292_v24 = vpop.permute.xlu0 %2291  ;;  %8690 = vmatpush1.bf16.msra.mxu1 %v8617_v13  ;;  %8618 = vmatpush1.bf16.msra.mxu0 %v8617_v13  ;;  %v15200_v10 = vld [vmem:[#allocation53_spill] sm:$0xff] }
 0x467   :  { %8448 = vmatmul.mubr.msk.f32.gmra.mrb[50].mxu0 %vm3421_vm12, %v3397_v22  ;;  %v3268_v47 = vsel %vm3215_vm9, %v3203_v63, %v2292_v24  ;;  %8675 = vmatprep.subr.bf16.mxu1 %v9777_v26  ;;  %v2946_v23 = vsel %vm27_vm0, %v9731_v42, %v15200_v10  ;;  %v15201_v22 = vld [vmem:[#allocation108_spill] sm:$0xff]  ;;  %v15213_v10 = vld [vmem:[#allocation166_spill] sm:$0xff] }
 0x468   :  { %8619 = vmatprep.subr.bf16.mxu0 %v9777_v26  ;;  %v3010_v24 = vsel %vm2955_vm5, %v2945_v16, %v15201_v22  ;;  %v3011_v12 = vsel %vm2955_vm5, %v2946_v23, %v15202_v1  ;;  %v6758_v63 = vld [vmem:[%s14605_s3 + $0x88] sm:$0xff]  ;;  %v6759_v13 = vld [vmem:[%s14605_s3 + $0x90] sm:$0xff]  ;;  %v6761_v1 = vld [vmem:[%s14605_s3 + $0xa0] sm:$0xff] }
 0x469   :  { %v2294_v37 = vpop.permute.xlu1 %2293  ;;  %v3076_v5 = vsel %vm3020_vm6, %v3011_v12, %v15204_v19  ;;  %v6762_v12 = vld [vmem:[%s14605_s3 + $0xa8] sm:$0xff] }
 0x46a   :  { %v2548_v7 = vpop.permute.xlu0 %2547  ;;  %v3269_v51 = vsel %vm3215_vm9, %v3204_v11, %v2294_v37  ;;  %8691 = vmatpush1.bf16.msra.mxu1 %v8620_v30  ;;  %v15203_v37 = vld [vmem:[#allocation164_spill] sm:$0xff]  ;;  %8621 = vmatpush1.bf16.msra.mxu0 %v8620_v30  ;;  %v3141_v57 = vsel %vm3085_vm7, %v3076_v5, %v15206_v44  ;;  %v15211_v30 = vld [vmem:[#allocation110_spill] sm:$0xff]  ;;  %v8632_v5 = vpack.c.bf16 %v6762_v12, %v6761_v1 }
 0x46b   :  { %v3333_v27 = vsel %vm3280_vm10, %v3268_v47, %v2548_v7  ;;  %v3075_v17 = vsel %vm3020_vm6, %v3010_v24, %v15203_v37  ;;  %8676 = vmatprep.subr.bf16.mxu1 %v9777_v26  ;;  %8622 = vmatprep.subr.bf16.mxu0 %v9777_v26  ;;  %v3206_v45 = vsel %vm3150_vm8, %v3141_v57, %v15208_v59  ;;  %v15214_v37 = vld [vmem:[#allocation167_spill] sm:$0xff]  ;;  %v15225_v1 = vld [vmem:[#allocation224_spill] sm:$0xff] }
 0x46c   :  { %v3140_v39 = vsel %vm3085_vm7, %v3075_v17, %v15205_v20  ;;  %v15216_v20 = vld [vmem:[#allocation223_spill] sm:$0xff] }
 0x46d   :  { %v2550_v15 = vpop.permute.xlu1 %2549  ;;  %v3205_v7 = vsel %vm3150_vm8, %v3140_v39, %v15207_v48  ;;  %v15218_v48 = vld [vmem:[#allocation279_spill] sm:$0xff] }
 0x46e   :  { %v2804_v8 = vpop.permute.xlu0 %2803  ;;  %v3334_v50 = vsel %vm3280_vm10, %v3269_v51, %v2550_v15  ;;  %8692 = vmatpush1.bf16.msra.mxu1 %v8623_v46  ;;  %8624 = vmatpush1.bf16.msra.mxu0 %v8623_v46 }
 0x46f   :  { %v3398_v55 = vsel %vm3345_vm11, %v3333_v27, %v2804_v8  ;;  %8677 = vmatprep.subr.bf16.mxu1 %v9777_v26  ;;  %v8626_v27 = vpack.c.bf16 %v6758_v63, %v6757_v41  ;;  %8625 = vmatprep.subr.bf16.mxu0 %v9777_v26 }
 0x470   :  { %8450 = vmatprep.mubr.msk.f32.mxu0 %vm3421_vm12, %v3398_v55 }
 0x471   :  { %v2806_v25 = vpop.permute.xlu1 %2805 }
 0x472   :  { %v3399_v0 = vsel %vm3345_vm11, %v3334_v50, %v2806_v25  ;;  %v8374_v58 = vpop.f32.mrb[0].mxu0  ;;  %v2296_v32 = vpop.permute.xlu0 %2295  ;;  %8693 = vmatpush1.bf16.msra.mxu1 %v8626_v27  ;;  %8627 = vmatpush1.bf16.msra.mxu0 %v8626_v27 }
 0x473   :  { %v3690_v9 = vadd.f32 %v8374_v58, %v12691_v62  ;;  %v3684_v33 = vpop.f32.mrb[1].mxu0  ;;  %8451 = vmatmul.mubr.msk.f32.gmra.mrb[52].mxu0 %vm3421_vm12, %v3399_v0  ;;  %v3270_v53 = vsel %vm3215_vm9, %v3205_v7, %v2296_v32  ;;  %8678 = vmatprep.subr.bf16.mxu1 %v9777_v26  ;;  %v6760_v0 = vld [vmem:[%s14605_s3 + $0x98] sm:$0xff] }
 0x474   :  { %v3685_v49 = vadd.f32 %v12691_v62, %v3684_v33  ;;  %v9732_v33 = vld [vmem:[#allocation2 + $0x2d0] sm:$0xff]  ;;  %8628 = vmatprep.subr.bf16.mxu0 %v9777_v26 }
 0x475   :  { %v4004_v36 = vmax.f32 %v3690_v9, 0.0  ;;  %v2298_v60 = vpop.permute.xlu1 %2297  ;;  %v8629_v9 = vpack.c.bf16 %v6760_v0, %v6759_v13  ;;  %v9734_v13 = vld [vmem:[#allocation2 + $0x2e8] sm:$0xff] }
 0x476   :  { %v4003_v29 = vmax.f32 %v3685_v49, 0.0  ;;  %v2552_v21 = vpop.permute.xlu0 %2551  ;;  %v3271_v15 = vsel %vm3215_vm9, %v3206_v45, %v2298_v60  ;;  %v15209_v49 = vld [vmem:[#allocation54_spill] sm:$0xff]  ;;  %v15219_v0 = vld [vmem:[#allocation56_spill] sm:$0xff] }
 0x477   :  { %4179 = vst.msk [vmem:[#allocation3 + $0x21] sm:$0xff] %vm4067_vm13, %v4004_v36  ;;  %v3335_v35 = vsel %vm3280_vm10, %v3270_v53, %v2552_v21  ;;  %v2947_v32 = vsel %vm27_vm0, %v9732_v33, %v15209_v49  ;;  %v15210_v36 = vld [vmem:[#allocation55_spill] sm:$0xff]  ;;  %8694 = vmatpush1.bf16.msra.mxu1 %v8629_v9  ;;  %v15215_v21 = vld [vmem:[#allocation222_spill] sm:$0xff]  ;;  %8630 = vmatpush1.bf16.msra.mxu0 %v8629_v9  ;;  %v9735_v49 = vld [vmem:[#allocation2 + $0x2f0] sm:$0xff] }
 0x478   :  { %4178 = vst.msk [vmem:[#allocation3 + $0x19] sm:$0xff] %vm4067_vm13, %v4003_v29  ;;  %v2948_v60 = vsel %vm27_vm0, %v9733_v40, %v15210_v36  ;;  %v3012_v34 = vsel %vm2955_vm5, %v2947_v32, %v15211_v30  ;;  %v15212_v29 = vld [vmem:[#allocation111_spill] sm:$0xff]  ;;  %8679 = vmatprep.subr.bf16.mxu1 %v9777_v26  ;;  %8631 = vmatprep.subr.bf16.mxu0 %v9777_v26  ;;  %v15220_v32 = vld [vmem:[#allocation57_spill] sm:$0xff]  ;;  %v15221_v40 = vld [vmem:[#allocation112_spill] sm:$0xff] }
 0x479   :  { %v2554_v43 = vpop.permute.xlu1 %2553  ;;  %v3013_v42 = vsel %vm2955_vm5, %v2948_v60, %v15212_v29  ;;  %v3077_v23 = vsel %vm3020_vm6, %v3012_v34, %v15213_v10  ;;  %v15222_v30 = vld [vmem:[#allocation113_spill] sm:$0xff] }
 0x47a   :  { %v8377_v3 = vpop.f32.mrb[2].mxu0  ;;  %v2808_v28 = vpop.permute.xlu0 %2807  ;;  %v3336_v6 = vsel %vm3280_vm10, %v3271_v15, %v2554_v43  ;;  %v3078_v17 = vsel %vm3020_vm6, %v3013_v42, %v15214_v37  ;;  %v3142_v54 = vsel %vm3085_vm7, %v3077_v23, %v15215_v21  ;;  %v15217_v43 = vld [vmem:[#allocation278_spill] sm:$0xff]  ;;  %v6763_v15 = vld [vmem:[%s14605_s3 + $0xb0] sm:$0xff] }
 0x47b   :  { %v3700_v61 = vadd.f32 %v8377_v3, %v12691_v62  ;;  %v3694_v14 = vpop.f32.mrb[3].mxu0  ;;  %v3400_v47 = vsel %vm3345_vm11, %v3335_v35, %v2808_v28  ;;  %v3143_v39 = vsel %vm3085_vm7, %v3078_v17, %v15216_v20  ;;  %v3207_v46 = vsel %vm3150_vm8, %v3142_v54, %v15217_v43  ;;  %8695 = vmatpush1.bf16.msra.mxu1 %v8632_v5  ;;  %v6764_v35 = vld [vmem:[%s14605_s3 + $0xb8] sm:$0xff]  ;;  %v6767_v10 = vld [vmem:[%s14605_s3 + $0xd0] sm:$0xff] }
 0x47c   :  { %v3695_v56 = vadd.f32 %v12691_v62, %v3694_v14  ;;  %8453 = vmatprep.mubr.msk.f32.mxu0 %vm3421_vm12, %v3400_v47  ;;  %v3208_v7 = vsel %vm3150_vm8, %v3143_v39, %v15218_v48  ;;  %8680 = vmatprep.subr.bf16.mxu1 %v9777_v26  ;;  %v8635_v63 = vpack.c.bf16 %v6764_v35, %v6763_v15  ;;  %v6768_v23 = vld [vmem:[%s14605_s3 + $0xd8] sm:$0xff] }
 0x47d   :  { %v4006_v11 = vmax.f32 %v3700_v61, 0.0  ;;  %v2810_v51 = vpop.permute.xlu1 %2809  ;;  %8633 = vmatpush1.bf16.msra.mxu0 %v8632_v5  ;;  %v8641_v17 = vpack.c.bf16 %v6768_v23, %v6767_v10  ;;  %v15226_v21 = vld [vmem:[#allocation225_spill] sm:$0xff]  ;;  %v15236_v23 = vld [vmem:[#allocation227_spill] sm:$0xff] }
 0x47e   :  { %v4005_v8 = vmax.f32 %v3695_v56, 0.0  ;;  %v3401_v52 = vsel %vm3345_vm11, %v3336_v6, %v2810_v51  ;;  %v4309_v2 = vld [vmem:[#allocation3 + $0x21] sm:$0xff]  ;;  %v2300_v55 = vpop.permute.xlu0 %2299  ;;  %8634 = vmatprep.subr.bf16.mxu0 %v9777_v26  ;;  %v15228_v20 = vld [vmem:[#allocation281_spill] sm:$0xff] }
 0x47f   :  { %4181 = vst.msk [vmem:[#allocation3 + $0x39] sm:$0xff] %vm4067_vm13, %v4006_v11  ;;  %8454 = vmatmul.mubr.msk.f32.gmra.mrb[54].mxu0 %vm3421_vm12, %v3401_v52  ;;  %v4308_v50 = vld [vmem:[#allocation3 + $0x19] sm:$0xff]  ;;  %v3272_v3 = vsel %vm3215_vm9, %v3207_v46, %v2300_v55  ;;  %8696 = vmatpush1.bf16.msra.mxu1 %v8635_v63 }
 0x480   :  { %4180 = vst.msk [vmem:[#allocation3 + $0x31] sm:$0xff] %vm4067_vm13, %v4005_v8  ;;  %v8725_v25 = vpack.i.bf16 %v4309_v2, %v4308_v50  ;;  %8681 = vmatprep.subr.bf16.mxu1 %v9777_v26  ;;  %v6765_v52 = vld [vmem:[%s14605_s3 + $0xc0] sm:$0xff]  ;;  %v6766_v2 = vld [vmem:[%s14605_s3 + $0xc8] sm:$0xff] }
 0x481   :  { %v2302_v58 = vpop.permute.xlu1 %2301  ;;  %8636 = vmatpush1.bf16.msra.mxu0 %v8635_v63 }
 0x482   :  { %v8380_v18 = vpop.f32.mrb[4].mxu0  ;;  %8726 = vrot.lane.b32.xlu1 %v8725_v25, %s9776_s8  ;;  %v2556_v24 = vpop.permute.xlu0 %2555  ;;  %v3273_v45 = vsel %vm3215_vm9, %v3208_v7, %v2302_v58  ;;  %v8638_v25 = vpack.c.bf16 %v6766_v2, %v6765_v52  ;;  %v2949_v58 = vsel %vm27_vm0, %v9734_v13, %v15219_v0  ;;  %8637 = vmatprep.subr.bf16.mxu0 %v9777_v26  ;;  %v9736_v52 = vld [vmem:[#allocation2 + $0x300] sm:$0xff] }
 0x483   :  { %v3710_v38 = vadd.f32 %v8380_v18, %v12691_v62  ;;  %v3704_v16 = vpop.f32.mrb[5].mxu0  ;;  %v3337_v53 = vsel %vm3280_vm10, %v3272_v3, %v2556_v24  ;;  %v2950_v18 = vsel %vm27_vm0, %v9735_v49, %v15220_v32  ;;  %v3014_v36 = vsel %vm2955_vm5, %v2949_v58, %v15221_v40  ;;  %v15229_v2 = vld [vmem:[#allocation58_spill] sm:$0xff]  ;;  %v15230_v13 = vld [vmem:[#allocation59_spill] sm:$0xff] }
 0x484   :  { %v3705_v22 = vadd.f32 %v12691_v62, %v3704_v16  ;;  %8697 = vmatpush1.bf16.msra.mxu1 %v8638_v25  ;;  %v3015_v34 = vsel %vm2955_vm5, %v2950_v18, %v15222_v30  ;;  %v15231_v58 = vld [vmem:[#allocation114_spill] sm:$0xff]  ;;  %v15232_v32 = vld [vmem:[#allocation115_spill] sm:$0xff] }
 0x485   :  { %v4008_v4 = vmax.f32 %v3710_v38, 0.0  ;;  %v2558_v19 = vpop.permute.xlu1 %2557  ;;  %v15223_v38 = vld [vmem:[#allocation168_spill] sm:$0xff]  ;;  %8682 = vmatprep.subr.bf16.mxu1 %v9777_v26  ;;  %8639 = vmatpush1.bf16.msra.mxu0 %v8638_v25  ;;  %v15233_v40 = vld [vmem:[#allocation170_spill] sm:$0xff] }
 0x486   :  { %v4007_v44 = vmax.f32 %v3705_v22, 0.0  ;;  %v4311_v57 = vld [vmem:[#allocation3 + $0x39] sm:$0xff]  ;;  %v2812_v61 = vpop.permute.xlu0 %2811  ;;  %v3338_v56 = vsel %vm3280_vm10, %v3273_v45, %v2558_v19  ;;  %v3079_v16 = vsel %vm3020_vm6, %v3014_v36, %v15223_v38  ;;  %8640 = vmatprep.subr.bf16.mxu0 %v9777_v26  ;;  %v6770_v45 = vld [vmem:[%s14605_s3 + $0xe8] sm:$0xff] }
 0x487   :  { %4183 = vst.msk [vmem:[#allocation3 + $0x51] sm:$0xff] %vm4067_vm13, %v4008_v4  ;;  %v4310_v59 = vld [vmem:[#allocation3 + $0x31] sm:$0xff]  ;;  %v3402_v28 = vsel %vm3345_vm11, %v3337_v53, %v2812_v61  ;;  %v3144_v12 = vsel %vm3085_vm7, %v3079_v16, %v15225_v1  ;;  %v9737_v25 = vld [vmem:[#allocation2 + $0x308] sm:$0xff]  ;;  %v15235_v16 = vld [vmem:[#allocation226_spill] sm:$0xff] }
 0x488   :  { %4182 = vst.msk [vmem:[#allocation3 + $0x49] sm:$0xff] %vm4067_vm13, %v4007_v44  ;;  %v8730_v14 = vpack.i.bf16 %v4311_v57, %v4310_v59  ;;  %8456 = vmatprep.mubr.msk.f32.mxu0 %vm3421_vm12, %v3402_v28  ;;  %v15224_v22 = vld [vmem:[#allocation169_spill] sm:$0xff]  ;;  %v15227_v4 = vld [vmem:[#allocation280_spill] sm:$0xff]  ;;  %8698 = vmatpush1.bf16.msra.mxu1 %v8641_v17  ;;  %v6769_v59 = vld [vmem:[%s14605_s3 + $0xe0] sm:$0xff]  ;;  %v2952_v0 = vsel %vm27_vm0, %v9737_v25, %v15230_v13 }
 0x489   :  { %v2814_v41 = vpop.permute.xlu1 %2813  ;;  %v3080_v24 = vsel %vm3020_vm6, %v3015_v34, %v15224_v22  ;;  %v3209_v19 = vsel %vm3150_vm8, %v3144_v12, %v15227_v4  ;;  %8683 = vmatprep.subr.bf16.mxu1 %v9777_v26  ;;  %v8644_v35 = vpack.c.bf16 %v6770_v45, %v6769_v59  ;;  %8642 = vmatpush1.bf16.msra.mxu0 %v8641_v17  ;;  %v15234_v34 = vld [vmem:[#allocation171_spill] sm:$0xff]  ;;  %v15241_v25 = vld [vmem:[#allocation116_spill] sm:$0xff] }
 0x48a   :  { %v3403_v6 = vsel %vm3345_vm11, %v3338_v56, %v2814_v41  ;;  %v8383_v11 = vpop.f32.mrb[6].mxu0  ;;  %8731 = vrot.lane.b32.xlu0 %v8730_v14, %s9776_s8  ;;  %v2304_v8 = vpop.permute.xlu0 %2303  ;;  %v3145_v54 = vsel %vm3085_vm7, %v3080_v24, %v15226_v21  ;;  %8643 = vmatprep.subr.bf16.mxu0 %v9777_v26  ;;  %v3017_v18 = vsel %vm2955_vm5, %v2952_v0, %v15232_v32  ;;  %v15237_v24 = vld [vmem:[#allocation282_spill] sm:$0xff]  ;;  %v15238_v17 = vld [vmem:[#allocation283_spill] sm:$0xff] }
 0x48b   :  { %v3720_v47 = vadd.f32 %v8383_v11, %v12691_v62  ;;  %v3714_v51 = vpop.f32.mrb[7].mxu0  ;;  %8457 = vmatmul.mubr.msk.f32.gmra.mrb[56].mxu0 %vm3421_vm12, %v3403_v6  ;;  %v3210_v39 = vsel %vm3150_vm8, %v3145_v54, %v15228_v20  ;;  %v3274_v43 = vsel %vm3215_vm9, %v3209_v19, %v2304_v8  ;;  %v3082_v38 = vsel %vm3020_vm6, %v3017_v18, %v15234_v34 }
 0x48c   :  { %v3715_v27 = vadd.f32 %v12691_v62, %v3714_v51  ;;  %8699 = vmatpush1.bf16.msra.mxu1 %v8644_v35  ;;  %v6772_v51 = vld [vmem:[%s14605_s3 + $0xf8] sm:$0xff]  ;;  %v3147_v22 = vsel %vm3085_vm7, %v3082_v38, %v15236_v23  ;;  %v15247_v23 = vld [vmem:[#allocation284_spill] sm:$0xff] }
 0x48d   :  { %v4010_v50 = vmax.f32 %v3720_v47, 0.0  ;;  %v2306_v55 = vpop.permute.xlu1 %2305  ;;  %8684 = vmatprep.subr.bf16.mxu1 %v9777_v26  ;;  %v6771_v47 = vld [vmem:[%s14605_s3 + $0xf0] sm:$0xff]  ;;  %8645 = vmatpush1.bf16.msra.mxu0 %v8644_v35  ;;  %v3212_v21 = vsel %vm3150_vm8, %v3147_v22, %v15238_v17 }
 0x48e   :  { %v4009_v9 = vmax.f32 %v3715_v27, 0.0  ;;  %v4313_v33 = vld [vmem:[#allocation3 + $0x51] sm:$0xff]  ;;  %v2560_v29 = vpop.permute.xlu0 %2559  ;;  %v3275_v57 = vsel %vm3215_vm9, %v3210_v39, %v2306_v55  ;;  %v8647_v8 = vpack.c.bf16 %v6772_v51, %v6771_v47  ;;  %8646 = vmatprep.subr.bf16.mxu0 %v9777_v26 }
 0x48f   :  { %4185 = vst.msk [vmem:[#allocation3 + $0x69] sm:$0xff] %vm4067_vm13, %v4010_v50  ;;  %v4312_v60 = vld [vmem:[#allocation3 + $0x49] sm:$0xff]  ;;  %v3339_v48 = vsel %vm3280_vm10, %v3274_v43, %v2560_v29  ;;  %v2951_v50 = vsel %vm27_vm0, %v9736_v52, %v15229_v2  ;;  %v9738_v47 = vld [vmem:[#allocation2 + $0x318] sm:$0xff]  ;;  %v9739_v2 = vld [vmem:[#allocation2 + $0x320] sm:$0xff] }
 0x490   :  { %4184 = vst.msk [vmem:[#allocation3 + $0x61] sm:$0xff] %vm4067_vm13, %v4009_v9  ;;  %v8735_v42 = vpack.i.bf16 %v4313_v33, %v4312_v60  ;;  %v3016_v9 = vsel %vm2955_vm5, %v2951_v50, %v15231_v58  ;;  %8700 = vmatpush1.bf16.msra.mxu1 %v8647_v8  ;;  %v15239_v51 = vld [vmem:[#allocation60_spill] sm:$0xff]  ;;  %v15240_v50 = vld [vmem:[#allocation61_spill] sm:$0xff] }
 0x491   :  { %v2562_v37 = vpop.permute.xlu1 %2561  ;;  %v3081_v36 = vsel %vm3020_vm6, %v3016_v9, %v15233_v40  ;;  %8648 = vmatpush1.bf16.msra.mxu0 %v8647_v8  ;;  %v15242_v58 = vld [vmem:[#allocation117_spill] sm:$0xff] }
 0x492   :  { %v8386_v5 = vpop.f32.mrb[8].mxu0  ;;  %8736 = vrot.lane.b32.xlu1 %v8735_v42, %s9776_s8  ;;  %v2816_v3 = vpop.permute.xlu0 %2815  ;;  %v3340_v53 = vsel %vm3280_vm10, %v3275_v57, %v2562_v37  ;;  %v3146_v29 = vsel %vm3085_vm7, %v3081_v36, %v15235_v16  ;;  %v4376_v37 = vld [vmem:[#allocation3 + $0x4a] sm:$0xff]  ;;  %v4377_v40 = vld [vmem:[#allocation3 + $0x52] sm:$0xff] }
 0x493   :  { %v3730_v46 = vadd.f32 %v8386_v5, %v12691_v62  ;;  %v3724_v44 = vpop.f32.mrb[9].mxu0  ;;  %v3404_v14 = vsel %vm3345_vm11, %v3339_v48, %v2816_v3  ;;  %v3211_v1 = vsel %vm3150_vm8, %v3146_v29, %v15237_v24  ;;  %v15244_v36 = vld [vmem:[#allocation173_spill] sm:$0xff] }
 0x494   :  { %v3725_v7 = vadd.f32 %v12691_v62, %v3724_v44  ;;  %8459 = vmatprep.mubr.msk.f32.mxu0 %vm3421_vm12, %v3404_v14 }
 0x495   :  { %v4012_v61 = vmax.f32 %v3730_v46, 0.0  ;;  %v2818_v15 = vpop.permute.xlu1 %2817 }
 0x496   :  { %v4011_v56 = vmax.f32 %v3725_v7, 0.0  ;;  %v3405_v28 = vsel %vm3345_vm11, %v3340_v53, %v2818_v15  ;;  %v4315_v41 = vld [vmem:[#allocation3 + $0x69] sm:$0xff]  ;;  %v2308_v6 = vpop.permute.xlu0 %2307 }
 0x497   :  { %4187 = vst.msk [vmem:[#allocation3 + $0x81] sm:$0xff] %vm4067_vm13, %v4012_v61  ;;  %8460 = vmatmul.mubr.msk.f32.gmra.mrb[58].mxu0 %vm3421_vm12, %v3405_v28  ;;  %v4314_v63 = vld [vmem:[#allocation3 + $0x61] sm:$0xff]  ;;  %v3276_v54 = vsel %vm3215_vm9, %v3211_v1, %v2308_v6  ;;  %v12937_v14 = vld [vmem:[#allocation3 + $0x6a] sm:$0xff] }
 0x498   :  { %4186 = vst.msk [vmem:[#allocation3 + $0x79] sm:$0xff] %vm4067_vm13, %v4011_v56  ;;  %v8740_v11 = vpack.i.bf16 %v4315_v41, %v4314_v63  ;;  %v12920_v5 = vld [vmem:[#allocation3 + $0x62] sm:$0xff] }
 0x499   :  { %v2310_v27 = vpop.permute.xlu1 %2309  ;;  %v4440_v28 = vld [vmem:[#allocation3 + $0x60] sm:$0xff]  ;;  %v4441_v0 = vld [vmem:[#allocation3 + $0x68] sm:$0xff] }
 0x49a   :  { %v8389_v55 = vpop.f32.mrb[10].mxu0  ;;  %8741 = vrot.lane.b32.xlu0 %v8740_v11, %s9776_s8  ;;  %v2564_v30 = vpop.permute.xlu0 %2563  ;;  %v3277_v20 = vsel %vm3215_vm9, %v3212_v21, %v2310_v27  ;;  %v2953_v27 = vsel %vm27_vm0, %v9738_v47, %v15239_v51 }
 0x49b   :  { %v3740_v33 = vadd.f32 %v8389_v55, %v12691_v62  ;;  %v3734_v49 = vpop.f32.mrb[11].mxu0  ;;  %v3341_v39 = vsel %vm3280_vm10, %v3276_v54, %v2564_v30  ;;  %v2954_v55 = vsel %vm27_vm0, %v9739_v2, %v15240_v50  ;;  %v3018_v13 = vsel %vm2955_vm5, %v2953_v27, %v15241_v25  ;;  %v15245_v30 = vld [vmem:[#allocation228_spill] sm:$0xff] }
 0x49c   :  { %v3735_v60 = vadd.f32 %v12691_v62, %v3734_v49  ;;  %v3019_v9 = vsel %vm2955_vm5, %v2954_v55, %v15242_v58  ;;  %vm6484_vm0 = vcmask 785408  }
 0x49d   :  { %v4014_v42 = vmax.f32 %v3740_v33, 0.0  ;;  %v2566_v10 = vpop.permute.xlu1 %2565  ;;  %v15243_v33 = vld [vmem:[#allocation172_spill] sm:$0xff] }
 0x49e   :  { %v4013_v12 = vmax.f32 %v3735_v60, 0.0  ;;  %v2820_v43 = vpop.permute.xlu0 %2819  ;;  %v3342_v57 = vsel %vm3280_vm10, %v3277_v20, %v2566_v10  ;;  %v12942_v11 = vld [vmem:[#allocation3 + $0x81] sm:$0xff]  ;;  %v3083_v49 = vsel %vm3020_vm6, %v3018_v13, %v15243_v33  ;;  %v3084_v60 = vsel %vm3020_vm6, %v3019_v9, %v15244_v36 }
 0x49f   :  { %4189 = vst.msk [vmem:[#allocation3 + $0x99] sm:$0xff] %vm4067_vm13, %v4014_v42  ;;  %v12918_v4 = vld [vmem:[#allocation3 + $0x78] sm:$0xff]  ;;  %v3406_v48 = vsel %vm3345_vm11, %v3341_v39, %v2820_v43  ;;  %v12947_v52 = vld [vmem:[#allocation3 + $0x80] sm:$0xff]  ;;  %v8770_v18 = vpack.i.bf16 %v4441_v0, %v12942_v11  ;;  %v3148_v34 = vsel %vm3085_vm7, %v3083_v49, %v15245_v30 }
 0x4a0   :  { %v4316_v19 = vld [vmem:[#allocation3 + $0x79] sm:$0xff]  ;;  %4188 = vst.msk [vmem:[#allocation3 + $0x91] sm:$0xff] %vm4067_vm13, %v4013_v12  ;;  %v8750_v46 = vpack.i.bf16 %v4376_v37, %v12918_v4  ;;  %8462 = vmatprep.mubr.msk.f32.mxu0 %vm3421_vm12, %v3406_v48  ;;  %v8765_v16 = vpack.i.bf16 %v4377_v40, %v12947_v52  ;;  %v3213_v22 = vsel %vm3150_vm8, %v3148_v34, %v15247_v23 }
 0x4a1   :  { %v8745_v44 = vpack.i.bf16 %v12920_v5, %v4316_v19  ;;  %v2822_v7 = vpop.permute.xlu1 %2821  ;;  %v12929_v3 = vld [vmem:[#allocation3 + $0x7a] sm:$0xff]  ;;  %v8755_v6 = vpack.i.bf16 %v4440_v28, %v4316_v19  ;;  %v15246_v42 = vld [vmem:[#allocation229_spill] sm:$0xff] }
 0x4a2   :  { %v3407_v59 = vsel %vm3345_vm11, %v3342_v57, %v2822_v7  ;;  %v8392_v45 = vpop.f32.mrb[12].mxu0  ;;  %8751 = vrot.lane.b32.xlu0 %v8750_v46, %s9778_s25  ;;  %v2312_v35 = vpop.permute.xlu0 %2311  ;;  %v8760_v56 = vpack.i.bf16 %v12929_v3, %v12937_v14  ;;  %v3149_v10 = vsel %vm3085_vm7, %v3084_v60, %v15246_v42  ;;  %v15248_v12 = vld [vmem:[#allocation285_spill] sm:$0xff] }
 0x4a3   :  { %v3750_v53 = vadd.f32 %v8392_v45, %v12691_v62  ;;  %8746 = vrot.lane.b32.xlu1 %v8745_v44, %s9776_s8  ;;  %v3744_v61 = vpop.f32.mrb[13].mxu0  ;;  %8463 = vmatmul.mubr.msk.f32.gmra.mrb[60].mxu0 %vm3421_vm12, %v3407_v59  ;;  %v3214_v37 = vsel %vm3150_vm8, %v3149_v10, %v15248_v12  ;;  %v3278_v17 = vsel %vm3215_vm9, %v3213_v22, %v2312_v35 }
 0x4a4   :  { %v3745_v15 = vadd.f32 %v12691_v62, %v3744_v61 }
 0x4a5   :  { %v4016_v41 = vmax.f32 %v3750_v53, 0.0  ;;  %v2314_v63 = vpop.permute.xlu1 %2313 }
 0x4a6   :  { %v4015_v8 = vmax.f32 %v3745_v15, 0.0  ;;  %8761 = vrot.lane.b32.xlu0 %v8760_v56, %s9776_s8  ;;  %v2568_v32 = vpop.permute.xlu0 %2567  ;;  %v3279_v19 = vsel %vm3215_vm9, %v3214_v37, %v2314_v63 }
 0x4a7   :  { %4191 = vst.msk [vmem:[#allocation3 + $0xb1] sm:$0xff] %vm4067_vm13, %v4016_v41  ;;  %8756 = vrot.lane.b32.xlu1 %v8755_v6, %s9779_s27  ;;  %v12966_v29 = vld [vmem:[#allocation3 + $0x91] sm:$0xff]  ;;  %v3343_v20 = vsel %vm3280_vm10, %v3278_v17, %v2568_v32  ;;  %v4700_v41 = vld [vmem:[#allocation3 + $0x99] sm:$0xff] }
 0x4a8   :  { %4190 = vst.msk [vmem:[#allocation3 + $0xa9] sm:$0xff] %vm4067_vm13, %v4015_v8  ;;  %v4635_v1 = vld [vmem:[#allocation3 + $0x90] sm:$0xff]  ;;  %v8780_v46 = vpack.i.bf16 %v12918_v4, %v12966_v29  ;;  %v4636_v45 = vld [vmem:[#allocation3 + $0x98] sm:$0xff]  ;;  %v8795_v8 = vpack.i.bf16 %v12947_v52, %v4700_v41 }
 0x4a9   :  { %v2570_v38 = vpop.permute.xlu1 %2569  ;;  %v8775_v59 = vpack.i.bf16 %v12920_v5, %v4635_v1  ;;  %v4572_v15 = vld [vmem:[#allocation3 + $0x92] sm:$0xff]  ;;  %v8790_v4 = vpack.i.bf16 %v12937_v14, %v4636_v45  ;;  %v4571_v5 = vld [vmem:[#allocation3 + $0x82] sm:$0xff]  ;;  %v4573_v14 = vld [vmem:[#allocation3 + $0x9a] sm:$0xff] }
 0x4aa   :  { %v8395_v24 = vpop.f32.mrb[14].mxu0  ;;  %8771 = vrot.lane.b32.xlu0 %v8770_v18, %s9779_s27  ;;  %v2824_v43 = vpop.permute.xlu0 %2823  ;;  %v3344_v44 = vsel %vm3280_vm10, %v3279_v19, %v2570_v38  ;;  %v8785_v35 = vpack.i.bf16 %v4572_v15, %v4571_v5  ;;  %v8810_v55 = vpack.i.bf16 %v12942_v11, %v4573_v14 }
 0x4ab   :  { %v3760_v21 = vadd.f32 %v8395_v24, %v12691_v62  ;;  %8766 = vrot.lane.b32.xlu1 %v8765_v16, %s9778_s25  ;;  %v3754_v54 = vpop.f32.mrb[15].mxu0  ;;  %v3408_v48 = vsel %vm3345_vm11, %v3343_v20, %v2824_v43 }
 0x4ac   :  { %v3755_v39 = vadd.f32 %v12691_v62, %v3754_v54  ;;  %8465 = vmatprep.mubr.msk.f32.mxu0 %vm3421_vm12, %v3408_v48 }
 0x4ad   :  { %v4018_v57 = vmax.f32 %v3760_v21, 0.0  ;;  %v2826_v7 = vpop.permute.xlu1 %2825 }
 0x4ae   :  { %v4017_v53 = vmax.f32 %v3755_v39, 0.0  ;;  %v3409_v61 = vsel %vm3345_vm11, %v3344_v44, %v2826_v7  ;;  %8781 = vrot.lane.b32.xlu0 %v8780_v46, %s9779_s27  ;;  %v4702_v13 = vld [vmem:[#allocation3 + $0xb1] sm:$0xff] }
 0x4af   :  { %4193 = vst.msk [vmem:[#allocation3 + $0xc9] sm:$0xff] %vm4067_vm13, %v4018_v57  ;;  %8776 = vrot.lane.b32.xlu1 %v8775_v59, %s9778_s25  ;;  %8466 = vmatmul.mubr.msk.f32.gmra.mrb[62].mxu0 %vm3421_vm12, %v3409_v61  ;;  %v4637_v56 = vld [vmem:[#allocation3 + $0xa8] sm:$0xff]  ;;  %v8820_v33 = vpack.i.bf16 %v4636_v45, %v4702_v13  ;;  %v4575_v30 = vld [vmem:[#allocation3 + $0xb2] sm:$0xff] }
 0x4b0   :  { %4192 = vst.msk [vmem:[#allocation3 + $0xc1] sm:$0xff] %vm4067_vm13, %v4017_v53  ;;  %v8800_v51 = vpack.i.bf16 %v12929_v3, %v4637_v56  ;;  %v4701_v50 = vld [vmem:[#allocation3 + $0xa9] sm:$0xff]  ;;  %v8840_v23 = vpack.i.bf16 %v4700_v41, %v4575_v30 }
 0x4b1   :  { %v8805_v25 = vpack.i.bf16 %v4635_v1, %v4701_v50  ;;  %v4638_v3 = vld [vmem:[#allocation3 + $0xb0] sm:$0xff] }
 0x4b2   :  { %v8398_v28 = vpop.f32.mrb[16].mxu0  ;;  %8791 = vrot.lane.b32.xlu0 %v8790_v4, %s9778_s25  ;;  %v8815_v32 = vpack.i.bf16 %v4571_v5, %v4638_v3  ;;  %v4574_v11 = vld [vmem:[#allocation3 + $0xaa] sm:$0xff] }
 0x4b3   :  { %v3770_v63 = vadd.f32 %v8398_v28, %v12691_v62  ;;  %8786 = vrot.lane.b32.xlu1 %v8785_v35, %s9776_s8  ;;  %v3764_v6 = vpop.f32.mrb[17].mxu0  ;;  %v8825_v60 = vpack.i.bf16 %v12966_v29, %v4574_v11 }
 0x4b4   :  { %v3765_v47 = vadd.f32 %v12691_v62, %v3764_v6 }
 0x4b5   :  { %v4020_v27 = vmax.f32 %v3770_v63, 0.0 }
 0x4b6   :  { %v4019_v2 = vmax.f32 %v3765_v47, 0.0  ;;  %8801 = vrot.lane.b32.xlu0 %v8800_v51, %s9778_s25  ;;  %v4704_v1 = vld [vmem:[#allocation3 + $0xc9] sm:$0xff] }
 0x4b7   :  { %4195 = vst.msk [vmem:[#allocation3 + $0xe1] sm:$0xff] %vm4067_vm13, %v4020_v27  ;;  %8796 = vrot.lane.b32.xlu1 %v8795_v8, %s9779_s27  ;;  %v4639_v18 = vld [vmem:[#allocation3 + $0xc0] sm:$0xff]  ;;  %v4640_v29 = vld [vmem:[#allocation3 + $0xc8] sm:$0xff]  ;;  %v8850_v37 = vpack.i.bf16 %v4638_v3, %v4704_v1 }
 0x4b8   :  { %4194 = vst.msk [vmem:[#allocation3 + $0xd9] sm:$0xff] %vm4067_vm13, %v4019_v2  ;;  %v8830_v36 = vpack.i.bf16 %v4572_v15, %v4639_v18  ;;  %v4703_v38 = vld [vmem:[#allocation3 + $0xc1] sm:$0xff]  ;;  %v8845_v17 = vpack.i.bf16 %v4573_v14, %v4640_v29  ;;  %v4577_v48 = vld [vmem:[#allocation3 + $0xca] sm:$0xff] }
 0x4b9   :  { %v8835_v24 = vpack.i.bf16 %v4637_v56, %v4703_v38  ;;  %v4576_v19 = vld [vmem:[#allocation3 + $0xc2] sm:$0xff]  ;;  %v8870_v45 = vpack.i.bf16 %v4702_v13, %v4577_v48 }
 0x4ba   :  { %v8401_v0 = vpop.f32.mrb[18].mxu0  ;;  %8811 = vrot.lane.b32.xlu0 %v8810_v55, %s9776_s8  ;;  %v8855_v57 = vpack.i.bf16 %v4701_v50, %v4576_v19 }
 0x4bb   :  { %v3780_v52 = vadd.f32 %v8401_v0, %v12691_v62  ;;  %8806 = vrot.lane.b32.xlu1 %v8805_v25, %s9779_s27  ;;  %v3774_v58 = vpop.f32.mrb[19].mxu0 }
 0x4bc   :  { %v3775_v9 = vadd.f32 %v12691_v62, %v3774_v58 }
 0x4bd   :  { %v4022_v49 = vmax.f32 %v3780_v52, 0.0 }
 0x4be   :  { %v4021_v40 = vmax.f32 %v3775_v9, 0.0  ;;  %8821 = vrot.lane.b32.xlu0 %v8820_v33, %s9779_s27  ;;  %v4706_v61 = vld [vmem:[#allocation3 + $0xe1] sm:$0xff] }
 0x4bf   :  { %4197 = vst.msk [vmem:[#allocation3 + $0xf9] sm:$0xff] %vm4067_vm13, %v4022_v49  ;;  %8816 = vrot.lane.b32.xlu1 %v8815_v32, %s9778_s25  ;;  %v4641_v21 = vld [vmem:[#allocation3 + $0xd8] sm:$0xff]  ;;  %v4642_v4 = vld [vmem:[#allocation3 + $0xe0] sm:$0xff]  ;;  %v8880_v28 = vpack.i.bf16 %v4640_v29, %v4706_v61 }
 0x4c0   :  { %4196 = vst.msk [vmem:[#allocation3 + $0xf1] sm:$0xff] %vm4067_vm13, %v4021_v40  ;;  %v8860_v46 = vpack.i.bf16 %v4574_v11, %v4641_v21  ;;  %v4705_v59 = vld [vmem:[#allocation3 + $0xd9] sm:$0xff]  ;;  %v8875_v63 = vpack.i.bf16 %v4575_v30, %v4642_v4  ;;  %v4579_v14 = vld [vmem:[#allocation3 + $0xe2] sm:$0xff] }
 0x4c1   :  { %v8865_v53 = vpack.i.bf16 %v4639_v18, %v4705_v59  ;;  %v4578_v51 = vld [vmem:[#allocation3 + $0xda] sm:$0xff]  ;;  %v8900_v0 = vpack.i.bf16 %v4704_v1, %v4579_v14 }
 0x4c2   :  { %v8404_v34 = vpop.f32.mrb[20].mxu0  ;;  %8831 = vrot.lane.b32.xlu0 %v8830_v36, %s9778_s25  ;;  %v8885_v8 = vpack.i.bf16 %v4703_v38, %v4578_v51 }
 0x4c3   :  { %v3790_v16 = vadd.f32 %v8404_v34, %v12691_v62  ;;  %8826 = vrot.lane.b32.xlu1 %v8825_v60, %s9776_s8  ;;  %v3784_v42 = vpop.f32.mrb[21].mxu0 }
 0x4c4   :  { %v3785_v10 = vadd.f32 %v12691_v62, %v3784_v42 }
 0x4c5   :  { %v4024_v22 = vmax.f32 %v3790_v16, 0.0 }
 0x4c6   :  { %v4023_v12 = vmax.f32 %v3785_v10, 0.0  ;;  %8841 = vrot.lane.b32.xlu0 %v8840_v23, %s9776_s8  ;;  %v4708_v58 = vld [vmem:[#allocation3 + $0xf9] sm:$0xff] }
 0x4c7   :  { %4199 = vst.msk [vmem:[#allocation3 + $0x111] sm:$0xff] %vm4067_vm13, %v4024_v22  ;;  %8836 = vrot.lane.b32.xlu1 %v8835_v24, %s9779_s27  ;;  %v4643_v6 = vld [vmem:[#allocation3 + $0xf0] sm:$0xff]  ;;  %v4644_v33 = vld [vmem:[#allocation3 + $0xf8] sm:$0xff]  ;;  %v8910_v49 = vpack.i.bf16 %v4642_v4, %v4708_v58 }
 0x4c8   :  { %4198 = vst.msk [vmem:[#allocation3 + $0x109] sm:$0xff] %vm4067_vm13, %v4023_v12  ;;  %v8890_v27 = vpack.i.bf16 %v4576_v19, %v4643_v6  ;;  %v4707_v50 = vld [vmem:[#allocation3 + $0xf1] sm:$0xff]  ;;  %v8905_v32 = vpack.i.bf16 %v4577_v48, %v4644_v33  ;;  %v4581_v42 = vld [vmem:[#allocation3 + $0xfa] sm:$0xff] }
 0x4c9   :  { %v8895_v52 = vpack.i.bf16 %v4641_v21, %v4707_v50  ;;  %v4580_v11 = vld [vmem:[#allocation3 + $0xf2] sm:$0xff]  ;;  %v8930_v22 = vpack.i.bf16 %v4706_v61, %v4581_v42 }
 0x4ca   :  { %v8407_v54 = vpop.f32.mrb[22].mxu0  ;;  %8851 = vrot.lane.b32.xlu0 %v8850_v37, %s9779_s27  ;;  %v8915_v16 = vpack.i.bf16 %v4705_v59, %v4580_v11 }
 0x4cb   :  { %v3800_v20 = vadd.f32 %v8407_v54, %v12691_v62  ;;  %8846 = vrot.lane.b32.xlu1 %v8845_v17, %s9778_s25  ;;  %v3794_v39 = vpop.f32.mrb[23].mxu0 }
 0x4cc   :  { %v3795_v43 = vadd.f32 %v12691_v62, %v3794_v39 }
 0x4cd   :  { %v4026_v44 = vmax.f32 %v3800_v20, 0.0 }
 0x4ce   :  { %v4025_v7 = vmax.f32 %v3795_v43, 0.0  ;;  %8861 = vrot.lane.b32.xlu0 %v8860_v46, %s9778_s25  ;;  %v4710_v1 = vld [vmem:[#allocation3 + $0x111] sm:$0xff] }
 0x4cf   :  { %4201 = vst.msk [vmem:[#allocation3 + $0x129] sm:$0xff] %vm4067_vm13, %v4026_v44  ;;  %8856 = vrot.lane.b32.xlu1 %v8855_v57, %s9776_s8  ;;  %v4645_v18 = vld [vmem:[#allocation3 + $0x108] sm:$0xff]  ;;  %v4646_v29 = vld [vmem:[#allocation3 + $0x110] sm:$0xff]  ;;  %v8940_v54 = vpack.i.bf16 %v4644_v33, %v4710_v1  ;;  %v13093_v33 = vld [vmem:[%s14604_s2] ss:$0 sm:$0xff] }
 0x4d0   :  { %4200 = vst.msk [vmem:[#allocation3 + $0x121] sm:$0xff] %vm4067_vm13, %v4025_v7  ;;  %v8920_v34 = vpack.i.bf16 %v4578_v51, %v4645_v18  ;;  %v4709_v23 = vld [vmem:[#allocation3 + $0x109] sm:$0xff]  ;;  %v8935_v20 = vpack.i.bf16 %v4579_v14, %v4646_v29  ;;  %v4583_v48 = vld [vmem:[#allocation3 + $0x112] sm:$0xff] }
 0x4d1   :  { %v8925_v24 = vpack.i.bf16 %v4643_v6, %v4709_v23  ;;  %v4582_v46 = vld [vmem:[#allocation3 + $0x10a] sm:$0xff] }
 0x4d2   :  { %v8410_v15 = vpop.f32.mrb[24].mxu0  ;;  %8871 = vrot.lane.b32.xlu0 %v8870_v45, %s9776_s8  ;;  %v8945_v57 = vpack.i.bf16 %v4707_v50, %v4582_v46 }
 0x4d3   :  { %v3810_v5 = vadd.f32 %v8410_v15, %v12691_v62  ;;  %8866 = vrot.lane.b32.xlu1 %v8865_v53, %s9779_s27  ;;  %v3804_v35 = vpop.f32.mrb[25].mxu0  ;;  %v8960_v15 = vpack.i.bf16 %v4708_v58, %v4583_v48 }
 0x4d4   :  { %v3805_v56 = vadd.f32 %v12691_v62, %v3804_v35 }
 0x4d5   :  { %v4028_v41 = vmax.f32 %v3810_v5, 0.0 }
 0x4d6   :  { %v4027_v47 = vmax.f32 %v3805_v56, 0.0  ;;  %8881 = vrot.lane.b32.xlu0 %v8880_v28, %s9779_s27  ;;  %v13069_v35 = vld [vmem:[#allocation3 + $0x129] sm:$0xff] }
 0x4d7   :  { %4203 = vst.msk [vmem:[#allocation3 + $0x141] sm:$0xff] %vm4067_vm13, %v4028_v41  ;;  %8876 = vrot.lane.b32.xlu1 %v8875_v63, %s9778_s25  ;;  %v4647_v39 = vld [vmem:[#allocation3 + $0x120] sm:$0xff]  ;;  %v4648_v28 = vld [vmem:[#allocation3 + $0x128] sm:$0xff]  ;;  %v8970_v41 = vpack.i.bf16 %v4646_v29, %v13069_v35 }
 0x4d8   :  { %4202 = vst.msk [vmem:[#allocation3 + $0x139] sm:$0xff] %vm4067_vm13, %v4027_v47  ;;  %v8950_v44 = vpack.i.bf16 %v4580_v11, %v4647_v39  ;;  %v13063_v59 = vld [vmem:[#allocation3 + $0x121] sm:$0xff]  ;;  %v8965_v63 = vpack.i.bf16 %v4581_v42, %v4648_v28 }
 0x4d9   :  { %v8955_v5 = vpack.i.bf16 %v4645_v18, %v13063_v59  ;;  %v4584_v51 = vld [vmem:[#allocation3 + $0x122] sm:$0xff] }
 0x4da   :  { %v8413_v2 = vpop.f32.mrb[26].mxu0  ;;  %8891 = vrot.lane.b32.xlu0 %v8890_v27, %s9778_s25 }
 0x4db   :  { %v3820_v55 = vadd.f32 %v8413_v2, %v12691_v62  ;;  %8886 = vrot.lane.b32.xlu1 %v8885_v8, %s9776_s8  ;;  %v3814_v25 = vpop.f32.mrb[27].mxu0 }
 0x4dc   :  { %v3815_v13 = vadd.f32 %v12691_v62, %v3814_v25  ;;  %v4585_v25 = vld [vmem:[#allocation3 + $0x12a] sm:$0xff] }
 0x4dd   :  { %v4030_v3 = vmax.f32 %v3820_v55, 0.0  ;;  %v8975_v55 = vpack.i.bf16 %v4709_v23, %v4584_v51 }
 0x4de   :  { %v4029_v9 = vmax.f32 %v3815_v13, 0.0  ;;  %8901 = vrot.lane.b32.xlu0 %v8900_v0, %s9776_s8  ;;  %v13087_v58 = vld [vmem:[#allocation3 + $0x141] sm:$0xff] }
 0x4df   :  { %4205 = vst.msk [vmem:[#allocation3 + $0x159] sm:$0xff] %vm4067_vm13, %v4030_v3  ;;  %8896 = vrot.lane.b32.xlu1 %v8895_v52, %s9779_s27  ;;  %v4649_v6 = vld [vmem:[#allocation3 + $0x138] sm:$0xff]  ;;  %v8990_v3 = vpack.i.bf16 %v4710_v1, %v4585_v25 }
 0x4e0   :  { %4204 = vst.msk [vmem:[#allocation3 + $0x151] sm:$0xff] %vm4067_vm13, %v4029_v9  ;;  %v8980_v2 = vpack.i.bf16 %v4582_v46, %v4649_v6  ;;  %v13081_v0 = vld [vmem:[#allocation3 + $0x139] sm:$0xff] }
 0x4e1   :  { %v8985_v52 = vpack.i.bf16 %v4647_v39, %v13081_v0  ;;  %v4650_v9 = vld [vmem:[#allocation3 + $0x140] sm:$0xff] }
 0x4e2   :  { %v8416_v40 = vpop.f32.mrb[28].mxu0  ;;  %8911 = vrot.lane.b32.xlu0 %v8910_v49, %s9779_s27 }
 0x4e3   :  { %v3830_v36 = vadd.f32 %v8416_v40, %v12691_v62  ;;  %8906 = vrot.lane.b32.xlu1 %v8905_v32, %s9778_s25  ;;  %v3824_v60 = vpop.f32.mrb[29].mxu0  ;;  %v9000_v40 = vpack.i.bf16 %v4648_v28, %v13087_v58 }
 0x4e4   :  { %v3825_v30 = vadd.f32 %v12691_v62, %v3824_v60 }
 0x4e5   :  { %v4032_v38 = vmax.f32 %v3830_v36, 0.0  ;;  %v8995_v36 = vpack.i.bf16 %v4583_v48, %v4650_v9  ;;  %v4370_v48 = vld [vmem:[#allocation3 + $0x2] sm:$0xff] }
 0x4e6   :  { %v4031_v10 = vmax.f32 %v3825_v30, 0.0  ;;  %8921 = vrot.lane.b32.xlu0 %v8920_v34, %s9778_s25  ;;  %v13101_v30 = vpop.permute.xlu0 %8721 }
 0x4e7   :  { %4207 = vst.msk [vmem:[#allocation3 + $0x171] sm:$0xff] %vm4067_vm13, %v4032_v38  ;;  %8916 = vrot.lane.b32.xlu1 %v8915_v16, %s9776_s8  ;;  %v13099_v60 = vld [vmem:[#allocation3 + $0x150] sm:$0xff]  ;;  %v13104_v38 = vld [vmem:[#allocation3 + $0x13a] sm:$0xff] }
 0x4e8   :  { %4206 = vst.msk [vmem:[#allocation3 + $0x169] sm:$0xff] %vm4067_vm13, %v4031_v10  ;;  %v9010_v16 = vpack.i.bf16 %v4584_v51, %v13099_v60  ;;  %v9005_v42 = vpack.i.bf16 %v13063_v59, %v13104_v38  ;;  %v13112_v10 = vld [vmem:[#allocation3 + $0x142] sm:$0xff]  ;;  %v13130_v39 = vld [vmem:[#allocation3 + $0x158] sm:$0xff] }
 0x4ea   :  { %v8419_v12 = vpop.f32.mrb[30].mxu0  ;;  %8931 = vrot.lane.b32.xlu0 %v8930_v22, %s9776_s8  ;;  %v13115_v22 = vld [vmem:[#allocation3 + $0x151] sm:$0xff] }
 0x4eb   :  { %v3840_v37 = vadd.f32 %v8419_v12, %v12691_v62  ;;  %8926 = vrot.lane.b32.xlu1 %v8925_v24, %s9779_s27  ;;  %v3834_v17 = vpop.f32.mrb[31].mxu0 }
 0x4ec   :  { %v3835_v21 = vadd.f32 %v12691_v62, %v3834_v17 }
 0x4ed   :  { %v4034_v19 = vmax.f32 %v3840_v37, 0.0  ;;  %v9020_v37 = vpack.i.bf16 %v13069_v35, %v13112_v10  ;;  %v13150_v35 = vld [vmem:[#allocation3 + $0x1a] sm:$0xff] }
 0x4ee   :  { %v4033_v43 = vmax.f32 %v3835_v21, 0.0  ;;  %8941 = vrot.lane.b32.xlu0 %v8940_v54, %s9779_s27  ;;  %v9015_v54 = vpack.i.bf16 %v4649_v6, %v13115_v22 }
 0x4ef   :  { %4209 = vst.msk [vmem:[#allocation3 + $0x189] sm:$0xff] %vm4067_vm13, %v4034_v19  ;;  %8936 = vrot.lane.b32.xlu1 %v8935_v20, %s9778_s25  ;;  %v13127_v19 = vld [vmem:[#allocation3 + $0x159] sm:$0xff] }
 0x4f0   :  { %4208 = vst.msk [vmem:[#allocation3 + $0x181] sm:$0xff] %vm4067_vm13, %v4033_v43  ;;  %v9030_v46 = vpack.i.bf16 %v4650_v9, %v13127_v19 }
 0x4f2   :  { %v8422_v7 = vpop.f32.mrb[32].mxu0  ;;  %8951 = vrot.lane.b32.xlu0 %v8950_v44, %s9778_s25 }
 0x4f3   :  { %v3850_v45 = vadd.f32 %v8422_v7, %v12691_v62  ;;  %8946 = vrot.lane.b32.xlu1 %v8945_v57, %s9776_s8  ;;  %v3844_v53 = vpop.f32.mrb[33].mxu0  ;;  %v9025_v57 = vpack.i.bf16 %v4585_v25, %v13130_v39  ;;  %v13141_v7 = vld [vmem:[#allocation3 + $0x30] sm:$0xff] }
 0x4f4   :  { %v3845_v61 = vadd.f32 %v12691_v62, %v3844_v53  ;;  %v13124_v17 = vpop.permute.xlu1 %8726 }
 0x4f5   :  { %v4036_v4 = vmax.f32 %v3850_v45, 0.0  ;;  %v13144_v45 = vld [vmem:[#allocation3 + $0x152] sm:$0xff] }
 0x4f6   :  { %v4035_v56 = vmax.f32 %v3845_v61, 0.0  ;;  %8961 = vrot.lane.b32.xlu0 %v8960_v15, %s9776_s8 }
 0x4f7   :  { %4211 = vst.msk [vmem:[#allocation3 + $0x1d1] sm:$0xff] %vm4067_vm13, %v4036_v4  ;;  %8956 = vrot.lane.b32.xlu1 %v8955_v5, %s9779_s27  ;;  %v9040_v5 = vpack.i.bf16 %v4370_v48, %v13141_v7  ;;  %v13194_v48 = vld [vmem:[#allocation3 + $0x38] sm:$0xff] }
 0x4f8   :  { %4210 = vst.msk [vmem:[#allocation3 + $0x1c9] sm:$0xff] %vm4067_vm13, %v4035_v56 }
 0x4fa   :  { %v8425_v47 = vpop.f32.mrb[34].mxu0  ;;  %8971 = vrot.lane.b32.xlu0 %v8970_v41, %s9779_s27  ;;  %v9035_v41 = vpack.i.bf16 %v13144_v45, %v13150_v35 }
 0x4fb   :  { %v3860_v27 = vadd.f32 %v8425_v47, %v12691_v62  ;;  %8966 = vrot.lane.b32.xlu1 %v8965_v63, %s9778_s25  ;;  %v3854_v8 = vpop.f32.mrb[35].mxu0  ;;  %v13156_v63 = vld [vmem:[#allocation3 + $0x168] sm:$0xff] }
 0x4fc   :  { %v3855_v14 = vadd.f32 %v12691_v62, %v3854_v8  ;;  %v13119_v12 = vpop.permute.xlu0 %8731 }
 0x4fd   :  { %v4038_v50 = vmax.f32 %v3860_v27, 0.0 }
 0x4fe   :  { %v4037_v13 = vmax.f32 %v3855_v14, 0.0  ;;  %8981 = vrot.lane.b32.xlu0 %v8980_v2, %s9778_s25  ;;  %v13163_v14 = vld [vmem:[#allocation3 + $0x61] sm:$0xff] }
 0x4ff   :  { %4213 = vst.msk [vmem:[#allocation3 + $0x1e9] sm:$0xff] %vm4067_vm13, %v4038_v50  ;;  %8976 = vrot.lane.b32.xlu1 %v8975_v55, %s9776_s8  ;;  %v9050_v50 = vpack.i.bf16 %v13104_v38, %v13156_v63  ;;  %v13170_v55 = vld [vmem:[#allocation3 + $0x22] sm:$0xff] }
 0x500   :  { %4212 = vst.msk [vmem:[#allocation3 + $0x1e1] sm:$0xff] %vm4067_vm13, %v4037_v13 }
 0x502   :  { %v8428_v62 = vpop.f32.mrb[36].mxu0  ;;  %8991 = vrot.lane.b32.xlu0 %v8990_v3, %s9776_s8  ;;  %v9045_v3 = vpack.i.bf16 %v13170_v55, %v13081_v0 }
 0x503   :  { %v3870_v49 = vadd.f32 %v13093_v33, %v8428_v62  ;;  %8986 = vrot.lane.b32.xlu1 %v8985_v52, %s9779_s27  ;;  %v3864_v32 = vpop.f32.mrb[37].mxu0  ;;  %v13176_v52 = vld [vmem:[#allocation3 + $0x48] sm:$0xff] }
 0x504   :  { %v3865_v18 = vadd.f32 %v13093_v33, %v3864_v32  ;;  %v13138_v44 = vpop.permute.xlu1 %8736  ;;  %v13178_v62 = vld [vmem:[#allocation3 + $0x169] sm:$0xff] }
 0x505   :  { %v4040_v11 = vmax.f32 %v3870_v49, 0.0  ;;  %v8738_v6 = vunpack.i.l.bf16 %v13138_v44  ;;  %v8739_v9 = vunpack.i.h.bf16 %v13138_v44 }
 0x506   :  { %v4039_v34 = vmax.f32 %v3865_v18, 0.0  ;;  %9001 = vrot.lane.b32.xlu0 %v9000_v40, %s9779_s27 }
 0x507   :  { %4215 = vst.msk [vmem:[#allocation3 + $0x201] sm:$0xff] %vm4067_vm13, %v4040_v11  ;;  %8996 = vrot.lane.b32.xlu1 %v8995_v36, %s9778_s25  ;;  %v6361_v40 = vsel %vm4067_vm13, %v13176_v52, %v8738_v6  ;;  %v4691_v11 = vld [vmem:[#allocation3 + $0x31] sm:$0xff] }
 0x508   :  { %4214 = vst.msk [vmem:[#allocation3 + $0x1f9] sm:$0xff] %vm4067_vm13, %v4039_v34 }
 0x50a   :  { %v8431_v23 = vpop.f32.mrb[38].mxu0  ;;  %9011 = vrot.lane.b32.xlu0 %v9010_v16, %s9778_s25 }
 0x50b   :  { %v3880_v24 = vadd.f32 %v13093_v33, %v8431_v23  ;;  %9006 = vrot.lane.b32.xlu1 %v9005_v42, %s9776_s8  ;;  %v3874_v1 = vpop.f32.mrb[39].mxu0 }
 0x50c   :  { %v3875_v29 = vadd.f32 %v13093_v33, %v3874_v1  ;;  %v13135_v43 = vpop.permute.xlu0 %8741 }
 0x50d   :  { %v4042_v21 = vmax.f32 %v3880_v24, 0.0 }
 0x50e   :  { %v4041_v20 = vmax.f32 %v3875_v29, 0.0  ;;  %9021 = vrot.lane.b32.xlu0 %v9020_v37, %s9776_s8  ;;  %v9060_v29 = vpack.i.bf16 %v13099_v60, %v13178_v62  ;;  %v4434_v37 = vld [vmem:[#allocation3 + $0x18] sm:$0xff]  ;;  %v13201_v60 = vld [vmem:[#allocation3 + $0x50] sm:$0xff] }
 0x50f   :  { %4217 = vst.msk [vmem:[#allocation3 + $0x219] sm:$0xff] %vm4067_vm13, %v4042_v21  ;;  %9016 = vrot.lane.b32.xlu1 %v9015_v54, %s9779_s27  ;;  %v9055_v44 = vpack.i.bf16 %v4434_v37, %v4691_v11  ;;  %v6362_v6 = vsel %vm4067_vm13, %v13201_v60, %v8739_v9  ;;  %v4506_v11 = vld [vmem:[#allocation3 + $0x79] sm:$0xff] }
 0x510   :  { %4216 = vst.msk [vmem:[#allocation3 + $0x211] sm:$0xff] %vm4067_vm13, %v4041_v20 }
 0x512   :  { %v8434_v59 = vpop.f32.mrb[40].mxu0  ;;  %9031 = vrot.lane.b32.xlu0 %v9030_v46, %s9779_s27 }
 0x513   :  { %v3890_v53 = vadd.f32 %v13093_v33, %v8434_v59  ;;  %9026 = vrot.lane.b32.xlu1 %v9025_v57, %s9778_s25  ;;  %v3884_v61 = vpop.f32.mrb[41].mxu0  ;;  %v4371_v57 = vld [vmem:[#allocation3 + $0xa] sm:$0xff] }
 0x514   :  { %v3885_v15 = vadd.f32 %v13093_v33, %v3884_v61  ;;  %v8752_v4 = vpop.permute.xlu0 %8751 }
 0x515   :  { %v4044_v56 = vmax.f32 %v3890_v53, 0.0  ;;  %v13152_v28 = vpop.permute.xlu1 %8746  ;;  %v8754_v27 = vunpack.i.h.bf16 %v8752_v4  ;;  %v8753_v8 = vunpack.i.l.bf16 %v8752_v4  ;;  %v13199_v4 = vld [vmem:[#allocation3 + $0x15a] sm:$0xff] }
 0x516   :  { %v4043_v47 = vmax.f32 %v3885_v15, 0.0  ;;  %v8749_v51 = vunpack.i.h.bf16 %v13152_v28  ;;  %9041 = vrot.lane.b32.xlu0 %v9040_v5, %s9778_s25  ;;  %v13197_v15 = vld [vmem:[#allocation3 + $0x69] sm:$0xff]  ;;  %v8743_v5 = vunpack.i.l.bf16 %v13135_v43 }
 0x517   :  { %4219 = vst.msk [vmem:[#allocation3 + $0x231] sm:$0xff] %vm4067_vm13, %v4044_v56  ;;  %9036 = vrot.lane.b32.xlu1 %v9035_v41, %s9776_s8  ;;  %v6426_v16 = vsel %vm6419_vm15, %v6361_v40, %v8754_v27  ;;  %v9070_v27 = vpack.i.bf16 %v4371_v57, %v13194_v48  ;;  %v13236_v57 = vld [vmem:[#allocation3 + $0x16a] sm:$0xff] }
 0x518   :  { %4218 = vst.msk [vmem:[#allocation3 + $0x229] sm:$0xff] %vm4067_vm13, %v4043_v47  ;;  %v13166_v2 = vpop.permute.xlu0 %8761  ;;  %v6555_v25 = vsel %vm4067_vm13, %v13163_v14, %v8749_v51 }
 0x519   :  { %v8757_v13 = vpop.permute.xlu1 %8756  ;;  %v8763_v36 = vunpack.i.l.bf16 %v13166_v2  ;;  %v6619_v38 = vsel %vm6419_vm15, %v6555_v25, %v8753_v8  ;;  %v8764_v56 = vunpack.i.h.bf16 %v13166_v2 }
 0x51a   :  { %v8759_v49 = vunpack.i.h.bf16 %v8757_v13  ;;  %v8758_v32 = vunpack.i.l.bf16 %v8757_v13  ;;  %v8437_v18 = vpop.f32.mrb[42].mxu0  ;;  %9051 = vrot.lane.b32.xlu0 %v9050_v50, %s9778_s25  ;;  %v9065_v13 = vpack.i.bf16 %v13087_v58, %v13199_v4 }
 0x51b   :  { %v3900_v0 = vadd.f32 %v13093_v33, %v8437_v18  ;;  %9046 = vrot.lane.b32.xlu1 %v9045_v3, %s9776_s8  ;;  %v3894_v34 = vpop.f32.mrb[43].mxu0  ;;  %v6556_v41 = vsel %vm4067_vm13, %v13197_v15, %v8763_v36  ;;  %v13220_v36 = vld [vmem:[#allocation3 + $0x170] sm:$0xff] }
 0x51c   :  { %v3895_v42 = vadd.f32 %v13093_v33, %v3894_v34  ;;  %v8772_v23 = vpop.permute.xlu0 %8771  ;;  %v6683_v24 = vsel %vm6484_vm0, %v6619_v38, %v8758_v32  ;;  %v6491_v1 = vsel %vm6484_vm0, %v6426_v16, %v8759_v49  ;;  %v4692_v49 = vld [vmem:[#allocation3 + $0x39] sm:$0xff]  ;;  %v6557_v38 = vsel %vm4067_vm13, %v4506_v11, %v8764_v56  ;;  %v13240_v56 = vld [vmem:[#allocation3 + $0x171] sm:$0xff] }
 0x51d   :  { %v4046_v21 = vmax.f32 %v3900_v0, 0.0  ;;  %v8774_v54 = vunpack.i.h.bf16 %v8772_v23  ;;  %v8773_v20 = vunpack.i.l.bf16 %v8772_v23  ;;  %v8767_v46 = vpop.permute.xlu1 %8766  ;;  %7070 = vmatprep.mubr.f32.mxu1 %v6683_v24  ;;  %v13222_v0 = vld [vmem:[#allocation3 + $0x60] sm:$0xff] }
 0x51e   :  { %v4045_v59 = vmax.f32 %v3895_v42, 0.0  ;;  %v8769_v53 = vunpack.i.h.bf16 %v8767_v46  ;;  %v8768_v61 = vunpack.i.l.bf16 %v8767_v46  ;;  %7071 = vmatmul.mubr.f32.vlgmr.msra.gmra.mrb[0].mxu1 %v6491_v1  ;;  %9061 = vrot.lane.b32.xlu0 %v9060_v29, %s9779_s27  ;;  %v4435_v16 = vld [vmem:[#allocation3 + $0x20] sm:$0xff]  ;;  %v6363_v42 = vsel %vm4067_vm13, %v13222_v0, %v8743_v5 }
 0x51f   :  { %4221 = vst.msk [vmem:[#allocation3 + $0x249] sm:$0xff] %vm4067_vm13, %v4046_v21  ;;  %9056 = vrot.lane.b32.xlu1 %v9055_v44, %s9779_s27  ;;  %v9080_v29 = vpack.i.bf16 %v4435_v16, %v4692_v49  ;;  %v8744_v21 = vunpack.i.h.bf16 %v13135_v43  ;;  %v9075_v44 = vpack.i.bf16 %v13112_v10, %v13220_v36  ;;  %v4507_v10 = vld [vmem:[#allocation3 + $0x81] sm:$0xff] }
 0x520   :  { %4220 = vst.msk [vmem:[#allocation3 + $0x241] sm:$0xff] %vm4067_vm13, %v4045_v59  ;;  %v8782_v47 = vpop.permute.xlu0 %8781  ;;  %v6620_v51 = vsel %vm6419_vm15, %v6556_v41, %v8768_v61  ;;  %v6427_v8 = vsel %vm6419_vm15, %v6362_v6, %v8769_v53  ;;  %v13244_v41 = vld [vmem:[#allocation3 + $0x32] sm:$0xff] }
 0x521   :  { %v8783_v2 = vunpack.i.l.bf16 %v8782_v47  ;;  %v8777_v50 = vpop.permute.xlu1 %8776  ;;  %v6684_v25 = vsel %vm6484_vm0, %v6620_v51, %v8773_v20  ;;  %v6492_v3 = vsel %vm6484_vm0, %v6427_v8, %v8774_v54  ;;  %v8784_v9 = vunpack.i.h.bf16 %v8782_v47 }
 0x522   :  { %v8779_v32 = vunpack.i.h.bf16 %v8777_v50  ;;  %v8778_v18 = vunpack.i.l.bf16 %v8777_v50  ;;  %7075 = vmatprep.mubr.f32.mxu1 %v6684_v25  ;;  %v8440_v40 = vpop.f32.mrb[44].mxu0  ;;  %9071 = vrot.lane.b32.xlu0 %v9070_v27, %s9778_s25  ;;  %v9090_v47 = vpack.i.bf16 %v13236_v57, %v13244_v41  ;;  %v13250_v27 = vld [vmem:[#allocation3 + $0x68] sm:$0xff]  ;;  %v8748_v8 = vunpack.i.l.bf16 %v13152_v28 }
 0x523   :  { %v3910_v34 = vadd.f32 %v13093_v33, %v8440_v40  ;;  %9066 = vrot.lane.b32.xlu1 %v9065_v13, %s9776_s8  ;;  %7076 = vmatmul.mubr.f32.gmra.mrb[2].mxu1 %v6492_v3  ;;  %v3904_v58 = vpop.f32.mrb[45].mxu0  ;;  %v9085_v50 = vpack.i.bf16 %v13130_v39, %v13240_v56  ;;  %v6364_v25 = vsel %vm4067_vm13, %v13250_v27, %v8744_v21  ;;  %v4508_v21 = vld [vmem:[#allocation3 + $0x91] sm:$0xff] }
 0x524   :  { %v3905_v23 = vadd.f32 %v13093_v33, %v3904_v58  ;;  %v8792_v24 = vpop.permute.xlu0 %8791  ;;  %v6621_v1 = vsel %vm6419_vm15, %v6557_v38, %v8778_v18  ;;  %v6428_v37 = vsel %vm6419_vm15, %v6363_v42, %v8779_v32 }
 0x525   :  { %v4048_v54 = vmax.f32 %v3910_v34, 0.0  ;;  %v8787_v20 = vpop.permute.xlu1 %8786  ;;  %v6685_v46 = vsel %vm6484_vm0, %v6621_v1, %v8783_v2  ;;  %v8794_v53 = vunpack.i.h.bf16 %v8792_v24  ;;  %v6493_v5 = vsel %vm6484_vm0, %v6428_v37, %v8784_v9  ;;  %v13262_v34 = vld [vmem:[#allocation3 + $0x3a] sm:$0xff] }
 0x526   :  { %v4047_v59 = vmax.f32 %v3905_v23, 0.0  ;;  %v8788_v61 = vunpack.i.l.bf16 %v8787_v20  ;;  %7080 = vmatprep.mubr.f32.mxu1 %v6685_v46  ;;  %9081 = vrot.lane.b32.xlu0 %v9080_v29, %s9779_s27  ;;  %v8793_v43 = vunpack.i.l.bf16 %v8792_v24  ;;  %v8789_v13 = vunpack.i.h.bf16 %v8787_v20  ;;  %v4252_v24 = vld [vmem:[#allocation3 + $0x78] sm:$0xff]  ;;  %v4693_v20 = vld [vmem:[#allocation3 + $0x49] sm:$0xff] }
 0x527   :  { %4223 = vst.msk [vmem:[#allocation3 + $0x261] sm:$0xff] %vm4067_vm13, %v4048_v54  ;;  %9076 = vrot.lane.b32.xlu1 %v9075_v44, %s9778_s25  ;;  %7081 = vmatmul.mubr.f32.gmra.mrb[4].mxu1 %v6493_v5  ;;  %v6429_v32 = vsel %vm6419_vm15, %v6364_v25, %v8794_v53  ;;  %v9100_v23 = vpack.i.bf16 %v13262_v34, %v13115_v22  ;;  %v13274_v22 = vld [vmem:[#allocation3 + $0x180] sm:$0xff]  ;;  %v13286_v25 = vld [vmem:[#allocation3 + $0x172] sm:$0xff] }
 0x528   :  { %4222 = vst.msk [vmem:[#allocation3 + $0x259] sm:$0xff] %vm4067_vm13, %v4047_v59  ;;  %v8802_v6 = vpop.permute.xlu0 %8801  ;;  %v6558_v51 = vsel %vm4067_vm13, %v4507_v10, %v8788_v61  ;;  %v9095_v37 = vpack.i.bf16 %v13150_v35, %v13176_v52  ;;  %v6365_v54 = vsel %vm4067_vm13, %v4252_v24, %v8748_v8  ;;  %v6559_v53 = vsel %vm4067_vm13, %v4508_v21, %v8789_v13 }
 0x529   :  { %v8797_v2 = vpop.permute.xlu1 %8796  ;;  %v8804_v18 = vunpack.i.h.bf16 %v8802_v6  ;;  %v8803_v40 = vunpack.i.l.bf16 %v8802_v6  ;;  %v6622_v39 = vsel %vm6419_vm15, %v6558_v51, %v8793_v43  ;;  %v9110_v51 = vpack.i.bf16 %v13141_v7, %v4693_v20 }
 0x52a   :  { %v8799_v3 = vunpack.i.h.bf16 %v8797_v2  ;;  %v8798_v49 = vunpack.i.l.bf16 %v8797_v2  ;;  %v8443_v9 = vpop.f32.mrb[46].mxu0  ;;  %9091 = vrot.lane.b32.xlu0 %v9090_v47, %s9776_s8 }
 0x52b   :  { %v3920_v11 = vadd.f32 %v13093_v33, %v8443_v9  ;;  %9086 = vrot.lane.b32.xlu1 %v9085_v50, %s9779_s27  ;;  %v3914_v28 = vpop.f32.mrb[47].mxu0  ;;  %v6623_v35 = vsel %vm6419_vm15, %v6559_v53, %v8803_v40  ;;  %v6430_v43 = vsel %vm6419_vm15, %v6365_v54, %v8804_v18  ;;  %v9105_v50 = vpack.i.bf16 %v13144_v45, %v13274_v22  ;;  %v4719_v18 = vld [vmem:[#allocation3 + $0x181] sm:$0xff]  ;;  %v4254_v53 = vld [vmem:[#allocation3 + $0x90] sm:$0xff] }
 0x52c   :  { %v3915_v58 = vadd.f32 %v13093_v33, %v3914_v28  ;;  %v8812_v38 = vpop.permute.xlu0 %8811  ;;  %v6686_v16 = vsel %vm6484_vm0, %v6622_v39, %v8798_v49  ;;  %v6494_v42 = vsel %vm6484_vm0, %v6429_v32, %v8799_v3  ;;  %v4509_v32 = vld [vmem:[#allocation3 + $0x99] sm:$0xff] }
 0x52d   :  { %v4050_v1 = vmax.f32 %v3920_v11, 0.0  ;;  %v8807_v29 = vpop.permute.xlu1 %8806  ;;  %7085 = vmatprep.mubr.f32.mxu1 %v6686_v16  ;;  %v8814_v61 = vunpack.i.h.bf16 %v8812_v38  ;;  %v8813_v5 = vunpack.i.l.bf16 %v8812_v38  ;;  %v4253_v40 = vld [vmem:[#allocation3 + $0x80] sm:$0xff]  ;;  %v9120_v16 = vpack.i.bf16 %v13127_v19, %v13286_v25 }
 0x52e   :  { %v4049_v46 = vmax.f32 %v3915_v58, 0.0  ;;  %v8809_v44 = vunpack.i.h.bf16 %v8807_v29  ;;  %v8808_v59 = vunpack.i.l.bf16 %v8807_v29  ;;  %7086 = vmatmul.mubr.f32.gmra.mrb[6].mxu1 %v6494_v42  ;;  %9101 = vrot.lane.b32.xlu0 %v9100_v23, %s9776_s8  ;;  %v9115_v29 = vpack.i.bf16 %v13156_v63, %v4719_v18 }
 0x52f   :  { %4225 = vst.msk [vmem:[#allocation3 + $0x279] sm:$0xff] %vm4067_vm13, %v4050_v1  ;;  %9096 = vrot.lane.b32.xlu1 %v9095_v37, %s9778_s25  ;;  %v6560_v28 = vsel %vm4067_vm13, %v4509_v32, %v8813_v5  ;;  %v6366_v45 = vsel %vm4067_vm13, %v4253_v40, %v8814_v61  ;;  %v13300_v37 = vld [vmem:[#allocation3 + $0x188] sm:$0xff] }
 0x530   :  { %4224 = vst.msk [vmem:[#allocation3 + $0x271] sm:$0xff] %vm4067_vm13, %v4049_v46  ;;  %v8822_v10 = vpop.permute.xlu0 %8821  ;;  %v6687_v6 = vsel %vm6484_vm0, %v6623_v35, %v8808_v59  ;;  %v6495_v47 = vsel %vm6484_vm0, %v6430_v43, %v8809_v44  ;;  %v4510_v59 = vld [vmem:[#allocation3 + $0xa9] sm:$0xff]  ;;  %v9130_v61 = vpack.i.bf16 %v13199_v4, %v13300_v37 }
 0x531   :  { %v8823_v8 = vunpack.i.l.bf16 %v8822_v10  ;;  %v8817_v2 = vpop.permute.xlu1 %8816  ;;  %7090 = vmatprep.mubr.f32.mxu1 %v6687_v6  ;;  %v8824_v13 = vunpack.i.h.bf16 %v8822_v10  ;;  %v9125_v10 = vpack.i.bf16 %v13170_v55, %v13201_v60  ;;  %v4720_v6 = vld [vmem:[#allocation3 + $0x189] sm:$0xff] }
 0x532   :  { %v8819_v3 = vunpack.i.h.bf16 %v8817_v2  ;;  %v8818_v49 = vunpack.i.l.bf16 %v8817_v2  ;;  %7091 = vmatmul.mubr.f32.gmra.mrb[8].mxu1 %v6495_v47  ;;  %v8446_v9 = vpop.f32.mrb[48].mxu0  ;;  %9111 = vrot.lane.b32.xlu0 %v9110_v51, %s9779_s27 }
 0x533   :  { %v3930_v7 = vadd.f32 %v13093_v33, %v8446_v9  ;;  %9106 = vrot.lane.b32.xlu1 %v9105_v50, %s9778_s25  ;;  %v3924_v11 = vpop.f32.mrb[49].mxu0  ;;  %v4694_v50 = vld [vmem:[#allocation3 + $0x51] sm:$0xff] }
 0x534   :  { %v3925_v39 = vadd.f32 %v13093_v33, %v3924_v11  ;;  %v8832_v58 = vpop.permute.xlu0 %8831  ;;  %v6624_v38 = vsel %vm6419_vm15, %v6560_v28, %v8818_v49  ;;  %v6431_v42 = vsel %vm6419_vm15, %v6366_v45, %v8819_v3 }
 0x535   :  { %v4052_v23 = vmax.f32 %v3930_v7, 0.0  ;;  %v8827_v24 = vpop.permute.xlu1 %8826  ;;  %v6688_v1 = vsel %vm6484_vm0, %v6624_v38, %v8823_v8  ;;  %v6496_v46 = vsel %vm6484_vm0, %v6431_v42, %v8824_v13  ;;  %v8834_v19 = vunpack.i.h.bf16 %v8832_v58 }
 0x536   :  { %v4051_v21 = vmax.f32 %v3925_v39, 0.0  ;;  %v8829_v54 = vunpack.i.h.bf16 %v8827_v24  ;;  %v8828_v20 = vunpack.i.l.bf16 %v8827_v24  ;;  %7095 = vmatprep.mubr.f32.mxu1 %v6688_v1  ;;  %9121 = vrot.lane.b32.xlu0 %v9120_v16, %s9776_s8  ;;  %v8833_v44 = vunpack.i.l.bf16 %v8832_v58  ;;  %v4592_v24 = vld [vmem:[#allocation3 + $0x182] sm:$0xff]  ;;  %v4255_v1 = vld [vmem:[#allocation3 + $0x98] sm:$0xff] }
 0x537   :  { %4227 = vst.msk [vmem:[#allocation3 + $0x291] sm:$0xff] %vm4067_vm13, %v4052_v23  ;;  %9116 = vrot.lane.b32.xlu1 %v9115_v29, %s9779_s27  ;;  %7096 = vmatmul.mubr.f32.gmra.mrb[10].mxu1 %v6496_v46  ;;  %v9140_v7 = vpack.i.bf16 %v13220_v36, %v4720_v6  ;;  %v9135_v58 = vpack.i.bf16 %v13194_v48, %v4694_v50  ;;  %v4511_v23 = vld [vmem:[#allocation3 + $0xb1] sm:$0xff] }
 0x538   :  { %4226 = vst.msk [vmem:[#allocation3 + $0x289] sm:$0xff] %vm4067_vm13, %v4051_v21  ;;  %v8842_v63 = vpop.permute.xlu0 %8841  ;;  %v6561_v5 = vsel %vm4067_vm13, %v4510_v59, %v8828_v20  ;;  %v6367_v35 = vsel %vm4067_vm13, %v4254_v53, %v8829_v54  ;;  %v9150_v54 = vpack.i.bf16 %v13244_v41, %v13222_v0  ;;  %v4566_v20 = vld [vmem:[#allocation3 + $0x4a] sm:$0xff]  ;;  %v4512_v0 = vld [vmem:[#allocation3 + $0xc1] sm:$0xff] }
 0x539   :  { %v8837_v43 = vpop.permute.xlu1 %8836  ;;  %v8844_v47 = vunpack.i.h.bf16 %v8842_v63  ;;  %v8843_v13 = vunpack.i.l.bf16 %v8842_v63  ;;  %v6625_v49 = vsel %vm6419_vm15, %v6561_v5, %v8833_v44  ;;  %v6432_v9 = vsel %vm6419_vm15, %v6367_v35, %v8834_v19  ;;  %v4657_v63 = vld [vmem:[#allocation3 + $0x198] sm:$0xff]  ;;  %v4256_v41 = vld [vmem:[#allocation3 + $0xa8] sm:$0xff] }
 0x53a   :  { %v8839_v51 = vunpack.i.h.bf16 %v8837_v43  ;;  %v8838_v8 = vunpack.i.l.bf16 %v8837_v43  ;;  %v8449_v2 = vpop.f32.mrb[50].mxu0  ;;  %9131 = vrot.lane.b32.xlu0 %v9130_v61, %s9778_s25  ;;  %v9145_v59 = vpack.i.bf16 %v4592_v24, %v4566_v20  ;;  %v9160_v6 = vpack.i.bf16 %v13236_v57, %v4657_v63  ;;  %v4257_v20 = vld [vmem:[#allocation3 + $0xb0] sm:$0xff] }
 0x53b   :  { %v3940_v3 = vadd.f32 %v13093_v33, %v8449_v2  ;;  %9126 = vrot.lane.b32.xlu1 %v9125_v10, %s9778_s25  ;;  %v3934_v4 = vpop.f32.mrb[51].mxu0  ;;  %v6562_v36 = vsel %vm4067_vm13, %v4511_v23, %v8843_v13  ;;  %v6368_v29 = vsel %vm4067_vm13, %v4255_v1, %v8844_v47  ;;  %v4567_v47 = vld [vmem:[#allocation3 + $0x52] sm:$0xff]  ;;  %v9165_v1 = vpack.i.bf16 %v13176_v52, %v13163_v14 }
 0x53c   :  { %v3935_v55 = vadd.f32 %v13093_v33, %v3934_v4  ;;  %v8852_v32 = vpop.permute.xlu0 %8851  ;;  %v6689_v18 = vsel %vm6484_vm0, %v6625_v49, %v8838_v8  ;;  %v6497_v40 = vsel %vm6484_vm0, %v6432_v9, %v8839_v51  ;;  %v9155_v50 = vpack.i.bf16 %v4567_v47, %v13178_v62  ;;  %v4721_v13 = vld [vmem:[#allocation3 + $0x199] sm:$0xff]  ;;  %v6774_v4 = vld [vmem:[%s14605_s3 + $0x108] sm:$0xff] }
 0x53d   :  { %v4054_v11 = vmax.f32 %v3940_v3, 0.0  ;;  %v8854_v28 = vunpack.i.h.bf16 %v8852_v32  ;;  %v8853_v45 = vunpack.i.l.bf16 %v8852_v32  ;;  %v8847_v39 = vpop.permute.xlu1 %8846  ;;  %7100 = vmatprep.mubr.f32.mxu1 %v6689_v18  ;;  %v6773_v3 = vld [vmem:[%s14605_s3 + $0x100] sm:$0xff] }
 0x53e   :  { %v4053_v38 = vmax.f32 %v3935_v55, 0.0  ;;  %v8849_v16 = vunpack.i.h.bf16 %v8847_v39  ;;  %v8848_v42 = vunpack.i.l.bf16 %v8847_v39  ;;  %7101 = vmatmul.mubr.f32.gmra.mrb[12].mxu1 %v6497_v40  ;;  %9141 = vrot.lane.b32.xlu0 %v9140_v7, %s9779_s27  ;;  %v13348_v32 = vpack.c.bf16 %v6774_v4, %v6773_v3 }
 0x53f   :  { %4229 = vst.msk [vmem:[#allocation3 + $0x2a9] sm:$0xff] %vm4067_vm13, %v4054_v11  ;;  %9136 = vrot.lane.b32.xlu1 %v9135_v58, %s9779_s27 }
 0x540   :  { %4228 = vst.msk [vmem:[#allocation3 + $0x2a1] sm:$0xff] %vm4067_vm13, %v4053_v38  ;;  %v8862_v48 = vpop.permute.xlu0 %8861  ;;  %v6626_v21 = vsel %vm6419_vm15, %v6562_v36, %v8848_v42  ;;  %v6433_v46 = vsel %vm6419_vm15, %v6368_v29, %v8849_v16  ;;  %v9170_v38 = vpack.i.bf16 %v13274_v22, %v4721_v13  ;;  %8650 = vmatprep.subr.bf16.mxu0 %v13348_v32 }
 0x541   :  { %v8857_v19 = vpop.permute.xlu1 %8856  ;;  %v6690_v44 = vsel %vm6484_vm0, %v6626_v21, %v8853_v45  ;;  %v6498_v53 = vsel %vm6484_vm0, %v6433_v46, %v8854_v28  ;;  %v8864_v35 = vunpack.i.h.bf16 %v8862_v48  ;;  %v8863_v43 = vunpack.i.l.bf16 %v8862_v48  ;;  %v4513_v21 = vld [vmem:[#allocation3 + $0xc9] sm:$0xff] }
 0x542   :  { %v8859_v61 = vunpack.i.h.bf16 %v8857_v19  ;;  %v8858_v5 = vunpack.i.l.bf16 %v8857_v19  ;;  %7105 = vmatprep.mubr.f32.mxu1 %v6690_v44  ;;  %9151 = vrot.lane.b32.xlu0 %v9150_v54, %s9778_s25  ;;  %v4593_v54 = vld [vmem:[#allocation3 + $0x18a] sm:$0xff]  ;;  %v9180_v19 = vpack.i.bf16 %v13262_v34, %v13250_v27  ;;  %v4514_v27 = vld [vmem:[#allocation3 + $0xd9] sm:$0xff] }
 0x543   :  { %9146 = vrot.lane.b32.xlu1 %v9145_v59, %s9776_s8  ;;  %7106 = vmatmul.mubr.f32.gmra.mrb[14].mxu1 %v6498_v53  ;;  %v9175_v63 = vpack.i.bf16 %v13240_v56, %v4593_v54  ;;  %v4258_v34 = vld [vmem:[#allocation3 + $0xc0] sm:$0xff] }
 0x544   :  { %v8872_v10 = vpop.permute.xlu0 %8871  ;;  %v6563_v51 = vsel %vm4067_vm13, %v4512_v0, %v8858_v5  ;;  %v6369_v8 = vsel %vm4067_vm13, %v4256_v41, %v8859_v61 }
 0x545   :  { %v8867_v2 = vpop.permute.xlu1 %8866  ;;  %v8874_v49 = vunpack.i.h.bf16 %v8872_v10  ;;  %v8873_v18 = vunpack.i.l.bf16 %v8872_v10  ;;  %v6627_v7 = vsel %vm6419_vm15, %v6563_v51, %v8863_v43  ;;  %v6434_v11 = vsel %vm6419_vm15, %v6369_v8, %v8864_v35  ;;  %v4658_v43 = vld [vmem:[#allocation3 + $0x1a0] sm:$0xff] }
 0x546   :  { %v8869_v9 = vunpack.i.h.bf16 %v8867_v2  ;;  %v8868_v57 = vunpack.i.l.bf16 %v8867_v2  ;;  %v8452_v55 = vpop.f32.mrb[52].mxu0  ;;  %9161 = vrot.lane.b32.xlu0 %v9160_v6, %s9778_s25  ;;  %v9190_v6 = vpack.i.bf16 %v13201_v60, %v13197_v15  ;;  %v9185_v8 = vpack.i.bf16 %v13286_v25, %v4658_v43  ;;  %v4338_v2 = vld [vmem:[#allocation3 + $0x1b1] sm:$0xff] }
 0x547   :  { %v3950_v62 = vadd.f32 %v13093_v33, %v8452_v55  ;;  %9156 = vrot.lane.b32.xlu1 %v9155_v50, %s9776_s8  ;;  %v3944_v40 = vpop.f32.mrb[53].mxu0  ;;  %v6564_v22 = vsel %vm4067_vm13, %v4513_v21, %v8873_v18  ;;  %v6370_v46 = vsel %vm4067_vm13, %v4257_v20, %v8874_v49  ;;  %v13381_v50 = vld [vmem:[#allocation3 + $0x1ca] sm:$0xff]  ;;  %v13412_v43 = vld [vmem:[#allocation3 + $0x1d2] sm:$0xff] }
 0x548   :  { %v3945_v28 = vadd.f32 %v13093_v33, %v3944_v40  ;;  %v8882_v45 = vpop.permute.xlu0 %8881  ;;  %v6691_v39 = vsel %vm6484_vm0, %v6627_v7, %v8868_v57  ;;  %v6499_v58 = vsel %vm6484_vm0, %v6434_v11, %v8869_v9  ;;  %v4722_v9 = vld [vmem:[#allocation3 + $0x1a1] sm:$0xff]  ;;  %v9200_v11 = vpack.i.bf16 %v4338_v2, %v13381_v50 }
 0x549   :  { %v4056_v16 = vmax.f32 %v3950_v62, 0.0  ;;  %v8884_v42 = vunpack.i.h.bf16 %v8882_v45  ;;  %v8883_v23 = vunpack.i.l.bf16 %v8882_v45  ;;  %v8877_v24 = vpop.permute.xlu1 %8876  ;;  %7110 = vmatprep.mubr.f32.mxu1 %v6691_v39  ;;  %v13419_v2 = vld [vmem:[#allocation3 + $0x1e2] sm:$0xff] }
 0x54a   :  { %v4055_v36 = vmax.f32 %v3945_v28, 0.0  ;;  %v8879_v29 = vunpack.i.h.bf16 %v8877_v24  ;;  %v8878_v48 = vunpack.i.l.bf16 %v8877_v24  ;;  %7111 = vmatmul.mubr.f32.gmra.mrb[16].mxu1 %v6499_v58  ;;  %9171 = vrot.lane.b32.xlu0 %v9170_v38, %s9779_s27  ;;  %v9195_v38 = vpack.i.bf16 %v13300_v37, %v4722_v9  ;;  %v4466_v37 = vld [vmem:[#allocation3 + $0x1c8] sm:$0xff] }
 0x54b   :  { %4231 = vst.msk [vmem:[#allocation3 + $0x2c1] sm:$0xff] %vm4067_vm13, %v4056_v16  ;;  %9166 = vrot.lane.b32.xlu1 %v9165_v1, %s9779_s27  ;;  %v13393_v16 = vld [vmem:[#allocation3 + $0x1e1] sm:$0xff]  ;;  %v13422_v9 = vld [vmem:[#allocation3 + $0x1e9] sm:$0xff] }
 0x54c   :  { %4230 = vst.msk [vmem:[#allocation3 + $0x2b9] sm:$0xff] %vm4067_vm13, %v4055_v36  ;;  %v8892_v14 = vpop.permute.xlu0 %8891  ;;  %v6628_v52 = vsel %vm6419_vm15, %v6564_v22, %v8878_v48  ;;  %v6435_v44 = vsel %vm6419_vm15, %v6370_v46, %v8879_v29  ;;  %v4515_v36 = vld [vmem:[#allocation3 + $0xe1] sm:$0xff]  ;;  %v9210_v46 = vpack.i.bf16 %v4466_v37, %v13393_v16 }
 0x54d   :  { %v8887_v59 = vpop.permute.xlu1 %8886  ;;  %v6692_v53 = vsel %vm6484_vm0, %v6628_v52, %v8883_v23  ;;  %v6500_v61 = vsel %vm6484_vm0, %v6435_v44, %v8884_v42  ;;  %v8894_v0 = vunpack.i.h.bf16 %v8892_v14  ;;  %v8893_v41 = vunpack.i.l.bf16 %v8892_v14  ;;  %v4402_v42 = vld [vmem:[#allocation3 + $0x1b2] sm:$0xff]  ;;  %v13396_v29 = vld [vmem:[#allocation3 + $0x1e0] sm:$0xff]  ;;  %v4259_v48 = vld [vmem:[#allocation3 + $0xc8] sm:$0xff] }
 0x54e   :  { %v8889_v5 = vunpack.i.h.bf16 %v8887_v59  ;;  %v8888_v35 = vunpack.i.l.bf16 %v8887_v59  ;;  %7115 = vmatprep.mubr.f32.mxu1 %v6692_v53  ;;  %9181 = vrot.lane.b32.xlu0 %v9180_v19, %s9778_s25  ;;  %v9205_v44 = vpack.i.bf16 %v4402_v42, %v13396_v29  ;;  %v4403_v53 = vld [vmem:[#allocation3 + $0x1ba] sm:$0xff] }
 0x54f   :  { %9176 = vrot.lane.b32.xlu1 %v9175_v63, %s9776_s8  ;;  %7116 = vmatmul.mubr.f32.gmra.mrb[18].mxu1 %v6500_v61  ;;  %v13409_v63 = vld [vmem:[#allocation3 + $0x1e8] sm:$0xff]  ;;  %v4261_v37 = vld [vmem:[#allocation3 + $0xe0] sm:$0xff] }
 0x550   :  { %v8902_v10 = vpop.permute.xlu0 %8901  ;;  %v6565_v56 = vsel %vm4067_vm13, %v4514_v27, %v8888_v35  ;;  %v6371_v47 = vsel %vm4067_vm13, %v4258_v34, %v8889_v5  ;;  %v4339_v35 = vld [vmem:[#allocation3 + $0x1b9] sm:$0xff]  ;;  %v4516_v27 = vld [vmem:[#allocation3 + $0xf1] sm:$0xff] }
 0x551   :  { %v8897_v51 = vpop.permute.xlu1 %8896  ;;  %v8904_v13 = vunpack.i.h.bf16 %v8902_v10  ;;  %v8903_v57 = vunpack.i.l.bf16 %v8902_v10  ;;  %v6629_v55 = vsel %vm6419_vm15, %v6565_v56, %v8893_v41  ;;  %v6436_v25 = vsel %vm6419_vm15, %v6371_v47, %v8894_v0  ;;  %v4260_v34 = vld [vmem:[#allocation3 + $0xd8] sm:$0xff] }
 0x552   :  { %v8899_v3 = vunpack.i.h.bf16 %v8897_v51  ;;  %v8898_v4 = vunpack.i.l.bf16 %v8897_v51  ;;  %v8455_v49 = vpop.f32.mrb[54].mxu0  ;;  %9191 = vrot.lane.b32.xlu0 %v9190_v6, %s9779_s27  ;;  %v9220_v6 = vpack.i.bf16 %v4403_v53, %v13409_v63 }
 0x553   :  { %v3960_v15 = vadd.f32 %v13093_v33, %v8455_v49  ;;  %9186 = vrot.lane.b32.xlu1 %v9185_v8, %s9778_s25  ;;  %v3954_v60 = vpop.f32.mrb[55].mxu0  ;;  %v6566_v21 = vsel %vm4067_vm13, %v4515_v36, %v8903_v57  ;;  %v6372_v54 = vsel %vm4067_vm13, %v4259_v48, %v8904_v13  ;;  %v9215_v8 = vpack.i.bf16 %v4339_v35, %v13412_v43  ;;  %v4517_v48 = vld [vmem:[#allocation3 + $0xf9] sm:$0xff] }
 0x554   :  { %v3955_v18 = vadd.f32 %v13093_v33, %v3954_v60  ;;  %v8912_v62 = vpop.permute.xlu0 %8911  ;;  %v6693_v40 = vsel %vm6484_vm0, %v6629_v55, %v8898_v4  ;;  %v6501_v7 = vsel %vm6484_vm0, %v6436_v25, %v8899_v3 }
 0x555   :  { %v4058_v28 = vmax.f32 %v3960_v15, 0.0  ;;  %v8914_v45 = vunpack.i.h.bf16 %v8912_v62  ;;  %v8913_v39 = vunpack.i.l.bf16 %v8912_v62  ;;  %v8907_v58 = vpop.permute.xlu1 %8906  ;;  %7120 = vmatprep.mubr.f32.mxu1 %v6693_v40 }
 0x556   :  { %v4057_v23 = vmax.f32 %v3955_v18, 0.0  ;;  %v8909_v24 = vunpack.i.h.bf16 %v8907_v58  ;;  %v8908_v1 = vunpack.i.l.bf16 %v8907_v58  ;;  %7121 = vmatmul.mubr.f32.gmra.mrb[20].mxu1 %v6501_v7  ;;  %9201 = vrot.lane.b32.xlu0 %v9200_v11, %s9776_s8  ;;  %v4340_v18 = vld [vmem:[#allocation3 + $0x1c9] sm:$0xff] }
 0x557   :  { %4233 = vst.msk [vmem:[#allocation3 + $0x2d9] sm:$0xff] %vm4067_vm13, %v4058_v28  ;;  %9196 = vrot.lane.b32.xlu1 %v9195_v38, %s9779_s27  ;;  %v9230_v28 = vpack.i.bf16 %v4340_v18, %v13419_v2 }
 0x558   :  { %4232 = vst.msk [vmem:[#allocation3 + $0x2d1] sm:$0xff] %vm4067_vm13, %v4057_v23  ;;  %v8922_v20 = vpop.permute.xlu0 %8921  ;;  %v6630_v22 = vsel %vm6419_vm15, %v6566_v21, %v8908_v1  ;;  %v6437_v14 = vsel %vm6419_vm15, %v6372_v54, %v8909_v24  ;;  %v13433_v24 = vld [vmem:[#allocation3 + $0x1f9] sm:$0xff] }
 0x559   :  { %v8917_v52 = vpop.permute.xlu1 %8916  ;;  %v6694_v19 = vsel %vm6484_vm0, %v6630_v22, %v8913_v39  ;;  %v6502_v59 = vsel %vm6484_vm0, %v6437_v14, %v8914_v45  ;;  %v8924_v0 = vunpack.i.h.bf16 %v8922_v20  ;;  %v8923_v41 = vunpack.i.l.bf16 %v8922_v20  ;;  %v4467_v45 = vld [vmem:[#allocation3 + $0x1d0] sm:$0xff]  ;;  %v13436_v21 = vld [vmem:[#allocation3 + $0x1f8] sm:$0xff] }
 0x55a   :  { %v8919_v61 = vunpack.i.h.bf16 %v8917_v52  ;;  %v8918_v5 = vunpack.i.l.bf16 %v8917_v52  ;;  %7125 = vmatprep.mubr.f32.mxu1 %v6694_v19  ;;  %9211 = vrot.lane.b32.xlu0 %v9210_v46, %s9779_s27  ;;  %v9225_v23 = vpack.i.bf16 %v4467_v45, %v13422_v9  ;;  %v9240_v14 = vpack.i.bf16 %v13396_v29, %v13433_v24 }
 0x55b   :  { %9206 = vrot.lane.b32.xlu1 %v9205_v44, %s9778_s25  ;;  %7126 = vmatmul.mubr.f32.gmra.mrb[22].mxu1 %v6502_v59  ;;  %v9235_v59 = vpack.i.bf16 %v13381_v50, %v13436_v21 }
 0x55c   :  { %v8932_v10 = vpop.permute.xlu0 %8931  ;;  %v6567_v56 = vsel %vm4067_vm13, %v4516_v27, %v8918_v5  ;;  %v6373_v47 = vsel %vm4067_vm13, %v4260_v34, %v8919_v61  ;;  %v13451_v61 = vld [vmem:[#allocation3 + $0x200] sm:$0xff]  ;;  %v4518_v27 = vld [vmem:[#allocation3 + $0x109] sm:$0xff] }
 0x55d   :  { %v8927_v51 = vpop.permute.xlu1 %8926  ;;  %v8934_v13 = vunpack.i.h.bf16 %v8932_v10  ;;  %v8933_v57 = vunpack.i.l.bf16 %v8932_v10  ;;  %v6631_v55 = vsel %vm6419_vm15, %v6567_v56, %v8923_v41  ;;  %v6438_v25 = vsel %vm6419_vm15, %v6373_v47, %v8924_v0  ;;  %v13454_v0 = vld [vmem:[#allocation3 + $0x1ea] sm:$0xff] }
 0x55e   :  { %v8929_v3 = vunpack.i.h.bf16 %v8927_v51  ;;  %v8928_v4 = vunpack.i.l.bf16 %v8927_v51  ;;  %v8458_v49 = vpop.f32.mrb[56].mxu0  ;;  %9221 = vrot.lane.b32.xlu0 %v9220_v6, %s9778_s25  ;;  %v4262_v34 = vld [vmem:[#allocation3 + $0xf0] sm:$0xff]  ;;  %v9250_v50 = vpack.i.bf16 %v13412_v43, %v13451_v61  ;;  %v13470_v43 = vld [vmem:[%s14604_s2] ss:$0 sm:$0xff] }
 0x55f   :  { %v3970_v15 = vadd.f32 %v13093_v33, %v8458_v49  ;;  %9216 = vrot.lane.b32.xlu1 %v9215_v8, %s9776_s8  ;;  %v3964_v60 = vpop.f32.mrb[57].mxu0  ;;  %v6568_v54 = vsel %vm4067_vm13, %v4517_v48, %v8933_v57  ;;  %v6374_v20 = vsel %vm4067_vm13, %v4261_v37, %v8934_v13  ;;  %v4341_v6 = vld [vmem:[#allocation3 + $0x1d1] sm:$0xff]  ;;  %v13462_v13 = vld [vmem:[#allocation3 + $0x1fa] sm:$0xff] }
 0x560   :  { %v3965_v62 = vadd.f32 %v13093_v33, %v3964_v60  ;;  %v8942_v40 = vpop.permute.xlu0 %8941  ;;  %v6695_v7 = vsel %vm6484_vm0, %v6631_v55, %v8928_v4  ;;  %v6503_v11 = vsel %vm6484_vm0, %v6438_v25, %v8929_v3  ;;  %v9245_v8 = vpack.i.bf16 %v4341_v6, %v13454_v0  ;;  %v4519_v37 = vld [vmem:[#allocation3 + $0x111] sm:$0xff] }
 0x561   :  { %v4060_v39 = vmax.f32 %v3970_v15, 0.0  ;;  %v8944_v58 = vunpack.i.h.bf16 %v8942_v40  ;;  %v8943_v38 = vunpack.i.l.bf16 %v8942_v40  ;;  %v8937_v42 = vpop.permute.xlu1 %8936  ;;  %7130 = vmatprep.mubr.f32.mxu1 %v6695_v7  ;;  %v13465_v15 = vld [vmem:[#allocation3 + $0x201] sm:$0xff]  ;;  %v9260_v45 = vpack.i.bf16 %v13393_v16, %v13462_v13  ;;  %v4263_v16 = vld [vmem:[#allocation3 + $0xf8] sm:$0xff] }
 0x562   :  { %v4059_v1 = vmax.f32 %v3965_v62, 0.0  ;;  %v8939_v36 = vunpack.i.h.bf16 %v8937_v42  ;;  %v8938_v33 = vunpack.i.l.bf16 %v8937_v42  ;;  %7131 = vmatmul.mubr.f32.gmra.mrb[24].mxu1 %v6503_v11  ;;  %9231 = vrot.lane.b32.xlu0 %v9230_v28, %s9776_s8 }
 0x563   :  { %4235 = vst.msk [vmem:[#allocation3 + $0x2f1] sm:$0xff] %vm4067_vm13, %v4060_v39  ;;  %9226 = vrot.lane.b32.xlu1 %v9225_v23, %s9779_s27  ;;  %v9255_v23 = vpack.i.bf16 %v13409_v63, %v13465_v15 }
 0x564   :  { %4234 = vst.msk [vmem:[#allocation3 + $0x2e9] sm:$0xff] %vm4067_vm13, %v4059_v1  ;;  %v8952_v22 = vpop.permute.xlu0 %8951  ;;  %v6632_v46 = vsel %vm6419_vm15, %v6568_v54, %v8938_v33  ;;  %v6439_v52 = vsel %vm6419_vm15, %v6374_v20, %v8939_v36  ;;  %v13483_v1 = vld [vmem:[#allocation3 + $0x211] sm:$0xff] }
 0x565   :  { %v8947_v19 = vpop.permute.xlu1 %8946  ;;  %v6696_v44 = vsel %vm6484_vm0, %v6632_v46, %v8943_v38  ;;  %v6504_v53 = vsel %vm6484_vm0, %v6439_v52, %v8944_v58  ;;  %v8954_v29 = vunpack.i.h.bf16 %v8952_v22  ;;  %v8953_v41 = vunpack.i.l.bf16 %v8952_v22  ;;  %v13486_v54 = vld [vmem:[#allocation3 + $0x210] sm:$0xff] }
 0x566   :  { %v8949_v5 = vunpack.i.h.bf16 %v8947_v19  ;;  %v8948_v35 = vunpack.i.l.bf16 %v8947_v19  ;;  %7135 = vmatprep.mubr.f32.mxu1 %v6696_v44  ;;  %9241 = vrot.lane.b32.xlu0 %v9240_v14, %s9779_s27  ;;  %v9270_v14 = vpack.i.bf16 %v13436_v21, %v13483_v1 }
 0x567   :  { %9236 = vrot.lane.b32.xlu1 %v9235_v59, %s9778_s25  ;;  %7136 = vmatmul.mubr.f32.gmra.mrb[26].mxu1 %v6504_v53  ;;  %v9265_v59 = vpack.i.bf16 %v13419_v2, %v13486_v54 }
 0x568   :  { %v8962_v10 = vpop.permute.xlu0 %8961  ;;  %v6569_v56 = vsel %vm4067_vm13, %v4518_v27, %v8948_v35  ;;  %v6375_v47 = vsel %vm4067_vm13, %v4262_v34, %v8949_v5  ;;  %v13501_v5 = vld [vmem:[#allocation3 + $0x218] sm:$0xff]  ;;  %v4520_v34 = vld [vmem:[#allocation3 + $0x121] sm:$0xff] }
 0x569   :  { %v8957_v51 = vpop.permute.xlu1 %8956  ;;  %v8964_v3 = vunpack.i.h.bf16 %v8962_v10  ;;  %v8963_v60 = vunpack.i.l.bf16 %v8962_v10  ;;  %v6633_v18 = vsel %vm6419_vm15, %v6569_v56, %v8953_v41  ;;  %v6440_v62 = vsel %vm6419_vm15, %v6375_v47, %v8954_v29  ;;  %v13504_v41 = vld [vmem:[#allocation3 + $0x202] sm:$0xff] }
 0x56a   :  { %v8959_v4 = vunpack.i.h.bf16 %v8957_v51  ;;  %v8958_v49 = vunpack.i.l.bf16 %v8957_v51  ;;  %v8461_v57 = vpop.f32.mrb[58].mxu0  ;;  %9251 = vrot.lane.b32.xlu0 %v9250_v50, %s9778_s25  ;;  %v4264_v10 = vld [vmem:[#allocation3 + $0x108] sm:$0xff]  ;;  %v9280_v2 = vpack.i.bf16 %v13454_v0, %v13501_v5  ;;  %v9275_v51 = vpack.i.bf16 %v13422_v9, %v13504_v41 }
 0x56b   :  { %v3980_v55 = vadd.f32 %v13470_v43, %v8461_v57  ;;  %9246 = vrot.lane.b32.xlu1 %v9245_v8, %s9776_s8  ;;  %v3974_v25 = vpop.f32.mrb[59].mxu0  ;;  %v6570_v20 = vsel %vm4067_vm13, %v4519_v37, %v8963_v60  ;;  %v6376_v63 = vsel %vm4067_vm13, %v4263_v16, %v8964_v3  ;;  %v13513_v8 = vld [vmem:[#allocation3 + $0x212] sm:$0xff]  ;;  %v4521_v37 = vld [vmem:[#allocation3 + $0x129] sm:$0xff] }
 0x56c   :  { %v3975_v40 = vadd.f32 %v13470_v43, %v3974_v25  ;;  %v8972_v7 = vpop.permute.xlu0 %8971  ;;  %v6697_v11 = vsel %vm6484_vm0, %v6633_v18, %v8958_v49  ;;  %v6505_v28 = vsel %vm6484_vm0, %v6440_v62, %v8959_v4  ;;  %v13516_v60 = vld [vmem:[#allocation3 + $0x219] sm:$0xff]  ;;  %v13532_v16 = vld [vmem:[#allocation3 + $0x228] sm:$0xff] }
 0x56d   :  { %v4062_v39 = vmax.f32 %v3980_v55, 0.0  ;;  %v8974_v58 = vunpack.i.h.bf16 %v8972_v7  ;;  %v8973_v38 = vunpack.i.l.bf16 %v8972_v7  ;;  %v8967_v42 = vpop.permute.xlu1 %8966  ;;  %7140 = vmatprep.mubr.f32.mxu1 %v6697_v11 }
 0x56e   :  { %v4061_v36 = vmax.f32 %v3975_v40, 0.0  ;;  %v8969_v33 = vunpack.i.h.bf16 %v8967_v42  ;;  %v8968_v48 = vunpack.i.l.bf16 %v8967_v42  ;;  %7141 = vmatmul.mubr.f32.gmra.mrb[28].mxu1 %v6505_v28  ;;  %9261 = vrot.lane.b32.xlu0 %v9260_v45, %s9776_s8  ;;  %v9290_v28 = vpack.i.bf16 %v13433_v24, %v13513_v8  ;;  %v4265_v24 = vld [vmem:[#allocation3 + $0x110] sm:$0xff] }
 0x56f   :  { %4237 = vst.msk [vmem:[#allocation3 + $0x309] sm:$0xff] %vm4067_vm13, %v4062_v39  ;;  %9256 = vrot.lane.b32.xlu1 %v9255_v23, %s9779_s27  ;;  %v9285_v42 = vpack.i.bf16 %v13451_v61, %v13516_v60  ;;  %v13529_v23 = vld [vmem:[#allocation3 + $0x229] sm:$0xff] }
 0x570   :  { %4236 = vst.msk [vmem:[#allocation3 + $0x301] sm:$0xff] %vm4067_vm13, %v4061_v36  ;;  %v8982_v22 = vpop.permute.xlu0 %8981  ;;  %v6634_v46 = vsel %vm6419_vm15, %v6570_v20, %v8968_v48  ;;  %v6441_v52 = vsel %vm6419_vm15, %v6376_v63, %v8969_v33 }
 0x571   :  { %v8977_v19 = vpop.permute.xlu1 %8976  ;;  %v6698_v44 = vsel %vm6484_vm0, %v6634_v46, %v8973_v38  ;;  %v6506_v53 = vsel %vm6484_vm0, %v6441_v52, %v8974_v58  ;;  %v8984_v21 = vunpack.i.h.bf16 %v8982_v22  ;;  %v8983_v27 = vunpack.i.l.bf16 %v8982_v22 }
 0x572   :  { %v8979_v35 = vunpack.i.h.bf16 %v8977_v19  ;;  %v8978_v29 = vunpack.i.l.bf16 %v8977_v19  ;;  %7145 = vmatprep.mubr.f32.mxu1 %v6698_v44  ;;  %9271 = vrot.lane.b32.xlu0 %v9270_v14, %s9779_s27  ;;  %v9300_v46 = vpack.i.bf16 %v13486_v54, %v13529_v23  ;;  %v9295_v44 = vpack.i.bf16 %v13462_v13, %v13532_v16 }
 0x573   :  { %9266 = vrot.lane.b32.xlu1 %v9265_v59, %s9778_s25  ;;  %7146 = vmatmul.mubr.f32.gmra.mrb[30].mxu1 %v6506_v53  ;;  %v13547_v53 = vld [vmem:[#allocation3 + $0x230] sm:$0xff] }
 0x574   :  { %v8992_v50 = vpop.permute.xlu0 %8991  ;;  %v6571_v6 = vsel %vm4067_vm13, %v4520_v34, %v8978_v29  ;;  %v6377_v56 = vsel %vm4067_vm13, %v4264_v10, %v8979_v35  ;;  %v4522_v34 = vld [vmem:[#allocation3 + $0x139] sm:$0xff]  ;;  %v9310_v13 = vpack.i.bf16 %v13504_v41, %v13547_v53 }
 0x575   :  { %v8987_v47 = vpop.permute.xlu1 %8986  ;;  %v8994_v3 = vunpack.i.h.bf16 %v8992_v50  ;;  %v8993_v55 = vunpack.i.l.bf16 %v8992_v50  ;;  %v6635_v18 = vsel %vm6419_vm15, %v6571_v6, %v8983_v27  ;;  %v6442_v9 = vsel %vm6419_vm15, %v6377_v56, %v8984_v21  ;;  %v13550_v21 = vld [vmem:[#allocation3 + $0x21a] sm:$0xff] }
 0x576   :  { %v8989_v4 = vunpack.i.h.bf16 %v8987_v47  ;;  %v8988_v49 = vunpack.i.l.bf16 %v8987_v47  ;;  %v8464_v57 = vpop.f32.mrb[60].mxu0  ;;  %9281 = vrot.lane.b32.xlu0 %v9280_v2, %s9778_s25  ;;  %v4266_v10 = vld [vmem:[#allocation3 + $0x120] sm:$0xff]  ;;  %v9305_v47 = vpack.i.bf16 %v13465_v15, %v13550_v21 }
 0x577   :  { %v3990_v0 = vadd.f32 %v13470_v43, %v8464_v57  ;;  %9276 = vrot.lane.b32.xlu1 %v9275_v51, %s9776_s8  ;;  %v3984_v25 = vpop.f32.mrb[61].mxu0  ;;  %v6572_v20 = vsel %vm4067_vm13, %v4521_v37, %v8993_v55  ;;  %v6378_v61 = vsel %vm4067_vm13, %v4265_v24, %v8994_v3  ;;  %v13559_v51 = vld [vmem:[#allocation3 + $0x22a] sm:$0xff]  ;;  %v13578_v37 = vld [vmem:[#allocation3 + $0x240] sm:$0xff] }
 0x578   :  { %v3985_v62 = vadd.f32 %v13470_v43, %v3984_v25  ;;  %v9002_v40 = vpop.permute.xlu0 %9001  ;;  %v6699_v7 = vsel %vm6484_vm0, %v6635_v18, %v8988_v49  ;;  %v6507_v11 = vsel %vm6484_vm0, %v6442_v9, %v8989_v4  ;;  %v13562_v55 = vld [vmem:[#allocation3 + $0x231] sm:$0xff] }
 0x579   :  { %v4064_v45 = vmax.f32 %v3990_v0, 0.0  ;;  %v9004_v39 = vunpack.i.h.bf16 %v9002_v40  ;;  %v9003_v58 = vunpack.i.l.bf16 %v9002_v40  ;;  %v8997_v38 = vpop.permute.xlu1 %8996  ;;  %7150 = vmatprep.mubr.f32.mxu1 %v6699_v7 }
 0x57a   :  { %v4063_v36 = vmax.f32 %v3985_v62, 0.0  ;;  %v8999_v33 = vunpack.i.h.bf16 %v8997_v38  ;;  %v8998_v48 = vunpack.i.l.bf16 %v8997_v38  ;;  %7151 = vmatmul.mubr.f32.gmra.mrb[32].mxu1 %v6507_v11  ;;  %9291 = vrot.lane.b32.xlu0 %v9290_v28, %s9776_s8  ;;  %v9320_v11 = vpack.i.bf16 %v13483_v1, %v13559_v51  ;;  %v4267_v1 = vld [vmem:[#allocation3 + $0x128] sm:$0xff] }
 0x57b   :  { %4239 = vst.msk [vmem:[#allocation3 + $0x321] sm:$0xff] %vm4067_vm13, %v4064_v45  ;;  %9286 = vrot.lane.b32.xlu1 %v9285_v42, %s9779_s27  ;;  %v9315_v38 = vpack.i.bf16 %v13501_v5, %v13562_v55  ;;  %v13575_v42 = vld [vmem:[#allocation3 + $0x241] sm:$0xff] }
 0x57c   :  { %4238 = vst.msk [vmem:[#allocation3 + $0x319] sm:$0xff] %vm4067_vm13, %v4063_v36  ;;  %v9012_v63 = vpop.permute.xlu0 %9011  ;;  %v6636_v22 = vsel %vm6419_vm15, %v6572_v20, %v8998_v48  ;;  %v6443_v14 = vsel %vm6419_vm15, %v6378_v61, %v8999_v33  ;;  %v4523_v48 = vld [vmem:[#allocation3 + $0x141] sm:$0xff] }
 0x57d   :  { %v9007_v52 = vpop.permute.xlu1 %9006  ;;  %v6700_v19 = vsel %vm6484_vm0, %v6636_v22, %v9003_v58  ;;  %v6508_v59 = vsel %vm6484_vm0, %v6443_v14, %v9004_v39  ;;  %v9014_v54 = vunpack.i.h.bf16 %v9012_v63  ;;  %v9013_v27 = vunpack.i.l.bf16 %v9012_v63 }
 0x57e   :  { %v9009_v35 = vunpack.i.h.bf16 %v9007_v52  ;;  %v9008_v29 = vunpack.i.l.bf16 %v9007_v52  ;;  %7155 = vmatprep.mubr.f32.mxu1 %v6700_v19  ;;  %9301 = vrot.lane.b32.xlu0 %v9300_v46, %s9779_s27  ;;  %v9330_v63 = vpack.i.bf16 %v13532_v16, %v13575_v42  ;;  %v9325_v52 = vpack.i.bf16 %v13513_v8, %v13578_v37  ;;  %v4242_v8 = vld [vmem:[#allocation3] sm:$0xff] }
 0x57f   :  { %9296 = vrot.lane.b32.xlu1 %v9295_v44, %s9778_s25  ;;  %7156 = vmatmul.mubr.f32.gmra.mrb[34].mxu1 %v6508_v59  ;;  %v13593_v44 = vld [vmem:[#allocation3 + $0x248] sm:$0xff]  ;;  %v13596_v59 = vld [vmem:[#allocation3 + $0x232] sm:$0xff]  ;;  %v8723_v16 = vunpack.i.l.bf16 %v13101_v30 }
 0x580   :  { %v9022_v50 = vpop.permute.xlu0 %9021  ;;  %v6573_v2 = vsel %vm4067_vm13, %v4522_v34, %v9008_v29  ;;  %v6379_v6 = vsel %vm4067_vm13, %v4266_v10, %v9009_v35  ;;  %v9335_v10 = vpack.i.bf16 %v13516_v60, %v13596_v59 }
 0x581   :  { %v9017_v56 = vpop.permute.xlu1 %9016  ;;  %v9024_v3 = vunpack.i.h.bf16 %v9022_v50  ;;  %v9023_v0 = vunpack.i.l.bf16 %v9022_v50  ;;  %v6637_v18 = vsel %vm6419_vm15, %v6573_v2, %v9013_v27  ;;  %v6444_v15 = vsel %vm6419_vm15, %v6379_v6, %v9014_v54  ;;  %v13606_v50 = vld [vmem:[#allocation3 + $0x242] sm:$0xff] }
 0x582   :  { %v9019_v4 = vunpack.i.h.bf16 %v9017_v56  ;;  %v9018_v49 = vunpack.i.l.bf16 %v9017_v56  ;;  %v8467_v57 = vpop.f32.mrb[62].mxu0  ;;  %9311 = vrot.lane.b32.xlu0 %v9310_v13, %s9778_s25  ;;  %v9340_v54 = vpack.i.bf16 %v13550_v21, %v13593_v44  ;;  %v13610_v56 = vld [vmem:[#allocation3 + $0x249] sm:$0xff]  ;;  %v6355_v60 = vsel %vm4067_vm13, %v4242_v8, %v8723_v16 }
 0x583   :  { %v4000_v41 = vadd.f32 %v13470_v43, %v8467_v57  ;;  %9306 = vrot.lane.b32.xlu1 %v9305_v47, %s9776_s8  ;;  %v3994_v25 = vpop.f32.mrb[63].mxu0  ;;  %v6574_v24 = vsel %vm4067_vm13, %v4523_v48, %v9023_v0  ;;  %v6380_v5 = vsel %vm4067_vm13, %v4267_v1, %v9024_v3  ;;  %v8724_v47 = vunpack.i.h.bf16 %v13101_v30  ;;  %v13650_v16 = vld [vmem:[#allocation3 + $0x24a] sm:$0xff] }
 0x584   :  { %v3995_v9 = vadd.f32 %v13470_v43, %v3994_v25  ;;  %v9032_v62 = vpop.permute.xlu0 %9031  ;;  %v6701_v40 = vsel %vm6484_vm0, %v6637_v18, %v9018_v49  ;;  %v6509_v7 = vsel %vm6484_vm0, %v6444_v15, %v9019_v4  ;;  %v4498_v4 = vld [vmem:[#allocation3 + $0x19] sm:$0xff]  ;;  %v9350_v0 = vpack.i.bf16 %v13529_v23, %v13606_v50  ;;  %v4524_v25 = vld [vmem:[#allocation3 + $0x151] sm:$0xff] }
 0x585   :  { %v4066_v28 = vmax.f32 %v4000_v41, 0.0  ;;  %v9034_v45 = vunpack.i.h.bf16 %v9032_v62  ;;  %v9033_v39 = vunpack.i.l.bf16 %v9032_v62  ;;  %v9027_v58 = vpop.permute.xlu1 %9026  ;;  %7160 = vmatprep.mubr.f32.mxu1 %v6701_v40  ;;  %v4268_v49 = vld [vmem:[#allocation3 + $0x138] sm:$0xff]  ;;  %v9345_v62 = vpack.i.bf16 %v13547_v53, %v13610_v56 }
 0x586   :  { %v4065_v36 = vmax.f32 %v3995_v9, 0.0  ;;  %v9029_v43 = vunpack.i.h.bf16 %v9027_v58  ;;  %v9028_v33 = vunpack.i.l.bf16 %v9027_v58  ;;  %7161 = vmatmul.mubr.f32.gmra.mrb[36].mxu1 %v6509_v7  ;;  %9321 = vrot.lane.b32.xlu0 %v9320_v11, %s9776_s8  ;;  %v13622_v7 = vld [vmem:[#allocation3 + $0x259] sm:$0xff]  ;;  %v6775_v11 = vld [vmem:[%s14605_s3 + $0x110] sm:$0xff] }
 0x587   :  { %4241 = vst.msk [vmem:[#allocation3 + $0x339] sm:$0xff] %vm4067_vm13, %v4066_v28  ;;  %9316 = vrot.lane.b32.xlu1 %v9315_v38, %s9779_s27  ;;  %v6776_v23 = vld [vmem:[%s14605_s3 + $0x118] sm:$0xff] }
 0x588   :  { %4240 = vst.msk [vmem:[#allocation3 + $0x331] sm:$0xff] %vm4067_vm13, %v4065_v36  ;;  %v9042_v20 = vpop.permute.xlu0 %9041  ;;  %v6638_v61 = vsel %vm6419_vm15, %v6574_v24, %v9028_v33  ;;  %v6445_v22 = vsel %vm6419_vm15, %v6380_v5, %v9029_v43  ;;  %v13633_v58 = vld [vmem:[#allocation3 + $0x258] sm:$0xff]  ;;  %v9360_v5 = vpack.i.bf16 %v13578_v37, %v13622_v7 }
 0x589   :  { %v9037_v46 = vpop.permute.xlu1 %9036  ;;  %v6702_v14 = vsel %vm6484_vm0, %v6638_v61, %v9033_v39  ;;  %v6510_v19 = vsel %vm6484_vm0, %v6445_v22, %v9034_v45  ;;  %v9044_v21 = vunpack.i.h.bf16 %v9042_v20  ;;  %v9043_v3 = vunpack.i.l.bf16 %v9042_v20 }
 0x58a   :  { %7165 = vmatprep.mubr.f32.mxu1 %v6702_v14  ;;  %9331 = vrot.lane.b32.xlu0 %v9330_v63, %s9779_s27  ;;  %v9038_v35 = vunpack.i.l.bf16 %v9037_v46  ;;  %v9039_v27 = vunpack.i.h.bf16 %v9037_v46  ;;  %v8653_v20 = vpack.c.bf16 %v6776_v23, %v6775_v11  ;;  %v9355_v22 = vpack.i.bf16 %v13559_v51, %v13633_v58  ;;  %v13647_v46 = vld [vmem:[#allocation3 + $0x260] sm:$0xff]  ;;  %v4243_v14 = vld [vmem:[#allocation3 + $0x8] sm:$0xff] }
 0x58b   :  { %9326 = vrot.lane.b32.xlu1 %v9325_v52, %s9778_s25  ;;  %7166 = vmatmul.mubr.f32.gmra.mrb[38].mxu1 %v6510_v19  ;;  %v6420_v43 = vsel %vm6419_vm15, %v6355_v60, %v9044_v21  ;;  %v6356_v51 = vsel %vm4067_vm13, %v4243_v14, %v8724_v47  ;;  %v13665_v47 = vld [vmem:[#allocation3 + $0x261] sm:$0xff]  ;;  %v8728_v11 = vunpack.i.l.bf16 %v13124_v17 }
 0x58c   :  { %v9052_v29 = vpop.permute.xlu0 %9051  ;;  %v6549_v41 = vsel %vm4067_vm13, %v4498_v4, %v9038_v35  ;;  %v6575_v40 = vsel %vm4067_vm13, %v4524_v25, %v9039_v27  ;;  %v9370_v35 = vpack.i.bf16 %v13596_v59, %v13647_v46  ;;  %v4269_v25 = vld [vmem:[#allocation3 + $0x140] sm:$0xff] }
 0x58d   :  { %v13602_v34 = vpop.permute.xlu1 %9046  ;;  %v9054_v13 = vunpack.i.h.bf16 %v9052_v29  ;;  %v9053_v2 = vunpack.i.l.bf16 %v9052_v29  ;;  %v6613_v38 = vsel %vm6419_vm15, %v6549_v41, %v9043_v3  ;;  %v4499_v29 = vld [vmem:[#allocation3 + $0x21] sm:$0xff]  ;;  %v4525_v41 = vld [vmem:[#allocation3 + $0x159] sm:$0xff] }
 0x58e   :  { %v9048_v6 = vunpack.i.l.bf16 %v13602_v34  ;;  %9341 = vrot.lane.b32.xlu0 %v9340_v54, %s9778_s25  ;;  %v9049_v61 = vunpack.i.h.bf16 %v13602_v34  ;;  %v9365_v34 = vpack.i.bf16 %v13562_v55, %v13650_v16 }
 0x58f   :  { %9336 = vrot.lane.b32.xlu1 %v9335_v10, %s9776_s8  ;;  %v6639_v39 = vsel %vm6419_vm15, %v6575_v40, %v9053_v2 }
 0x590   :  { %v9062_v57 = vpop.permute.xlu0 %9061  ;;  %v6381_v18 = vsel %vm4067_vm13, %v4268_v49, %v9048_v6  ;;  %v6550_v10 = vsel %vm4067_vm13, %v4499_v29, %v9049_v61 }
 0x591   :  { %v9064_v15 = vunpack.i.h.bf16 %v9062_v57  ;;  %v9063_v9 = vunpack.i.l.bf16 %v9062_v57  ;;  %v9057_v30 = vpop.permute.xlu1 %9056  ;;  %v6446_v53 = vsel %vm6419_vm15, %v6381_v18, %v9054_v13  ;;  %v13660_v13 = vld [vmem:[#allocation3 + $0x25a] sm:$0xff]  ;;  %v13677_v18 = vld [vmem:[#allocation3 + $0x271] sm:$0xff] }
 0x592   :  { %v9059_v28 = vunpack.i.h.bf16 %v9057_v30  ;;  %v9058_v45 = vunpack.i.l.bf16 %v9057_v30  ;;  %9351 = vrot.lane.b32.xlu0 %v9350_v0, %s9776_s8  ;;  %v9380_v60 = vpack.i.bf16 %v13575_v42, %v13660_v13  ;;  %v9375_v0 = vpack.i.bf16 %v13593_v44, %v13665_v47  ;;  %v13682_v42 = vld [vmem:[#allocation3 + $0x270] sm:$0xff] }
 0x593   :  { %9346 = vrot.lane.b32.xlu1 %v9345_v62, %s9779_s27  ;;  %v6703_v36 = vsel %vm6484_vm0, %v6639_v39, %v9063_v9  ;;  %v6511_v33 = vsel %vm6484_vm0, %v6446_v53, %v9064_v15  ;;  %v9390_v39 = vpack.i.bf16 %v13633_v58, %v13677_v18 }
 0x594   :  { %v9072_v48 = vpop.permute.xlu0 %9071  ;;  %v6677_v1 = vsel %vm6484_vm0, %v6613_v38, %v9058_v45  ;;  %7170 = vmatprep.mubr.f32.mxu1 %v6703_v36  ;;  %v6485_v24 = vsel %vm6484_vm0, %v6420_v43, %v9059_v28  ;;  %v9385_v36 = vpack.i.bf16 %v13606_v50, %v13682_v42  ;;  %v13697_v43 = vld [vmem:[#allocation3 + $0x278] sm:$0xff] }
 0x595   :  { %v9067_v63 = vpop.permute.xlu1 %9066  ;;  %7040 = vmatprep.mubr.f32.mxu0 %v6677_v1  ;;  %7171 = vmatmul.mubr.f32.gmra.mrb[40].mxu1 %v6511_v33  ;;  %v9074_v52 = vunpack.i.h.bf16 %v9072_v48  ;;  %v9073_v19 = vunpack.i.l.bf16 %v9072_v48  ;;  %v13700_v1 = vld [vmem:[#allocation3 + $0x262] sm:$0xff] }
 0x596   :  { %7041 = vmatmul.mubr.f32.vlgmr.msra.gmra.mrb[64].mxu0 %v6485_v24  ;;  %9361 = vrot.lane.b32.xlu0 %v9360_v5, %s9779_s27  ;;  %v9069_v2 = vunpack.i.h.bf16 %v9067_v63  ;;  %v4244_v24 = vld [vmem:[#allocation3 + $0x18] sm:$0xff]  ;;  %v9400_v5 = vpack.i.bf16 %v13650_v16, %v13697_v43  ;;  %v9395_v14 = vpack.i.bf16 %v13610_v56, %v13700_v1 }
 0x597   :  { %9356 = vrot.lane.b32.xlu1 %v9355_v22, %s9778_s25  ;;  %8652 = vmatpush3.bf16.msra.mxu0 %v13348_v32  ;;  %v9068_v32 = vunpack.i.l.bf16 %v9067_v63  ;;  %v6614_v59 = vsel %vm6419_vm15, %v6550_v10, %v9073_v19  ;;  %v6421_v6 = vsel %vm6419_vm15, %v6356_v51, %v9074_v52  ;;  %v6357_v61 = vsel %vm4067_vm13, %v4244_v24, %v8728_v11  ;;  %v13709_v19 = vld [vmem:[#allocation3 + $0x272] sm:$0xff]  ;;  %v13745_v11 = vld [vmem:[#allocation3 + $0x27a] sm:$0xff] }
 0x598   :  { %v9082_v37 = vpop.permute.xlu0 %9081  ;;  %8654 = vmatprep.subr.bf16.mxu0 %v8653_v20  ;;  %v6382_v62 = vsel %vm4067_vm13, %v4269_v25, %v9069_v2  ;;  %v13716_v51 = vld [vmem:[#allocation3 + $0x279] sm:$0xff]  ;;  %v9410_v10 = vpack.i.bf16 %v13622_v7, %v13709_v19  ;;  %v8729_v7 = vunpack.i.h.bf16 %v13124_v17 }
 0x599   :  { %v9084_v54 = vunpack.i.h.bf16 %v9082_v37  ;;  %v9083_v8 = vunpack.i.l.bf16 %v9082_v37  ;;  %v9077_v27 = vpop.permute.xlu1 %9076  ;;  %v6576_v30 = vsel %vm4067_vm13, %v4525_v41, %v9068_v32  ;;  %v9405_v32 = vpack.i.bf16 %v13647_v46, %v13716_v51 }
 0x59a   :  { %9371 = vrot.lane.b32.xlu0 %v9370_v35, %s9778_s25  ;;  %v9079_v21 = vunpack.i.h.bf16 %v9077_v27  ;;  %v9078_v3 = vunpack.i.l.bf16 %v9077_v27 }
 0x59b   :  { %9366 = vrot.lane.b32.xlu1 %v9365_v34, %s9776_s8  ;;  %v6678_v55 = vsel %vm6484_vm0, %v6614_v59, %v9083_v8  ;;  %v6486_v4 = vsel %vm6484_vm0, %v6421_v6, %v9084_v54  ;;  %8656 = vmatpush3.bf16.msra.mxu0 %v8653_v20  ;;  %v4500_v20 = vld [vmem:[#allocation3 + $0x31] sm:$0xff]  ;;  %v4526_v59 = vld [vmem:[#allocation3 + $0x169] sm:$0xff] }
 0x59c   :  { %v13670_v49 = vpop.permute.xlu0 %9091  ;;  %7045 = vmatprep.mubr.f32.mxu0 %v6678_v55  ;;  %8657 = vmatprep.subr.bf16.mxu0 %v9777_v26  ;;  %v6640_v40 = vsel %vm6419_vm15, %v6576_v30, %v9078_v3  ;;  %v6447_v44 = vsel %vm6419_vm15, %v6382_v62, %v9079_v21  ;;  %v4270_v6 = vld [vmem:[#allocation3 + $0x150] sm:$0xff] }
 0x59d   :  { %v9087_v57 = vpop.permute.xlu1 %9086  ;;  %7046 = vmatmul.mubr.f32.gmra.mrb[66].mxu0 %v6486_v4  ;;  %v9093_v53 = vunpack.i.l.bf16 %v13670_v49  ;;  %v9094_v37 = vunpack.i.h.bf16 %v13670_v49  ;;  %v13725_v21 = vld [vmem:[#allocation3 + $0x289] sm:$0xff] }
 0x59e   :  { %v9089_v15 = vunpack.i.h.bf16 %v9087_v57  ;;  %v9088_v9 = vunpack.i.l.bf16 %v9087_v57  ;;  %9381 = vrot.lane.b32.xlu0 %v9380_v60, %s9776_s8  ;;  %v13730_v60 = vld [vmem:[#allocation3 + $0x288] sm:$0xff] }
 0x59f   :  { %9376 = vrot.lane.b32.xlu1 %v9375_v0, %s9779_s27  ;;  %v6551_v52 = vsel %vm4067_vm13, %v4500_v20, %v9093_v53  ;;  %v6577_v4 = vsel %vm4067_vm13, %v4526_v59, %v9094_v37  ;;  %v9415_v17 = vpack.i.bf16 %v13660_v13, %v13730_v60  ;;  %v4245_v53 = vld [vmem:[#allocation3 + $0x20] sm:$0xff]  ;;  %v9425_v13 = vpack.i.bf16 %v13665_v47, %v13745_v11  ;;  %v13762_v37 = vld [vmem:[#allocation3 + $0x291] sm:$0xff] }
 0x5a0   :  { %v13688_v23 = vpop.permute.xlu0 %9101  ;;  %v6704_v28 = vsel %vm6484_vm0, %v6640_v40, %v9088_v9  ;;  %v6512_v45 = vsel %vm6484_vm0, %v6447_v44, %v9089_v15  ;;  %v9420_v9 = vpack.i.bf16 %v13682_v42, %v13725_v21  ;;  %v13743_v44 = vld [vmem:[#allocation3 + $0x290] sm:$0xff]  ;;  %v4501_v42 = vld [vmem:[#allocation3 + $0x39] sm:$0xff]  ;;  %v6358_v24 = vsel %vm4067_vm13, %v4245_v53, %v8729_v7  ;;  %v13788_v7 = vld [vmem:[#allocation3 + $0x2a8] sm:$0xff] }
 0x5a1   :  { %v9097_v38 = vpop.permute.xlu1 %9096  ;;  %7175 = vmatprep.mubr.f32.mxu1 %v6704_v28  ;;  %v9103_v35 = vunpack.i.l.bf16 %v13688_v23  ;;  %v9104_v0 = vunpack.i.h.bf16 %v13688_v23  ;;  %v13778_v59 = vld [vmem:[#allocation3 + $0x2a0] sm:$0xff] }
 0x5a2   :  { %v9099_v33 = vunpack.i.h.bf16 %v9097_v38  ;;  %v9098_v48 = vunpack.i.l.bf16 %v9097_v38  ;;  %7176 = vmatmul.mubr.f32.gmra.mrb[42].mxu1 %v6512_v45  ;;  %9391 = vrot.lane.b32.xlu0 %v9390_v39, %s9779_s27 }
 0x5a3   :  { %9386 = vrot.lane.b32.xlu1 %v9385_v36, %s9778_s25  ;;  %v6383_v49 = vsel %vm4067_vm13, %v4270_v6, %v9103_v35  ;;  %v9430_v36 = vpack.i.bf16 %v13700_v1, %v13743_v44  ;;  %v8733_v6 = vunpack.i.l.bf16 %v13119_v12 }
 0x5a4   :  { %v9112_v58 = vpop.permute.xlu0 %9111  ;;  %v6615_v16 = vsel %vm6419_vm15, %v6551_v52, %v9098_v48  ;;  %v6422_v29 = vsel %vm6419_vm15, %v6357_v61, %v9099_v33  ;;  %v6552_v33 = vsel %vm4067_vm13, %v4501_v42, %v9104_v0  ;;  %v4527_v48 = vld [vmem:[#allocation3 + $0x171] sm:$0xff] }
 0x5a5   :  { %v9114_v50 = vunpack.i.h.bf16 %v9112_v58  ;;  %v9113_v63 = vunpack.i.l.bf16 %v9112_v58  ;;  %v9107_v22 = vpop.permute.xlu1 %9106  ;;  %v4271_v58 = vld [vmem:[#allocation3 + $0x158] sm:$0xff] }
 0x5a6   :  { %9401 = vrot.lane.b32.xlu0 %v9400_v5, %s9778_s25  ;;  %v9109_v54 = vunpack.i.h.bf16 %v9107_v22  ;;  %v9108_v8 = vunpack.i.l.bf16 %v9107_v22  ;;  %v13757_v22 = vld [vmem:[#allocation3 + $0x28a] sm:$0xff] }
 0x5a7   :  { %9396 = vrot.lane.b32.xlu1 %v9395_v14, %s9776_s8  ;;  %v6679_v56 = vsel %vm6484_vm0, %v6615_v16, %v9113_v63  ;;  %v6487_v27 = vsel %vm6484_vm0, %v6422_v29, %v9114_v50 }
 0x5a8   :  { %v9122_v34 = vpop.permute.xlu0 %9121  ;;  %7050 = vmatprep.mubr.f32.mxu0 %v6679_v56  ;;  %v6641_v46 = vsel %vm6419_vm15, %v6577_v4, %v9108_v8  ;;  %v6448_v57 = vsel %vm6419_vm15, %v6383_v49, %v9109_v54 }
 0x5a9   :  { %v9117_v2 = vpop.permute.xlu1 %9116  ;;  %7051 = vmatmul.mubr.f32.gmra.mrb[68].mxu0 %v6487_v27  ;;  %v9124_v30 = vunpack.i.h.bf16 %v9122_v34  ;;  %v9123_v62 = vunpack.i.l.bf16 %v9122_v34  ;;  %v9440_v34 = vpack.i.bf16 %v13677_v18, %v13757_v22 }
 0x5aa   :  { %v9119_v3 = vunpack.i.h.bf16 %v9117_v2  ;;  %v9118_v55 = vunpack.i.l.bf16 %v9117_v2  ;;  %9411 = vrot.lane.b32.xlu0 %v9410_v10, %s9776_s8  ;;  %v9435_v2 = vpack.i.bf16 %v13697_v43, %v13762_v37  ;;  %v9445_v43 = vpack.i.bf16 %v13709_v19, %v13778_v59 }
 0x5ab   :  { %9406 = vrot.lane.b32.xlu1 %v9405_v32, %s9779_s27  ;;  %v6578_v50 = vsel %vm4067_vm13, %v4527_v48, %v9123_v62  ;;  %v6384_v63 = vsel %vm4067_vm13, %v4271_v58, %v9124_v30  ;;  %v13775_v32 = vld [vmem:[#allocation3 + $0x2a1] sm:$0xff]  ;;  %v9460_v19 = vpack.i.bf16 %v13745_v11, %v13788_v7 }
 0x5ac   :  { %v9132_v41 = vpop.permute.xlu0 %9131  ;;  %v6705_v25 = vsel %vm6484_vm0, %v6641_v46, %v9118_v55  ;;  %v6513_v15 = vsel %vm6484_vm0, %v6448_v57, %v9119_v3  ;;  %v9450_v18 = vpack.i.bf16 %v13730_v60, %v13775_v32  ;;  %v4502_v60 = vld [vmem:[#allocation3 + $0x49] sm:$0xff] }
 0x5ad   :  { %v9127_v40 = vpop.permute.xlu1 %9126  ;;  %7180 = vmatprep.mubr.f32.mxu1 %v6705_v25  ;;  %v9134_v23 = vunpack.i.h.bf16 %v9132_v41  ;;  %v9133_v28 = vunpack.i.l.bf16 %v9132_v41  ;;  %v13792_v41 = vld [vmem:[#allocation3 + $0x292] sm:$0xff]  ;;  %v4272_v30 = vld [vmem:[#allocation3 + $0x168] sm:$0xff] }
 0x5ae   :  { %7181 = vmatmul.mubr.f32.gmra.mrb[44].mxu1 %v6513_v15  ;;  %9421 = vrot.lane.b32.xlu0 %v9420_v9, %s9779_s27  ;;  %v9129_v45 = vunpack.i.h.bf16 %v9127_v40  ;;  %v9128_v39 = vunpack.i.l.bf16 %v9127_v40  ;;  %v4246_v9 = vld [vmem:[#allocation3 + $0x30] sm:$0xff]  ;;  %v9455_v53 = vpack.i.bf16 %v13716_v51, %v13792_v41 }
 0x5af   :  { %9416 = vrot.lane.b32.xlu1 %v9415_v17, %s9778_s25  ;;  %v6642_v47 = vsel %vm6419_vm15, %v6578_v50, %v9133_v28  ;;  %v6449_v52 = vsel %vm6419_vm15, %v6384_v63, %v9134_v23  ;;  %v4528_v17 = vld [vmem:[#allocation3 + $0x181] sm:$0xff]  ;;  %v6359_v23 = vsel %vm4067_vm13, %v4246_v9, %v8733_v6 }
 0x5b0   :  { %v9142_v38 = vpop.permute.xlu0 %9141  ;;  %v6616_v35 = vsel %vm6419_vm15, %v6552_v33, %v9128_v39  ;;  %v6423_v29 = vsel %vm6419_vm15, %v6358_v24, %v9129_v45  ;;  %v13808_v24 = vld [vmem:[#allocation3 + $0x2a9] sm:$0xff] }
 0x5b1   :  { %v9144_v5 = vunpack.i.h.bf16 %v9142_v38  ;;  %v9143_v20 = vunpack.i.l.bf16 %v9142_v38  ;;  %v9137_v61 = vpop.permute.xlu1 %9136 }
 0x5b2   :  { %v9139_v14 = vunpack.i.h.bf16 %v9137_v61  ;;  %v9138_v1 = vunpack.i.l.bf16 %v9137_v61  ;;  %9431 = vrot.lane.b32.xlu0 %v9430_v36, %s9778_s25  ;;  %v13803_v36 = vld [vmem:[#allocation3 + $0x2a2] sm:$0xff]  ;;  %v8734_v61 = vunpack.i.h.bf16 %v13119_v12 }
 0x5b3   :  { %9426 = vrot.lane.b32.xlu1 %v9425_v13, %s9776_s8  ;;  %v6706_v16 = vsel %vm6484_vm0, %v6642_v47, %v9143_v20  ;;  %v6514_v54 = vsel %vm6484_vm0, %v6449_v52, %v9144_v5 }
 0x5b4   :  { %v9152_v8 = vpop.permute.xlu0 %9151  ;;  %v6680_v56 = vsel %vm6484_vm0, %v6616_v35, %v9138_v1  ;;  %7185 = vmatprep.mubr.f32.mxu1 %v6706_v16  ;;  %v6488_v27 = vsel %vm6484_vm0, %v6423_v29, %v9139_v14  ;;  %v9470_v1 = vpack.i.bf16 %v13725_v21, %v13803_v36  ;;  %v9465_v35 = vpack.i.bf16 %v13743_v44, %v13808_v24  ;;  %v13823_v16 = vld [vmem:[#allocation3 + $0x2b9] sm:$0xff] }
 0x5b5   :  { %v9147_v10 = vpop.permute.xlu1 %9146  ;;  %7055 = vmatprep.mubr.f32.mxu0 %v6680_v56  ;;  %7186 = vmatmul.mubr.f32.gmra.mrb[46].mxu1 %v6514_v54  ;;  %v9154_v25 = vunpack.i.h.bf16 %v9152_v8  ;;  %v9153_v15 = vunpack.i.l.bf16 %v9152_v8  ;;  %v13826_v54 = vld [vmem:[#allocation3 + $0x2b8] sm:$0xff]  ;;  %v9480_v56 = vpack.i.bf16 %v13778_v59, %v13823_v16 }
 0x5b6   :  { %7056 = vmatmul.mubr.f32.gmra.mrb[70].mxu0 %v6488_v27  ;;  %9441 = vrot.lane.b32.xlu0 %v9440_v34, %s9776_s8  ;;  %v9148_v3 = vunpack.i.l.bf16 %v9147_v10  ;;  %v9149_v4 = vunpack.i.h.bf16 %v9147_v10  ;;  %v4247_v21 = vld [vmem:[#allocation3 + $0x38] sm:$0xff]  ;;  %v9475_v6 = vpack.i.bf16 %v13757_v22, %v13826_v54 }
 0x5b7   :  { %9436 = vrot.lane.b32.xlu1 %v9435_v2, %s9779_s27  ;;  %v6424_v5 = vsel %vm6419_vm15, %v6359_v23, %v9154_v25  ;;  %v4503_v27 = vld [vmem:[#allocation3 + $0x51] sm:$0xff]  ;;  %v6360_v34 = vsel %vm4067_vm13, %v4247_v21, %v8734_v61 }
 0x5b8   :  { %v9162_v55 = vpop.permute.xlu0 %9161  ;;  %v6553_v40 = vsel %vm4067_vm13, %v4502_v60, %v9148_v3  ;;  %v6579_v38 = vsel %vm4067_vm13, %v4528_v17, %v9149_v4  ;;  %v4755_v60 = vld [vmem:[#allocation3 + $0x32] sm:$0xff] }
 0x5b9   :  { %v13784_v49 = vpop.permute.xlu1 %9156  ;;  %v9164_v46 = vunpack.i.h.bf16 %v9162_v55  ;;  %v9163_v57 = vunpack.i.l.bf16 %v9162_v55  ;;  %v6617_v58 = vsel %vm6419_vm15, %v6553_v40, %v9153_v15  ;;  %v13835_v55 = vld [vmem:[#allocation3 + $0x2c0] sm:$0xff] }
 0x5ba   :  { %v9158_v0 = vunpack.i.l.bf16 %v13784_v49  ;;  %9451 = vrot.lane.b32.xlu0 %v9450_v18, %s9779_s27  ;;  %v9159_v47 = vunpack.i.h.bf16 %v13784_v49  ;;  %v9490_v15 = vpack.i.bf16 %v13792_v41, %v13835_v55  ;;  %v13849_v40 = vld [vmem:[#allocation3 + $0x2ba] sm:$0xff] }
 0x5bb   :  { %9446 = vrot.lane.b32.xlu1 %v9445_v43, %s9778_s25  ;;  %v6643_v11 = vsel %vm6419_vm15, %v6579_v38, %v9163_v57  ;;  %v13840_v43 = vld [vmem:[#allocation3 + $0x2aa] sm:$0xff] }
 0x5bc   :  { %v9172_v62 = vpop.permute.xlu0 %9171  ;;  %v6385_v28 = vsel %vm4067_vm13, %v4272_v30, %v9158_v0  ;;  %v6554_v3 = vsel %vm4067_vm13, %v4503_v27, %v9159_v47  ;;  %v9485_v30 = vpack.i.bf16 %v13762_v37, %v13840_v43  ;;  %v4530_v47 = vld [vmem:[#allocation3 + $0x1c9] sm:$0xff] }
 0x5bd   :  { %v9174_v45 = vunpack.i.h.bf16 %v9172_v62  ;;  %v9173_v39 = vunpack.i.l.bf16 %v9172_v62  ;;  %v9167_v42 = vpop.permute.xlu1 %9166  ;;  %v6450_v48 = vsel %vm6419_vm15, %v6385_v28, %v9164_v46  ;;  %v4529_v62 = vld [vmem:[#allocation3 + $0x189] sm:$0xff] }
 0x5be   :  { %v9169_v13 = vunpack.i.h.bf16 %v9167_v42  ;;  %v9168_v33 = vunpack.i.l.bf16 %v9167_v42  ;;  %9461 = vrot.lane.b32.xlu0 %v9460_v19, %s9778_s25  ;;  %v4273_v19 = vld [vmem:[#allocation3 + $0x170] sm:$0xff] }
 0x5bf   :  { %9456 = vrot.lane.b32.xlu1 %v9455_v53, %s9776_s8  ;;  %v6707_v51 = vsel %vm6484_vm0, %v6643_v11, %v9173_v39  ;;  %v6515_v20 = vsel %vm6484_vm0, %v6450_v48, %v9174_v45  ;;  %v13855_v45 = vld [vmem:[#allocation3 + $0x2c1] sm:$0xff]  ;;  %v9500_v48 = vpack.i.bf16 %v13775_v32, %v13849_v40  ;;  %v13870_v32 = vld [vmem:[#allocation3 + $0x2d0] sm:$0xff] }
 0x5c0   :  { %v9182_v50 = vpop.permute.xlu0 %9181  ;;  %v6681_v63 = vsel %vm6484_vm0, %v6617_v58, %v9168_v33  ;;  %7190 = vmatprep.mubr.f32.mxu1 %v6707_v51  ;;  %v6489_v14 = vsel %vm6484_vm0, %v6424_v5, %v9169_v13  ;;  %v4756_v11 = vld [vmem:[#allocation3 + $0x3a] sm:$0xff]  ;;  %v4274_v58 = vld [vmem:[#allocation3 + $0x1b0] sm:$0xff]  ;;  %v9495_v61 = vpack.i.bf16 %v13788_v7, %v13855_v45 }
 0x5c1   :  { %v9177_v52 = vpop.permute.xlu1 %9176  ;;  %7060 = vmatprep.mubr.f32.mxu0 %v6681_v63  ;;  %7191 = vmatmul.mubr.f32.gmra.mrb[48].mxu1 %v6515_v20  ;;  %v9184_v12 = vunpack.i.h.bf16 %v9182_v50  ;;  %v9183_v29 = vunpack.i.l.bf16 %v9182_v50  ;;  %v13867_v50 = vld [vmem:[#allocation3 + $0x2d1] sm:$0xff] }
 0x5c2   :  { %7061 = vmatmul.mubr.f32.gmra.mrb[72].mxu0 %v6489_v14  ;;  %9471 = vrot.lane.b32.xlu0 %v9470_v1, %s9776_s8  ;;  %v9179_v18 = vunpack.i.h.bf16 %v9177_v52  ;;  %v9178_v4 = vunpack.i.l.bf16 %v9177_v52  ;;  %v4757_v1 = vld [vmem:[#allocation3 + $0x4a] sm:$0xff]  ;;  %v9510_v21 = vpack.i.bf16 %v13826_v54, %v13867_v50  ;;  %v13888_v54 = vld [vmem:[#allocation3 + $0x2c2] sm:$0xff] }
 0x5c3   :  { %9466 = vrot.lane.b32.xlu1 %v9465_v35, %s9779_s27  ;;  %v6618_v49 = vsel %vm6419_vm15, %v6554_v3, %v9183_v29  ;;  %v6425_v59 = vsel %vm6419_vm15, %v6360_v34, %v9184_v12  ;;  %v4758_v29 = vld [vmem:[#allocation3 + $0x52] sm:$0xff]  ;;  %v9505_v34 = vpack.i.bf16 %v13803_v36, %v13870_v32 }
 0x5c4   :  { %v9192_v8 = vpop.permute.xlu0 %9191  ;;  %v6580_v28 = vsel %vm4067_vm13, %v4529_v62, %v9178_v4  ;;  %v6386_v41 = vsel %vm4067_vm13, %v4273_v19, %v9179_v18 }
 0x5c5   :  { %v9194_v44 = vunpack.i.h.bf16 %v9192_v8  ;;  %v9193_v10 = vunpack.i.l.bf16 %v9192_v8  ;;  %v9187_v2 = vpop.permute.xlu1 %9186 }
 0x5c6   :  { %9481 = vrot.lane.b32.xlu0 %v9480_v56, %s9779_s27  ;;  %v9189_v46 = vunpack.i.h.bf16 %v9187_v2  ;;  %v9188_v57 = vunpack.i.l.bf16 %v9187_v2  ;;  %v4275_v2 = vld [vmem:[#allocation3 + $0x1b8] sm:$0xff] }
 0x5c7   :  { %9476 = vrot.lane.b32.xlu1 %v9475_v6, %s9778_s25  ;;  %v6682_v22 = vsel %vm6484_vm0, %v6618_v49, %v9193_v10  ;;  %v6490_v0 = vsel %vm6484_vm0, %v6425_v59, %v9194_v44  ;;  %v13885_v10 = vld [vmem:[#allocation3 + $0x2d8] sm:$0xff]  ;;  %v4759_v49 = vld [vmem:[#allocation3 + $0x62] sm:$0xff] }
 0x5c8   :  { %v9202_v25 = vpop.permute.xlu0 %9201  ;;  %7065 = vmatprep.mubr.f32.mxu0 %v6682_v22  ;;  %v6644_v37 = vsel %vm6419_vm15, %v6580_v28, %v9188_v57  ;;  %v6451_v53 = vsel %vm6419_vm15, %v6386_v41, %v9189_v46  ;;  %v4531_v59 = vld [vmem:[#allocation3 + $0x1d1] sm:$0xff]  ;;  %v9520_v57 = vpack.i.bf16 %v13840_v43, %v13885_v10  ;;  %v13903_v43 = vld [vmem:[#allocation3 + $0x2d9] sm:$0xff] }
 0x5c9   :  { %v9197_v9 = vpop.permute.xlu1 %9196  ;;  %7066 = vmatmul.mubr.f32.gmra.mrb[74].mxu0 %v6490_v0  ;;  %v9204_v39 = vunpack.i.h.bf16 %v9202_v25  ;;  %v9203_v42 = vunpack.i.l.bf16 %v9202_v25  ;;  %v4760_v46 = vld [vmem:[#allocation3 + $0x6a] sm:$0xff] }
 0x5ca   :  { %v9199_v17 = vunpack.i.h.bf16 %v9197_v9  ;;  %v9198_v23 = vunpack.i.l.bf16 %v9197_v9  ;;  %9491 = vrot.lane.b32.xlu0 %v9490_v15, %s9778_s25  ;;  %8476 = vmatprep.mubr.msk.f32.mxu0 %vm4067_vm13, %v4755_v60  ;;  %v9515_v15 = vpack.i.bf16 %v13808_v24, %v13888_v54  ;;  %v4761_v60 = vld [vmem:[#allocation3 + $0x7a] sm:$0xff]  ;;  %v13899_v9 = vld [vmem:[#allocation3 + $0x2d2] sm:$0xff] }
 0x5cb   :  { %9486 = vrot.lane.b32.xlu1 %v9485_v30, %s9776_s8  ;;  %v6581_v52 = vsel %vm4067_vm13, %v4530_v47, %v9203_v42  ;;  %v6387_v35 = vsel %vm4067_vm13, %v4274_v58, %v9204_v39  ;;  %v4762_v42 = vld [vmem:[#allocation3 + $0x82] sm:$0xff] }
 0x5cc   :  { %v9212_v38 = vpop.permute.xlu0 %9211  ;;  %v6708_v13 = vsel %vm6484_vm0, %v6644_v37, %v9198_v23  ;;  %v6516_v33 = vsel %vm6484_vm0, %v6451_v53, %v9199_v17  ;;  %v9530_v37 = vpack.i.bf16 %v13823_v16, %v13899_v9  ;;  %v4276_v16 = vld [vmem:[#allocation3 + $0x1c8] sm:$0xff] }
 0x5cd   :  { %v9214_v51 = vunpack.i.h.bf16 %v9212_v38  ;;  %v9213_v5 = vunpack.i.l.bf16 %v9212_v38  ;;  %v9207_v20 = vpop.permute.xlu1 %9206  ;;  %7195 = vmatprep.mubr.f32.mxu1 %v6708_v13  ;;  %8477 = vmatmul.mubr.msk.f32.vlgmr.msra.gmra.mrb[76].mxu0 %vm4067_vm13, %v4756_v11  ;;  %v4763_v11 = vld [vmem:[#allocation3 + $0x92] sm:$0xff] }
 0x5ce   :  { %v9209_v63 = vunpack.i.h.bf16 %v9207_v20  ;;  %v9208_v14 = vunpack.i.l.bf16 %v9207_v20  ;;  %7196 = vmatmul.mubr.f32.gmra.mrb[50].mxu1 %v6516_v33  ;;  %9501 = vrot.lane.b32.xlu0 %v9500_v48, %s9776_s8  ;;  %v9525_v33 = vpack.i.bf16 %v13835_v55, %v13903_v43  ;;  %v13915_v48 = vld [vmem:[#allocation3 + $0x2e9] sm:$0xff] }
 0x5cf   :  { %9496 = vrot.lane.b32.xlu1 %v9495_v61, %s9779_s27  ;;  %8479 = vmatprep.mubr.msk.f32.mxu0 %vm4067_vm13, %v4757_v1  ;;  %v13918_v20 = vld [vmem:[#allocation3 + $0x2e8] sm:$0xff]  ;;  %v4764_v1 = vld [vmem:[#allocation3 + $0x9a] sm:$0xff]  ;;  %v9540_v47 = vpack.i.bf16 %v13870_v32, %v13915_v48 }
 0x5d0   :  { %v9222_v7 = vpop.permute.xlu0 %9221  ;;  %v6645_v12 = vsel %vm6419_vm15, %v6581_v52, %v9208_v14  ;;  %v6452_v8 = vsel %vm6419_vm15, %v6387_v35, %v9209_v63  ;;  %v13936_v32 = vld [vmem:[#allocation3 + $0x2da] sm:$0xff] }
 0x5d1   :  { %v9217_v56 = vpop.permute.xlu1 %9216  ;;  %v6709_v27 = vsel %vm6484_vm0, %v6645_v12, %v9213_v5  ;;  %8480 = vmatmul.mubr.msk.f32.gmra.mrb[78].mxu0 %vm4067_vm13, %v4758_v29  ;;  %v6517_v44 = vsel %vm6484_vm0, %v6452_v8, %v9214_v51  ;;  %v9224_v18 = vunpack.i.h.bf16 %v9222_v7  ;;  %v9223_v4 = vunpack.i.l.bf16 %v9222_v7  ;;  %v4532_v5 = vld [vmem:[#allocation3 + $0x1e1] sm:$0xff] }
 0x5d2   :  { %v9219_v6 = vunpack.i.h.bf16 %v9217_v56  ;;  %v9218_v3 = vunpack.i.l.bf16 %v9217_v56  ;;  %7200 = vmatprep.mubr.f32.mxu1 %v6709_v27  ;;  %9511 = vrot.lane.b32.xlu0 %v9510_v21, %s9779_s27  ;;  %v9535_v12 = vpack.i.bf16 %v13849_v40, %v13918_v20  ;;  %v13933_v21 = vld [vmem:[#allocation3 + $0x2f0] sm:$0xff] }
 0x5d3   :  { %9506 = vrot.lane.b32.xlu1 %v9505_v34, %s9778_s25  ;;  %7201 = vmatmul.mubr.f32.gmra.mrb[52].mxu1 %v6517_v44  ;;  %v4765_v44 = vld [vmem:[#allocation3 + $0xaa] sm:$0xff] }
 0x5d4   :  { %8482 = vmatprep.mubr.msk.f32.mxu0 %vm4067_vm13, %v4759_v49  ;;  %v9232_v36 = vpop.permute.xlu0 %9231  ;;  %v6582_v22 = vsel %vm4067_vm13, %v4531_v59, %v9218_v3  ;;  %v6388_v0 = vsel %vm4067_vm13, %v4275_v2, %v9219_v6  ;;  %v4533_v2 = vld [vmem:[#allocation3 + $0x1e9] sm:$0xff]  ;;  %v4766_v3 = vld [vmem:[#allocation3 + $0xb2] sm:$0xff] }
 0x5d5   :  { %v9227_v25 = vpop.permute.xlu1 %9226  ;;  %8483 = vmatmul.mubr.msk.f32.gmra.mrb[80].mxu0 %vm4067_vm13, %v4760_v46  ;;  %v9234_v19 = vunpack.i.h.bf16 %v9232_v36  ;;  %v9233_v17 = vunpack.i.l.bf16 %v9232_v36  ;;  %v6646_v23 = vsel %vm6419_vm15, %v6582_v22, %v9223_v4  ;;  %v6453_v28 = vsel %vm6419_vm15, %v6388_v0, %v9224_v18  ;;  %v4277_v6 = vld [vmem:[#allocation3 + $0x1d0] sm:$0xff]  ;;  %v4767_v46 = vld [vmem:[#allocation3 + $0xc2] sm:$0xff] }
 0x5d6   :  { %v9229_v30 = vunpack.i.h.bf16 %v9227_v25  ;;  %v9228_v62 = vunpack.i.l.bf16 %v9227_v25  ;;  %9521 = vrot.lane.b32.xlu0 %v9520_v57, %s9778_s25  ;;  %8485 = vmatprep.mubr.msk.f32.mxu0 %vm4067_vm13, %v4761_v60  ;;  %v9550_v18 = vpack.i.bf16 %v13888_v54, %v13933_v21  ;;  %v9545_v36 = vpack.i.bf16 %v13855_v45, %v13936_v32  ;;  %v13947_v57 = vld [vmem:[#allocation3 + $0x2ea] sm:$0xff] }
 0x5d7   :  { %9516 = vrot.lane.b32.xlu1 %v9515_v15, %s9776_s8  ;;  %v6583_v61 = vsel %vm4067_vm13, %v4532_v5, %v9233_v17  ;;  %v6389_v55 = vsel %vm4067_vm13, %v4276_v16, %v9234_v19  ;;  %v13951_v54 = vld [vmem:[#allocation3 + $0x2f1] sm:$0xff]  ;;  %v4770_v5 = vld [vmem:[#allocation3 + $0xe2] sm:$0xff] }
 0x5d8   :  { %v9242_v24 = vpop.permute.xlu0 %9241  ;;  %v6710_v41 = vsel %vm6484_vm0, %v6646_v23, %v9228_v62  ;;  %v6518_v39 = vsel %vm6484_vm0, %v6453_v28, %v9229_v30  ;;  %v4768_v17 = vld [vmem:[#allocation3 + $0xca] sm:$0xff]  ;;  %v9560_v23 = vpack.i.bf16 %v13867_v50, %v13947_v57  ;;  %v4278_v50 = vld [vmem:[#allocation3 + $0x1e0] sm:$0xff] }
 0x5d9   :  { %v9244_v53 = vunpack.i.h.bf16 %v9242_v24  ;;  %v9243_v38 = vunpack.i.l.bf16 %v9242_v24  ;;  %v9237_v13 = vpop.permute.xlu1 %9236  ;;  %7205 = vmatprep.mubr.f32.mxu1 %v6710_v41  ;;  %8486 = vmatmul.mubr.msk.f32.gmra.mrb[82].mxu0 %vm4067_vm13, %v4762_v42  ;;  %v4769_v42 = vld [vmem:[#allocation3 + $0xda] sm:$0xff] }
 0x5da   :  { %v9239_v58 = vunpack.i.h.bf16 %v9237_v13  ;;  %v9238_v51 = vunpack.i.l.bf16 %v9237_v13  ;;  %7206 = vmatmul.mubr.f32.gmra.mrb[54].mxu1 %v6518_v39  ;;  %9531 = vrot.lane.b32.xlu0 %v9530_v37, %s9776_s8  ;;  %v9555_v39 = vpack.i.bf16 %v13885_v10, %v13951_v54  ;;  %v13963_v37 = vld [vmem:[#allocation3 + $0x301] sm:$0xff]  ;;  %v4534_v13 = vld [vmem:[#allocation3 + $0x1f9] sm:$0xff] }
 0x5db   :  { %9526 = vrot.lane.b32.xlu1 %v9525_v33, %s9779_s27  ;;  %8488 = vmatprep.mubr.msk.f32.mxu0 %vm4067_vm13, %v4763_v11  ;;  %v13966_v33 = vld [vmem:[#allocation3 + $0x300] sm:$0xff]  ;;  %v9570_v16 = vpack.i.bf16 %v13918_v20, %v13963_v37  ;;  %v13984_v20 = vld [vmem:[#allocation3 + $0x2f2] sm:$0xff] }
 0x5dc   :  { %v9252_v63 = vpop.permute.xlu0 %9251  ;;  %v6647_v14 = vsel %vm6419_vm15, %v6583_v61, %v9238_v51  ;;  %v6454_v52 = vsel %vm6419_vm15, %v6389_v55, %v9239_v58 }
 0x5dd   :  { %v9247_v35 = vpop.permute.xlu1 %9246  ;;  %v6711_v7 = vsel %vm6484_vm0, %v6647_v14, %v9243_v38  ;;  %8489 = vmatmul.mubr.msk.f32.gmra.mrb[84].mxu0 %vm4067_vm13, %v4764_v1  ;;  %v6519_v29 = vsel %vm6484_vm0, %v6454_v52, %v9244_v53  ;;  %v9254_v27 = vunpack.i.h.bf16 %v9252_v63  ;;  %v9253_v34 = vunpack.i.l.bf16 %v9252_v63 }
 0x5de   :  { %v9249_v8 = vunpack.i.h.bf16 %v9247_v35  ;;  %v9248_v56 = vunpack.i.l.bf16 %v9247_v35  ;;  %7210 = vmatprep.mubr.f32.mxu1 %v6711_v7  ;;  %9541 = vrot.lane.b32.xlu0 %v9540_v47, %s9779_s27  ;;  %v9565_v14 = vpack.i.bf16 %v13899_v9, %v13966_v33  ;;  %v13981_v47 = vld [vmem:[#allocation3 + $0x308] sm:$0xff] }
 0x5df   :  { %9536 = vrot.lane.b32.xlu1 %v9535_v12, %s9778_s25  ;;  %7211 = vmatmul.mubr.f32.gmra.mrb[56].mxu1 %v6519_v29  ;;  %v4771_v29 = vld [vmem:[#allocation3 + $0xf2] sm:$0xff] }
 0x5e0   :  { %8491 = vmatprep.mubr.msk.f32.mxu0 %vm4067_vm13, %v4765_v44  ;;  %v9262_v40 = vpop.permute.xlu0 %9261  ;;  %v6584_v4 = vsel %vm4067_vm13, %v4533_v2, %v9248_v56  ;;  %v6390_v49 = vsel %vm4067_vm13, %v4277_v6, %v9249_v8  ;;  %v4535_v8 = vld [vmem:[#allocation3 + $0x201] sm:$0xff] }
 0x5e1   :  { %v9257_v59 = vpop.permute.xlu1 %9256  ;;  %8492 = vmatmul.mubr.msk.f32.gmra.mrb[86].mxu0 %vm4067_vm13, %v4766_v3  ;;  %v9264_v25 = vunpack.i.h.bf16 %v9262_v40  ;;  %v9263_v15 = vunpack.i.l.bf16 %v9262_v40  ;;  %v6648_v60 = vsel %vm6419_vm15, %v6584_v4, %v9253_v34  ;;  %v6455_v30 = vsel %vm6419_vm15, %v6390_v49, %v9254_v27  ;;  %v4279_v56 = vld [vmem:[#allocation3 + $0x1e8] sm:$0xff]  ;;  %v4772_v27 = vld [vmem:[#allocation3 + $0xfa] sm:$0xff] }
 0x5e2   :  { %v9259_v22 = vunpack.i.h.bf16 %v9257_v59  ;;  %v9258_v0 = vunpack.i.l.bf16 %v9257_v59  ;;  %9551 = vrot.lane.b32.xlu0 %v9550_v18, %s9778_s25  ;;  %8494 = vmatprep.mubr.msk.f32.mxu0 %vm4067_vm13, %v4767_v46  ;;  %v9580_v34 = vpack.i.bf16 %v13936_v32, %v13981_v47  ;;  %v9575_v40 = vpack.i.bf16 %v13903_v43, %v13984_v20  ;;  %v4773_v3 = vld [vmem:[#allocation3 + $0x10a] sm:$0xff]  ;;  %v13995_v18 = vld [vmem:[#allocation3 + $0x302] sm:$0xff] }
 0x5e3   :  { %9546 = vrot.lane.b32.xlu1 %v9545_v36, %s9776_s8  ;;  %v6585_v11 = vsel %vm4067_vm13, %v4534_v13, %v9263_v15  ;;  %v6391_v10 = vsel %vm4067_vm13, %v4278_v50, %v9264_v25  ;;  %v13999_v59 = vld [vmem:[#allocation3 + $0x309] sm:$0xff] }
 0x5e4   :  { %v9272_v45 = vpop.permute.xlu0 %9271  ;;  %v6712_v62 = vsel %vm6484_vm0, %v6648_v60, %v9258_v0  ;;  %v6520_v19 = vsel %vm6484_vm0, %v6455_v30, %v9259_v22  ;;  %v4774_v60 = vld [vmem:[#allocation3 + $0x112] sm:$0xff]  ;;  %v9590_v30 = vpack.i.bf16 %v13915_v48, %v13995_v18 }
 0x5e5   :  { %v9274_v28 = vunpack.i.h.bf16 %v9272_v45  ;;  %v9273_v24 = vunpack.i.l.bf16 %v9272_v45  ;;  %v9267_v41 = vpop.permute.xlu1 %9266  ;;  %7215 = vmatprep.mubr.f32.mxu1 %v6712_v62  ;;  %8495 = vmatmul.mubr.msk.f32.gmra.mrb[88].mxu0 %vm4067_vm13, %v4768_v17  ;;  %v4536_v48 = vld [vmem:[#allocation3 + $0x211] sm:$0xff] }
 0x5e6   :  { %v9269_v53 = vunpack.i.h.bf16 %v9267_v41  ;;  %v9268_v38 = vunpack.i.l.bf16 %v9267_v41  ;;  %7216 = vmatmul.mubr.f32.gmra.mrb[58].mxu1 %v6520_v19  ;;  %9561 = vrot.lane.b32.xlu0 %v9560_v23, %s9776_s8  ;;  %v9585_v23 = vpack.i.bf16 %v13933_v21, %v13999_v59 }
 0x5e7   :  { %9556 = vrot.lane.b32.xlu1 %v9555_v39, %s9779_s27  ;;  %8497 = vmatprep.mubr.msk.f32.mxu0 %vm4067_vm13, %v4769_v42 }
 0x5e8   :  { %v9282_v58 = vpop.permute.xlu0 %9281  ;;  %v6649_v51 = vsel %vm6419_vm15, %v6585_v11, %v9268_v38  ;;  %v6456_v61 = vsel %vm6419_vm15, %v6391_v10, %v9269_v53  ;;  %v14016_v53 = vld [vmem:[#allocation3 + $0x318] sm:$0xff]  ;;  %v4776_v10 = vld [vmem:[#allocation3 + $0x12a] sm:$0xff] }
 0x5e9   :  { %v9277_v55 = vpop.permute.xlu1 %9276  ;;  %v6713_v63 = vsel %vm6484_vm0, %v6649_v51, %v9273_v24  ;;  %8498 = vmatmul.mubr.msk.f32.gmra.mrb[90].mxu0 %vm4067_vm13, %v4770_v5  ;;  %v6521_v1 = vsel %vm6484_vm0, %v6456_v61, %v9274_v28  ;;  %v9284_v7 = vunpack.i.h.bf16 %v9282_v58  ;;  %v9283_v12 = vunpack.i.l.bf16 %v9282_v58  ;;  %v4775_v28 = vld [vmem:[#allocation3 + $0x122] sm:$0xff]  ;;  %v14013_v24 = vld [vmem:[#allocation3 + $0x319] sm:$0xff] }
 0x5ea   :  { %v9279_v52 = vunpack.i.h.bf16 %v9277_v55  ;;  %v9278_v35 = vunpack.i.l.bf16 %v9277_v55  ;;  %7220 = vmatprep.mubr.f32.mxu1 %v6713_v63  ;;  %9571 = vrot.lane.b32.xlu0 %v9570_v16, %s9779_s27  ;;  %v4280_v38 = vld [vmem:[#allocation3 + $0x1f8] sm:$0xff]  ;;  %v9600_v58 = vpack.i.bf16 %v13966_v33, %v14013_v24  ;;  %v9595_v61 = vpack.i.bf16 %v13947_v57, %v14016_v53  ;;  %v14031_v63 = vld [vmem:[#allocation3 + $0x320] sm:$0xff]  ;;  %v14036_v33 = vld [vmem:[#allocation3 + $0x30a] sm:$0xff] }
 0x5eb   :  { %9566 = vrot.lane.b32.xlu1 %v9565_v14, %s9778_s25  ;;  %7221 = vmatmul.mubr.f32.gmra.mrb[60].mxu1 %v6521_v1 }
 0x5ec   :  { %8500 = vmatprep.mubr.msk.f32.mxu0 %vm4067_vm13, %v4771_v29  ;;  %v9292_v9 = vpop.permute.xlu0 %9291  ;;  %v6586_v44 = vsel %vm4067_vm13, %v4535_v8, %v9278_v35  ;;  %v6392_v2 = vsel %vm4067_vm13, %v4279_v56, %v9279_v52  ;;  %v4777_v29 = vld [vmem:[#allocation3 + $0x13a] sm:$0xff] }
 0x5ed   :  { %v9287_v6 = vpop.permute.xlu1 %9286  ;;  %8501 = vmatmul.mubr.msk.f32.gmra.mrb[92].mxu0 %vm4067_vm13, %v4772_v27  ;;  %v9294_v36 = vunpack.i.h.bf16 %v9292_v9  ;;  %v9293_v46 = vunpack.i.l.bf16 %v9292_v9  ;;  %v6650_v22 = vsel %vm6419_vm15, %v6586_v44, %v9283_v12  ;;  %v6457_v0 = vsel %vm6419_vm15, %v6392_v2, %v9284_v7  ;;  %v4537_v8 = vld [vmem:[#allocation3 + $0x219] sm:$0xff]  ;;  %v4778_v27 = vld [vmem:[#allocation3 + $0x142] sm:$0xff] }
 0x5ee   :  { %v9289_v4 = vunpack.i.h.bf16 %v9287_v6  ;;  %v9288_v49 = vunpack.i.l.bf16 %v9287_v6  ;;  %9581 = vrot.lane.b32.xlu0 %v9580_v34, %s9778_s25  ;;  %8503 = vmatprep.mubr.msk.f32.mxu0 %vm4067_vm13, %v4773_v3  ;;  %v4281_v56 = vld [vmem:[#allocation3 + $0x200] sm:$0xff]  ;;  %v9610_v34 = vpack.i.bf16 %v13984_v20, %v14031_v63  ;;  %v4779_v3 = vld [vmem:[#allocation3 + $0x152] sm:$0xff] }
 0x5ef   :  { %9576 = vrot.lane.b32.xlu1 %v9575_v40, %s9776_s8  ;;  %v6587_v13 = vsel %vm4067_vm13, %v4536_v48, %v9293_v46  ;;  %v6393_v21 = vsel %vm4067_vm13, %v4280_v38, %v9294_v36  ;;  %v9605_v40 = vpack.i.bf16 %v13951_v54, %v14036_v33  ;;  %v4751_v48 = vld [vmem:[#allocation3 + $0x331] sm:$0xff] }
 0x5f0   :  { %v9302_v43 = vpop.permute.xlu0 %9301  ;;  %v6714_v25 = vsel %vm6484_vm0, %v6650_v22, %v9288_v49  ;;  %v6522_v15 = vsel %vm6484_vm0, %v6457_v0, %v9289_v4  ;;  %v14047_v4 = vld [vmem:[#allocation3 + $0x31a] sm:$0xff] }
 0x5f1   :  { %v9304_v45 = vunpack.i.h.bf16 %v9302_v43  ;;  %v9303_v62 = vunpack.i.l.bf16 %v9302_v43  ;;  %v9297_v19 = vpop.permute.xlu1 %9296  ;;  %v14008_v17 = vpop.f32.mrb[0].mxu1  ;;  %7225 = vmatprep.mubr.f32.mxu1 %v6714_v25  ;;  %8504 = vmatmul.mubr.msk.f32.gmra.mrb[94].mxu0 %vm4067_vm13, %v4774_v60  ;;  %v14053_v22 = vld [vmem:[#allocation3 + $0x321] sm:$0xff] }
 0x5f2   :  { %v9299_v41 = vunpack.i.h.bf16 %v9297_v19  ;;  %v9298_v39 = vunpack.i.l.bf16 %v9297_v19  ;;  %v7074_v42 = vpop.f32.mrb[1].mxu1  ;;  %7226 = vmatmul.mubr.f32.gmra.mrb[62].mxu1 %v6522_v15  ;;  %9591 = vrot.lane.b32.xlu0 %v9590_v30, %s9776_s8  ;;  %v9620_v19 = vpack.i.bf16 %v13963_v37, %v14047_v4  ;;  %v4282_v37 = vld [vmem:[#allocation3 + $0x210] sm:$0xff] }
 0x5f3   :  { %9586 = vrot.lane.b32.xlu1 %v9585_v23, %s9779_s27  ;;  %8506 = vmatprep.mubr.msk.f32.mxu0 %vm4067_vm13, %v4775_v28  ;;  %v4781_v42 = vld [vmem:[#allocation3 + $0x16a] sm:$0xff] }
 0x5f4   :  { %v9312_v50 = vpop.permute.xlu0 %9311  ;;  %v6651_v11 = vsel %vm6419_vm15, %v6587_v13, %v9298_v39  ;;  %v6458_v51 = vsel %vm6419_vm15, %v6393_v21, %v9299_v41  ;;  %v9615_v39 = vpack.i.bf16 %v13981_v47, %v14053_v22  ;;  %v4538_v21 = vld [vmem:[#allocation3 + $0x229] sm:$0xff] }
 0x5f5   :  { %v9307_v5 = vpop.permute.xlu1 %9306  ;;  %v6715_v16 = vsel %vm6484_vm0, %v6651_v11, %v9303_v62  ;;  %8507 = vmatmul.mubr.msk.f32.gmra.mrb[96].mxu0 %vm4067_vm13, %v4776_v10  ;;  %v6523_v55 = vsel %vm6484_vm0, %v6458_v51, %v9304_v45  ;;  %v9314_v35 = vunpack.i.h.bf16 %v9312_v50  ;;  %v9313_v7 = vunpack.i.l.bf16 %v9312_v50  ;;  %v4780_v62 = vld [vmem:[#allocation3 + $0x15a] sm:$0xff]  ;;  %v14066_v50 = vld [vmem:[#allocation3 + $0x330] sm:$0xff] }
 0x5f6   :  { %v9309_v14 = vunpack.i.h.bf16 %v9307_v5  ;;  %v9308_v1 = vunpack.i.l.bf16 %v9307_v5  ;;  %v14033_v52 = vpop.f32.mrb[2].mxu1  ;;  %7230 = vmatprep.mubr.f32.mxu1 %v6715_v16  ;;  %9601 = vrot.lane.b32.xlu0 %v9600_v58, %s9779_s27  ;;  %v4782_v51 = vld [vmem:[#allocation3 + $0x172] sm:$0xff]  ;;  %v9630_v5 = vpack.i.bf16 %v14016_v53, %v4751_v48  ;;  %v4783_v53 = vld [vmem:[#allocation3 + $0x182] sm:$0xff] }
 0x5f7   :  { %9596 = vrot.lane.b32.xlu1 %v9595_v61, %s9778_s25  ;;  %v7079_v12 = vpop.f32.mrb[3].mxu1  ;;  %7231 = vmatmul.mubr.f32.gmra.mrb[64].mxu1 %v6523_v55 }
 0x5f8   :  { %8509 = vmatprep.mubr.msk.f32.mxu0 %vm4067_vm13, %v4777_v29  ;;  %v9322_v9 = vpop.permute.xlu0 %9321  ;;  %v6588_v44 = vsel %vm4067_vm13, %v4537_v8, %v9308_v1  ;;  %v6394_v2 = vsel %vm4067_vm13, %v4281_v56, %v9309_v14  ;;  %v9625_v1 = vpack.i.bf16 %v13995_v18, %v14066_v50  ;;  %v14085_v56 = vld [vmem:[#allocation3 + $0x322] sm:$0xff] }
 0x5f9   :  { %v9317_v6 = vpop.permute.xlu1 %9316  ;;  %8510 = vmatmul.mubr.msk.f32.gmra.mrb[98].mxu0 %vm4067_vm13, %v4778_v27  ;;  %v9324_v0 = vunpack.i.h.bf16 %v9322_v9  ;;  %v9323_v43 = vunpack.i.l.bf16 %v9322_v9  ;;  %v6652_v54 = vsel %vm6419_vm15, %v6588_v44, %v9313_v7  ;;  %v6459_v15 = vsel %vm6419_vm15, %v6394_v2, %v9314_v35  ;;  %v14082_v7 = vld [vmem:[#allocation3 + $0x338] sm:$0xff] }
 0x5fa   :  { %v9319_v49 = vunpack.i.h.bf16 %v9317_v6  ;;  %v9318_v36 = vunpack.i.l.bf16 %v9317_v6  ;;  %v14049_v46 = vpop.f32.mrb[4].mxu1  ;;  %9611 = vrot.lane.b32.xlu0 %v9610_v34, %s9778_s25  ;;  %8512 = vmatprep.mubr.msk.f32.mxu0 %vm4067_vm13, %v4779_v3  ;;  %v4539_v34 = vld [vmem:[#allocation3 + $0x231] sm:$0xff]  ;;  %v4785_v44 = vld [vmem:[#allocation3 + $0x19a] sm:$0xff]  ;;  %v9640_v3 = vpack.i.bf16 %v14036_v33, %v14082_v7 }
 0x5fb   :  { %9606 = vrot.lane.b32.xlu1 %v9605_v40, %s9776_s8  ;;  %v7084_v25 = vpop.f32.mrb[5].mxu1  ;;  %v6589_v11 = vsel %vm4067_vm13, %v4538_v21, %v9323_v43  ;;  %v6395_v10 = vsel %vm4067_vm13, %v4282_v37, %v9324_v0  ;;  %v4283_v2 = vld [vmem:[#allocation3 + $0x218] sm:$0xff]  ;;  %v4784_v40 = vld [vmem:[#allocation3 + $0x18a] sm:$0xff] }
 0x5fc   :  { %v9332_v60 = vpop.permute.xlu0 %9331  ;;  %v6716_v30 = vsel %vm6484_vm0, %v6652_v54, %v9318_v36  ;;  %v6524_v45 = vsel %vm6484_vm0, %v6459_v15, %v9319_v49  ;;  %v9635_v25 = vpack.i.bf16 %v13999_v59, %v14085_v56  ;;  %v14098_v54 = vld [vmem:[#allocation3 + $0x332] sm:$0xff] }
 0x5fd   :  { %v9334_v23 = vunpack.i.h.bf16 %v9332_v60  ;;  %v9333_v28 = vunpack.i.l.bf16 %v9332_v60  ;;  %v9327_v41 = vpop.permute.xlu1 %9326  ;;  %7235 = vmatprep.mubr.f32.mxu1 %v6716_v30  ;;  %8513 = vmatmul.mubr.msk.f32.gmra.mrb[100].mxu0 %vm4067_vm13, %v4780_v62  ;;  %v4752_v62 = vld [vmem:[#allocation3 + $0x339] sm:$0xff]  ;;  %v9650_v48 = vpack.i.bf16 %v14013_v24, %v14098_v54  ;;  %v4284_v24 = vld [vmem:[#allocation3 + $0x228] sm:$0xff] }
 0x5fe   :  { %v9329_v38 = vunpack.i.h.bf16 %v9327_v41  ;;  %v9328_v13 = vunpack.i.l.bf16 %v9327_v41  ;;  %7236 = vmatmul.mubr.f32.gmra.mrb[66].mxu1 %v6524_v45  ;;  %9621 = vrot.lane.b32.xlu0 %v9620_v19, %s9776_s8  ;;  %v4786_v45 = vld [vmem:[#allocation3 + $0x1a2] sm:$0xff]  ;;  %v9645_v37 = vpack.i.bf16 %v14031_v63, %v4752_v62 }
 0x5ff   :  { %9616 = vrot.lane.b32.xlu1 %v9615_v39, %s9779_s27  ;;  %8515 = vmatprep.mubr.msk.f32.mxu0 %vm4067_vm13, %v4781_v42 }
 0x600   :  { %v9342_v47 = vpop.permute.xlu0 %9341  ;;  %v6653_v58 = vsel %vm6419_vm15, %v6589_v11, %v9328_v13  ;;  %v6460_v16 = vsel %vm6419_vm15, %v6395_v10, %v9329_v38  ;;  %v4787_v11 = vld [vmem:[#allocation3 + $0x1e2] sm:$0xff] }
 0x601   :  { %v9337_v61 = vpop.permute.xlu1 %9336  ;;  %v14075_v55 = vpop.f32.mrb[6].mxu1  ;;  %v6717_v14 = vsel %vm6484_vm0, %v6653_v58, %v9333_v28  ;;  %8516 = vmatmul.mubr.msk.f32.gmra.mrb[102].mxu0 %vm4067_vm13, %v4782_v51  ;;  %v6525_v35 = vsel %vm6484_vm0, %v6460_v16, %v9334_v23  ;;  %v9344_v9 = vunpack.i.h.bf16 %v9342_v47  ;;  %v9343_v27 = vunpack.i.l.bf16 %v9342_v47  ;;  %v4753_v10 = vld [vmem:[#allocation3 + $0x349] sm:$0xff] }
 0x602   :  { %v9339_v12 = vunpack.i.h.bf16 %v9337_v61  ;;  %v9338_v29 = vunpack.i.l.bf16 %v9337_v61  ;;  %v7089_v8 = vpop.f32.mrb[7].mxu1  ;;  %7240 = vmatprep.mubr.f32.mxu1 %v6717_v14  ;;  %9631 = vrot.lane.b32.xlu0 %v9630_v5, %s9779_s27  ;;  %v4540_v5 = vld [vmem:[#allocation3 + $0x241] sm:$0xff] }
 0x603   :  { %9626 = vrot.lane.b32.xlu1 %v9625_v1, %s9778_s25  ;;  %7241 = vmatmul.mubr.f32.gmra.mrb[68].mxu1 %v6525_v35  ;;  %v4689_v16 = vld [vmem:[#allocation3 + $0x348] sm:$0xff] }
 0x604   :  { %8518 = vmatprep.mubr.msk.f32.mxu0 %vm4067_vm13, %v4783_v53  ;;  %v9352_v6 = vpop.permute.xlu0 %9351  ;;  %v6590_v49 = vsel %vm4067_vm13, %v4539_v34, %v9338_v29  ;;  %v6396_v36 = vsel %vm4067_vm13, %v4283_v2, %v9339_v12  ;;  %v4788_v12 = vld [vmem:[#allocation3 + $0x1ea] sm:$0xff]  ;;  %v9660_v29 = vpack.i.bf16 %v14066_v50, %v4753_v10  ;;  %v4792_v10 = vld [vmem:[#allocation3 + $0x21a] sm:$0xff] }
 0x605   :  { %v9347_v0 = vpop.permute.xlu1 %9346  ;;  %v14093_v43 = vpop.f32.mrb[8].mxu1  ;;  %8519 = vmatmul.mubr.msk.f32.gmra.mrb[104].mxu0 %vm4067_vm13, %v4784_v40  ;;  %v9354_v19 = vunpack.i.h.bf16 %v9352_v6  ;;  %v9353_v23 = vunpack.i.l.bf16 %v9352_v6  ;;  %v6654_v28 = vsel %vm6419_vm15, %v6590_v49, %v9343_v27  ;;  %v6461_v41 = vsel %vm6419_vm15, %v6396_v36, %v9344_v9  ;;  %v14126_v40 = vld [vmem:[#allocation3 + $0x33a] sm:$0xff]  ;;  %v4541_v36 = vld [vmem:[#allocation3 + $0x249] sm:$0xff] }
 0x606   :  { %v9349_v15 = vunpack.i.h.bf16 %v9347_v0  ;;  %v9348_v60 = vunpack.i.l.bf16 %v9347_v0  ;;  %v7094_v30 = vpop.f32.mrb[9].mxu1  ;;  %9641 = vrot.lane.b32.xlu0 %v9640_v3, %s9778_s25  ;;  %8521 = vmatprep.mubr.msk.f32.mxu0 %vm4067_vm13, %v4785_v44  ;;  %v9655_v27 = vpack.i.bf16 %v14047_v4, %v4689_v16  ;;  %v4690_v44 = vld [vmem:[#allocation3 + $0x350] sm:$0xff]  ;;  %v4789_v49 = vld [vmem:[#allocation3 + $0x1fa] sm:$0xff] }
 0x607   :  { %9636 = vrot.lane.b32.xlu1 %v9635_v25, %s9776_s8  ;;  %v6591_v14 = vsel %vm4067_vm13, %v4540_v5, %v9353_v23  ;;  %v6397_v63 = vsel %vm4067_vm13, %v4284_v24, %v9354_v19  ;;  %v4285_v0 = vld [vmem:[#allocation3 + $0x230] sm:$0xff]  ;;  %v9665_v23 = vpack.i.bf16 %v14053_v22, %v14126_v40 }
 0x608   :  { %v9362_v59 = vpop.permute.xlu0 %9361  ;;  %v6718_v39 = vsel %vm6484_vm0, %v6654_v28, %v9348_v60  ;;  %v6526_v42 = vsel %vm6484_vm0, %v6461_v41, %v9349_v15  ;;  %v4790_v15 = vld [vmem:[#allocation3 + $0x202] sm:$0xff]  ;;  %v9670_v60 = vpack.i.bf16 %v14085_v56, %v4690_v44  ;;  %v4791_v28 = vld [vmem:[#allocation3 + $0x212] sm:$0xff]  ;;  %v4793_v24 = vld [vmem:[#allocation3 + $0x22a] sm:$0xff] }
 0x609   :  { %v9364_v38 = vunpack.i.h.bf16 %v9362_v59  ;;  %v9363_v13 = vunpack.i.l.bf16 %v9362_v59  ;;  %v9357_v21 = vpop.permute.xlu1 %9356  ;;  %7245 = vmatprep.mubr.f32.mxu1 %v6718_v39  ;;  %8522 = vmatmul.mubr.msk.f32.gmra.mrb[106].mxu0 %vm4067_vm13, %v4786_v45 }
 0x60a   :  { %v9359_v47 = vunpack.i.h.bf16 %v9357_v21  ;;  %v9358_v58 = vunpack.i.l.bf16 %v9357_v21  ;;  %v14111_v51 = vpop.f32.mrb[10].mxu1  ;;  %7246 = vmatmul.mubr.f32.gmra.mrb[70].mxu1 %v6526_v42  ;;  %9651 = vrot.lane.b32.xlu0 %v9650_v48, %s9776_s8  ;;  %v4754_v42 = vld [vmem:[#allocation3 + $0x351] sm:$0xff] }
 0x60b   :  { %9646 = vrot.lane.b32.xlu1 %v9645_v37, %s9779_s27  ;;  %v7099_v61 = vpop.f32.mrb[11].mxu1  ;;  %8524 = vmatprep.mubr.msk.f32.mxu0 %vm4067_vm13, %v4787_v11  ;;  %v9675_v16 = vpack.i.bf16 %v14082_v7, %v4754_v42 }
 0x60c   :  { %v9372_v1 = vpop.permute.xlu0 %9371  ;;  %v6655_v35 = vsel %vm6419_vm15, %v6591_v14, %v9358_v58  ;;  %v6462_v8 = vsel %vm6419_vm15, %v6397_v63, %v9359_v47 }
 0x60d   :  { %v9367_v53 = vpop.permute.xlu1 %9366  ;;  %v6719_v9 = vsel %vm6484_vm0, %v6655_v35, %v9363_v13  ;;  %8525 = vmatmul.mubr.msk.f32.gmra.mrb[108].mxu0 %vm4067_vm13, %v4788_v12  ;;  %v6527_v34 = vsel %vm6484_vm0, %v6462_v8, %v9364_v38  ;;  %v9374_v50 = vunpack.i.h.bf16 %v9372_v1  ;;  %v9373_v3 = vunpack.i.l.bf16 %v9372_v1  ;;  %v4542_v1 = vld [vmem:[#allocation3 + $0x259] sm:$0xff] }
 0x60e   :  { %v9369_v2 = vunpack.i.h.bf16 %v9367_v53  ;;  %v9368_v6 = vunpack.i.l.bf16 %v9367_v53  ;;  %7250 = vmatprep.mubr.f32.mxu1 %v6719_v9  ;;  %9661 = vrot.lane.b32.xlu0 %v9660_v29, %s9779_s27  ;;  %v4286_v35 = vld [vmem:[#allocation3 + $0x240] sm:$0xff]  ;;  %v4794_v9 = vld [vmem:[#allocation3 + $0x232] sm:$0xff] }
 0x60f   :  { %9656 = vrot.lane.b32.xlu1 %v9655_v27, %s9778_s25  ;;  %7251 = vmatmul.mubr.f32.gmra.mrb[72].mxu1 %v6527_v34 }
 0x610   :  { %8527 = vmatprep.mubr.msk.f32.mxu0 %vm4067_vm13, %v4789_v49  ;;  %v9382_v25 = vpop.permute.xlu0 %9381  ;;  %v6592_v30 = vsel %vm4067_vm13, %v4541_v36, %v9368_v6  ;;  %v6398_v45 = vsel %vm4067_vm13, %v4285_v0, %v9369_v2  ;;  %v4795_v6 = vld [vmem:[#allocation3 + $0x242] sm:$0xff] }
 0x611   :  { %v9377_v62 = vpop.permute.xlu1 %9376  ;;  %v14133_v19 = vpop.f32.mrb[12].mxu1  ;;  %8528 = vmatmul.mubr.msk.f32.gmra.mrb[110].mxu0 %vm4067_vm13, %v4790_v15  ;;  %v9384_v48 = vunpack.i.h.bf16 %v9382_v25  ;;  %v9383_v38 = vunpack.i.l.bf16 %v9382_v25  ;;  %v6656_v13 = vsel %vm6419_vm15, %v6592_v30, %v9373_v3  ;;  %v6463_v21 = vsel %vm6419_vm15, %v6398_v45, %v9374_v50  ;;  %v4543_v0 = vld [vmem:[#allocation3 + $0x261] sm:$0xff] }
 0x612   :  { %v9379_v41 = vunpack.i.h.bf16 %v9377_v62  ;;  %v9378_v59 = vunpack.i.l.bf16 %v9377_v62  ;;  %v7104_v39 = vpop.f32.mrb[13].mxu1  ;;  %9671 = vrot.lane.b32.xlu0 %v9670_v60, %s9778_s25  ;;  %8530 = vmatprep.mubr.msk.f32.mxu0 %vm4067_vm13, %v4791_v28  ;;  %v4287_v25 = vld [vmem:[#allocation3 + $0x248] sm:$0xff]  ;;  %v4797_v28 = vld [vmem:[#allocation3 + $0x25a] sm:$0xff] }
 0x613   :  { %9666 = vrot.lane.b32.xlu1 %v9665_v23, %s9776_s8  ;;  %v6593_v29 = vsel %vm4067_vm13, %v4542_v1, %v9383_v38  ;;  %v6399_v8 = vsel %vm4067_vm13, %v4286_v35, %v9384_v48  ;;  %v4796_v60 = vld [vmem:[#allocation3 + $0x24a] sm:$0xff]  ;;  %v4288_v1 = vld [vmem:[#allocation3 + $0x258] sm:$0xff] }
 0x614   :  { %v9392_v37 = vpop.permute.xlu0 %9391  ;;  %v6720_v22 = vsel %vm6484_vm0, %v6656_v13, %v9378_v59  ;;  %v6528_v11 = vsel %vm6484_vm0, %v6463_v21, %v9379_v41 }
 0x615   :  { %v9394_v47 = vunpack.i.h.bf16 %v9392_v37  ;;  %v9393_v58 = vunpack.i.l.bf16 %v9392_v37  ;;  %v9387_v5 = vpop.permute.xlu1 %9386  ;;  %7255 = vmatprep.mubr.f32.mxu1 %v6720_v22  ;;  %8531 = vmatmul.mubr.msk.f32.gmra.mrb[112].mxu0 %vm4067_vm13, %v4792_v10 }
 0x616   :  { %v9389_v61 = vunpack.i.h.bf16 %v9387_v5  ;;  %v9388_v14 = vunpack.i.l.bf16 %v9387_v5  ;;  %v14147_v63 = vpop.f32.mrb[14].mxu1  ;;  %7256 = vmatmul.mubr.f32.gmra.mrb[74].mxu1 %v6528_v11  ;;  %8533 = vmatprep.mubr.msk.f32.mxu0 %vm4067_vm13, %v4793_v24  ;;  %v4798_v11 = vld [vmem:[#allocation3 + $0x262] sm:$0xff]  ;;  %v4799_v5 = vld [vmem:[#allocation3 + $0x272] sm:$0xff] }
 0x617   :  { %9676 = vrot.lane.b32.xlu1 %v9675_v16, %s9779_s27  ;;  %v7109_v12 = vpop.f32.mrb[15].mxu1 }
 0x618   :  { %v9402_v53 = vpop.permute.xlu0 %9401  ;;  %v6657_v7 = vsel %vm6419_vm15, %v6593_v29, %v9388_v14  ;;  %v6464_v27 = vsel %vm6419_vm15, %v6399_v8, %v9389_v61  ;;  %v4544_v14 = vld [vmem:[#allocation3 + $0x271] sm:$0xff] }
 0x619   :  { %v9397_v34 = vpop.permute.xlu1 %9396  ;;  %v6721_v44 = vsel %vm6484_vm0, %v6657_v7, %v9393_v58  ;;  %8534 = vmatmul.mubr.msk.f32.gmra.mrb[114].mxu0 %vm4067_vm13, %v4794_v9  ;;  %v6529_v2 = vsel %vm6484_vm0, %v6464_v27, %v9394_v47  ;;  %v9404_v49 = vunpack.i.h.bf16 %v9402_v53  ;;  %v9403_v36 = vunpack.i.l.bf16 %v9402_v53  ;;  %v4800_v7 = vld [vmem:[#allocation3 + $0x27a] sm:$0xff] }
 0x61a   :  { %v9399_v50 = vunpack.i.h.bf16 %v9397_v34  ;;  %v9398_v3 = vunpack.i.l.bf16 %v9397_v34  ;;  %7260 = vmatprep.mubr.f32.mxu1 %v6721_v44  ;;  %8536 = vmatprep.mubr.msk.f32.mxu0 %vm4067_vm13, %v4795_v6 }
 0x61b   :  { %7261 = vmatmul.mubr.f32.gmra.mrb[76].mxu1 %v6529_v2  ;;  %v4801_v2 = vld [vmem:[#allocation3 + $0x28a] sm:$0xff] }
 0x61c   :  { %v9412_v15 = vpop.permute.xlu0 %9411  ;;  %v6594_v30 = vsel %vm4067_vm13, %v4543_v0, %v9398_v3  ;;  %v6400_v45 = vsel %vm4067_vm13, %v4287_v25, %v9399_v50  ;;  %v4289_v0 = vld [vmem:[#allocation3 + $0x260] sm:$0xff] }
 0x61d   :  { %v9407_v62 = vpop.permute.xlu1 %9406  ;;  %v14161_v23 = vpop.f32.mrb[16].mxu1  ;;  %8537 = vmatmul.mubr.msk.f32.gmra.mrb[116].mxu0 %vm4067_vm13, %v4796_v60  ;;  %v9414_v42 = vunpack.i.h.bf16 %v9412_v15  ;;  %v9413_v48 = vunpack.i.l.bf16 %v9412_v15  ;;  %v6658_v38 = vsel %vm6419_vm15, %v6594_v30, %v9403_v36  ;;  %v6465_v13 = vsel %vm6419_vm15, %v6400_v45, %v9404_v49  ;;  %v4545_v36 = vld [vmem:[#allocation3 + $0x279] sm:$0xff] }
 0x61e   :  { %v9409_v41 = vunpack.i.h.bf16 %v9407_v62  ;;  %v9408_v59 = vunpack.i.l.bf16 %v9407_v62  ;;  %v7114_v39 = vpop.f32.mrb[17].mxu1  ;;  %8539 = vmatprep.mubr.msk.f32.mxu0 %vm4067_vm13, %v4797_v28  ;;  %v4802_v15 = vld [vmem:[#allocation3 + $0x292] sm:$0xff]  ;;  %v4803_v28 = vld [vmem:[#allocation3 + $0x2a2] sm:$0xff] }
 0x61f   :  { %v6595_v12 = vsel %vm4067_vm13, %v4544_v14, %v9413_v48  ;;  %v6401_v29 = vsel %vm4067_vm13, %v4288_v1, %v9414_v42  ;;  %v4546_v1 = vld [vmem:[#allocation3 + $0x289] sm:$0xff] }
 0x620   :  { %v9422_v21 = vpop.permute.xlu0 %9421  ;;  %v6722_v37 = vsel %vm6484_vm0, %v6658_v38, %v9408_v59  ;;  %v6530_v22 = vsel %vm6484_vm0, %v6465_v13, %v9409_v41 }
 0x621   :  { %v9424_v10 = vunpack.i.h.bf16 %v9422_v21  ;;  %v9423_v47 = vunpack.i.l.bf16 %v9422_v21  ;;  %v9417_v58 = vpop.permute.xlu1 %9416  ;;  %7265 = vmatprep.mubr.f32.mxu1 %v6722_v37  ;;  %8540 = vmatmul.mubr.msk.f32.gmra.mrb[118].mxu0 %vm4067_vm13, %v4798_v11  ;;  %v4804_v11 = vld [vmem:[#allocation3 + $0x2aa] sm:$0xff] }
 0x622   :  { %v9419_v16 = vunpack.i.h.bf16 %v9417_v58  ;;  %v9418_v24 = vunpack.i.l.bf16 %v9417_v58  ;;  %v14170_v61 = vpop.f32.mrb[18].mxu1  ;;  %7266 = vmatmul.mubr.f32.gmra.mrb[78].mxu1 %v6530_v22  ;;  %8542 = vmatprep.mubr.msk.f32.mxu0 %vm4067_vm13, %v4799_v5  ;;  %v4805_v5 = vld [vmem:[#allocation3 + $0x2ba] sm:$0xff] }
 0x623   :  { %v7119_v35 = vpop.f32.mrb[19].mxu1 }
 0x624   :  { %v9432_v8 = vpop.permute.xlu0 %9431  ;;  %v6659_v53 = vsel %vm6419_vm15, %v6595_v12, %v9418_v24  ;;  %v6466_v9 = vsel %vm6419_vm15, %v6401_v29, %v9419_v16  ;;  %v4290_v35 = vld [vmem:[#allocation3 + $0x270] sm:$0xff] }
 0x625   :  { %v9427_v27 = vpop.permute.xlu1 %9426  ;;  %v6723_v34 = vsel %vm6484_vm0, %v6659_v53, %v9423_v47  ;;  %8543 = vmatmul.mubr.msk.f32.gmra.mrb[120].mxu0 %vm4067_vm13, %v4800_v7  ;;  %v6531_v44 = vsel %vm6484_vm0, %v6466_v9, %v9424_v10  ;;  %v9434_v3 = vunpack.i.h.bf16 %v9432_v8  ;;  %v9433_v49 = vunpack.i.l.bf16 %v9432_v8  ;;  %v4806_v9 = vld [vmem:[#allocation3 + $0x2c2] sm:$0xff] }
 0x626   :  { %v9429_v6 = vunpack.i.h.bf16 %v9427_v27  ;;  %v9428_v50 = vunpack.i.l.bf16 %v9427_v27  ;;  %7270 = vmatprep.mubr.f32.mxu1 %v6723_v34  ;;  %8545 = vmatprep.mubr.msk.f32.mxu0 %vm4067_vm13, %v4801_v2 }
 0x627   :  { %7271 = vmatmul.mubr.f32.gmra.mrb[80].mxu1 %v6531_v44 }
 0x628   :  { %v9442_v25 = vpop.permute.xlu0 %9441  ;;  %v6596_v60 = vsel %vm4067_vm13, %v4545_v36, %v9428_v50  ;;  %v6402_v30 = vsel %vm4067_vm13, %v4289_v0, %v9429_v6  ;;  %v4807_v6 = vld [vmem:[#allocation3 + $0x2d2] sm:$0xff] }
 0x629   :  { %v9437_v45 = vpop.permute.xlu1 %9436  ;;  %v14183_v62 = vpop.f32.mrb[20].mxu1  ;;  %8546 = vmatmul.mubr.msk.f32.gmra.mrb[122].mxu0 %vm4067_vm13, %v4802_v15  ;;  %v9444_v42 = vunpack.i.h.bf16 %v9442_v25  ;;  %v9443_v48 = vunpack.i.l.bf16 %v9442_v25  ;;  %v6660_v38 = vsel %vm6419_vm15, %v6596_v60, %v9433_v49  ;;  %v6467_v13 = vsel %vm6419_vm15, %v6402_v30, %v9434_v3  ;;  %v4547_v0 = vld [vmem:[#allocation3 + $0x291] sm:$0xff] }
 0x62a   :  { %v9439_v41 = vunpack.i.h.bf16 %v9437_v45  ;;  %v9438_v59 = vunpack.i.l.bf16 %v9437_v45  ;;  %v7124_v39 = vpop.f32.mrb[21].mxu1  ;;  %8548 = vmatprep.mubr.msk.f32.mxu0 %vm4067_vm13, %v4803_v28  ;;  %v4291_v25 = vld [vmem:[#allocation3 + $0x278] sm:$0xff] }
 0x62b   :  { %v6597_v29 = vsel %vm4067_vm13, %v4546_v1, %v9443_v48  ;;  %v6403_v8 = vsel %vm4067_vm13, %v4290_v35, %v9444_v42 }
 0x62c   :  { %v9452_v21 = vpop.permute.xlu0 %9451  ;;  %v6724_v37 = vsel %vm6484_vm0, %v6660_v38, %v9438_v59  ;;  %v6532_v22 = vsel %vm6484_vm0, %v6467_v13, %v9439_v41 }
 0x62d   :  { %v9454_v10 = vunpack.i.h.bf16 %v9452_v21  ;;  %v9453_v47 = vunpack.i.l.bf16 %v9452_v21  ;;  %v9447_v58 = vpop.permute.xlu1 %9446  ;;  %7275 = vmatprep.mubr.f32.mxu1 %v6724_v37  ;;  %8549 = vmatmul.mubr.msk.f32.gmra.mrb[124].mxu0 %vm4067_vm13, %v4804_v11 }
 0x62e   :  { %v9449_v16 = vunpack.i.h.bf16 %v9447_v58  ;;  %v9448_v24 = vunpack.i.l.bf16 %v9447_v58  ;;  %v14192_v14 = vpop.f32.mrb[22].mxu1  ;;  %7276 = vmatmul.mubr.f32.gmra.mrb[82].mxu1 %v6532_v22  ;;  %8551 = vmatprep.mubr.msk.f32.mxu0 %vm4067_vm13, %v4805_v5  ;;  %v4548_v5 = vld [vmem:[#allocation3 + $0x2a1] sm:$0xff] }
 0x62f   :  { %v7129_v12 = vpop.f32.mrb[23].mxu1 }
 0x630   :  { %v9462_v53 = vpop.permute.xlu0 %9461  ;;  %v6661_v7 = vsel %vm6419_vm15, %v6597_v29, %v9448_v24  ;;  %v6468_v27 = vsel %vm6419_vm15, %v6403_v8, %v9449_v16  ;;  %v4292_v16 = vld [vmem:[#allocation3 + $0x288] sm:$0xff] }
 0x631   :  { %v9457_v34 = vpop.permute.xlu1 %9456  ;;  %v6725_v44 = vsel %vm6484_vm0, %v6661_v7, %v9453_v47  ;;  %8552 = vmatmul.mubr.msk.f32.gmra.mrb[126].mxu0 %vm4067_vm13, %v4806_v9  ;;  %v6533_v2 = vsel %vm6484_vm0, %v6468_v27, %v9454_v10  ;;  %v9464_v49 = vunpack.i.h.bf16 %v9462_v53  ;;  %v9463_v36 = vunpack.i.l.bf16 %v9462_v53 }
 0x632   :  { %v9459_v50 = vunpack.i.h.bf16 %v9457_v34  ;;  %v9458_v3 = vunpack.i.l.bf16 %v9457_v34  ;;  %7280 = vmatprep.mubr.f32.mxu1 %v6725_v44  ;;  %8554 = vmatprep.mubr.msk.f32.mxu0 %vm4067_vm13, %v4807_v6  ;;  %v4549_v44 = vld [vmem:[#allocation3 + $0x2a9] sm:$0xff] }
 0x633   :  { %7281 = vmatmul.mubr.f32.gmra.mrb[84].mxu1 %v6533_v2  ;;  %v4293_v2 = vld [vmem:[#allocation3 + $0x290] sm:$0xff] }
 0x634   :  { %v9472_v15 = vpop.permute.xlu0 %9471  ;;  %v6598_v60 = vsel %vm4067_vm13, %v4547_v0, %v9458_v3  ;;  %v6404_v30 = vsel %vm4067_vm13, %v4291_v25, %v9459_v50 }
 0x635   :  { %v9467_v45 = vpop.permute.xlu1 %9466  ;;  %v14205_v28 = vpop.f32.mrb[24].mxu1  ;;  %8555 = vmatmul.mubr.msk.f32.gmra.mrb[128].mxu0 %vm4067_vm13, %v13936_v32  ;;  %v9474_v42 = vunpack.i.h.bf16 %v9472_v15  ;;  %v9473_v48 = vunpack.i.l.bf16 %v9472_v15  ;;  %v6662_v38 = vsel %vm6419_vm15, %v6598_v60, %v9463_v36  ;;  %v6469_v13 = vsel %vm6419_vm15, %v6404_v30, %v9464_v49 }
 0x636   :  { %v9469_v41 = vunpack.i.h.bf16 %v9467_v45  ;;  %v9468_v59 = vunpack.i.l.bf16 %v9467_v45  ;;  %v7134_v39 = vpop.f32.mrb[25].mxu1  ;;  %8557 = vmatprep.mubr.msk.f32.mxu0 %vm4067_vm13, %v13947_v57  ;;  %v4817_v45 = vld [vmem:[#allocation3 + $0x34a] sm:$0xff] }
 0x637   :  { %v6599_v1 = vsel %vm4067_vm13, %v4548_v5, %v9473_v48  ;;  %v6405_v35 = vsel %vm4067_vm13, %v4292_v16, %v9474_v42 }
 0x638   :  { %v9482_v21 = vpop.permute.xlu0 %9481  ;;  %v6726_v37 = vsel %vm6484_vm0, %v6662_v38, %v9468_v59  ;;  %v6534_v22 = vsel %vm6484_vm0, %v6469_v13, %v9469_v41 }
 0x639   :  { %v9484_v11 = vunpack.i.h.bf16 %v9482_v21  ;;  %v9483_v10 = vunpack.i.l.bf16 %v9482_v21  ;;  %v9477_v32 = vpop.permute.xlu1 %9476  ;;  %7285 = vmatprep.mubr.f32.mxu1 %v6726_v37  ;;  %8558 = vmatmul.mubr.msk.f32.gmra.mrb[130].mxu0 %vm4067_vm13, %v13984_v20  ;;  %v4550_v21 = vld [vmem:[#allocation3 + $0x2b9] sm:$0xff] }
 0x63a   :  { %v9479_v47 = vunpack.i.h.bf16 %v9477_v32  ;;  %v9478_v57 = vunpack.i.l.bf16 %v9477_v32  ;;  %v14217_v58 = vpop.f32.mrb[26].mxu1  ;;  %7286 = vmatmul.mubr.f32.gmra.mrb[86].mxu1 %v6534_v22  ;;  %8560 = vmatprep.mubr.msk.f32.mxu0 %vm4067_vm13, %v13995_v18  ;;  %v4294_v37 = vld [vmem:[#allocation3 + $0x2a0] sm:$0xff]  ;;  %v4818_v22 = vld [vmem:[#allocation3 + $0x352] sm:$0xff] }
 0x63b   :  { %v7139_v24 = vpop.f32.mrb[27].mxu1 }
 0x63c   :  { %v9492_v12 = vpop.permute.xlu0 %9491  ;;  %v6663_v29 = vsel %vm6419_vm15, %v6599_v1, %v9478_v57  ;;  %v6470_v20 = vsel %vm6419_vm15, %v6405_v35, %v9479_v47 }
 0x63d   :  { %v9487_v8 = vpop.permute.xlu1 %9486  ;;  %v6727_v53 = vsel %vm6484_vm0, %v6663_v29, %v9483_v10  ;;  %8561 = vmatmul.mubr.msk.f32.gmra.mrb[132].mxu0 %vm4067_vm13, %v14036_v33  ;;  %v6535_v18 = vsel %vm6484_vm0, %v6470_v20, %v9484_v11  ;;  %v9494_v27 = vunpack.i.h.bf16 %v9492_v12  ;;  %v9493_v34 = vunpack.i.l.bf16 %v9492_v12  ;;  %v4551_v20 = vld [vmem:[#allocation3 + $0x2c1] sm:$0xff] }
 0x63e   :  { %v9489_v7 = vunpack.i.h.bf16 %v9487_v8  ;;  %v9488_v9 = vunpack.i.l.bf16 %v9487_v8  ;;  %7290 = vmatprep.mubr.f32.mxu1 %v6727_v53  ;;  %8563 = vmatprep.mubr.msk.f32.mxu0 %vm4067_vm13, %v14047_v4  ;;  %v4295_v8 = vld [vmem:[#allocation3 + $0x2a8] sm:$0xff] }
 0x63f   :  { %7291 = vmatmul.mubr.f32.gmra.mrb[88].mxu1 %v6535_v18 }
 0x640   :  { %v9502_v6 = vpop.permute.xlu0 %9501  ;;  %v6600_v50 = vsel %vm4067_vm13, %v4549_v44, %v9488_v9  ;;  %v6406_v3 = vsel %vm4067_vm13, %v4293_v2, %v9489_v7 }
 0x641   :  { %v9497_v49 = vpop.permute.xlu1 %9496  ;;  %v14233_v33 = vpop.f32.mrb[28].mxu1  ;;  %8564 = vmatmul.mubr.msk.f32.gmra.mrb[134].mxu0 %vm4067_vm13, %v14085_v56  ;;  %v9504_v4 = vunpack.i.h.bf16 %v9502_v6  ;;  %v9503_v15 = vunpack.i.l.bf16 %v9502_v6  ;;  %v6664_v60 = vsel %vm6419_vm15, %v6600_v50, %v9493_v34  ;;  %v6471_v30 = vsel %vm6419_vm15, %v6406_v3, %v9494_v27 }
 0x642   :  { %v9499_v36 = vunpack.i.h.bf16 %v9497_v49  ;;  %v9498_v0 = vunpack.i.l.bf16 %v9497_v49  ;;  %v7144_v25 = vpop.f32.mrb[29].mxu1  ;;  %8566 = vmatprep.mubr.msk.f32.mxu0 %vm4067_vm13, %v14098_v54 }
 0x643   :  { %v6601_v10 = vsel %vm4067_vm13, %v4550_v21, %v9503_v15  ;;  %v6407_v32 = vsel %vm4067_vm13, %v4294_v37, %v9504_v4 }
 0x644   :  { %v9512_v41 = vpop.permute.xlu0 %9511  ;;  %v6728_v59 = vsel %vm6484_vm0, %v6664_v60, %v9498_v0  ;;  %v6536_v39 = vsel %vm6484_vm0, %v6471_v30, %v9499_v36 }
 0x645   :  { %v9514_v42 = vunpack.i.h.bf16 %v9512_v41  ;;  %v9513_v56 = vunpack.i.l.bf16 %v9512_v41  ;;  %v9507_v48 = vpop.permute.xlu1 %9506  ;;  %7295 = vmatprep.mubr.f32.mxu1 %v6728_v59  ;;  %8567 = vmatmul.mubr.msk.f32.gmra.mrb[136].mxu0 %vm4067_vm13, %v14126_v40  ;;  %v4552_v59 = vld [vmem:[#allocation3 + $0x2d1] sm:$0xff] }
 0x646   :  { %v9509_v54 = vunpack.i.h.bf16 %v9507_v48  ;;  %v9508_v38 = vunpack.i.l.bf16 %v9507_v48  ;;  %v14245_v13 = vpop.f32.mrb[30].mxu1  ;;  %7296 = vmatmul.mubr.f32.gmra.mrb[90].mxu1 %v6536_v39  ;;  %8569 = vmatprep.mubr.msk.f32.mxu0 %vm4067_vm13, %v4817_v45  ;;  %v4296_v39 = vld [vmem:[#allocation3 + $0x2b8] sm:$0xff] }
 0x647   :  { %v7149_v11 = vpop.f32.mrb[31].mxu1 }
 0x648   :  { %v9522_v47 = vpop.permute.xlu0 %9521  ;;  %v6665_v57 = vsel %vm6419_vm15, %v6601_v10, %v9508_v38  ;;  %v6472_v40 = vsel %vm6419_vm15, %v6407_v32, %v9509_v54 }
 0x649   :  { %v9517_v5 = vpop.permute.xlu1 %9516  ;;  %v6729_v16 = vsel %vm6484_vm0, %v6665_v57, %v9513_v56  ;;  %v6537_v24 = vsel %vm6484_vm0, %v6472_v40, %v9514_v42  ;;  %8570 = vmatmul.mubr.msk.f32.gmra.mrb[138].mxu0 %vm4067_vm13, %v4818_v22  ;;  %v9524_v12 = vunpack.i.h.bf16 %v9522_v47  ;;  %v9523_v29 = vunpack.i.l.bf16 %v9522_v47  ;;  %v4553_v40 = vld [vmem:[#allocation3 + $0x2d9] sm:$0xff] }
 0x64a   :  { %v9519_v1 = vunpack.i.h.bf16 %v9517_v5  ;;  %v9518_v35 = vunpack.i.l.bf16 %v9517_v5  ;;  %7300 = vmatprep.mubr.f32.mxu1 %v6729_v16  ;;  %v4297_v5 = vld [vmem:[#allocation3 + $0x2c0] sm:$0xff]  ;;  %8588 = vmatprep.mubr.msk.f32.mxu0 %vm9780_vm1, %v15022_v31 }
 0x64b   :  { %7301 = vmatmul.mubr.f32.gmra.mrb[92].mxu1 %v6537_v24 }
 0x64c   :  { %v9532_v53 = vpop.permute.xlu0 %9531  ;;  %v6602_v18 = vsel %vm4067_vm13, %v4551_v20, %v9518_v35  ;;  %v6408_v7 = vsel %vm4067_vm13, %v4295_v8, %v9519_v1 }
 0x64d   :  { %v9527_v9 = vpop.permute.xlu1 %9526  ;;  %v14257_v27 = vpop.f32.mrb[32].mxu1  ;;  %v9534_v6 = vunpack.i.h.bf16 %v9532_v53  ;;  %v9533_v50 = vunpack.i.l.bf16 %v9532_v53  ;;  %v6666_v3 = vsel %vm6419_vm15, %v6602_v18, %v9523_v29  ;;  %v6473_v49 = vsel %vm6419_vm15, %v6408_v7, %v9524_v12 }
 0x64e   :  { %v9529_v34 = vunpack.i.h.bf16 %v9527_v9  ;;  %v9528_v44 = vunpack.i.l.bf16 %v9527_v9  ;;  %v7154_v2 = vpop.f32.mrb[33].mxu1 }
 0x64f   :  { %v6603_v56 = vsel %vm4067_vm13, %v4552_v59, %v9533_v50  ;;  %v6409_v48 = vsel %vm4067_vm13, %v4296_v39, %v9534_v6 }
 0x650   :  { %v9542_v36 = vpop.permute.xlu0 %9541  ;;  %v6730_v0 = vsel %vm6484_vm0, %v6666_v3, %v9528_v44  ;;  %v6538_v25 = vsel %vm6484_vm0, %v6473_v49, %v9529_v34 }
 0x651   :  { %v9544_v4 = vunpack.i.h.bf16 %v9542_v36  ;;  %v9543_v15 = vunpack.i.l.bf16 %v9542_v36  ;;  %v9537_v60 = vpop.permute.xlu1 %9536  ;;  %7305 = vmatprep.mubr.f32.mxu1 %v6730_v0 }
 0x652   :  { %v9539_v30 = vunpack.i.h.bf16 %v9537_v60  ;;  %v9538_v45 = vunpack.i.l.bf16 %v9537_v60  ;;  %v14263_v41 = vpop.f32.mrb[34].mxu1  ;;  %7306 = vmatmul.mubr.f32.gmra.mrb[94].mxu1 %v6538_v25  ;;  %v4554_v25 = vld [vmem:[#allocation3 + $0x2e9] sm:$0xff] }
 0x653   :  { %v7159_v42 = vpop.f32.mrb[35].mxu1 }
 0x654   :  { %v9552_v54 = vpop.permute.xlu0 %9551  ;;  %v6667_v38 = vsel %vm6419_vm15, %v6603_v56, %v9538_v45  ;;  %v6474_v21 = vsel %vm6419_vm15, %v6409_v48, %v9539_v30 }
 0x655   :  { %v9547_v37 = vpop.permute.xlu1 %9546  ;;  %v6731_v22 = vsel %vm6484_vm0, %v6667_v38, %v9543_v15  ;;  %v6539_v11 = vsel %vm6484_vm0, %v6474_v21, %v9544_v4  ;;  %v9554_v47 = vunpack.i.h.bf16 %v9552_v54  ;;  %v9553_v57 = vunpack.i.l.bf16 %v9552_v54  ;;  %v4298_v4 = vld [vmem:[#allocation3 + $0x2d0] sm:$0xff] }
 0x656   :  { %v9549_v10 = vunpack.i.h.bf16 %v9547_v37  ;;  %v9548_v32 = vunpack.i.l.bf16 %v9547_v37  ;;  %7310 = vmatprep.mubr.f32.mxu1 %v6731_v22  ;;  %v4555_v22 = vld [vmem:[#allocation3 + $0x2f1] sm:$0xff] }
 0x657   :  { %7311 = vmatmul.mubr.f32.gmra.mrb[96].mxu1 %v6539_v11  ;;  %v4299_v11 = vld [vmem:[#allocation3 + $0x2d8] sm:$0xff] }
 0x658   :  { %v9562_v16 = vpop.permute.xlu0 %9561  ;;  %v6604_v24 = vsel %vm4067_vm13, %v4553_v40, %v9548_v32  ;;  %v6410_v1 = vsel %vm4067_vm13, %v4297_v5, %v9549_v10 }
 0x659   :  { %v9557_v35 = vpop.permute.xlu1 %9556  ;;  %v14273_v12 = vpop.f32.mrb[36].mxu1  ;;  %v9564_v53 = vunpack.i.h.bf16 %v9562_v16  ;;  %v9563_v18 = vunpack.i.l.bf16 %v9562_v16  ;;  %v6668_v7 = vsel %vm6419_vm15, %v6604_v24, %v9553_v57  ;;  %v6475_v9 = vsel %vm6419_vm15, %v6410_v1, %v9554_v47 }
 0x65a   :  { %v9559_v29 = vunpack.i.h.bf16 %v9557_v35  ;;  %v9558_v20 = vunpack.i.l.bf16 %v9557_v35  ;;  %v7164_v8 = vpop.f32.mrb[37].mxu1 }
 0x65b   :  { %v6605_v60 = vsel %vm4067_vm13, %v4554_v25, %v9563_v18  ;;  %v6411_v30 = vsel %vm4067_vm13, %v4298_v4, %v9564_v53 }
 0x65c   :  { %v9572_v34 = vpop.permute.xlu0 %9571  ;;  %v6732_v44 = vsel %vm6484_vm0, %v6668_v7, %v9558_v20  ;;  %v6540_v2 = vsel %vm6484_vm0, %v6475_v9, %v9559_v29 }
 0x65d   :  { %v9574_v6 = vunpack.i.h.bf16 %v9572_v34  ;;  %v9573_v50 = vunpack.i.l.bf16 %v9572_v34  ;;  %v9567_v3 = vpop.permute.xlu1 %9566  ;;  %7315 = vmatprep.mubr.f32.mxu1 %v6732_v44 }
 0x65e   :  { %v9569_v49 = vunpack.i.h.bf16 %v9567_v3  ;;  %v9568_v36 = vunpack.i.l.bf16 %v9567_v3  ;;  %v14279_v0 = vpop.f32.mrb[38].mxu1  ;;  %7316 = vmatmul.mubr.f32.gmra.mrb[98].mxu1 %v6540_v2  ;;  %v4556_v3 = vld [vmem:[#allocation3 + $0x301] sm:$0xff] }
 0x65f   :  { %v7169_v15 = vpop.f32.mrb[39].mxu1 }
 0x660   :  { %v9582_v45 = vpop.permute.xlu0 %9581  ;;  %v6669_v59 = vsel %vm6419_vm15, %v6605_v60, %v9568_v36  ;;  %v6476_v39 = vsel %vm6419_vm15, %v6411_v30, %v9569_v49  ;;  %v4300_v49 = vld [vmem:[#allocation3 + $0x2e8] sm:$0xff] }
 0x661   :  { %v9577_v42 = vpop.permute.xlu1 %9576  ;;  %v6733_v56 = vsel %vm6484_vm0, %v6669_v59, %v9573_v50  ;;  %v6541_v48 = vsel %vm6484_vm0, %v6476_v39, %v9574_v6  ;;  %v9584_v21 = vunpack.i.h.bf16 %v9582_v45  ;;  %v9583_v37 = vunpack.i.l.bf16 %v9582_v45 }
 0x662   :  { %v9579_v54 = vunpack.i.h.bf16 %v9577_v42  ;;  %v9578_v38 = vunpack.i.l.bf16 %v9577_v42  ;;  %7320 = vmatprep.mubr.f32.mxu1 %v6733_v56 }
 0x663   :  { %7321 = vmatmul.mubr.f32.gmra.mrb[100].mxu1 %v6541_v48 }
 0x664   :  { %v9592_v10 = vpop.permute.xlu0 %9591  ;;  %v6606_v32 = vsel %vm4067_vm13, %v4555_v22, %v9578_v38  ;;  %v6412_v47 = vsel %vm4067_vm13, %v4299_v11, %v9579_v54  ;;  %v4557_v54 = vld [vmem:[#allocation3 + $0x309] sm:$0xff] }
 0x665   :  { %v9587_v57 = vpop.permute.xlu1 %9586  ;;  %v9594_v16 = vunpack.i.h.bf16 %v9592_v10  ;;  %v9593_v24 = vunpack.i.l.bf16 %v9592_v10  ;;  %v6670_v1 = vsel %vm6419_vm15, %v6606_v32, %v9583_v37  ;;  %v6477_v35 = vsel %vm6419_vm15, %v6412_v47, %v9584_v21  ;;  %v4301_v38 = vld [vmem:[#allocation3 + $0x2f0] sm:$0xff] }
 0x666   :  { %v9589_v40 = vunpack.i.h.bf16 %v9587_v57  ;;  %v9588_v5 = vunpack.i.l.bf16 %v9587_v57 }
 0x667   :  { %v6607_v36 = vsel %vm4067_vm13, %v4556_v3, %v9593_v24  ;;  %v6413_v25 = vsel %vm4067_vm13, %v4300_v49, %v9594_v16 }
 0x668   :  { %v9602_v29 = vpop.permute.xlu0 %9601  ;;  %v14291_v20 = vpop.f32.mrb[40].mxu1  ;;  %v6734_v8 = vsel %vm6484_vm0, %v6670_v1, %v9588_v5  ;;  %v6542_v53 = vsel %vm6484_vm0, %v6477_v35, %v9589_v40 }
 0x669   :  { %v9604_v18 = vunpack.i.h.bf16 %v9602_v29  ;;  %v9603_v7 = vunpack.i.l.bf16 %v9602_v29  ;;  %v9597_v9 = vpop.permute.xlu1 %9596  ;;  %v14295_v34 = vpop.f32.mrb[64].mxu0  ;;  %7325 = vmatprep.mubr.f32.mxu1 %v6734_v8 }
 0x66a   :  { %v9599_v44 = vunpack.i.h.bf16 %v9597_v9  ;;  %v9598_v2 = vunpack.i.l.bf16 %v9597_v9  ;;  %v7044_v6 = vpop.f32.mrb[65].mxu0  ;;  %v7174_v50 = vpop.f32.mrb[41].mxu1  ;;  %7326 = vmatmul.mubr.f32.gmra.mrb[102].mxu1 %v6542_v53 }
 0x66b   :  { %v4558_v6 = vld [vmem:[#allocation3 + $0x319] sm:$0xff] }
 0x66c   :  { %v9612_v4 = vpop.permute.xlu0 %9611  ;;  %v6671_v15 = vsel %vm6419_vm15, %v6607_v36, %v9598_v2  ;;  %v6478_v60 = vsel %vm6419_vm15, %v6413_v25, %v9599_v44  ;;  %v4302_v50 = vld [vmem:[#allocation3 + $0x300] sm:$0xff] }
 0x66d   :  { %v9607_v30 = vpop.permute.xlu1 %9606  ;;  %v6735_v45 = vsel %vm6484_vm0, %v6671_v15, %v9603_v7  ;;  %v6543_v59 = vsel %vm6484_vm0, %v6478_v60, %v9604_v18  ;;  %v9614_v56 = vunpack.i.h.bf16 %v9612_v4  ;;  %v9613_v48 = vunpack.i.l.bf16 %v9612_v4 }
 0x66e   :  { %v9609_v39 = vunpack.i.h.bf16 %v9607_v30  ;;  %v9608_v42 = vunpack.i.l.bf16 %v9607_v30  ;;  %7330 = vmatprep.mubr.f32.mxu1 %v6735_v45 }
 0x66f   :  { %7331 = vmatmul.mubr.f32.gmra.mrb[104].mxu1 %v6543_v59 }
 0x670   :  { %v9622_v21 = vpop.permute.xlu0 %9621  ;;  %v14303_v37 = vpop.f32.mrb[66].mxu0  ;;  %v6608_v22 = vsel %vm4067_vm13, %v4557_v54, %v9608_v42  ;;  %v6414_v11 = vsel %vm4067_vm13, %v4301_v38, %v9609_v39 }
 0x671   :  { %v9617_v10 = vpop.permute.xlu1 %9616  ;;  %v7049_v32 = vpop.f32.mrb[67].mxu0  ;;  %v9624_v40 = vunpack.i.h.bf16 %v9622_v21  ;;  %v9623_v5 = vunpack.i.l.bf16 %v9622_v21  ;;  %v6672_v16 = vsel %vm6419_vm15, %v6608_v22, %v9613_v48  ;;  %v6479_v24 = vsel %vm6419_vm15, %v6414_v11, %v9614_v56  ;;  %v4559_v56 = vld [vmem:[#allocation3 + $0x321] sm:$0xff] }
 0x672   :  { %v9619_v47 = vunpack.i.h.bf16 %v9617_v10  ;;  %v9618_v57 = vunpack.i.l.bf16 %v9617_v10  ;;  %v4303_v48 = vld [vmem:[#allocation3 + $0x308] sm:$0xff] }
 0x673   :  { %v6609_v3 = vsel %vm4067_vm13, %v4558_v6, %v9623_v5  ;;  %v6415_v49 = vsel %vm4067_vm13, %v4302_v50, %v9624_v40 }
 0x674   :  { %v9632_v1 = vpop.permute.xlu0 %9631  ;;  %v6736_v35 = vsel %vm6484_vm0, %v6672_v16, %v9618_v57  ;;  %v6544_v29 = vsel %vm6484_vm0, %v6479_v24, %v9619_v47  ;;  %v7951_v24 = vld [vmem:[%s14607_s5] sm:$0xff] }
 0x675   :  { %v9634_v8 = vunpack.i.h.bf16 %v9632_v1  ;;  %v9633_v53 = vunpack.i.l.bf16 %v9632_v1  ;;  %v9627_v18 = vpop.permute.xlu1 %9626  ;;  %v14311_v7 = vpop.f32.mrb[42].mxu1  ;;  %7335 = vmatprep.mubr.f32.mxu1 %v6736_v35  ;;  %v7952_v1 = vld [vmem:[%s14607_s5 + $0x8] sm:$0xff] }
 0x676   :  { %v9629_v9 = vunpack.i.h.bf16 %v9627_v18  ;;  %v9628_v44 = vunpack.i.l.bf16 %v9627_v18  ;;  %v7179_v2 = vpop.f32.mrb[43].mxu1  ;;  %7336 = vmatmul.mubr.f32.gmra.mrb[106].mxu1 %v6544_v29 }
 0x678   :  { %v9642_v36 = vpop.permute.xlu0 %9641  ;;  %v6673_v25 = vsel %vm6419_vm15, %v6609_v3, %v9628_v44  ;;  %v6480_v4 = vsel %vm6419_vm15, %v6415_v49, %v9629_v9  ;;  %v4560_v49 = vld [vmem:[#allocation3 + $0x331] sm:$0xff] }
 0x679   :  { %v9637_v15 = vpop.permute.xlu1 %9636  ;;  %v6737_v60 = vsel %vm6484_vm0, %v6673_v25, %v9633_v53  ;;  %v6545_v30 = vsel %vm6484_vm0, %v6480_v4, %v9634_v8  ;;  %v9644_v39 = vunpack.i.h.bf16 %v9642_v36  ;;  %v9643_v42 = vunpack.i.l.bf16 %v9642_v36  ;;  %v4304_v36 = vld [vmem:[#allocation3 + $0x318] sm:$0xff] }
 0x67a   :  { %v9639_v45 = vunpack.i.h.bf16 %v9637_v15  ;;  %v9638_v59 = vunpack.i.l.bf16 %v9637_v15  ;;  %7340 = vmatprep.mubr.f32.mxu1 %v6737_v60  ;;  %v8658_v53 = vpack.c.bf16 %v7952_v1, %v7951_v24 }
 0x67b   :  { %7341 = vmatmul.mubr.f32.gmra.mrb[108].mxu1 %v6545_v30 }
 0x67c   :  { %v9652_v54 = vpop.permute.xlu0 %9651  ;;  %v14319_v38 = vpop.f32.mrb[68].mxu0  ;;  %v6610_v21 = vsel %vm4067_vm13, %v4559_v56, %v9638_v59  ;;  %v6416_v22 = vsel %vm4067_vm13, %v4303_v48, %v9639_v45  ;;  %8659 = vmatpush3.bf16.msra.mxu0 %v8658_v53 }
 0x67d   :  { %v9647_v11 = vpop.permute.xlu1 %9646  ;;  %v7054_v10 = vpop.f32.mrb[69].mxu0  ;;  %v9654_v57 = vunpack.i.h.bf16 %v9652_v54  ;;  %v9653_v40 = vunpack.i.l.bf16 %v9652_v54  ;;  %v6674_v5 = vsel %vm6419_vm15, %v6610_v21, %v9643_v42  ;;  %v6481_v16 = vsel %vm6419_vm15, %v6416_v22, %v9644_v39  ;;  %8660 = vmatprep.subr.bf16.mxu0 %v9777_v26  ;;  %v4561_v21 = vld [vmem:[#allocation3 + $0x339] sm:$0xff] }
 0x67e   :  { %v9649_v32 = vunpack.i.h.bf16 %v9647_v11  ;;  %v9648_v47 = vunpack.i.l.bf16 %v9647_v11  ;;  %v4305_v22 = vld [vmem:[#allocation3 + $0x320] sm:$0xff] }
 0x67f   :  { %v6611_v25 = vsel %vm4067_vm13, %v4560_v49, %v9653_v40  ;;  %v6417_v4 = vsel %vm4067_vm13, %v4304_v36, %v9654_v57 }
 0x680   :  { %v9662_v35 = vpop.permute.xlu0 %9661  ;;  %v6738_v29 = vsel %vm6484_vm0, %v6674_v5, %v9648_v47  ;;  %v6546_v8 = vsel %vm6484_vm0, %v6481_v16, %v9649_v32 }
 0x681   :  { %v9664_v18 = vunpack.i.h.bf16 %v9662_v35  ;;  %v9663_v9 = vunpack.i.l.bf16 %v9662_v35  ;;  %v9657_v44 = vpop.permute.xlu1 %9656  ;;  %v14333_v2 = vpop.f32.mrb[44].mxu1  ;;  %7345 = vmatprep.mubr.f32.mxu1 %v6738_v29 }
 0x682   :  { %v9659_v6 = vunpack.i.h.bf16 %v9657_v44  ;;  %v9658_v50 = vunpack.i.l.bf16 %v9657_v44  ;;  %v7184_v3 = vpop.f32.mrb[45].mxu1  ;;  %7346 = vmatmul.mubr.f32.gmra.mrb[110].mxu1 %v6546_v8 }
 0x683   :  { %v14355_v3 = vld [vmem:[%s14606_s4] ss:$0 sm:$0xff] }
 0x684   :  { %v9672_v15 = vpop.permute.xlu0 %9671  ;;  %v6675_v60 = vsel %vm6419_vm15, %v6611_v25, %v9658_v50  ;;  %v6482_v30 = vsel %vm6419_vm15, %v6417_v4, %v9659_v6  ;;  %v7048_v49 = vadd.f32 %v14355_v3, %v14303_v37  ;;  %v7043_v36 = vadd.f32 %v14355_v3, %v14295_v34 }
 0x685   :  { %v9667_v45 = vpop.permute.xlu1 %9666  ;;  %v6739_v59 = vsel %vm6484_vm0, %v6675_v60, %v9663_v9  ;;  %v6547_v39 = vsel %vm6484_vm0, %v6482_v30, %v9664_v18  ;;  %v9674_v48 = vunpack.i.h.bf16 %v9672_v15  ;;  %v9673_v54 = vunpack.i.l.bf16 %v9672_v15  ;;  %v7953_v30 = vld [vmem:[%s14607_s5 + $0x10] sm:$0xff] }
 0x686   :  { %v9669_v42 = vunpack.i.h.bf16 %v9667_v45  ;;  %v9668_v56 = vunpack.i.l.bf16 %v9667_v45  ;;  %7350 = vmatprep.mubr.f32.mxu1 %v6739_v59  ;;  %v7954_v45 = vld [vmem:[%s14607_s5 + $0x18] sm:$0xff]  ;;  %v7053_v34 = vadd.f32 %v14355_v3, %v14319_v38 }
 0x687   :  { %7351 = vmatmul.mubr.f32.gmra.mrb[112].mxu1 %v6547_v39 }
 0x688   :  { %v14342_v11 = vpop.f32.mrb[46].mxu1  ;;  %v6612_v10 = vsel %vm4067_vm13, %v4561_v21, %v9668_v56  ;;  %v6418_v32 = vsel %vm4067_vm13, %v4305_v22, %v9669_v42  ;;  %v8661_v42 = vpack.c.bf16 %v7954_v45, %v7953_v30 }
 0x689   :  { %v9677_v47 = vpop.permute.xlu1 %9676  ;;  %v7057_v57 = vpop.f32.mrb[70].mxu0  ;;  %v6676_v1 = vsel %vm6419_vm15, %v6612_v10, %v9673_v54  ;;  %v6483_v35 = vsel %vm6419_vm15, %v6418_v32, %v9674_v48 }
 0x68a   :  { %v9679_v40 = vunpack.i.h.bf16 %v9677_v47  ;;  %v9678_v5 = vunpack.i.l.bf16 %v9677_v47  ;;  %v7059_v16 = vpop.f32.mrb[71].mxu0  ;;  %v7189_v24 = vpop.f32.mrb[47].mxu1  ;;  %v7058_v37 = vadd.f32 %v14355_v3, %v7057_v57  ;;  %8662 = vmatpush3.bf16.msra.mxu0 %v8661_v42 }
 0x68b   :  { %8663 = vmatprep.subr.bf16.mxu0 %v9777_v26 }
 0x68c   :  { %v6740_v29 = vsel %vm6484_vm0, %v6676_v1, %v9678_v5  ;;  %v6548_v8 = vsel %vm6484_vm0, %v6483_v35, %v9679_v40 }
 0x68d   :  { %7355 = vmatprep.mubr.f32.mxu1 %v6740_v29 }
 0x68e   :  { %7356 = vmatmul.mubr.f32.gmra.mrb[114].mxu1 %v6548_v8 }
 0x694   :  { %v14350_v53 = vpop.f32.mrb[48].mxu1 }
 0x695   :  { %v7062_v18 = vpop.f32.mrb[72].mxu0  ;;  %v7194_v9 = vpop.f32.mrb[49].mxu1 }
 0x696   :  { %v7064_v44 = vpop.f32.mrb[73].mxu0  ;;  %v7063_v38 = vadd.f32 %v14355_v3, %v7062_v18 }
 0x69c   :  { %v7067_v6 = vpop.f32.mrb[74].mxu0 }
 0x69d   :  { %v7069_v50 = vpop.f32.mrb[75].mxu0  ;;  %v7068_v57 = vadd.f32 %v14355_v3, %v7067_v6 }
 0x69e   :  { %v7078_v50 = vadd.f32 %v14355_v3, %v14033_v52  ;;  %v7088_v52 = vadd.f32 %v14355_v3, %v14075_v55  ;;  %v7098_v55 = vadd.f32 %v14355_v3, %v14111_v51 }
 0x6a0   :  { %v8478_v25 = vpop.f32.mrb[76].mxu0 }
 0x6a1   :  { %v14361_v4 = vpop.f32.mrb[50].mxu1  ;;  %v7433_v15 = vadd.f32 %v8478_v25, %v7048_v49  ;;  %v7427_v60 = vpop.f32.mrb[77].mxu0 }
 0x6a2   :  { %v7199_v59 = vpop.f32.mrb[51].mxu1  ;;  %v7428_v39 = vadd.f32 %v7427_v60, %v7043_v36  ;;  %v7073_v36 = vadd.f32 %v14355_v3, %v14008_v17  ;;  %v7083_v17 = vadd.f32 %v14355_v3, %v14049_v46  ;;  %v7093_v46 = vadd.f32 %v14355_v3, %v14093_v43 }
 0x6a3   :  { %v7747_v56 = vmax.f32 %v7433_v15, 0.0 }
 0x6a4   :  { %v7746_v48 = vmax.f32 %v7428_v39, 0.0  ;;  %v8481_v54 = vpop.f32.mrb[78].mxu0 }
 0x6a5   :  { %v7811_v21 = vsel %vm6419_vm15, %v7747_v56, 0.0  ;;  %v7443_v22 = vadd.f32 %v8481_v54, %v7058_v37  ;;  %v7437_v10 = vpop.f32.mrb[79].mxu0 }
 0x6a6   :  { %v7810_v32 = vsel %vm6419_vm15, %v7746_v48, 0.0  ;;  %v14375_v47 = vpop.f32.mrb[52].mxu1  ;;  %v7438_v40 = vadd.f32 %v7437_v10, %v7053_v34 }
 0x6a7   :  { %v7812_v5 = vadd.f32 %v7811_v21, %v7810_v32  ;;  %v7204_v16 = vpop.f32.mrb[53].mxu1  ;;  %v7749_v24 = vmax.f32 %v7443_v22, 0.0 }
 0x6a8   :  { %v7748_v1 = vmax.f32 %v7438_v40, 0.0  ;;  %v8484_v35 = vpop.f32.mrb[80].mxu0 }
 0x6a9   :  { %v7453_v29 = vadd.f32 %v8484_v35, %v7068_v57  ;;  %v7447_v8 = vpop.f32.mrb[81].mxu0  ;;  %v7815_v6 = vsel %vm6419_vm15, %v7749_v24, 0.0 }
 0x6aa   :  { %v7813_v9 = vsel %vm6419_vm15, %v7748_v1, 0.0  ;;  %v7448_v44 = vadd.f32 %v7447_v8, %v7063_v38 }
 0x6ab   :  { %v7814_v49 = vadd.f32 %v7813_v9, %v7812_v5  ;;  %v7751_v25 = vmax.f32 %v7453_v29, 0.0 }
 0x6ac   :  { %v7750_v15 = vmax.f32 %v7448_v44, 0.0  ;;  %v8487_v18 = vpop.f32.mrb[82].mxu0 }
 0x6ad   :  { %v7816_v60 = vadd.f32 %v7815_v6, %v7814_v49  ;;  %v14385_v30 = vpop.f32.mrb[54].mxu1  ;;  %v7463_v45 = vadd.f32 %v8487_v18, %v7078_v50  ;;  %v7457_v59 = vpop.f32.mrb[83].mxu0  ;;  %v7819_v34 = vsel %vm6419_vm15, %v7751_v25, 0.0  ;;  %v7103_v6 = vadd.f32 %v14355_v3, %v14133_v19 }
 0x6ae   :  { %v7817_v39 = vsel %vm6419_vm15, %v7750_v15, 0.0  ;;  %v7209_v42 = vpop.f32.mrb[55].mxu1  ;;  %v7458_v37 = vadd.f32 %v7457_v59, %v7073_v36  ;;  %v7108_v36 = vadd.f32 %v14355_v3, %v14147_v63  ;;  %v7118_v63 = vadd.f32 %v14355_v3, %v14170_v61  ;;  %v7955_v61 = vld [vmem:[%s14607_s5 + $0x20] sm:$0xff] }
 0x6af   :  { %v7818_v56 = vadd.f32 %v7817_v39, %v7816_v60  ;;  %v7753_v48 = vmax.f32 %v7463_v45, 0.0  ;;  %v7113_v19 = vadd.f32 %v14355_v3, %v14161_v23  ;;  %v7956_v23 = vld [vmem:[%s14607_s5 + $0x28] sm:$0xff] }
 0x6b0   :  { %v7752_v54 = vmax.f32 %v7458_v37, 0.0  ;;  %v8490_v21 = vpop.f32.mrb[84].mxu0 }
 0x6b1   :  { %v7820_v22 = vadd.f32 %v7819_v34, %v7818_v56  ;;  %v7473_v10 = vadd.f32 %v8490_v21, %v7088_v52  ;;  %v7467_v32 = vpop.f32.mrb[85].mxu0  ;;  %v7823_v24 = vsel %vm6419_vm15, %v7753_v48, 0.0 }
 0x6b2   :  { %v7821_v40 = vsel %vm6419_vm15, %v7752_v54, 0.0  ;;  %v14394_v57 = vpop.f32.mrb[56].mxu1  ;;  %v7468_v5 = vadd.f32 %v7467_v32, %v7083_v17 }
 0x6b3   :  { %v7822_v16 = vadd.f32 %v7821_v40, %v7820_v22  ;;  %v7214_v38 = vpop.f32.mrb[57].mxu1  ;;  %v7755_v1 = vmax.f32 %v7473_v10, 0.0 }
 0x6b4   :  { %v7754_v35 = vmax.f32 %v7468_v5, 0.0  ;;  %v8493_v29 = vpop.f32.mrb[86].mxu0 }
 0x6b5   :  { %v7824_v8 = vadd.f32 %v7823_v24, %v7822_v16  ;;  %v7483_v9 = vadd.f32 %v8493_v29, %v7098_v55  ;;  %v7477_v44 = vpop.f32.mrb[87].mxu0  ;;  %v7827_v43 = vsel %vm6419_vm15, %v7755_v1, 0.0  ;;  %v7128_v55 = vadd.f32 %v14355_v3, %v14192_v14 }
 0x6b6   :  { %v7825_v50 = vsel %vm6419_vm15, %v7754_v35, 0.0  ;;  %v7478_v49 = vadd.f32 %v7477_v44, %v7093_v46  ;;  %v8664_v46 = vpack.c.bf16 %v7956_v23, %v7955_v61  ;;  %v7123_v24 = vadd.f32 %v14355_v3, %v14183_v62 }
 0x6b7   :  { %v7826_v51 = vadd.f32 %v7825_v50, %v7824_v8  ;;  %v7757_v25 = vmax.f32 %v7483_v9, 0.0  ;;  %v7138_v14 = vadd.f32 %v14355_v3, %v14217_v58  ;;  %v7133_v62 = vadd.f32 %v14355_v3, %v14205_v28 }
 0x6b8   :  { %v7756_v15 = vmax.f32 %v7478_v49, 0.0  ;;  %v8496_v18 = vpop.f32.mrb[88].mxu0  ;;  %8665 = vmatpush3.bf16.msra.mxu0 %v8664_v46  ;;  %v7148_v58 = vadd.f32 %v14355_v3, %v14245_v13  ;;  %v7143_v28 = vadd.f32 %v14355_v3, %v14233_v33  ;;  %v7158_v13 = vadd.f32 %v14355_v3, %v14263_v41 }
 0x6b9   :  { %v7828_v60 = vadd.f32 %v7827_v43, %v7826_v51  ;;  %v14407_v45 = vpop.f32.mrb[58].mxu1  ;;  %v7493_v59 = vadd.f32 %v8496_v18, %v7108_v36  ;;  %v7487_v39 = vpop.f32.mrb[89].mxu0  ;;  %v7831_v17 = vsel %vm6419_vm15, %v7757_v25, 0.0  ;;  %8666 = vmatprep.subr.bf16.mxu0 %v9777_v26  ;;  %v7153_v33 = vadd.f32 %v14355_v3, %v14257_v27 }
 0x6ba   :  { %v7829_v42 = vsel %vm6419_vm15, %v7756_v15, 0.0  ;;  %v7219_v37 = vpop.f32.mrb[59].mxu1  ;;  %v7488_v52 = vadd.f32 %v7487_v39, %v7103_v6 }
 0x6bb   :  { %v7830_v56 = vadd.f32 %v7829_v42, %v7828_v60  ;;  %v7759_v34 = vmax.f32 %v7493_v59, 0.0 }
 0x6bc   :  { %v7758_v48 = vmax.f32 %v7488_v52, 0.0  ;;  %v8499_v54 = vpop.f32.mrb[90].mxu0 }
 0x6bd   :  { %v7832_v21 = vadd.f32 %v7831_v17, %v7830_v56  ;;  %v7503_v22 = vadd.f32 %v8499_v54, %v7118_v63  ;;  %v7497_v10 = vpop.f32.mrb[91].mxu0  ;;  %v7835_v1 = vsel %vm6419_vm15, %v7759_v34, 0.0 }
 0x6be   :  { %v7833_v32 = vsel %vm6419_vm15, %v7758_v48, 0.0  ;;  %v14416_v40 = vpop.f32.mrb[60].mxu1  ;;  %v7498_v5 = vadd.f32 %v7497_v10, %v7113_v19 }
 0x6bf   :  { %v7834_v16 = vadd.f32 %v7833_v32, %v7832_v21  ;;  %v7224_v38 = vpop.f32.mrb[61].mxu1  ;;  %v7761_v35 = vmax.f32 %v7503_v22, 0.0 }
 0x6c0   :  { %v7760_v29 = vmax.f32 %v7498_v5, 0.0  ;;  %v8502_v8 = vpop.f32.mrb[92].mxu0 }
 0x6c1   :  { %v7836_v9 = vadd.f32 %v7835_v1, %v7834_v16  ;;  %v7513_v44 = vadd.f32 %v8502_v8, %v7128_v55  ;;  %v7507_v50 = vpop.f32.mrb[93].mxu0  ;;  %v7839_v6 = vsel %vm6419_vm15, %v7761_v35, 0.0  ;;  %v7163_v8 = vadd.f32 %v14355_v3, %v14273_v12 }
 0x6c2   :  { %v7837_v49 = vsel %vm6419_vm15, %v7760_v29, 0.0  ;;  %v7508_v36 = vadd.f32 %v7507_v50, %v7123_v24  ;;  %v7168_v29 = vadd.f32 %v14355_v3, %v14279_v0  ;;  %v7178_v0 = vadd.f32 %v14355_v3, %v14311_v7 }
 0x6c3   :  { %v7838_v51 = vadd.f32 %v7837_v49, %v7836_v9  ;;  %v7763_v43 = vmax.f32 %v7513_v44, 0.0  ;;  %v7173_v12 = vadd.f32 %v14355_v3, %v14291_v20  ;;  %v7188_v7 = vadd.f32 %v14355_v3, %v14342_v11 }
 0x6c4   :  { %v7762_v25 = vmax.f32 %v7508_v36, 0.0  ;;  %v8505_v15 = vpop.f32.mrb[94].mxu0  ;;  %v7183_v20 = vadd.f32 %v14355_v3, %v14333_v2 }
 0x6c5   :  { %v7840_v18 = vadd.f32 %v7839_v6, %v7838_v51  ;;  %v14436_v60 = vpop.f32.mrb[62].mxu1  ;;  %v7523_v59 = vadd.f32 %v8505_v15, %v7138_v14  ;;  %v7517_v39 = vpop.f32.mrb[95].mxu0  ;;  %v7843_v63 = vsel %vm6419_vm15, %v7763_v43, 0.0 }
 0x6c6   :  { %v7841_v42 = vsel %vm6419_vm15, %v7762_v25, 0.0  ;;  %v7229_v26 = vpop.f32.mrb[63].mxu1  ;;  %v7518_v37 = vadd.f32 %v7517_v39, %v7133_v62 }
 0x6c7   :  { %v7842_v52 = vadd.f32 %v7841_v42, %v7840_v18  ;;  %v7765_v56 = vmax.f32 %v7523_v59, 0.0 }
 0x6c8   :  { %v7764_v19 = vmax.f32 %v7518_v37, 0.0  ;;  %v8508_v17 = vpop.f32.mrb[96].mxu0 }
 0x6c9   :  { %v7844_v34 = vadd.f32 %v7843_v63, %v7842_v52  ;;  %v7533_v48 = vadd.f32 %v8508_v17, %v7148_v58  ;;  %v7527_v54 = vpop.f32.mrb[97].mxu0  ;;  %v7847_v61 = vsel %vm6419_vm15, %v7765_v56, 0.0 }
 0x6ca   :  { %v7845_v21 = vsel %vm6419_vm15, %v7764_v19, 0.0  ;;  %v14445_v22 = vpop.f32.mrb[64].mxu1  ;;  %v7528_v10 = vadd.f32 %v7527_v54, %v7143_v28 }
 0x6cb   :  { %v7846_v32 = vadd.f32 %v7845_v21, %v7844_v34  ;;  %v7234_v5 = vpop.f32.mrb[65].mxu1  ;;  %v7767_v23 = vmax.f32 %v7533_v48, 0.0 }
 0x6cc   :  { %v7766_v55 = vmax.f32 %v7528_v10, 0.0  ;;  %v8511_v16 = vpop.f32.mrb[98].mxu0  ;;  %v7198_v5 = vadd.f32 %v14355_v3, %v14361_v4 }
 0x6cd   :  { %v7848_v38 = vadd.f32 %v7847_v61, %v7846_v32  ;;  %v7543_v46 = vadd.f32 %v8511_v16, %v7158_v13  ;;  %v7537_v24 = vpop.f32.mrb[99].mxu0  ;;  %v7851_v27 = vsel %vm6419_vm15, %v7767_v23, 0.0  ;;  %v7957_v16 = vld [vmem:[%s14607_s5 + $0x30] sm:$0xff] }
 0x6ce   :  { %v7849_v1 = vsel %vm6419_vm15, %v7766_v55, 0.0  ;;  %v7538_v35 = vadd.f32 %v7537_v24, %v7153_v33  ;;  %v7193_v33 = vadd.f32 %v14355_v3, %v14350_v53 }
 0x6cf   :  { %v7850_v41 = vadd.f32 %v7849_v1, %v7848_v38  ;;  %v7769_v9 = vmax.f32 %v7543_v46, 0.0  ;;  %v7958_v38 = vld [vmem:[%s14607_s5 + $0x38] sm:$0xff] }
 0x6d0   :  { %v7768_v44 = vmax.f32 %v7538_v35, 0.0  ;;  %v8514_v50 = vpop.f32.mrb[100].mxu0  ;;  %v8667_v35 = vpack.c.bf16 %v7958_v38, %v7957_v16 }
 0x6d1   :  { %v7852_v49 = vadd.f32 %v7851_v27, %v7850_v41  ;;  %v14458_v36 = vpop.f32.mrb[66].mxu1  ;;  %v7553_v14 = vadd.f32 %v8514_v50, %v7168_v29  ;;  %v7547_v51 = vpop.f32.mrb[101].mxu0  ;;  %v7855_v15 = vsel %vm6419_vm15, %v7769_v9, 0.0  ;;  %v7203_v9 = vadd.f32 %v14355_v3, %v14375_v47 }
 0x6d2   :  { %v7853_v62 = vsel %vm6419_vm15, %v7768_v44, 0.0  ;;  %v7239_v6 = vpop.f32.mrb[67].mxu1  ;;  %v7548_v43 = vadd.f32 %v7547_v51, %v7163_v8  ;;  %v7208_v8 = vadd.f32 %v14355_v3, %v14385_v30  ;;  %8668 = vmatpush3.bf16.msra.mxu0 %v8667_v35  ;;  %v7218_v30 = vadd.f32 %v14355_v3, %v14407_v45 }
 0x6d3   :  { %v7854_v25 = vadd.f32 %v7853_v62, %v7852_v49  ;;  %v7771_v18 = vmax.f32 %v7553_v14, 0.0  ;;  %v7213_v47 = vadd.f32 %v14355_v3, %v14394_v57  ;;  %v7228_v45 = vadd.f32 %v14355_v3, %v14436_v60 }
 0x6d4   :  { %v7770_v59 = vmax.f32 %v7548_v43, 0.0  ;;  %v8517_v39 = vpop.f32.mrb[102].mxu0  ;;  %v7223_v57 = vadd.f32 %v14355_v3, %v14416_v40  ;;  %v7233_v60 = vadd.f32 %v14355_v3, %v14445_v22 }
 0x6d5   :  { %v7856_v42 = vadd.f32 %v7855_v15, %v7854_v25  ;;  %v7563_v26 = vadd.f32 %v8517_v39, %v7178_v0  ;;  %v7557_v37 = vpop.f32.mrb[103].mxu0  ;;  %v7859_v19 = vsel %vm6419_vm15, %v7771_v18, 0.0 }
 0x6d6   :  { %v7857_v58 = vsel %vm6419_vm15, %v7770_v59, 0.0  ;;  %v14467_v52 = vpop.f32.mrb[68].mxu1  ;;  %v7558_v28 = vadd.f32 %v7557_v37, %v7173_v12 }
 0x6d7   :  { %v7858_v63 = vadd.f32 %v7857_v58, %v7856_v42  ;;  %v7244_v56 = vpop.f32.mrb[69].mxu1  ;;  %v7773_v17 = vmax.f32 %v7563_v26, 0.0  ;;  %v7243_v35 = vadd.f32 %v14355_v3, %v14467_v52 }
 0x6d8   :  { %v7772_v34 = vmax.f32 %v7558_v28, 0.0  ;;  %v8520_v48 = vpop.f32.mrb[104].mxu0 }
 0x6d9   :  { %v7860_v54 = vadd.f32 %v7859_v19, %v7858_v63  ;;  %v7573_v21 = vadd.f32 %v8520_v48, %v7188_v7  ;;  %v7567_v10 = vpop.f32.mrb[105].mxu0  ;;  %v7863_v2 = vsel %vm6419_vm15, %v7773_v17, 0.0 }
 0x6da   :  { %v7861_v13 = vsel %vm6419_vm15, %v7772_v34, 0.0  ;;  %v7568_v32 = vadd.f32 %v7567_v10, %v7183_v20 }
 0x6db   :  { %v7862_v11 = vadd.f32 %v7861_v13, %v7860_v54  ;;  %v7775_v61 = vmax.f32 %v7573_v21, 0.0 }
 0x6dc   :  { %v7774_v23 = vmax.f32 %v7568_v32, 0.0  ;;  %v8523_v55 = vpop.f32.mrb[106].mxu0  ;;  %v7238_v32 = vadd.f32 %v14355_v3, %v14458_v36 }
 0x6dd   :  { %v7864_v46 = vadd.f32 %v7863_v2, %v7862_v11  ;;  %v7247_v24 = vpop.f32.mrb[70].mxu1  ;;  %v7583_v4 = vadd.f32 %v8523_v55, %v7198_v5  ;;  %v7577_v1 = vpop.f32.mrb[107].mxu0  ;;  %v7867_v44 = vsel %vm6419_vm15, %v7775_v61, 0.0 }
 0x6de   :  { %v7865_v53 = vsel %vm6419_vm15, %v7774_v23, 0.0  ;;  %v7249_v29 = vpop.f32.mrb[71].mxu1  ;;  %v7578_v41 = vadd.f32 %v7577_v1, %v7193_v33 }
 0x6df   :  { %v7866_v27 = vadd.f32 %v7865_v53, %v7864_v46  ;;  %v7777_v50 = vmax.f32 %v7583_v4, 0.0  ;;  %v7248_v4 = vadd.f32 %v14355_v3, %v7247_v24 }
 0x6e0   :  { %v7776_v49 = vmax.f32 %v7578_v41, 0.0  ;;  %v8526_v14 = vpop.f32.mrb[108].mxu0 }
 0x6e1   :  { %v7868_v51 = vadd.f32 %v7867_v44, %v7866_v27  ;;  %v7593_v62 = vadd.f32 %v8526_v14, %v7208_v8  ;;  %v7587_v6 = vpop.f32.mrb[109].mxu0  ;;  %v7871_v59 = vsel %vm6419_vm15, %v7777_v50, 0.0 }
 0x6e2   :  { %v7869_v43 = vsel %vm6419_vm15, %v7776_v49, 0.0  ;;  %v7252_v0 = vpop.f32.mrb[72].mxu1  ;;  %v7588_v25 = vadd.f32 %v7587_v6, %v7203_v9 }
 0x6e3   :  { %v7870_v12 = vadd.f32 %v7869_v43, %v7868_v51  ;;  %v7779_v15 = vmax.f32 %v7593_v62, 0.0  ;;  %v7254_v18 = vpop.f32.mrb[73].mxu1  ;;  %v7253_v24 = vadd.f32 %v14355_v3, %v7252_v0 }
 0x6e4   :  { %v7778_v39 = vmax.f32 %v7588_v25, 0.0  ;;  %v8529_v42 = vpop.f32.mrb[110].mxu0 }
 0x6e5   :  { %v14498_v26 = vadd.f32 %v7871_v59, %v7870_v12  ;;  %v7880_v37 = vsel %vm6419_vm15, %v7779_v15, 0.0  ;;  %v7603_v58 = vadd.f32 %v8529_v42, %v7218_v30  ;;  %v7597_v28 = vpop.f32.mrb[111].mxu0 }
 0x6e6   :  { %v7879_v7 = vsel %vm6419_vm15, %v7778_v39, 0.0  ;;  %v7598_v63 = vadd.f32 %v7597_v28, %v7213_v47 }
 0x6e7   :  { %v7881_v56 = vadd.f32 %v7880_v37, %v7879_v7  ;;  %v7781_v20 = vmax.f32 %v7603_v58, 0.0 }
 0x6e8   :  { %v7780_v19 = vmax.f32 %v7598_v63, 0.0  ;;  %v8532_v17 = vpop.f32.mrb[112].mxu0 }
 0x6e9   :  { %v7257_v34 = vpop.f32.mrb[74].mxu1  ;;  %v7613_v48 = vadd.f32 %v8532_v17, %v7228_v45  ;;  %v7607_v54 = vpop.f32.mrb[113].mxu0  ;;  %v7884_v11 = vsel %vm6419_vm15, %v7781_v20, 0.0 }
 0x6ea   :  { %v7882_v21 = vsel %vm6419_vm15, %v7780_v19, 0.0  ;;  %v7259_v10 = vpop.f32.mrb[75].mxu1  ;;  %v7608_v13 = vadd.f32 %v7607_v54, %v7223_v57  ;;  %v7258_v49 = vadd.f32 %v14355_v3, %v7257_v34 }
 0x6eb   :  { %v7883_v5 = vadd.f32 %v7882_v21, %v7881_v56  ;;  %v7783_v40 = vmax.f32 %v7613_v48, 0.0 }
 0x6ec   :  { %v7782_v33 = vmax.f32 %v7608_v13, 0.0  ;;  %v8535_v2 = vpop.f32.mrb[114].mxu0 }
 0x6ed   :  { %v7885_v61 = vadd.f32 %v7884_v11, %v7883_v5  ;;  %v7623_v23 = vadd.f32 %v8535_v2, %v7238_v32  ;;  %v7617_v55 = vpop.f32.mrb[115].mxu0  ;;  %v7888_v22 = vsel %vm6419_vm15, %v7783_v40, 0.0 }
 0x6ee   :  { %v7886_v16 = vsel %vm6419_vm15, %v7782_v33, 0.0  ;;  %v7262_v38 = vpop.f32.mrb[76].mxu1  ;;  %v7618_v46 = vadd.f32 %v7617_v55, %v7233_v60 }
 0x6ef   :  { %v7887_v1 = vadd.f32 %v7886_v16, %v7885_v61  ;;  %v7264_v36 = vpop.f32.mrb[77].mxu1  ;;  %v7785_v53 = vmax.f32 %v7623_v23, 0.0  ;;  %v7263_v42 = vadd.f32 %v14355_v3, %v7262_v38 }
 0x6f0   :  { %v7784_v29 = vmax.f32 %v7618_v46, 0.0  ;;  %v8538_v41 = vpop.f32.mrb[116].mxu0 }
 0x6f1   :  { %v7889_v8 = vadd.f32 %v7888_v22, %v7887_v1  ;;  %v7633_v27 = vadd.f32 %v8538_v41, %v7248_v4  ;;  %v7627_v9 = vpop.f32.mrb[117].mxu0  ;;  %v7892_v51 = vsel %vm6419_vm15, %v7785_v53, 0.0 }
 0x6f2   :  { %v7890_v44 = vsel %vm6419_vm15, %v7784_v29, 0.0  ;;  %v7628_v50 = vadd.f32 %v7627_v9, %v7243_v35 }
 0x6f3   :  { %v7891_v14 = vadd.f32 %v7890_v44, %v7889_v8  ;;  %v7787_v62 = vmax.f32 %v7633_v27, 0.0 }
 0x6f4   :  { %v7786_v52 = vmax.f32 %v7628_v50, 0.0  ;;  %v8541_v6 = vpop.f32.mrb[118].mxu0 }
 0x6f5   :  { %v7893_v43 = vadd.f32 %v7892_v51, %v7891_v14  ;;  %v7267_v25 = vpop.f32.mrb[78].mxu1  ;;  %v7643_v30 = vadd.f32 %v8541_v6, %v7258_v49  ;;  %v7637_v12 = vpop.f32.mrb[119].mxu0  ;;  %v7896_v0 = vsel %vm6419_vm15, %v7787_v62, 0.0 }
 0x6f6   :  { %v7894_v15 = vsel %vm6419_vm15, %v7786_v52, 0.0  ;;  %v7269_v18 = vpop.f32.mrb[79].mxu1  ;;  %v7638_v47 = vadd.f32 %v7637_v12, %v7253_v24  ;;  %v7268_v39 = vadd.f32 %v14355_v3, %v7267_v25 }
 0x6f7   :  { %v7895_v59 = vadd.f32 %v7894_v15, %v7893_v43  ;;  %v7789_v37 = vmax.f32 %v7643_v30, 0.0 }
 0x6f8   :  { %v7788_v58 = vmax.f32 %v7638_v47, 0.0  ;;  %v8544_v28 = vpop.f32.mrb[120].mxu0 }
 0x6f9   :  { %v7897_v7 = vadd.f32 %v7896_v0, %v7895_v59  ;;  %v7653_v63 = vadd.f32 %v8544_v28, %v7268_v39  ;;  %v7647_v45 = vpop.f32.mrb[121].mxu0  ;;  %v7900_v34 = vsel %vm6419_vm15, %v7789_v37, 0.0 }
 0x6fa   :  { %v7898_v56 = vsel %vm6419_vm15, %v7788_v58, 0.0  ;;  %v7272_v57 = vpop.f32.mrb[80].mxu1  ;;  %v7648_v20 = vadd.f32 %v7647_v45, %v7263_v42 }
 0x6fb   :  { %v7899_v19 = vadd.f32 %v7898_v56, %v7897_v7  ;;  %v7274_v17 = vpop.f32.mrb[81].mxu1  ;;  %v7791_v48 = vmax.f32 %v7653_v63, 0.0  ;;  %v7273_v54 = vadd.f32 %v14355_v3, %v7272_v57 }
 0x6fc   :  { %v7790_v21 = vmax.f32 %v7648_v20, 0.0  ;;  %v8547_v10 = vpop.f32.mrb[122].mxu0 }
 0x6fd   :  { %v7901_v13 = vadd.f32 %v7900_v34, %v7899_v19  ;;  %v7657_v32 = vpop.f32.mrb[123].mxu0  ;;  %v7904_v11 = vsel %vm6419_vm15, %v7791_v48, 0.0 }
 0x6fe   :  { %v7902_v31 = vsel %vm6419_vm15, %v7790_v21, 0.0  ;;  %v7658_v5 = vadd.f32 %v7657_v32, %v7273_v54 }
 0x6ff   :  { %v7903_v60 = vadd.f32 %v7902_v31, %v7901_v13 }
 0x700   :  { %v7792_v40 = vmax.f32 %v7658_v5, 0.0  ;;  %v8550_v33 = vpop.f32.mrb[124].mxu0 }
 0x701   :  { %v7905_v2 = vadd.f32 %v7904_v11, %v7903_v60  ;;  %v7277_v61 = vpop.f32.mrb[82].mxu1  ;;  %v7667_v23 = vpop.f32.mrb[125].mxu0 }
 0x702   :  { %v7906_v55 = vsel %vm6419_vm15, %v7792_v40, 0.0  ;;  %v7278_v16 = vadd.f32 %v14355_v3, %v7277_v61  ;;  %v7279_v38 = vpop.f32.mrb[83].mxu1 }
 0x703   :  { %v7907_v46 = vadd.f32 %v7906_v55, %v7905_v2 }
 0x704   :  { %v7663_v4 = vadd.f32 %v8547_v10, %v7278_v16  ;;  %v8553_v1 = vpop.f32.mrb[126].mxu0 }
 0x705   :  { %v7677_v36 = vpop.f32.mrb[127].mxu0 }
 0x706   :  { %v7793_v35 = vmax.f32 %v7663_v4, 0.0  ;;  %v7282_v22 = vpop.f32.mrb[84].mxu1 }
 0x707   :  { %v7283_v53 = vadd.f32 %v14355_v3, %v7282_v22  ;;  %v7284_v29 = vpop.f32.mrb[85].mxu1 }
 0x708   :  { %v7908_v41 = vsel %vm6419_vm15, %v7793_v35, 0.0  ;;  %v8556_v8 = vpop.f32.mrb[128].mxu0 }
 0x709   :  { %v7909_v27 = vadd.f32 %v7908_v41, %v7907_v46  ;;  %v7668_v9 = vadd.f32 %v7667_v23, %v7283_v53  ;;  %v7687_v44 = vpop.f32.mrb[129].mxu0 }
 0x70b   :  { %v7794_v50 = vmax.f32 %v7668_v9, 0.0 }
 0x70c   :  { %v8559_v49 = vpop.f32.mrb[130].mxu0 }
 0x70d   :  { %v7910_v14 = vsel %vm6419_vm15, %v7794_v50, 0.0  ;;  %v7287_v24 = vpop.f32.mrb[86].mxu1  ;;  %v7697_v51 = vpop.f32.mrb[131].mxu0 }
 0x70e   :  { %v7911_v62 = vadd.f32 %v7910_v14, %v7909_v27  ;;  %v7288_v52 = vadd.f32 %v14355_v3, %v7287_v24  ;;  %v7289_v6 = vpop.f32.mrb[87].mxu1 }
 0x710   :  { %v7673_v43 = vadd.f32 %v8550_v33, %v7288_v52  ;;  %v14537_v25 = vpop.f32.mrb[132].mxu0 }
 0x711   :  { %v7707_v30 = vpop.f32.mrb[133].mxu0 }
 0x712   :  { %v7795_v12 = vmax.f32 %v7673_v43, 0.0  ;;  %v7292_v15 = vpop.f32.mrb[88].mxu1 }
 0x713   :  { %v7293_v18 = vadd.f32 %v14355_v3, %v7292_v15  ;;  %v7294_v47 = vpop.f32.mrb[89].mxu1 }
 0x714   :  { %v7912_v59 = vsel %vm6419_vm15, %v7795_v12, 0.0  ;;  %v14541_v39 = vpop.f32.mrb[134].mxu0 }
 0x715   :  { %v7913_v42 = vadd.f32 %v7912_v59, %v7911_v62  ;;  %v7678_v0 = vadd.f32 %v7677_v36, %v7293_v18  ;;  %v7717_v37 = vpop.f32.mrb[135].mxu0 }
 0x717   :  { %v7796_v58 = vmax.f32 %v7678_v0, 0.0 }
 0x718   :  { %v14543_v28 = vpop.f32.mrb[136].mxu0 }
 0x719   :  { %v7914_v7 = vsel %vm6419_vm15, %v7796_v58, 0.0  ;;  %v7297_v63 = vpop.f32.mrb[90].mxu1  ;;  %v14546_v45 = vpop.f32.mrb[137].mxu0 }
 0x71a   :  { %v7915_v56 = vadd.f32 %v7914_v7, %v7913_v42  ;;  %v7298_v57 = vadd.f32 %v14355_v3, %v7297_v63  ;;  %v7299_v20 = vpop.f32.mrb[91].mxu1 }
 0x71c   :  { %v7683_v19 = vadd.f32 %v8553_v1, %v7298_v57  ;;  %v14549_v17 = vpop.f32.mrb[138].mxu0 }
 0x71d   :  { %v14551_v34 = vpop.f32.mrb[139].mxu0 }
 0x71e   :  { %v7797_v48 = vmax.f32 %v7683_v19, 0.0  ;;  %v7302_v54 = vpop.f32.mrb[92].mxu1 }
 0x71f   :  { %v7303_v21 = vadd.f32 %v14355_v3, %v7302_v54  ;;  %v7304_v10 = vpop.f32.mrb[93].mxu1 }
 0x720   :  { %v7916_v13 = vsel %vm6419_vm15, %v7797_v48, 0.0 }
 0x721   :  { %v7917_v32 = vadd.f32 %v7916_v13, %v7915_v56  ;;  %v7688_v31 = vadd.f32 %v7687_v44, %v7303_v21 }
 0x723   :  { %v7798_v5 = vmax.f32 %v7688_v31, 0.0 }
 0x725   :  { %v7918_v60 = vsel %vm6419_vm15, %v7798_v5, 0.0  ;;  %v7307_v11 = vpop.f32.mrb[94].mxu1 }
 0x726   :  { %v7919_v40 = vadd.f32 %v7918_v60, %v7917_v32  ;;  %v7308_v33 = vadd.f32 %v14355_v3, %v7307_v11  ;;  %v7309_v2 = vpop.f32.mrb[95].mxu1 }
 0x728   :  { %v7693_v61 = vadd.f32 %v8556_v8, %v7308_v33 }
 0x72a   :  { %v7799_v23 = vmax.f32 %v7693_v61, 0.0  ;;  %v7312_v55 = vpop.f32.mrb[96].mxu1 }
 0x72b   :  { %v7313_v16 = vadd.f32 %v14355_v3, %v7312_v55  ;;  %v7314_v38 = vpop.f32.mrb[97].mxu1 }
 0x72c   :  { %v7920_v46 = vsel %vm6419_vm15, %v7799_v23, 0.0 }
 0x72d   :  { %v7921_v4 = vadd.f32 %v7920_v46, %v7919_v40  ;;  %v7698_v1 = vadd.f32 %v7697_v51, %v7313_v16  ;;  %v7873_v46 = vrot.slane %v14498_v26, 4 }
 0x72f   :  { %v7800_v36 = vmax.f32 %v7698_v1, 0.0 }
 0x731   :  { %v7922_v35 = vsel %vm6419_vm15, %v7800_v36, 0.0  ;;  %v7317_v22 = vpop.f32.mrb[98].mxu1 }
 0x732   :  { %v7923_v53 = vadd.f32 %v7922_v35, %v7921_v4  ;;  %v7318_v29 = vadd.f32 %v14355_v3, %v7317_v22  ;;  %v7319_v41 = vpop.f32.mrb[99].mxu1 }
 0x734   :  { %v7703_v27 = vadd.f32 %v8559_v49, %v7318_v29 }
 0x736   :  { %v7801_v9 = vmax.f32 %v7703_v27, 0.0  ;;  %v7322_v8 = vpop.f32.mrb[100].mxu1 }
 0x737   :  { %v7323_v44 = vadd.f32 %v14355_v3, %v7322_v8  ;;  %v7324_v50 = vpop.f32.mrb[101].mxu1 }
 0x738   :  { %v7924_v14 = vsel %vm6419_vm15, %v7801_v9, 0.0 }
 0x739   :  { %v7925_v24 = vadd.f32 %v7924_v14, %v7923_v53  ;;  %v7708_v62 = vadd.f32 %v7707_v30, %v7323_v44  ;;  %v7874_v53 = vadd.f32 %v7873_v46, %v14498_v26 }
 0x73b   :  { %v7802_v52 = vmax.f32 %v7708_v62, 0.0  ;;  %v7875_v27 = vrot.slane %v7874_v53, 2 }
 0x73d   :  { %v7926_v51 = vsel %vm6419_vm15, %v7802_v52, 0.0  ;;  %v7327_v6 = vpop.f32.mrb[102].mxu1  ;;  %v7876_v8 = vadd.f32 %v7875_v27, %v7874_v53 }
 0x73e   :  { %v7927_v43 = vadd.f32 %v7926_v51, %v7925_v24  ;;  %v7328_v12 = vadd.f32 %v14355_v3, %v7327_v6  ;;  %v7329_v15 = vpop.f32.mrb[103].mxu1 }
 0x73f   :  { %v7877_v14 = vrot.slane %v7876_v8, 1  ;;  %v8046_v15 = vlaneseq }
 0x740   :  { %v7713_v18 = vadd.f32 %v14537_v25, %v7328_v12 }
 0x741   :  { %v7878_v52 = vadd.f32 %v7877_v14, %v7876_v8 }
 0x742   :  { %v7803_v49 = vmax.f32 %v7713_v18, 0.0  ;;  %v7332_v47 = vpop.f32.mrb[104].mxu1 }
 0x743   :  { %v7333_v59 = vadd.f32 %v14355_v3, %v7332_v47  ;;  %v7334_v42 = vpop.f32.mrb[105].mxu1  ;;  %v8217_v47 = vld [vmem:[%s14608_s6] ss:$0 sm:$0xff] }
 0x744   :  { %v7928_v0 = vsel %vm6419_vm15, %v7803_v49, 0.0  ;;  %v8047_v49 = vshrl.u32 %v8046_v15, 7 }
 0x745   :  { %v7929_v58 = vadd.f32 %v7928_v0, %v7927_v43  ;;  %v7718_v7 = vadd.f32 %v7717_v37, %v7333_v59 }
 0x747   :  { %v7804_v30 = vmax.f32 %v7718_v7, 0.0 }
 0x749   :  { %v7930_v63 = vsel %vm6419_vm15, %v7804_v30, 0.0  ;;  %v7337_v56 = vpop.f32.mrb[106].mxu1 }
 0x74a   :  { %v7931_v57 = vadd.f32 %v7930_v63, %v7929_v58  ;;  %v7338_v20 = vadd.f32 %v14355_v3, %v7337_v56  ;;  %v7339_v19 = vpop.f32.mrb[107].mxu1 }
 0x74c   :  { %v7723_v48 = vadd.f32 %v14541_v39, %v7338_v20 }
 0x74e   :  { %v7805_v25 = vmax.f32 %v7723_v48, 0.0  ;;  %v7342_v54 = vpop.f32.mrb[108].mxu1 }
 0x74f   :  { %v7343_v21 = vadd.f32 %v14355_v3, %v7342_v54  ;;  %v7344_v10 = vpop.f32.mrb[109].mxu1 }
 0x750   :  { %v7932_v13 = vsel %vm6419_vm15, %v7805_v25, 0.0 }
 0x751   :  { %v7933_v32 = vadd.f32 %v7932_v13, %v7931_v57  ;;  %v7728_v37 = vadd.f32 %v14546_v45, %v7343_v21 }
 0x753   :  { %v7806_v31 = vmax.f32 %v7728_v37, 0.0 }
 0x755   :  { %v7934_v5 = vsel %vm6419_vm15, %v7806_v31, 0.0  ;;  %v7347_v60 = vpop.f32.mrb[110].mxu1 }
 0x756   :  { %v7935_v11 = vadd.f32 %v7934_v5, %v7933_v32  ;;  %v7348_v40 = vadd.f32 %v14355_v3, %v7347_v60  ;;  %v7349_v33 = vpop.f32.mrb[111].mxu1 }
 0x758   :  { %v7733_v39 = vadd.f32 %v14543_v28, %v7348_v40 }
 0x75a   :  { %v7807_v2 = vmax.f32 %v7733_v39, 0.0  ;;  %v7352_v61 = vpop.f32.mrb[112].mxu1 }
 0x75b   :  { %v7353_v23 = vadd.f32 %v14355_v3, %v7352_v61  ;;  %v7354_v55 = vpop.f32.mrb[113].mxu1 }
 0x75c   :  { %v7936_v16 = vsel %vm6419_vm15, %v7807_v2, 0.0 }
 0x75d   :  { %v7738_v38 = vadd.f32 %v14551_v34, %v7353_v23  ;;  %v7937_v45 = vadd.f32 %v7936_v16, %v7935_v11 }
 0x75f   :  { %v7808_v4 = vmax.f32 %v7738_v38, 0.0 }
 0x761   :  { %v7938_v1 = vsel %vm6419_vm15, %v7808_v4, 0.0  ;;  %v7357_v36 = vpop.f32.mrb[114].mxu1 }
 0x762   :  { %v7939_v35 = vadd.f32 %v7938_v1, %v7937_v45  ;;  %v7358_v22 = vadd.f32 %v14355_v3, %v7357_v36  ;;  %v7359_v28 = vpop.f32.mrb[115].mxu1  ;;  %v7949_v3 = vmul.f32 0.00390625, %v7878_v52 }
 0x764   :  { %v7743_v29 = vadd.f32 %v14549_v17, %v7358_v22  ;;  %v9781_v17 = vmov 1966171168  }
 0x765   :  { %v8044_v12 = vunpack.c.l.s4 %v9781_v17 }
 0x766   :  { %v7809_v41 = vmax.f32 %v7743_v29, 0.0 }
 0x767   :  { %v8045_v18 = vunpack.c.0.s8 %v8044_v12 }
 0x768   :  { %v7940_v9 = vsel %vm6419_vm15, %v7809_v41, 0.0 }
 0x769   :  { %v7941_v34 = vadd.f32 %v7940_v9, %v7939_v35  ;;  %v8048_v59 = vsub.s32 %v8045_v18, %v8047_v49 }
 0x76b   :  { %v7942_v44 = vrot.slane %v7941_v34, 4 }
 0x76d   :  { %v7943_v50 = vadd.f32 %v7942_v44, %v7941_v34 }
 0x76f   :  { %v7944_v24 = vrot.slane %v7943_v50, 2 }
 0x771   :  { %v7945_v62 = vadd.f32 %v7944_v24, %v7943_v50 }
 0x773   :  { %v7946_v51 = vrot.slane %v7945_v62, 1 }
 0x775   :  { %v7947_v6 = vadd.f32 %v7946_v51, %v7945_v62 }
 0x777   :  { %v7950_v43 = vmul.f32 0.00390625, %v7947_v6 }
 0x779   :  { %v7969_v26 = vsel %vm7968_vm2, %v7950_v43, %v7949_v3 }
 0x77a   :  { %8589 = vmatmul.mubr.msk.f32.vlgmr.msra.gmra.mrb[140].mxu0 %vm6419_vm15, %v7969_v26 }
 0x84d   :  { %v8038_v42 = vpop.f32.mrb[140].mxu0 }
 0x84e   :  { %v8039_v0 = vadd.f32 %v8217_v47, %v8038_v42  ;;  %v8590_v58 = vpop.f32.mrb[141].mxu0 }
 0x850   :  { %v8049_v7 = vrot.slane %v8039_v0, %v8048_v59 }
 0x852   :  { %v8050_v30 = vcombine.high %v8049_v7, %v8049_v7  ;;  %v8057_v63 = vrot.slane %v8049_v7, %v8048_v59 }
 0x854   :  { %v8064_v56 = vrot.slane %v8050_v30, %v8048_v59  ;;  %8068 = vst.msk [vmem:[#allocation4] sm:$0x1] %vm8067_vm3, %v8057_v63 }
 0x856   :  { %8069 = vst.msk [vmem:[#allocation4 + $0x1] sm:$0x1] %vm8067_vm3, %v8064_v56 }
 0x857   :  { %9753 = shalt.err (!%p9750_p4)
}
 0x858   :  { %s9754_s11 = scalar_lea.hbm %s14609_s7, 32 }
 0x859   :  { %p9755_p5 = scmp.ne.s32.totalorder %s14609_s7, %s9754_s11  ;;  %p9758_p6 = scmp.lt.u32.totalorder %s9754_s11, %s14609_s7 }
 0x85b   :  { %p9760_p7 = pnand %p9758_p6, %p9755_p5 }
 0x85d   :  { %9763 = shalt.err (!%p9760_p7)
}
 0x85e   :  { %s9783_s3 = smov 16   ;;  %s9784_s8 = smov 1  }
 0x85f   :  { %8081 = dma.vmem_to_hbm [thread:$0]  %s8076_s9, 32, %s14609_s7, [#allocation5], %s9783_s3, %s9783_s3, %s9784_s8  }
 0x860   :  { %9764 = dma.done.wait [#allocation5], 32  }
 0x861   :  { %9765 = vsyncadd [#allocation5], 4294967264 }
 0x862   :  { %8085 = vsyncpa [#allocation5], 1 }

</bundles_post_ra>
